<compile_context>
chip_gen: v7x
topology: tpu7x:2x2x1
jax: 0.10.0
libtpu: 0.0.40
codegen_flags: <defaults>
</compile_context>

<pallas_src>
import numpy as np
import jax
import jax.numpy as jnp
from jax.experimental import pallas as pl
from jax.experimental.pallas import tpu as pltpu

# Keep f32 matmul precision so the Pallas kernel and the pure-JAX reference
# agree to 1e-3 (compute is negligible at these shapes).
jax.config.update("jax_default_matmul_precision", "highest")

# ---------------- config (small, consistent with the module) ----------------
DIM = 32          # dim
HEADS = 2         # heads
HEAD_DIM = 16     # head_dim
INNER = HEADS * HEAD_DIM
MLP_DIM = 64      # mlp_dim
WINDOW = 4        # window_size
SHIFTED = True
REL_POS = True    # relative_pos_embedding
LN_EPS = 1e-5
NEG = -1e30       # stands in for -inf; exp underflows to exactly 0 in f32

B, NH, NW = 2, 8, 8   # batch, n_h, n_w
TOKENS = NH * NW      # tokens per batch image (= nw * window_size^2) = 64
BT = B * TOKENS       # rows handled by the single kernel call = 128


# ------------------------------ in-kernel math -------------------------------
def _erf(x):
    # Abramowitz & Stegun 7.1.26 (|err| <= 1.5e-7): effectively exact-erf GELU
    # in f32 without relying on an erf lowering inside Mosaic.
    a1, a2, a3, a4, a5 = 0.254829592, -0.284496736, 1.421413741, -1.453152027, 1.061405429
    p = 0.3275911
    sgn = jnp.where(x >= 0.0, 1.0, -1.0)
    ax = jnp.abs(x)
    t = 1.0 / (1.0 + p * ax)
    poly = ((((a5 * t + a4) * t + a3) * t + a2) * t + a1) * t
    return sgn * (1.0 - poly * jnp.exp(-ax * ax))


def _gelu_exact(x):
    return 0.5 * x * (1.0 + _erf(x * 0.7071067811865476))


def _layernorm(x, g, b):
    mu = jnp.mean(x, axis=-1, keepdims=True)
    var = jnp.mean(jnp.square(x - mu), axis=-1, keepdims=True)
    return (x - mu) * jax.lax.rsqrt(var + LN_EPS) * g + b


# ------------------------------ fused kernel ---------------------------------
def swin_block_kernel(x_ref, bias_ref, g1_ref, b1_ref, wqkv_ref,
                      wo_ref, bo_ref, g2_ref, b2n_ref, w1_ref, bb1_ref,
                      w2_ref, bb2_ref, o_ref):
    """Whole batch, already shift-rolled and window-permuted.

    x_ref:    (BT, DIM)  tokens, batch-major then window-major (BT = B*T = 128)
    bias_ref: (BT, BT)   block-diagonal rel-pos bias (+ shift masks), NEG elsewhere
    """
    x = x_ref[...]                                    # (BT, DIM)

    # PreNorm 1 + fused QKV projection (q columns pre-scaled by head_dim^-0.5)
    xn = _layernorm(x, g1_ref[...], b1_ref[...])
    qkv = jnp.dot(xn, wqkv_ref[...], preferred_element_type=jnp.float32)  # (BT, 3*INNER)

    bias = bias_ref[...]                              # (BT, BT), loaded once
    wo = wo_ref[...]                                  # (INNER, DIM)

    # Per-head attention over all windows / all batch images at once: the
    # block-diagonal bias restricts attention to within-window keys
    # (off-diag exp -> exactly 0).
    acc = None
    for hh in range(HEADS):                           # static unroll (2 heads)
        q = qkv[:, hh * HEAD_DIM:(hh + 1) * HEAD_DIM]
        k = qkv[:, INNER + hh * HEAD_DIM: INNER + (hh + 1) * HEAD_DIM]
        v = qkv[:, 2 * INNER + hh * HEAD_DIM: 2 * INNER + (hh + 1) * HEAD_DIM]
        dots = jax.lax.dot_general(q, k, (((1,), (1,)), ((), ())),
                                   preferred_element_type=jnp.float32)   # (BT, BT)
        dots = dots + bias
        m = jnp.max(dots, axis=-1, keepdims=True)
        e = jnp.exp(dots - m)
        attn = e / jnp.sum(e, axis=-1, keepdims=True)
        o_h = jnp.dot(attn, v, preferred_element_type=jnp.float32)       # (BT, HEAD_DIM)
        # fold this head's slice of the output projection (avoids a concat)
        contrib = jnp.dot(o_h, wo[hh * HEAD_DIM:(hh + 1) * HEAD_DIM, :],
                          preferred_element_type=jnp.float32)            # (BT, DIM)
        acc = contrib if acc is None else acc + contrib

    x1 = acc + bo_ref[...] + x                        # to_out bias + residual 1

    # PreNorm 2 + MLP (GELU) + residual 2  (dropout p=0 is identity)
    x1n = _layernorm(x1, g2_ref[...], b2n_ref[...])
    h1 = jnp.dot(x1n, w1_ref[...], preferred_element_type=jnp.float32) + bb1_ref[...]
    h1 = _gelu_exact(h1)
    x2 = jnp.dot(h1, w2_ref[...], preferred_element_type=jnp.float32) + bb2_ref[...] + x1
    o_ref[...] = x2


# ------------------------------- full forward ---------------------------------
def _full_spec(shape):
    n = len(shape)
    return pl.BlockSpec(shape, lambda i, n=n: (0,) * n)


def swin_block_forward(x, p):
    b, n_h, n_w, dim = x.shape
    ws = WINDOW
    disp = ws // 2 if SHIFTED else 0
    nw_h, nw_w = n_h // ws, n_w // ws
    T = n_h * n_w                                     # tokens per batch image

    # Glue (token permutations only — they commute with every token-wise op,
    # so the residuals/MLP can run in shifted+windowed coordinates):
    x_s = jnp.roll(x, (-disp, -disp), axis=(1, 2)) if SHIFTED else x
    xw = x_s.reshape(b, nw_h, ws, nw_w, ws, dim)
    xw = xw.transpose(0, 1, 3, 2, 4, 5).reshape(b * T, dim)   # (BT, DIM)

    params = (p["attn_bias_dense"], p["ln1_g"], p["ln1_b"], p["w_qkv_s"],
              p["w_out"], p["b_out"], p["ln2_g"], p["ln2_b"],
              p["w1"], p["b1"], p["w2"], p["b2"])

    in_specs = [_full_spec(xw.shape)] + [_full_spec(q.shape) for q in params]

    out = pl.pallas_call(
        swin_block_kernel,
        out_shape=jax.ShapeDtypeStruct((b * T, dim), jnp.float32),
        grid=(1,),                                    # single step: whole problem in VMEM
        in_specs=in_specs,
        out_specs=_full_spec((b * T, dim)),
        compiler_params=pltpu.CompilerParams(
            dimension_semantics=("arbitrary",)),
    )(xw, *params)

    # Undo window partition and cyclic shift.
    y = out.reshape(b, nw_h, nw_w, ws, ws, dim).transpose(0, 1, 3, 2, 4, 5)
    y = y.reshape(b, n_h, n_w, dim)
    if SHIFTED:
        y = jnp.roll(y, (disp, disp), axis=(1, 2))
    return y


# ------------------------------- parameter setup -------------------------------
def make_attn_bias(pos_emb):
    """Per-window additive bias = rel-pos bias (+ shift masks). numpy (nw, ws2, ws2)."""
    ws = WINDOW
    ws2 = ws * ws
    nw_h, nw_w = NH // ws, NW // ws
    nw = nw_h * nw_w
    pe = np.asarray(pos_emb)
    if REL_POS:
        idx = np.array([[x, y] for x in range(ws) for y in range(ws)])
        rel = idx[None, :, :] - idx[:, None, :] + ws - 1      # (ws2, ws2, 2)
        pos_bias = pe[rel[:, :, 0], rel[:, :, 1]]             # (ws2, ws2)
    else:
        pos_bias = pe
    bias = np.broadcast_to(pos_bias, (nw, ws2, ws2)).astype(np.float32).copy()
    if SHIFTED:
        disp = ws // 2
        ul = np.zeros((ws2, ws2), np.float32)
        ul[-disp * ws:, :-disp * ws] = NEG
        ul[:-disp * ws, -disp * ws:] = NEG
        lr = np.zeros((ws, ws, ws, ws), np.float32)
        lr[:, -disp:, :, :-disp] = NEG
        lr[:, :-disp, :, -disp:] = NEG
        lr = lr.reshape(ws2, ws2)
        bias[nw - nw_w:] += ul            # last row of windows
        bias[nw_w - 1::nw_w] += lr        # last column of windows
    return bias


def make_dense_bias(bias_nw, batch):
    """Block-diagonal (B*T, B*T) bias: per-window bias on the diagonal, NEG elsewhere."""
    nw, ws2, _ = bias_nw.shape
    T = nw * ws2
    dense = np.full((batch * T, batch * T), NEG, np.float32)
    for bi in range(batch):
        for w in range(nw):
            r0 = bi * T + w * ws2
            dense[r0:r0 + ws2, r0:r0 + ws2] = bias_nw[w]
    return jnp.asarray(dense)


def make_params(key):
    ks = jax.random.split(key, 12)
    f32 = jnp.float32
    p = {
        "ln1_g": (1.0 + 0.1 * jax.random.normal(ks[0], (1, DIM))).astype(f32),
        "ln1_b": (0.1 * jax.random.normal(ks[1], (1, DIM))).astype(f32),
        "w_qkv": (jax.random.normal(ks[2], (DIM, 3 * INNER)) / np.sqrt(DIM)).astype(f32),
        "w_out": (jax.random.normal(ks[3], (INNER, DIM)) / np.sqrt(INNER)).astype(f32),
        "b_out": (0.1 * jax.random.normal(ks[4], (1, DIM))).astype(f32),
        "ln2_g": (1.0 + 0.1 * jax.random.normal(ks[5], (1, DIM))).astype(f32),
        "ln2_b": (0.1 * jax.random.normal(ks[6], (1, DIM))).astype(f32),
        "w1": (jax.random.normal(ks[7], (DIM, MLP_DIM)) / np.sqrt(DIM)).astype(f32),
        "b1": (0.1 * jax.random.normal(ks[8], (1, MLP_DIM))).astype(f32),
        "w2": (jax.random.normal(ks[9], (MLP_DIM, DIM)) / np.sqrt(MLP_DIM)).astype(f32),
        "b2": (0.1 * jax.random.normal(ks[10], (1, DIM))).astype(f32),
    }
    if REL_POS:
        pos_emb = jax.random.normal(ks[11], (2 * WINDOW - 1, 2 * WINDOW - 1)).astype(f32)
    else:
        pos_emb = jax.random.normal(ks[11], (WINDOW ** 2, WINDOW ** 2)).astype(f32)
    p["pos_emb"] = pos_emb

    bias_nw = make_attn_bias(pos_emb)
    p["attn_bias"] = jnp.asarray(bias_nw)                 # (nw, ws2, ws2) — reference
    p["attn_bias_dense"] = make_dense_bias(bias_nw, B)    # (B*T, B*T)     — kernel

    # Fold the 1/sqrt(head_dim) attention scale into the Q columns (one-time).
    scale = HEAD_DIM ** -0.5
    p["w_qkv_s"] = jnp.concatenate(
        [p["w_qkv"][:, :INNER] * scale, p["w_qkv"][:, INNER:]], axis=1)
    return p


# ------------------------------ pure-JAX reference -----------------------------
def swin_block_reference(x, p):
    b, n_h, n_w, dim = x.shape
    ws = WINDOW
    disp = ws // 2 if SHIFTED else 0
    nw_h, nw_w = n_h // ws, n_w // ws
    nw = nw_h * nw_w
    h, d = HEADS, HEAD_DIM

    def ln(t, g, be):
        mu = jnp.mean(t, -1, keepdims=True)
        var = jnp.mean((t - mu) ** 2, -1, keepdims=True)
        return (t - mu) / jnp.sqrt(var + LN_EPS) * g.reshape(-1) + be.reshape(-1)

    xn = ln(x, p["ln1_g"], p["ln1_b"])
    xs = jnp.roll(xn, (-disp, -disp), (1, 2)) if SHIFTED else xn
    qkv = xs @ p["w_qkv"]
    q, k, v = jnp.split(qkv, 3, -1)

    def tw(t):
        t = t.reshape(b, nw_h, ws, nw_w, ws, h, d).transpose(0, 5, 1, 3, 2, 4, 6)
        return t.reshape(b, h, nw, ws * ws, d)

    q, k, v = map(tw, (q, k, v))
    dots = jnp.einsum("bhwid,bhwjd->bhwij", q, k) * (HEAD_DIM ** -0.5)
    dots = dots + p["attn_bias"][None, None]
    attn = jax.nn.softmax(dots, -1)
    o = jnp.einsum("bhwij,bhwjd->bhwid", attn, v)
    o = o.reshape(b, h, nw_h, nw_w, ws, ws, d).transpose(0, 2, 4, 3, 5, 1, 6)
    o = o.reshape(b, n_h, n_w, h * d) @ p["w_out"] + p["b_out"].reshape(-1)
    if SHIFTED:
        o = jnp.roll(o, (disp, disp), (1, 2))
    x1 = o + x

    x1n = ln(x1, p["ln2_g"], p["ln2_b"])
    hdn = x1n @ p["w1"] + p["b1"].reshape(-1)
    hdn = 0.5 * hdn * (1.0 + jax.scipy.special.erf(hdn * 0.7071067811865476))
    x2 = hdn @ p["w2"] + p["b2"].reshape(-1) + x1
    return x2


# ------------------------------------ main -------------------------------------
if __name__ == "__main__":
    key = jax.random.PRNGKey(0)
    kx, kp = jax.random.split(key)
    x = jax.random.normal(kx, (B, NH, NW, DIM), dtype=jnp.float32)
    params = make_params(kp)

    out = jax.jit(swin_block_forward)(x, params)
    out = jax.block_until_ready(out)

    ref = swin_block_reference(x, params)
    np.testing.assert_allclose(np.asarray(out), np.asarray(ref),
                               rtol=1e-3, atol=1e-3)
    print("KERNEL_OK")
</pallas_src>

<mosaic_0001>
module attributes {stable_mosaic.version = 11 : i64} {
  func.func @swin_block_kernel(%arg0: i32, %arg1: memref<128x32xf32, #tpu.memory_space<vmem>>, %arg2: memref<128x128xf32, #tpu.memory_space<vmem>>, %arg3: memref<1x32xf32, #tpu.memory_space<vmem>>, %arg4: memref<1x32xf32, #tpu.memory_space<vmem>>, %arg5: memref<32x96xf32, #tpu.memory_space<vmem>>, %arg6: memref<32x32xf32, #tpu.memory_space<vmem>>, %arg7: memref<1x32xf32, #tpu.memory_space<vmem>>, %arg8: memref<1x32xf32, #tpu.memory_space<vmem>>, %arg9: memref<1x32xf32, #tpu.memory_space<vmem>>, %arg10: memref<32x64xf32, #tpu.memory_space<vmem>>, %arg11: memref<1x64xf32, #tpu.memory_space<vmem>>, %arg12: memref<64x32xf32, #tpu.memory_space<vmem>>, %arg13: memref<1x32xf32, #tpu.memory_space<vmem>>, %arg14: memref<128x32xf32, #tpu.memory_space<vmem>>) attributes {dimension_semantics = [#tpu.dimension_semantics<arbitrary>], iteration_bounds = array<i64: 1>, scalar_prefetch = 0 : i64, scratch_operands = 0 : i64, tpu.core_type = #tpu.core_type<tc>, window_params = [{pipeline_mode = #tpu.pipeline_mode<synchronous>, transform_indices = @transform_0, window_bounds = array<i64: 128, 32>}, {pipeline_mode = #tpu.pipeline_mode<synchronous>, transform_indices = @transform_1, window_bounds = array<i64: 128, 128>}, {pipeline_mode = #tpu.pipeline_mode<synchronous>, transform_indices = @transform_2, window_bounds = array<i64: 1, 32>}, {pipeline_mode = #tpu.pipeline_mode<synchronous>, transform_indices = @transform_3, window_bounds = array<i64: 1, 32>}, {pipeline_mode = #tpu.pipeline_mode<synchronous>, transform_indices = @transform_4, window_bounds = array<i64: 32, 96>}, {pipeline_mode = #tpu.pipeline_mode<synchronous>, transform_indices = @transform_5, window_bounds = array<i64: 32, 32>}, {pipeline_mode = #tpu.pipeline_mode<synchronous>, transform_indices = @transform_6, window_bounds = array<i64: 1, 32>}, {pipeline_mode = #tpu.pipeline_mode<synchronous>, transform_indices = @transform_7, window_bounds = array<i64: 1, 32>}, {pipeline_mode = #tpu.pipeline_mode<synchronous>, transform_indices = @transform_8, window_bounds = array<i64: 1, 32>}, {pipeline_mode = #tpu.pipeline_mode<synchronous>, transform_indices = @transform_9, window_bounds = array<i64: 32, 64>}, {pipeline_mode = #tpu.pipeline_mode<synchronous>, transform_indices = @transform_10, window_bounds = array<i64: 1, 64>}, {pipeline_mode = #tpu.pipeline_mode<synchronous>, transform_indices = @transform_11, window_bounds = array<i64: 64, 32>}, {pipeline_mode = #tpu.pipeline_mode<synchronous>, transform_indices = @transform_12, window_bounds = array<i64: 1, 32>}, {pipeline_mode = #tpu.pipeline_mode<synchronous>, transform_indices = @transform_13, window_bounds = array<i64: 128, 32>}]} {
    %c0 = arith.constant 0 : index
    %c0_0 = arith.constant 0 : index
    %0 = vector.load %arg1[%c0, %c0_0] : memref<128x32xf32, #tpu.memory_space<vmem>>, vector<128x32xf32>
    %c0_1 = arith.constant 0 : index
    %c0_2 = arith.constant 0 : index
    %1 = vector.load %arg3[%c0_1, %c0_2] : memref<1x32xf32, #tpu.memory_space<vmem>>, vector<1x32xf32>
    %c0_3 = arith.constant 0 : index
    %c0_4 = arith.constant 0 : index
    %2 = vector.load %arg4[%c0_3, %c0_4] : memref<1x32xf32, #tpu.memory_space<vmem>>, vector<1x32xf32>
    %cst = arith.constant dense<0.000000e+00> : vector<128xf32>
    %3 = vector.multi_reduction <add>, %0, %cst [1] : vector<128x32xf32> to vector<128xf32>
    %4 = vector.shape_cast %3 : vector<128xf32> to vector<128x1xf32>
    %cst_5 = arith.constant 3.200000e+01 : f32
    %5 = vector.broadcast %cst_5 : f32 to vector<128x1xf32>
    %6 = arith.divf %4, %5 : vector<128x1xf32>
    %7 = vector.broadcast %6 : vector<128x1xf32> to vector<128x32xf32>
    %8 = arith.subf %0, %7 : vector<128x32xf32>
    %9 = arith.mulf %8, %8 : vector<128x32xf32>
    %cst_6 = arith.constant dense<0.000000e+00> : vector<128xf32>
    %10 = vector.multi_reduction <add>, %9, %cst_6 [1] : vector<128x32xf32> to vector<128xf32>
    %11 = vector.shape_cast %10 : vector<128xf32> to vector<128x1xf32>
    %cst_7 = arith.constant 3.200000e+01 : f32
    %12 = vector.broadcast %cst_7 : f32 to vector<128x1xf32>
    %13 = arith.divf %11, %12 : vector<128x1xf32>
    %14 = vector.broadcast %6 : vector<128x1xf32> to vector<128x32xf32>
    %15 = arith.subf %0, %14 : vector<128x32xf32>
    %cst_8 = arith.constant 9.99999974E-6 : f32
    %16 = vector.broadcast %cst_8 : f32 to vector<128x1xf32>
    %17 = arith.addf %13, %16 : vector<128x1xf32>
    %18 = math.rsqrt %17 : vector<128x1xf32>
    %19 = vector.broadcast %18 : vector<128x1xf32> to vector<128x32xf32>
    %20 = arith.mulf %15, %19 : vector<128x32xf32>
    %21 = vector.broadcast %1 : vector<1x32xf32> to vector<128x32xf32>
    %22 = arith.mulf %20, %21 : vector<128x32xf32>
    %23 = vector.broadcast %2 : vector<1x32xf32> to vector<128x32xf32>
    %24 = arith.addf %22, %23 : vector<128x32xf32>
    %c0_9 = arith.constant 0 : index
    %c0_10 = arith.constant 0 : index
    %25 = vector.load %arg5[%c0_9, %c0_10] : memref<32x96xf32, #tpu.memory_space<vmem>>, vector<32x96xf32>
    %cst_11 = arith.constant dense<0.000000e+00> : vector<128x96xf32>
    %26 = tpu.matmul %24, %25, %cst_11 {dimension_numbers = #tpu.dot_dimension_numbers<[1], [0], [0], [1], [0, 0, 1, 1], [], []>, precision = #tpu.contract_precision<fp32>} : vector<128x32xf32>, vector<32x96xf32>, vector<128x96xf32> -> vector<128x96xf32>
    %c0_12 = arith.constant 0 : index
    %c0_13 = arith.constant 0 : index
    %27 = vector.load %arg2[%c0_12, %c0_13] : memref<128x128xf32, #tpu.memory_space<vmem>>, vector<128x128xf32>
    %c0_14 = arith.constant 0 : index
    %c0_15 = arith.constant 0 : index
    %28 = vector.load %arg6[%c0_14, %c0_15] : memref<32x32xf32, #tpu.memory_space<vmem>>, vector<32x32xf32>
    %29 = vector.extract_strided_slice %26 {offsets = [0, 0], sizes = [128, 16], strides = [1, 1]} : vector<128x96xf32> to vector<128x16xf32>
    %30 = vector.extract_strided_slice %26 {offsets = [0, 32], sizes = [128, 16], strides = [1, 1]} : vector<128x96xf32> to vector<128x16xf32>
    %31 = vector.extract_strided_slice %26 {offsets = [0, 64], sizes = [128, 16], strides = [1, 1]} : vector<128x96xf32> to vector<128x16xf32>
    %cst_16 = arith.constant dense<0.000000e+00> : vector<128x128xf32>
    %32 = tpu.matmul %29, %30, %cst_16 {dimension_numbers = #tpu.dot_dimension_numbers<[1], [1], [0], [0], [0, 0, 1, 0], [], []>, precision = #tpu.contract_precision<fp32>} : vector<128x16xf32>, vector<128x16xf32>, vector<128x128xf32> -> vector<128x128xf32>
    %33 = arith.addf %32, %27 : vector<128x128xf32>
    %cst_17 = arith.constant dense<0xFF800000> : vector<128xf32>
    %34 = vector.multi_reduction <maximumf>, %33, %cst_17 [1] : vector<128x128xf32> to vector<128xf32>
    %35 = vector.shape_cast %34 : vector<128xf32> to vector<128x1xf32>
    %36 = vector.broadcast %35 : vector<128x1xf32> to vector<128x128xf32>
    %37 = arith.subf %33, %36 : vector<128x128xf32>
    %38 = math.exp %37 : vector<128x128xf32>
    %cst_18 = arith.constant dense<0.000000e+00> : vector<128xf32>
    %39 = vector.multi_reduction <add>, %38, %cst_18 [1] : vector<128x128xf32> to vector<128xf32>
    %40 = vector.shape_cast %39 : vector<128xf32> to vector<128x1xf32>
    %41 = vector.broadcast %40 : vector<128x1xf32> to vector<128x128xf32>
    %42 = arith.divf %38, %41 : vector<128x128xf32>
    %cst_19 = arith.constant dense<0.000000e+00> : vector<128x16xf32>
    %43 = tpu.matmul %42, %31, %cst_19 {dimension_numbers = #tpu.dot_dimension_numbers<[1], [0], [0], [1], [0, 0, 1, 1], [], []>, precision = #tpu.contract_precision<fp32>} : vector<128x128xf32>, vector<128x16xf32>, vector<128x16xf32> -> vector<128x16xf32>
    %44 = vector.extract_strided_slice %28 {offsets = [0, 0], sizes = [16, 32], strides = [1, 1]} : vector<32x32xf32> to vector<16x32xf32>
    %cst_20 = arith.constant dense<0.000000e+00> : vector<128x32xf32>
    %45 = tpu.matmul %43, %44, %cst_20 {dimension_numbers = #tpu.dot_dimension_numbers<[1], [0], [0], [1], [0, 0, 1, 1], [], []>, precision = #tpu.contract_precision<fp32>} : vector<128x16xf32>, vector<16x32xf32>, vector<128x32xf32> -> vector<128x32xf32>
    %46 = vector.extract_strided_slice %26 {offsets = [0, 16], sizes = [128, 16], strides = [1, 1]} : vector<128x96xf32> to vector<128x16xf32>
    %47 = vector.extract_strided_slice %26 {offsets = [0, 48], sizes = [128, 16], strides = [1, 1]} : vector<128x96xf32> to vector<128x16xf32>
    %48 = vector.extract_strided_slice %26 {offsets = [0, 80], sizes = [128, 16], strides = [1, 1]} : vector<128x96xf32> to vector<128x16xf32>
    %cst_21 = arith.constant dense<0.000000e+00> : vector<128x128xf32>
    %49 = tpu.matmul %46, %47, %cst_21 {dimension_numbers = #tpu.dot_dimension_numbers<[1], [1], [0], [0], [0, 0, 1, 0], [], []>, precision = #tpu.contract_precision<fp32>} : vector<128x16xf32>, vector<128x16xf32>, vector<128x128xf32> -> vector<128x128xf32>
    %50 = arith.addf %49, %27 : vector<128x128xf32>
    %cst_22 = arith.constant dense<0xFF800000> : vector<128xf32>
    %51 = vector.multi_reduction <maximumf>, %50, %cst_22 [1] : vector<128x128xf32> to vector<128xf32>
    %52 = vector.shape_cast %51 : vector<128xf32> to vector<128x1xf32>
    %53 = vector.broadcast %52 : vector<128x1xf32> to vector<128x128xf32>
    %54 = arith.subf %50, %53 : vector<128x128xf32>
    %55 = math.exp %54 : vector<128x128xf32>
    %cst_23 = arith.constant dense<0.000000e+00> : vector<128xf32>
    %56 = vector.multi_reduction <add>, %55, %cst_23 [1] : vector<128x128xf32> to vector<128xf32>
    %57 = vector.shape_cast %56 : vector<128xf32> to vector<128x1xf32>
    %58 = vector.broadcast %57 : vector<128x1xf32> to vector<128x128xf32>
    %59 = arith.divf %55, %58 : vector<128x128xf32>
    %cst_24 = arith.constant dense<0.000000e+00> : vector<128x16xf32>
    %60 = tpu.matmul %59, %48, %cst_24 {dimension_numbers = #tpu.dot_dimension_numbers<[1], [0], [0], [1], [0, 0, 1, 1], [], []>, precision = #tpu.contract_precision<fp32>} : vector<128x128xf32>, vector<128x16xf32>, vector<128x16xf32> -> vector<128x16xf32>
    %61 = vector.extract_strided_slice %28 {offsets = [16, 0], sizes = [16, 32], strides = [1, 1]} : vector<32x32xf32> to vector<16x32xf32>
    %cst_25 = arith.constant dense<0.000000e+00> : vector<128x32xf32>
    %62 = tpu.matmul %60, %61, %cst_25 {dimension_numbers = #tpu.dot_dimension_numbers<[1], [0], [0], [1], [0, 0, 1, 1], [], []>, precision = #tpu.contract_precision<fp32>} : vector<128x16xf32>, vector<16x32xf32>, vector<128x32xf32> -> vector<128x32xf32>
    %63 = arith.addf %45, %62 : vector<128x32xf32>
    %c0_26 = arith.constant 0 : index
    %c0_27 = arith.constant 0 : index
    %64 = vector.load %arg7[%c0_26, %c0_27] : memref<1x32xf32, #tpu.memory_space<vmem>>, vector<1x32xf32>
    %65 = vector.broadcast %64 : vector<1x32xf32> to vector<128x32xf32>
    %66 = arith.addf %63, %65 : vector<128x32xf32>
    %67 = arith.addf %66, %0 : vector<128x32xf32>
    %c0_28 = arith.constant 0 : index
    %c0_29 = arith.constant 0 : index
    %68 = vector.load %arg8[%c0_28, %c0_29] : memref<1x32xf32, #tpu.memory_space<vmem>>, vector<1x32xf32>
    %c0_30 = arith.constant 0 : index
    %c0_31 = arith.constant 0 : index
    %69 = vector.load %arg9[%c0_30, %c0_31] : memref<1x32xf32, #tpu.memory_space<vmem>>, vector<1x32xf32>
    %cst_32 = arith.constant dense<0.000000e+00> : vector<128xf32>
    %70 = vector.multi_reduction <add>, %67, %cst_32 [1] : vector<128x32xf32> to vector<128xf32>
    %71 = vector.shape_cast %70 : vector<128xf32> to vector<128x1xf32>
    %cst_33 = arith.constant 3.200000e+01 : f32
    %72 = vector.broadcast %cst_33 : f32 to vector<128x1xf32>
    %73 = arith.divf %71, %72 : vector<128x1xf32>
    %74 = vector.broadcast %73 : vector<128x1xf32> to vector<128x32xf32>
    %75 = arith.subf %67, %74 : vector<128x32xf32>
    %76 = arith.mulf %75, %75 : vector<128x32xf32>
    %cst_34 = arith.constant dense<0.000000e+00> : vector<128xf32>
    %77 = vector.multi_reduction <add>, %76, %cst_34 [1] : vector<128x32xf32> to vector<128xf32>
    %78 = vector.shape_cast %77 : vector<128xf32> to vector<128x1xf32>
    %cst_35 = arith.constant 3.200000e+01 : f32
    %79 = vector.broadcast %cst_35 : f32 to vector<128x1xf32>
    %80 = arith.divf %78, %79 : vector<128x1xf32>
    %81 = vector.broadcast %73 : vector<128x1xf32> to vector<128x32xf32>
    %82 = arith.subf %67, %81 : vector<128x32xf32>
    %cst_36 = arith.constant 9.99999974E-6 : f32
    %83 = vector.broadcast %cst_36 : f32 to vector<128x1xf32>
    %84 = arith.addf %80, %83 : vector<128x1xf32>
    %85 = math.rsqrt %84 : vector<128x1xf32>
    %86 = vector.broadcast %85 : vector<128x1xf32> to vector<128x32xf32>
    %87 = arith.mulf %82, %86 : vector<128x32xf32>
    %88 = vector.broadcast %68 : vector<1x32xf32> to vector<128x32xf32>
    %89 = arith.mulf %87, %88 : vector<128x32xf32>
    %90 = vector.broadcast %69 : vector<1x32xf32> to vector<128x32xf32>
    %91 = arith.addf %89, %90 : vector<128x32xf32>
    %c0_37 = arith.constant 0 : index
    %c0_38 = arith.constant 0 : index
    %92 = vector.load %arg10[%c0_37, %c0_38] : memref<32x64xf32, #tpu.memory_space<vmem>>, vector<32x64xf32>
    %cst_39 = arith.constant dense<0.000000e+00> : vector<128x64xf32>
    %93 = tpu.matmul %91, %92, %cst_39 {dimension_numbers = #tpu.dot_dimension_numbers<[1], [0], [0], [1], [0, 0, 1, 1], [], []>, precision = #tpu.contract_precision<fp32>} : vector<128x32xf32>, vector<32x64xf32>, vector<128x64xf32> -> vector<128x64xf32>
    %c0_40 = arith.constant 0 : index
    %c0_41 = arith.constant 0 : index
    %94 = vector.load %arg11[%c0_40, %c0_41] : memref<1x64xf32, #tpu.memory_space<vmem>>, vector<1x64xf32>
    %95 = vector.broadcast %94 : vector<1x64xf32> to vector<128x64xf32>
    %96 = arith.addf %93, %95 : vector<128x64xf32>
    %cst_42 = arith.constant 5.000000e-01 : f32
    %97 = vector.broadcast %cst_42 : f32 to vector<128x64xf32>
    %98 = arith.mulf %97, %96 : vector<128x64xf32>
    %cst_43 = arith.constant 0.707106769 : f32
    %99 = vector.broadcast %cst_43 : f32 to vector<128x64xf32>
    %100 = arith.mulf %96, %99 : vector<128x64xf32>
    %cst_44 = arith.constant 0.000000e+00 : f32
    %101 = vector.broadcast %cst_44 : f32 to vector<128x64xf32>
    %102 = arith.cmpf oge, %100, %101 : vector<128x64xf32>
    %cst_45 = arith.constant 1.000000e+00 : f32
    %cst_46 = arith.constant -1.000000e+00 : f32
    %103 = vector.broadcast %cst_45 : f32 to vector<128x64xf32>
    %104 = vector.broadcast %cst_46 : f32 to vector<128x64xf32>
    %105 = arith.select %102, %103, %104 : vector<128x64xi1>, vector<128x64xf32>
    %106 = math.absf %100 : vector<128x64xf32>
    %cst_47 = arith.constant 0.327591091 : f32
    %107 = vector.broadcast %cst_47 : f32 to vector<128x64xf32>
    %108 = arith.mulf %107, %106 : vector<128x64xf32>
    %cst_48 = arith.constant 1.000000e+00 : f32
    %109 = vector.broadcast %cst_48 : f32 to vector<128x64xf32>
    %110 = arith.addf %109, %108 : vector<128x64xf32>
    %cst_49 = arith.constant 1.000000e+00 : f32
    %111 = vector.broadcast %cst_49 : f32 to vector<128x64xf32>
    %112 = arith.divf %111, %110 : vector<128x64xf32>
    %cst_50 = arith.constant 1.06140542 : f32
    %113 = vector.broadcast %cst_50 : f32 to vector<128x64xf32>
    %114 = arith.mulf %113, %112 : vector<128x64xf32>
    %cst_51 = arith.constant -1.45315206 : f32
    %115 = vector.broadcast %cst_51 : f32 to vector<128x64xf32>
    %116 = arith.addf %114, %115 : vector<128x64xf32>
    %117 = arith.mulf %116, %112 : vector<128x64xf32>
    %cst_52 = arith.constant 1.42141378 : f32
    %118 = vector.broadcast %cst_52 : f32 to vector<128x64xf32>
    %119 = arith.addf %117, %118 : vector<128x64xf32>
    %120 = arith.mulf %119, %112 : vector<128x64xf32>
    %cst_53 = arith.constant -0.284496725 : f32
    %121 = vector.broadcast %cst_53 : f32 to vector<128x64xf32>
    %122 = arith.addf %120, %121 : vector<128x64xf32>
    %123 = arith.mulf %122, %112 : vector<128x64xf32>
    %cst_54 = arith.constant 0.254829586 : f32
    %124 = vector.broadcast %cst_54 : f32 to vector<128x64xf32>
    %125 = arith.addf %123, %124 : vector<128x64xf32>
    %126 = arith.mulf %125, %112 : vector<128x64xf32>
    %cst_55 = arith.constant 0.000000e+00 : f32
    %127 = vector.broadcast %cst_55 : f32 to vector<128x64xf32>
    %128 = arith.subf %127, %106 : vector<128x64xf32>
    %129 = arith.mulf %128, %106 : vector<128x64xf32>
    %130 = math.exp %129 : vector<128x64xf32>
    %131 = arith.mulf %126, %130 : vector<128x64xf32>
    %cst_56 = arith.constant 1.000000e+00 : f32
    %132 = vector.broadcast %cst_56 : f32 to vector<128x64xf32>
    %133 = arith.subf %132, %131 : vector<128x64xf32>
    %134 = arith.mulf %105, %133 : vector<128x64xf32>
    %cst_57 = arith.constant 1.000000e+00 : f32
    %135 = vector.broadcast %cst_57 : f32 to vector<128x64xf32>
    %136 = arith.addf %135, %134 : vector<128x64xf32>
    %137 = arith.mulf %98, %136 : vector<128x64xf32>
    %c0_58 = arith.constant 0 : index
    %c0_59 = arith.constant 0 : index
    %138 = vector.load %arg12[%c0_58, %c0_59] : memref<64x32xf32, #tpu.memory_space<vmem>>, vector<64x32xf32>
    %cst_60 = arith.constant dense<0.000000e+00> : vector<128x32xf32>
    %139 = tpu.matmul %137, %138, %cst_60 {dimension_numbers = #tpu.dot_dimension_numbers<[1], [0], [0], [1], [0, 0, 1, 1], [], []>, precision = #tpu.contract_precision<fp32>} : vector<128x64xf32>, vector<64x32xf32>, vector<128x32xf32> -> vector<128x32xf32>
    %c0_61 = arith.constant 0 : index
    %c0_62 = arith.constant 0 : index
    %140 = vector.load %arg13[%c0_61, %c0_62] : memref<1x32xf32, #tpu.memory_space<vmem>>, vector<1x32xf32>
    %141 = vector.broadcast %140 : vector<1x32xf32> to vector<128x32xf32>
    %142 = arith.addf %139, %141 : vector<128x32xf32>
    %143 = arith.addf %142, %67 : vector<128x32xf32>
    %c0_63 = arith.constant 0 : index
    %c0_64 = arith.constant 0 : index
    %144 = vector.load %arg14[%c0_63, %c0_64] : memref<128x32xf32, #tpu.memory_space<vmem>>, vector<128x32xf32>
    tpu.vector_store %arg14[%c0_63, %c0_64], %143 {strides = array<i32>} : memref<128x32xf32, #tpu.memory_space<vmem>>, vector<128x32xf32>,
    return
  }
  func.func @transform_0(%arg0: i32) -> (i32, i32) {
    %c0_i32 = arith.constant 0 : i32
    %c0_i32_0 = arith.constant 0 : i32
    %c0_i32_1 = arith.constant 0 : i32
    return %c0_i32, %c0_i32_0 : i32, i32
  }
  func.func @transform_1(%arg0: i32) -> (i32, i32) {
    %c0_i32 = arith.constant 0 : i32
    %c0_i32_0 = arith.constant 0 : i32
    %c0_i32_1 = arith.constant 0 : i32
    return %c0_i32, %c0_i32_0 : i32, i32
  }
  func.func @transform_2(%arg0: i32) -> (i32, i32) {
    %c0_i32 = arith.constant 0 : i32
    %c0_i32_0 = arith.constant 0 : i32
    %c0_i32_1 = arith.constant 0 : i32
    return %c0_i32, %c0_i32_0 : i32, i32
  }
  func.func @transform_3(%arg0: i32) -> (i32, i32) {
    %c0_i32 = arith.constant 0 : i32
    %c0_i32_0 = arith.constant 0 : i32
    %c0_i32_1 = arith.constant 0 : i32
    return %c0_i32, %c0_i32_0 : i32, i32
  }
  func.func @transform_4(%arg0: i32) -> (i32, i32) {
    %c0_i32 = arith.constant 0 : i32
    %c0_i32_0 = arith.constant 0 : i32
    %c0_i32_1 = arith.constant 0 : i32
    return %c0_i32, %c0_i32_0 : i32, i32
  }
  func.func @transform_5(%arg0: i32) -> (i32, i32) {
    %c0_i32 = arith.constant 0 : i32
    %c0_i32_0 = arith.constant 0 : i32
    %c0_i32_1 = arith.constant 0 : i32
    return %c0_i32, %c0_i32_0 : i32, i32
  }
  func.func @transform_6(%arg0: i32) -> (i32, i32) {
    %c0_i32 = arith.constant 0 : i32
    %c0_i32_0 = arith.constant 0 : i32
    %c0_i32_1 = arith.constant 0 : i32
    return %c0_i32, %c0_i32_0 : i32, i32
  }
  func.func @transform_7(%arg0: i32) -> (i32, i32) {
    %c0_i32 = arith.constant 0 : i32
    %c0_i32_0 = arith.constant 0 : i32
    %c0_i32_1 = arith.constant 0 : i32
    return %c0_i32, %c0_i32_0 : i32, i32
  }
  func.func @transform_8(%arg0: i32) -> (i32, i32) {
    %c0_i32 = arith.constant 0 : i32
    %c0_i32_0 = arith.constant 0 : i32
    %c0_i32_1 = arith.constant 0 : i32
    return %c0_i32, %c0_i32_0 : i32, i32
  }
  func.func @transform_9(%arg0: i32) -> (i32, i32) {
    %c0_i32 = arith.constant 0 : i32
    %c0_i32_0 = arith.constant 0 : i32
    %c0_i32_1 = arith.constant 0 : i32
    return %c0_i32, %c0_i32_0 : i32, i32
  }
  func.func @transform_10(%arg0: i32) -> (i32, i32) {
    %c0_i32 = arith.constant 0 : i32
    %c0_i32_0 = arith.constant 0 : i32
    %c0_i32_1 = arith.constant 0 : i32
    return %c0_i32, %c0_i32_0 : i32, i32
  }
  func.func @transform_11(%arg0: i32) -> (i32, i32) {
    %c0_i32 = arith.constant 0 : i32
    %c0_i32_0 = arith.constant 0 : i32
    %c0_i32_1 = arith.constant 0 : i32
    return %c0_i32, %c0_i32_0 : i32, i32
  }
  func.func @transform_12(%arg0: i32) -> (i32, i32) {
    %c0_i32 = arith.constant 0 : i32
    %c0_i32_0 = arith.constant 0 : i32
    %c0_i32_1 = arith.constant 0 : i32
    return %c0_i32, %c0_i32_0 : i32, i32
  }
  func.func @transform_13(%arg0: i32) -> (i32, i32) {
    %c0_i32 = arith.constant 0 : i32
    %c0_i32_0 = arith.constant 0 : i32
    %c0_i32_1 = arith.constant 0 : i32
    return %c0_i32, %c0_i32_0 : i32, i32
  }
}

</mosaic_0001>

<bundles_post_ra>
// kernel: swin_block_forward.1
= control target key start
LH: loop header
LB: loop body
LE: loop exit
PB: predicated region body
PF: predicated region fallthrough
CT: control target
= control target key end

     0   :  { %vm62_vm0 = vcmask 261120   ;;  %vm1566_vm1 = vcmask 130048   ;;  %s18575_s30 = smov 80   ;;  %vm11520_vm10 = vcmask 523264   ;;  %s24150_s0 = inlined_call_operand.vmem [shape: f32[128,32], index: 0, kind: input, shape index: {}]   ;;  %s24151_s4 = inlined_call_operand.vmem [shape: f32[32,96], index: 4, kind: input, shape index: {}]   ;;  %s24152_s2 = inlined_call_operand.vmem [shape: f32[1,32], index: 2, kind: input, shape index: {}]   ;;  %s24153_s3 = inlined_call_operand.vmem [shape: f32[1,32], index: 3, kind: input, shape index: {}]   ;;  %s24154_s1 = inlined_call_operand.vmem [shape: f32[128,128], index: 1, kind: input, shape index: {}]   ;;  %s24155_s5 = inlined_call_operand.vmem [shape: f32[32,32], index: 5, kind: input, shape index: {}]   ;;  %s24156_s6 = inlined_call_operand.vmem [shape: f32[1,32], index: 6, kind: input, shape index: {}]   ;;  %s24157_s9 = inlined_call_operand.vmem [shape: f32[32,64], index: 9, kind: input, shape index: {}]   ;;  %s24158_s7 = inlined_call_operand.vmem [shape: f32[1,32], index: 7, kind: input, shape index: {}]   ;;  %s24159_s8 = inlined_call_operand.vmem [shape: f32[1,32], index: 8, kind: input, shape index: {}]   ;;  %s24160_s11 = inlined_call_operand.vmem [shape: f32[64,32], index: 11, kind: input, shape index: {}]   ;;  %s24161_s10 = inlined_call_operand.vmem [shape: f32[1,64], index: 10, kind: input, shape index: {}]   ;;  %s24162_s12 = inlined_call_operand.vmem [shape: f32[1,32], index: 12, kind: input, shape index: {}]   ;;  %s24163_s13 = inlined_call_operand.vmem [shape: f32[128,32], index: 13, kind: output, shape index: {}]  }
   0x1   :  { %v44_v0 = vld [vmem:[%s24150_s0] sm:$0xff]  ;;  %v46_v1 = vld [vmem:[%s24150_s0 + $0x10] sm:$0xff]  ;;  %v45_v2 = vld [vmem:[%s24150_s0 + $0x8] sm:$0xff] }
   0x2   :  { %v63_v3 = vsel %vm62_vm0, %v44_v0, 0.0  ;;  %v69_v4 = vsel %vm62_vm0, %v46_v1, 0.0  ;;  %v47_v5 = vld [vmem:[%s24150_s0 + $0x18] sm:$0xff]  ;;  %v66_v6 = vsel %vm62_vm0, %v45_v2, 0.0  ;;  %v48_v8 = vld [vmem:[%s24150_s0 + $0x20] sm:$0xff]  ;;  %v49_v9 = vld [vmem:[%s24150_s0 + $0x28] sm:$0xff] }
   0x3   :  { %64 = vadd.xlane.f32.xlu0 %v63_v3  ;;  %70 = vadd.xlane.f32.xlu1 %v69_v4  ;;  %v72_v7 = vsel %vm62_vm0, %v47_v5, 0.0  ;;  %v75_v10 = vsel %vm62_vm0, %v48_v8, 0.0  ;;  %v78_v11 = vsel %vm62_vm0, %v49_v9, 0.0  ;;  %v18676_v12 = vld [vmem:[%s24150_s0 + $0x30] sm:$0xff]  ;;  %v18681_v13 = vld [vmem:[%s24150_s0 + $0x38] sm:$0xff]  ;;  %v18690_v16 = vld [vmem:[%s24150_s0 + $0x40] sm:$0xff] }
   0x4   :  { %v81_v14 = vsel %vm62_vm0, %v18676_v12, 0.0  ;;  %v84_v15 = vsel %vm62_vm0, %v18681_v13, 0.0  ;;  %v18695_v17 = vld [vmem:[%s24150_s0 + $0x48] sm:$0xff]  ;;  %v87_v18 = vsel %vm62_vm0, %v18690_v16, 0.0  ;;  %v18704_v20 = vld [vmem:[%s24150_s0 + $0x50] sm:$0xff]  ;;  %v18709_v21 = vld [vmem:[%s24150_s0 + $0x58] sm:$0xff] }
   0x5   :  { %v90_v19 = vsel %vm62_vm0, %v18695_v17, 0.0  ;;  %v93_v22 = vsel %vm62_vm0, %v18704_v20, 0.0  ;;  %v96_v23 = vsel %vm62_vm0, %v18709_v21, 0.0  ;;  %v18718_v24 = vld [vmem:[%s24150_s0 + $0x60] sm:$0xff]  ;;  %v18723_v25 = vld [vmem:[%s24150_s0 + $0x68] sm:$0xff]  ;;  %v18732_v28 = vld [vmem:[%s24150_s0 + $0x70] sm:$0xff] }
   0x6   :  { %v99_v26 = vsel %vm62_vm0, %v18718_v24, 0.0  ;;  %v102_v27 = vsel %vm62_vm0, %v18723_v25, 0.0  ;;  %v18737_v29 = vld [vmem:[%s24150_s0 + $0x78] sm:$0xff]  ;;  %v105_v30 = vsel %vm62_vm0, %v18732_v28, 0.0 }
   0x7   :  { %67 = vadd.xlane.f32.xlu0 %v66_v6  ;;  %73 = vadd.xlane.f32.xlu1 %v72_v7  ;;  %v108_v31 = vsel %vm62_vm0, %v18737_v29, 0.0 }
   0xb   :  { %76 = vadd.xlane.f32.xlu0 %v75_v10  ;;  %79 = vadd.xlane.f32.xlu1 %v78_v11 }
   0xf   :  { %82 = vadd.xlane.f32.xlu0 %v81_v14  ;;  %85 = vadd.xlane.f32.xlu1 %v84_v15 }
  0x13   :  { %88 = vadd.xlane.f32.xlu0 %v87_v18  ;;  %91 = vadd.xlane.f32.xlu1 %v90_v19 }
  0x17   :  { %94 = vadd.xlane.f32.xlu0 %v93_v22  ;;  %97 = vadd.xlane.f32.xlu1 %v96_v23 }
  0x1b   :  { %100 = vadd.xlane.f32.xlu0 %v99_v26  ;;  %103 = vadd.xlane.f32.xlu1 %v102_v27 }
  0x1f   :  { %106 = vadd.xlane.f32.xlu0 %v105_v30  ;;  %109 = vadd.xlane.f32.xlu1 %v108_v31 }
  0x90   :  { %v65_v32 = vpop.xlane.xlu0 %64  ;;  %v71_v33 = vpop.xlane.xlu1 %70 }
  0x91   :  { %v112_v34 = vmul.f32 0.03125, %v65_v32  ;;  %v114_v35 = vmul.f32 0.03125, %v71_v33 }
  0x93   :  { %v18743_v36 = vsub.f32 %v44_v0, %v112_v34  ;;  %v18745_v37 = vsub.f32 %v46_v1, %v114_v35 }
  0x94   :  { %v68_v38 = vpop.xlane.xlu0 %67  ;;  %v74_v39 = vpop.xlane.xlu1 %73 }
  0x95   :  { %v113_v40 = vmul.f32 0.03125, %v68_v38  ;;  %v115_v41 = vmul.f32 0.03125, %v74_v39  ;;  %v144_v42 = vmul.f32 %v18743_v36, %v18743_v36  ;;  %v146_v43 = vmul.f32 %v18745_v37, %v18745_v37 }
  0x97   :  { %v18751_v44 = vsub.f32 %v45_v2, %v113_v40  ;;  %v18753_v45 = vsub.f32 %v47_v5, %v115_v41  ;;  %v160_v46 = vsel %vm62_vm0, %v144_v42, 0.0  ;;  %v166_v49 = vsel %vm62_vm0, %v146_v43, 0.0 }
  0x98   :  { %161 = vadd.xlane.f32.xlu0 %v160_v46  ;;  %v77_v47 = vpop.xlane.xlu0 %76  ;;  %v80_v48 = vpop.xlane.xlu1 %79 }
  0x99   :  { %v116_v50 = vmul.f32 0.03125, %v77_v47  ;;  %v117_v51 = vmul.f32 0.03125, %v80_v48  ;;  %v145_v52 = vmul.f32 %v18751_v44, %v18751_v44  ;;  %v147_v53 = vmul.f32 %v18753_v45, %v18753_v45  ;;  %v317_v47 = vld [vmem:[%s24151_s4 + $0x8] sm:$0xff] }
  0x9b   :  { %v18761_v54 = vsub.f32 %v48_v8, %v116_v50  ;;  %v18763_v55 = vsub.f32 %v49_v9, %v117_v51  ;;  %v163_v56 = vsel %vm62_vm0, %v145_v52, 0.0  ;;  %v169_v59 = vsel %vm62_vm0, %v147_v53, 0.0 }
  0x9c   :  { %167 = vadd.xlane.f32.xlu0 %v166_v49  ;;  %164 = vadd.xlane.f32.xlu1 %v163_v56  ;;  %v83_v57 = vpop.xlane.xlu0 %82  ;;  %v86_v58 = vpop.xlane.xlu1 %85  ;;  %v372_v52 = vand.u32 4294901760, %v317_v47 }
  0x9d   :  { %v118_v60 = vmul.f32 0.03125, %v83_v57  ;;  %v119_v61 = vmul.f32 0.03125, %v86_v58  ;;  %v148_v62 = vmul.f32 %v18761_v54, %v18761_v54  ;;  %v149_v63 = vmul.f32 %v18763_v55, %v18763_v55 }
  0x9f   :  { %v18772_v0 = vsub.f32 %v18676_v12, %v118_v60  ;;  %v18775_v1 = vsub.f32 %v18681_v13, %v119_v61  ;;  %v172_v2 = vsel %vm62_vm0, %v148_v62, 0.0  ;;  %v175_v5 = vsel %vm62_vm0, %v149_v63, 0.0 }
  0xa0   :  { %170 = vadd.xlane.f32.xlu1 %v169_v59  ;;  %173 = vadd.xlane.f32.xlu0 %v172_v2  ;;  %v89_v3 = vpop.xlane.xlu0 %88  ;;  %v92_v4 = vpop.xlane.xlu1 %91  ;;  %v319_v59 = vld [vmem:[%s24151_s4 + $0x18] sm:$0xff] }
  0xa1   :  { %v120_v6 = vmul.f32 0.03125, %v89_v3  ;;  %v121_v7 = vmul.f32 0.03125, %v92_v4  ;;  %v150_v8 = vmul.f32 %v18772_v0, %v18772_v0  ;;  %v151_v9 = vmul.f32 %v18775_v1, %v18775_v1 }
  0xa2   :  { %v378_v62 = vand.u32 4294901760, %v319_v59 }
  0xa3   :  { %v18784_v10 = vsub.f32 %v18690_v16, %v120_v6  ;;  %v18787_v11 = vsub.f32 %v18695_v17, %v121_v7  ;;  %v178_v12 = vsel %vm62_vm0, %v150_v8, 0.0  ;;  %v181_v15 = vsel %vm62_vm0, %v151_v9, 0.0 }
  0xa4   :  { %176 = vadd.xlane.f32.xlu1 %v175_v5  ;;  %179 = vadd.xlane.f32.xlu0 %v178_v12  ;;  %v95_v13 = vpop.xlane.xlu0 %94  ;;  %v98_v14 = vpop.xlane.xlu1 %97  ;;  %v18853_v5 = vsub.f32 %v319_v59, %v378_v62 }
  0xa5   :  { %v122_v18 = vmul.f32 0.03125, %v95_v13  ;;  %v123_v19 = vmul.f32 0.03125, %v98_v14  ;;  %v152_v22 = vmul.f32 %v18784_v10, %v18784_v10  ;;  %v153_v16 = vmul.f32 %v18787_v11, %v18787_v11 }
  0xa6   :  { %v621_v9 = vand.u32 4294901760, %v18853_v5 }
  0xa7   :  { %v18796_v23 = vsub.f32 %v18704_v20, %v122_v18  ;;  %v18799_v17 = vsub.f32 %v18709_v21, %v123_v19  ;;  %v184_v26 = vsel %vm62_vm0, %v152_v22, 0.0  ;;  %v187_v31 = vsel %vm62_vm0, %v153_v16, 0.0 }
  0xa8   :  { %182 = vadd.xlane.f32.xlu1 %v181_v15  ;;  %185 = vadd.xlane.f32.xlu0 %v184_v26  ;;  %v101_v27 = vpop.xlane.xlu0 %100  ;;  %v104_v30 = vpop.xlane.xlu1 %103  ;;  %v622_v15 = vsub.f32 %v18853_v5, %v621_v9 }
  0xa9   :  { %v124_v32 = vmul.f32 0.03125, %v101_v27  ;;  %v125_v33 = vmul.f32 0.03125, %v104_v30  ;;  %v154_v34 = vmul.f32 %v18796_v23, %v18796_v23  ;;  %v155_v20 = vmul.f32 %v18799_v17, %v18799_v17 }
  0xaa   :  { %v623_v22 = vand.u32 4294901760, %v622_v15 }
  0xab   :  { %v18808_v35 = vsub.f32 %v18718_v24, %v124_v32  ;;  %v18811_v21 = vsub.f32 %v18723_v25, %v125_v33  ;;  %v190_v38 = vsel %vm62_vm0, %v154_v34, 0.0  ;;  %v193_v41 = vsel %vm62_vm0, %v155_v20, 0.0  ;;  %v316_v25 = vld [vmem:[%s24151_s4] sm:$0xff] }
  0xac   :  { %188 = vadd.xlane.f32.xlu1 %v187_v31  ;;  %191 = vadd.xlane.f32.xlu0 %v190_v38  ;;  %v107_v39 = vpop.xlane.xlu0 %106  ;;  %v110_v40 = vpop.xlane.xlu1 %109  ;;  %v369_v51 = vand.u32 4294901760, %v316_v25 }
  0xad   :  { %v126_v42 = vmul.f32 0.03125, %v107_v39  ;;  %v127_v43 = vmul.f32 0.03125, %v110_v40  ;;  %v156_v46 = vmul.f32 %v18808_v35, %v18808_v35  ;;  %v157_v24 = vmul.f32 %v18811_v21, %v18811_v21 }
  0xae   :  { %v18837_v58 = vsub.f32 %v316_v25, %v369_v51  ;;  %v18869_v26 = vpack.c.bf16 %v372_v52, %v369_v51 }
  0xaf   :  { %v18826_v48 = vsub.f32 %v18732_v28, %v126_v42  ;;  %v18829_v49 = vsub.f32 %v18737_v29, %v127_v43  ;;  %v196_v50 = vsel %vm62_vm0, %v156_v46, 0.0  ;;  %v199_v53 = vsel %vm62_vm0, %v157_v24, 0.0  ;;  %v318_v29 = vld [vmem:[%s24151_s4 + $0x10] sm:$0xff]  ;;  %s18577_s4 = smov 48  }
  0xb0   :  { %194 = vadd.xlane.f32.xlu1 %v193_v41  ;;  %197 = vadd.xlane.f32.xlu0 %v196_v50  ;;  %v18839_v28 = vsub.f32 %v317_v47, %v372_v52  ;;  %v375_v61 = vand.u32 4294901760, %v318_v29  ;;  %v600_v63 = vand.u32 4294901760, %v18837_v58 }
  0xb1   :  { %v158_v56 = vmul.f32 %v18826_v48, %v18826_v48  ;;  %v159_v57 = vmul.f32 %v18829_v49, %v18829_v49  ;;  %16467 = vmatprep.subr.bf16.mxu1 %v18869_v26 }
  0xb2   :  { %v607_v2 = vand.u32 4294901760, %v18839_v28  ;;  %v18851_v4 = vsub.f32 %v318_v29, %v375_v61  ;;  %v601_v6 = vsub.f32 %v18837_v58, %v600_v63  ;;  %16469 = vmatpush3.bf16.msra.mxu1 %v18869_v26  ;;  %v18873_v27 = vpack.c.bf16 %v378_v62, %v375_v61 }
  0xb3   :  { %v202_v60 = vsel %vm62_vm0, %v158_v56, 0.0  ;;  %v205_v3 = vsel %vm62_vm0, %v159_v57, 0.0  ;;  %v18879_v30 = vpack.c.bf16 %v18839_v28, %v18837_v58 }
  0xb4   :  { %200 = vadd.xlane.f32.xlu1 %v199_v53  ;;  %203 = vadd.xlane.f32.xlu0 %v202_v60  ;;  %v608_v7 = vsub.f32 %v18839_v28, %v607_v2  ;;  %v614_v8 = vand.u32 4294901760, %v18851_v4  ;;  %v602_v12 = vand.u32 4294901760, %v601_v6  ;;  %v18884_v31 = vpack.c.bf16 %v18853_v5, %v18851_v4  ;;  %v18889_v60 = vld [vmem:[%s24152_s2] ss:$0 sm:$0xff]  ;;  %s18573_s2 = smov 96  }
  0xb5   :  { %16471 = vmatprep.subr.bf16.mxu1 %v18873_v27 }
  0xb6   :  { %v609_v13 = vand.u32 4294901760, %v608_v7  ;;  %v615_v14 = vsub.f32 %v18851_v4, %v614_v8  ;;  %16473 = vmatpush3.bf16.msra.mxu1 %v18873_v27  ;;  %v16502_v58 = vpack.c.bf16 %v621_v9, %v614_v8 }
  0xb8   :  { %206 = vadd.xlane.f32.xlu1 %v205_v3  ;;  %v16474_v18 = vpack.c.bf16 %v609_v13, %v602_v12  ;;  %v616_v19 = vand.u32 4294901760, %v615_v14  ;;  %v18895_v12 = vld [vmem:[%s24153_s3] ss:$0 sm:$0xff]  ;;  %s18574_s3 = smov 64  }
  0xba   :  { %16475 = vmatprep.subr.bf16.mxu0 %v16474_v18  ;;  %v16478_v16 = vpack.c.bf16 %v623_v22, %v616_v19 }
  0xbb   :  { %16477 = vmatpush3.bf16.msra.mxu0 %v16474_v18 }
  0xbc   :  { %16479 = vmatprep.subr.bf16.mxu0 %v16478_v16 }
  0xbf   :  { %16481 = vmatpush3.bf16.msra.mxu0 %v16478_v16 }
  0xc0   :  { %16483 = vmatprep.subr.bf16.mxu0 %v18879_v30 }
 0x125   :  { %v162_v32 = vpop.xlane.xlu0 %161 }
 0x126   :  { %v208_v33 = vmul.f32 0.03125, %v162_v32 }
 0x128   :  { %v224_v34 = vadd.f32 1e-05, %v208_v33 }
 0x129   :  { %v165_v20 = vpop.xlane.xlu1 %164  ;;  %v168_v38 = vpop.xlane.xlu0 %167 }
 0x12a   :  { %18280 = vrsqrt.f32 %v224_v34  ;;  %v209_v39 = vmul.f32 0.03125, %v165_v20  ;;  %v210_v40 = vmul.f32 0.03125, %v168_v38 }
 0x12c   :  { %v225_v41 = vadd.f32 1e-05, %v209_v39  ;;  %v226_v42 = vadd.f32 1e-05, %v210_v40 }
 0x12d   :  { %v171_v43 = vpop.xlane.xlu1 %170  ;;  %v174_v46 = vpop.xlane.xlu0 %173 }
 0x12e   :  { %18282 = vrsqrt.f32 %v225_v41  ;;  %v211_v24 = vmul.f32 0.03125, %v171_v43  ;;  %v212_v25 = vmul.f32 0.03125, %v174_v46 }
 0x12f   :  { %18284 = vrsqrt.f32 %v226_v42 }
 0x130   :  { %v227_v47 = vadd.f32 1e-05, %v211_v24  ;;  %v228_v50 = vadd.f32 1e-05, %v212_v25 }
 0x131   :  { %v177_v51 = vpop.xlane.xlu1 %176  ;;  %v180_v52 = vpop.xlane.xlu0 %179 }
 0x132   :  { %18286 = vrsqrt.f32 %v227_v47  ;;  %v213_v53 = vmul.f32 0.03125, %v177_v51  ;;  %v214_v56 = vmul.f32 0.03125, %v180_v52 }
 0x133   :  { %18288 = vrsqrt.f32 %v228_v50 }
 0x134   :  { %v18281_v57 = vpop.eup %18280  ;;  %v229_v29 = vadd.f32 1e-05, %v213_v53  ;;  %v230_v59 = vadd.f32 1e-05, %v214_v56 }
 0x135   :  { %v256_v61 = vmul.f32 %v18281_v57, %v18743_v36  ;;  %v183_v62 = vpop.xlane.xlu1 %182  ;;  %v186_v3 = vpop.xlane.xlu0 %185 }
 0x136   :  { %18290 = vrsqrt.f32 %v229_v29  ;;  %v215_v6 = vmul.f32 0.03125, %v183_v62  ;;  %v216_v7 = vmul.f32 0.03125, %v186_v3 }
 0x137   :  { %18292 = vrsqrt.f32 %v230_v59  ;;  %v278_v13 = vmul.f32 %v18889_v60, %v256_v61 }
 0x138   :  { %v18283_v14 = vpop.eup %18282  ;;  %v231_v15 = vadd.f32 1e-05, %v215_v6  ;;  %v232_v18 = vadd.f32 1e-05, %v216_v7 }
 0x139   :  { %v18285_v19 = vpop.eup %18284  ;;  %v257_v22 = vmul.f32 %v18283_v14, %v18751_v44  ;;  %v189_v36 = vpop.xlane.xlu1 %188  ;;  %v300_v32 = vadd.f32 %v18895_v12, %v278_v13 }
 0x13a   :  { %v192_v16 = vpop.xlane.xlu0 %191  ;;  %v258_v33 = vmul.f32 %v18285_v19, %v18745_v37  ;;  %18294 = vrsqrt.f32 %v231_v15  ;;  %v217_v34 = vmul.f32 0.03125, %v189_v36 }
 0x13b   :  { %v218_v20 = vmul.f32 0.03125, %v192_v16  ;;  %18296 = vrsqrt.f32 %v232_v18  ;;  %v321_v38 = vsel %vm62_vm0, %v300_v32, 0  ;;  %v279_v39 = vmul.f32 %v18889_v60, %v257_v22 }
 0x13c   :  { %v18287_v40 = vpop.eup %18286  ;;  %v233_v41 = vadd.f32 1e-05, %v217_v34  ;;  %v18903_v43 = vand.u32 4294901760, %v321_v38  ;;  %v280_v44 = vmul.f32 %v18889_v60, %v258_v33 }
 0x13d   :  { %v234_v42 = vadd.f32 1e-05, %v218_v20  ;;  %v18289_v46 = vpop.eup %18288  ;;  %v259_v24 = vmul.f32 %v18287_v40, %v18753_v45  ;;  %v195_v25 = vpop.xlane.xlu1 %194  ;;  %v301_v47 = vadd.f32 %v18895_v12, %v279_v39 }
 0x13e   :  { %v198_v37 = vpop.xlane.xlu0 %197  ;;  %v260_v50 = vmul.f32 %v18289_v46, %v18761_v54  ;;  %18298 = vrsqrt.f32 %v233_v41  ;;  %v219_v51 = vmul.f32 0.03125, %v195_v25  ;;  %14202 = vmatprep.mubr.f32.mxu0 %v18903_v43  ;;  %v302_v56 = vadd.f32 %v18895_v12, %v280_v44 }
 0x13f   :  { %v220_v52 = vmul.f32 0.03125, %v198_v37  ;;  %18300 = vrsqrt.f32 %v234_v42  ;;  %v324_v53 = vsel %vm62_vm0, %v301_v47, 0  ;;  %v18913_v57 = vsub.f32 %v321_v38, %v18903_v43 }
 0x140   :  { %v18291_v45 = vpop.eup %18290  ;;  %v235_v29 = vadd.f32 1e-05, %v219_v51  ;;  %v18915_v61 = vand.u32 4294901760, %v324_v53  ;;  %v281_v54 = vmul.f32 %v18889_v60, %v259_v24  ;;  %v327_v13 = vsel %vm62_vm0, %v302_v56, 0 }
 0x141   :  { %v236_v59 = vadd.f32 1e-05, %v220_v52  ;;  %v18293_v62 = vpop.eup %18292  ;;  %v261_v3 = vmul.f32 %v18291_v45, %v18763_v55  ;;  %v201_v6 = vpop.xlane.xlu1 %200  ;;  %v439_v14 = vand.u32 4294901760, %v18913_v57  ;;  %v282_v15 = vmul.f32 %v18889_v60, %v260_v50 }
 0x142   :  { %v204_v7 = vpop.xlane.xlu0 %203  ;;  %v262_v18 = vmul.f32 %v18293_v62, %v18772_v0  ;;  %18302 = vrsqrt.f32 %v235_v29  ;;  %v221_v19 = vmul.f32 0.03125, %v201_v6  ;;  %14203 = vmatmul.mubr.f32.vlgmr.msra.gmra.mrb[0].mxu0 %v18915_v61  ;;  %v18924_v36 = vand.u32 4294901760, %v327_v13 }
 0x143   :  { %v222_v22 = vmul.f32 0.03125, %v204_v7  ;;  %18304 = vrsqrt.f32 %v236_v59  ;;  %16485 = vmatpush3.bf16.msra.mxu0 %v18879_v30  ;;  %v440_v55 = vsub.f32 %v18913_v57, %v439_v14  ;;  %v303_v16 = vadd.f32 %v18895_v12, %v281_v54 }
 0x144   :  { %v18295_v32 = vpop.eup %18294  ;;  %v237_v33 = vadd.f32 1e-05, %v221_v19  ;;  %v304_v0 = vadd.f32 %v18895_v12, %v282_v15  ;;  %v18933_v20 = vsub.f32 %v324_v53, %v18915_v61  ;;  %16487 = vmatprep.subr.bf16.mxu0 %v18884_v31  ;;  %14205 = vmatprep.mubr.f32.mxu0 %v18924_v36  ;;  %v283_v42 = vmul.f32 %v18889_v60, %v261_v3 }
 0x145   :  { %v238_v34 = vadd.f32 1e-05, %v222_v22  ;;  %v18297_v38 = vpop.eup %18296  ;;  %v263_v39 = vmul.f32 %v18295_v32, %v18775_v1  ;;  %v207_v30 = vpop.xlane.xlu1 %206  ;;  %v441_v40 = vand.u32 4294901760, %v440_v55  ;;  %v330_v41 = vsel %vm62_vm0, %v303_v16, 0 }
 0x146   :  { %v264_v44 = vmul.f32 %v18297_v38, %v18784_v10  ;;  %18306 = vrsqrt.f32 %v237_v33  ;;  %v223_v46 = vmul.f32 0.03125, %v207_v30  ;;  %v18941_v24 = vand.u32 4294901760, %v330_v41 }
 0x147   :  { %18308 = vrsqrt.f32 %v238_v34  ;;  %14170 = vmatprep.mubr.f32.mxu1 %v441_v40  ;;  %v333_v25 = vsel %vm62_vm0, %v304_v0, 0  ;;  %v449_v1 = vand.u32 4294901760, %v18933_v20  ;;  %v305_v37 = vadd.f32 %v18895_v12, %v283_v42  ;;  %16489 = vmatpush3.bf16.msra.mxu0 %v18884_v31 }
 0x148   :  { %v18299_v47 = vpop.eup %18298  ;;  %v239_v50 = vadd.f32 1e-05, %v223_v46  ;;  %14206 = vmatmul.mubr.f32.gmra.mrb[2].mxu0 %v18941_v24  ;;  %v18948_v51 = vand.u32 4294901760, %v333_v25  ;;  %v18951_v10 = vsub.f32 %v327_v13, %v18924_v36  ;;  %v284_v52 = vmul.f32 %v18889_v60, %v262_v18  ;;  %16491 = vmatprep.subr.bf16.mxu0 %v18869_v26 }
 0x149   :  { %v18301_v53 = vpop.eup %18300  ;;  %v265_v56 = vmul.f32 %v18299_v47, %v18787_v11  ;;  %v450_v31 = vsub.f32 %v18933_v20, %v449_v1  ;;  %v336_v45 = vsel %vm62_vm0, %v305_v37, 0  ;;  %v18961_v29 = vsub.f32 %v330_v41, %v18941_v24 }
 0x14a   :  { %v266_v59 = vmul.f32 %v18301_v53, %v18796_v23  ;;  %18310 = vrsqrt.f32 %v239_v50  ;;  %14208 = vmatprep.mubr.f32.mxu0 %v18948_v51  ;;  %v18965_v54 = vand.u32 4294901760, %v336_v45  ;;  %v459_v62 = vand.u32 4294901760, %v18951_v10 }
 0x14b   :  { %v451_v3 = vand.u32 4294901760, %v450_v31  ;;  %v306_v11 = vadd.f32 %v18895_v12, %v284_v52  ;;  %v469_v6 = vand.u32 4294901760, %v18961_v29  ;;  %v285_v7 = vmul.f32 %v18889_v60, %v263_v39 }
 0x14c   :  { %v18303_v13 = vpop.eup %18302  ;;  %14209 = vmatmul.mubr.f32.gmra.mrb[4].mxu0 %v18965_v54  ;;  %v460_v23 = vsub.f32 %v18951_v10, %v459_v62  ;;  %v18976_v15 = vsub.f32 %v333_v25, %v18948_v51  ;;  %v286_v18 = vmul.f32 %v18889_v60, %v264_v44  ;;  %v18980_v19 = vsub.f32 %v336_v45, %v18965_v54 }
 0x14d   :  { %v18305_v22 = vpop.eup %18304  ;;  %v267_v55 = vmul.f32 %v18303_v13, %v18799_v17  ;;  %14171 = vmatmul.mubr.f32.vlgmr.msra.gmra.mrb[0].mxu1 %v451_v3  ;;  %v339_v16 = vsel %vm62_vm0, %v306_v11, 0  ;;  %v470_v32 = vsub.f32 %v18961_v29, %v469_v6  ;;  %v307_v33 = vadd.f32 %v18895_v12, %v285_v7 }
 0x14e   :  { %v268_v34 = vmul.f32 %v18305_v22, %v18808_v35  ;;  %v461_v0 = vand.u32 4294901760, %v460_v23  ;;  %v18989_v38 = vand.u32 4294901760, %v339_v16  ;;  %v479_v39 = vand.u32 4294901760, %v18976_v15 }
 0x14f   :  { %v471_v30 = vand.u32 4294901760, %v470_v32  ;;  %v342_v40 = vsel %vm62_vm0, %v307_v33, 0  ;;  %v308_v17 = vadd.f32 %v18895_v12, %v286_v18  ;;  %v489_v41 = vand.u32 4294901760, %v18980_v19 }
 0x150   :  { %v18307_v42 = vpop.eup %18306  ;;  %14173 = vmatprep.mubr.f32.mxu1 %v461_v0  ;;  %14211 = vmatprep.mubr.f32.mxu0 %v18989_v38  ;;  %v18996_v44 = vand.u32 4294901760, %v342_v40  ;;  %v480_v35 = vsub.f32 %v18976_v15, %v479_v39  ;;  %v287_v46 = vmul.f32 %v18889_v60, %v265_v56  ;;  %v19003_v25 = vsub.f32 %v339_v16, %v18989_v38 }
 0x151   :  { %v18309_v37 = vpop.eup %18308  ;;  %v269_v47 = vmul.f32 %v18307_v42, %v18811_v21  ;;  %14174 = vmatmul.mubr.f32.gmra.mrb[2].mxu1 %v471_v30  ;;  %v345_v50 = vsel %vm62_vm0, %v308_v17, 0  ;;  %v490_v52 = vsub.f32 %v18980_v19, %v489_v41  ;;  %v288_v53 = vmul.f32 %v18889_v60, %v266_v59 }
 0x152   :  { %v270_v31 = vmul.f32 %v18309_v37, %v18826_v48  ;;  %14212 = vmatmul.mubr.f32.gmra.mrb[6].mxu0 %v18996_v44  ;;  %v481_v56 = vand.u32 4294901760, %v480_v35  ;;  %v19013_v45 = vand.u32 4294901760, %v345_v50  ;;  %v309_v3 = vadd.f32 %v18895_v12, %v287_v46 }
 0x153   :  { %v491_v11 = vand.u32 4294901760, %v490_v52  ;;  %v499_v21 = vand.u32 4294901760, %v19003_v25  ;;  %v310_v7 = vadd.f32 %v18895_v12, %v288_v53  ;;  %v19019_v13 = vsub.f32 %v342_v40, %v18996_v44 }
 0x154   :  { %v18311_v23 = vpop.eup %18310  ;;  %14176 = vmatprep.mubr.f32.mxu1 %v481_v56  ;;  %14214 = vmatprep.mubr.f32.mxu0 %v19013_v45  ;;  %v348_v48 = vsel %vm62_vm0, %v309_v3, 0  ;;  %v289_v59 = vmul.f32 %v18889_v60, %v267_v55  ;;  %v19025_v18 = vsub.f32 %v345_v50, %v19013_v45  ;;  %v290_v22 = vmul.f32 %v18889_v60, %v268_v34 }
 0x155   :  { %v271_v16 = vmul.f32 %v18311_v23, %v18829_v49  ;;  %14177 = vmatmul.mubr.f32.gmra.mrb[4].mxu1 %v491_v11  ;;  %v19029_v32 = vand.u32 4294901760, %v348_v48  ;;  %v500_v33 = vsub.f32 %v19003_v25, %v499_v21  ;;  %v351_v0 = vsel %vm62_vm0, %v310_v7, 0 }
 0x156   :  { %v19035_v30 = vand.u32 4294901760, %v351_v0  ;;  %v509_v55 = vand.u32 4294901760, %v19019_v13  ;;  %v311_v40 = vadd.f32 %v18895_v12, %v289_v59  ;;  %v519_v17 = vand.u32 4294901760, %v19025_v18 }
 0x157   :  { %14215 = vmatmul.mubr.f32.gmra.mrb[8].mxu0 %v19029_v32  ;;  %v501_v49 = vand.u32 4294901760, %v500_v33  ;;  %v312_v34 = vadd.f32 %v18895_v12, %v290_v22  ;;  %v19043_v42 = vsub.f32 %v348_v48, %v19029_v32  ;;  %v291_v35 = vmul.f32 %v18889_v60, %v269_v47 }
 0x158   :  { %14217 = vmatprep.mubr.f32.mxu0 %v19035_v30  ;;  %v510_v46 = vsub.f32 %v19019_v13, %v509_v55  ;;  %v354_v37 = vsel %vm62_vm0, %v311_v40, 0  ;;  %v520_v50 = vsub.f32 %v19025_v18, %v519_v17  ;;  %v19055_v52 = vsub.f32 %v351_v0, %v19035_v30 }
 0x159   :  { %14179 = vmatprep.mubr.f32.mxu1 %v501_v49  ;;  %v19057_v53 = vand.u32 4294901760, %v354_v37  ;;  %v357_v47 = vsel %vm62_vm0, %v312_v34, 0  ;;  %v24164_v56 = vand.u32 4294901760, %v19043_v42  ;;  %v313_v3 = vadd.f32 %v18895_v12, %v291_v35 }
 0x15a   :  { %v511_v11 = vand.u32 4294901760, %v510_v46  ;;  %v521_v7 = vand.u32 4294901760, %v520_v50  ;;  %v19062_v23 = vand.u32 4294901760, %v357_v47  ;;  %v539_v48 = vand.u32 4294901760, %v19055_v52 }
 0x15b   :  { %14218 = vmatmul.mubr.f32.gmra.mrb[10].mxu0 %v19057_v53  ;;  %v530_v59 = vsub.f32 %v19043_v42, %v24164_v56  ;;  %v360_v22 = vsel %vm62_vm0, %v313_v3, 0  ;;  %v292_v33 = vmul.f32 %v18889_v60, %v270_v31  ;;  %v19072_v0 = vsub.f32 %v354_v37, %v19057_v53 }
 0x15c   :  { %14180 = vmatmul.mubr.f32.gmra.mrb[6].mxu1 %v511_v11  ;;  %14220 = vmatprep.mubr.f32.mxu0 %v19062_v23  ;;  %v19075_v40 = vand.u32 4294901760, %v360_v22  ;;  %v540_v49 = vsub.f32 %v19055_v52, %v539_v48  ;;  %v293_v34 = vmul.f32 %v18889_v60, %v271_v16  ;;  %v19082_v35 = vsub.f32 %v357_v47, %v19062_v23 }
 0x15d   :  { %14182 = vmatprep.mubr.f32.mxu1 %v521_v7  ;;  %v531_v46 = vand.u32 4294901760, %v530_v59  ;;  %v314_v31 = vadd.f32 %v18895_v12, %v292_v33  ;;  %v24166_v37 = vand.u32 4294901760, %v19072_v0  ;;  %v24548_v28 = vand.u32 4294901760, %v19043_v42 }
 0x15e   :  { %v541_v50 = vand.u32 4294901760, %v540_v49  ;;  %v315_v3 = vadd.f32 %v18895_v12, %v293_v34  ;;  %v24165_v11 = vand.u32 4294901760, %v19082_v35  ;;  %v19089_v56 = vsub.f32 %v360_v22, %v19075_v40 }
 0x15f   :  { %14221 = vmatmul.mubr.f32.gmra.mrb[12].mxu0 %v19075_v40  ;;  %v363_v60 = vsel %vm62_vm0, %v314_v31, 0  ;;  %v550_v16 = vsub.f32 %v19072_v0, %v24166_v37 }
 0x160   :  { %14183 = vmatmul.mubr.f32.gmra.mrb[8].mxu1 %v531_v46  ;;  %v19096_v47 = vand.u32 4294901760, %v363_v60  ;;  %v366_v7 = vsel %vm62_vm0, %v315_v3, 0  ;;  %v560_v12 = vsub.f32 %v19082_v35, %v24165_v11  ;;  %v569_v59 = vand.u32 4294901760, %v19089_v56 }
 0x161   :  { %14185 = vmatprep.mubr.f32.mxu1 %v541_v50  ;;  %v551_v22 = vand.u32 4294901760, %v550_v16  ;;  %v19103_v33 = vand.u32 4294901760, %v366_v7 }
 0x162   :  { %14223 = vmatprep.mubr.f32.mxu0 %v19096_v47  ;;  %v561_v49 = vand.u32 4294901760, %v560_v12  ;;  %v570_v34 = vsub.f32 %v19089_v56, %v569_v59  ;;  %v578_v46 = vsub.f32 %v363_v60, %v19096_v47 }
 0x163   :  { %14224 = vmatmul.mubr.f32.gmra.mrb[14].mxu0 %v19103_v33  ;;  %v588_v31 = vsub.f32 %v366_v7, %v19103_v33  ;;  %v16498_v7 = vpack.c.bf16 %v607_v2, %v600_v63  ;;  %v24549_v63 = vand.u32 4294901760, %v19072_v0  ;;  %v24550_v2 = vand.u32 4294901760, %v19082_v35 }
 0x164   :  { %14186 = vmatmul.mubr.f32.gmra.mrb[10].mxu1 %v551_v22  ;;  %14234 = vmatprep.mubr.f32.mxu0 %v18913_v57  ;;  %v571_v3 = vand.u32 4294901760, %v570_v34  ;;  %v579_v11 = vand.u32 4294901760, %v578_v46 }
 0x165   :  { %14188 = vmatprep.mubr.f32.mxu1 %v561_v49  ;;  %v589_v50 = vand.u32 4294901760, %v588_v31 }
 0x166   :  { %v580_v16 = vsub.f32 %v578_v46, %v579_v11 }
 0x167   :  { %14235 = vmatmul.mubr.f32.vlgmr.msra.gmra.mrb[0].mxu0 %v18933_v20  ;;  %v590_v37 = vsub.f32 %v588_v31, %v589_v50 }
 0x168   :  { %14189 = vmatmul.mubr.f32.gmra.mrb[12].mxu1 %v571_v3  ;;  %v581_v12 = vand.u32 4294901760, %v580_v16  ;;  %14237 = vmatprep.mubr.f32.mxu0 %v18951_v10 }
 0x169   :  { %16493 = vmatpush3.bf16.msra.mxu0 %v18869_v26  ;;  %v591_v60 = vand.u32 4294901760, %v590_v37 }
 0x16a   :  { %14191 = vmatprep.mubr.f32.mxu1 %v581_v12  ;;  %16495 = vmatprep.subr.bf16.mxu0 %v18873_v27 }
 0x16b   :  { %14238 = vmatmul.mubr.f32.gmra.mrb[2].mxu0 %v18961_v29 }
 0x16c   :  { %14192 = vmatmul.mubr.f32.gmra.mrb[14].mxu1 %v591_v60  ;;  %14240 = vmatprep.mubr.f32.mxu0 %v18976_v15 }
 0x16d   :  { %16497 = vmatpush3.bf16.msra.mxu0 %v18873_v27 }
 0x16e   :  { %16499 = vmatprep.subr.bf16.mxu0 %v16498_v7 }
 0x16f   :  { %14241 = vmatmul.mubr.f32.gmra.mrb[4].mxu0 %v18980_v19 }
 0x170   :  { %14243 = vmatprep.mubr.f32.mxu0 %v19003_v25 }
 0x173   :  { %14244 = vmatmul.mubr.f32.gmra.mrb[6].mxu0 %v19019_v13 }
 0x174   :  { %14246 = vmatprep.mubr.f32.mxu0 %v19025_v18 }
 0x177   :  { %14247 = vmatmul.mubr.f32.gmra.mrb[8].mxu0 %v19043_v42 }
 0x178   :  { %14249 = vmatprep.mubr.f32.mxu0 %v19055_v52 }
 0x17b   :  { %14250 = vmatmul.mubr.f32.gmra.mrb[10].mxu0 %v19072_v0 }
 0x17c   :  { %14252 = vmatprep.mubr.f32.mxu0 %v19082_v35 }
 0x17f   :  { %14253 = vmatmul.mubr.f32.gmra.mrb[12].mxu0 %v19089_v56 }
 0x180   :  { %14255 = vmatprep.mubr.f32.mxu0 %v578_v46 }
 0x183   :  { %14256 = vmatmul.mubr.f32.gmra.mrb[14].mxu0 %v588_v31 }
 0x184   :  { %14266 = vmatprep.mubr.f32.mxu0 %v439_v14 }
 0x187   :  { %14267 = vmatmul.mubr.f32.vlgmr.msra.gmra.mrb[0].mxu0 %v449_v1 }
 0x188   :  { %14269 = vmatprep.mubr.f32.mxu0 %v459_v62  ;;  %16501 = vmatpush3.bf16.msra.mxu0 %v16498_v7 }
 0x189   :  { %16503 = vmatprep.subr.bf16.mxu0 %v16502_v58 }
 0x18b   :  { %14270 = vmatmul.mubr.f32.gmra.mrb[2].mxu0 %v469_v6 }
 0x18c   :  { %14272 = vmatprep.mubr.f32.mxu0 %v479_v39  ;;  %16505 = vmatpush3.bf16.msra.mxu0 %v16502_v58 }
 0x18d   :  { %16507 = vmatprep.subr.bf16.mxu0 %v18869_v26 }
 0x18f   :  { %14273 = vmatmul.mubr.f32.gmra.mrb[4].mxu0 %v489_v41 }
 0x190   :  { %14275 = vmatprep.mubr.f32.mxu0 %v499_v21 }
 0x193   :  { %14276 = vmatmul.mubr.f32.gmra.mrb[6].mxu0 %v509_v55 }
 0x194   :  { %14278 = vmatprep.mubr.f32.mxu0 %v519_v17 }
 0x197   :  { %14279 = vmatmul.mubr.f32.gmra.mrb[8].mxu0 %v24548_v28 }
 0x198   :  { %14281 = vmatprep.mubr.f32.mxu0 %v539_v48 }
 0x19b   :  { %14282 = vmatmul.mubr.f32.gmra.mrb[10].mxu0 %v24549_v63 }
 0x19c   :  { %14284 = vmatprep.mubr.f32.mxu0 %v24550_v2 }
 0x19f   :  { %14285 = vmatmul.mubr.f32.gmra.mrb[12].mxu0 %v569_v59 }
 0x1a0   :  { %14287 = vmatprep.mubr.f32.mxu0 %v579_v11 }
 0x1a3   :  { %14288 = vmatmul.mubr.f32.gmra.mrb[14].mxu0 %v589_v50 }
 0x1a4   :  { %14298 = vmatprep.mubr.f32.mxu0 %v18903_v43 }
 0x1a7   :  { %14299 = vmatmul.mubr.f32.vlgmr.msra.gmra.mrb[0].mxu0 %v18915_v61 }
 0x1a8   :  { %14301 = vmatprep.mubr.f32.mxu0 %v18924_v36  ;;  %16509 = vmatpush3.bf16.msra.mxu0 %v18869_v26 }
 0x1a9   :  { %16511 = vmatprep.subr.bf16.mxu0 %v18873_v27 }
 0x1ab   :  { %14302 = vmatmul.mubr.f32.gmra.mrb[2].mxu0 %v18941_v24 }
 0x1ac   :  { %14304 = vmatprep.mubr.f32.mxu0 %v18948_v51  ;;  %16513 = vmatpush3.bf16.msra.mxu0 %v18873_v27 }
 0x1af   :  { %14305 = vmatmul.mubr.f32.gmra.mrb[4].mxu0 %v18965_v54 }
 0x1b0   :  { %14307 = vmatprep.mubr.f32.mxu0 %v18989_v38 }
 0x1b3   :  { %14308 = vmatmul.mubr.f32.gmra.mrb[6].mxu0 %v18996_v44 }
 0x1b4   :  { %14310 = vmatprep.mubr.f32.mxu0 %v19013_v45 }
 0x1b7   :  { %14311 = vmatmul.mubr.f32.gmra.mrb[8].mxu0 %v19029_v32 }
 0x1b8   :  { %14313 = vmatprep.mubr.f32.mxu0 %v19035_v30 }
 0x1bb   :  { %14314 = vmatmul.mubr.f32.gmra.mrb[10].mxu0 %v19057_v53 }
 0x1bc   :  { %14316 = vmatprep.mubr.f32.mxu0 %v19062_v23 }
 0x1bf   :  { %14317 = vmatmul.mubr.f32.gmra.mrb[12].mxu0 %v19075_v40 }
 0x1c0   :  { %14319 = vmatprep.mubr.f32.mxu0 %v19096_v47 }
 0x1c3   :  { %14320 = vmatmul.mubr.f32.gmra.mrb[14].mxu0 %v19103_v33 }
 0x1c4   :  { %14330 = vmatprep.mubr.f32.mxu0 %v18903_v43 }
 0x1c7   :  { %14331 = vmatmul.mubr.f32.vlgmr.msra.gmra.mrb[0].mxu0 %v18915_v61 }
 0x1c8   :  { %14333 = vmatprep.mubr.f32.mxu0 %v18924_v36 }
 0x1cb   :  { %14334 = vmatmul.mubr.f32.gmra.mrb[2].mxu0 %v18941_v24 }
 0x1cc   :  { %14336 = vmatprep.mubr.f32.mxu0 %v18948_v51 }
 0x1cf   :  { %14337 = vmatmul.mubr.f32.gmra.mrb[4].mxu0 %v18965_v54 }
 0x1d0   :  { %14339 = vmatprep.mubr.f32.mxu0 %v18989_v38 }
 0x1d3   :  { %14340 = vmatmul.mubr.f32.gmra.mrb[6].mxu0 %v18996_v44 }
 0x1d4   :  { %14342 = vmatprep.mubr.f32.mxu0 %v19013_v45 }
 0x1d7   :  { %14343 = vmatmul.mubr.f32.gmra.mrb[8].mxu0 %v19029_v32 }
 0x1d8   :  { %14345 = vmatprep.mubr.f32.mxu0 %v19035_v30 }
 0x1db   :  { %14346 = vmatmul.mubr.f32.gmra.mrb[10].mxu0 %v19057_v53 }
 0x1dc   :  { %14348 = vmatprep.mubr.f32.mxu0 %v19062_v23 }
 0x1df   :  { %14349 = vmatmul.mubr.f32.gmra.mrb[12].mxu0 %v19075_v40 }
 0x1e0   :  { %14351 = vmatprep.mubr.f32.mxu0 %v19096_v47 }
 0x1e3   :  { %14352 = vmatmul.mubr.f32.gmra.mrb[14].mxu0 %v19103_v33 }
 0x220   :  { %v14172_v4 = vpop.f32.mrb[0].mxu1 }
 0x221   :  { %v443_v5 = vpop.f32.mrb[1].mxu1 }
 0x224   :  { %v14175_v8 = vpop.f32.mrb[2].mxu1 }
 0x225   :  { %v463_v9 = vpop.f32.mrb[3].mxu1 }
 0x228   :  { %v14178_v26 = vpop.f32.mrb[4].mxu1 }
 0x229   :  { %v483_v27 = vpop.f32.mrb[5].mxu1 }
 0x22f   :  { %v14181_v43 = vpop.f32.mrb[6].mxu1 }
 0x230   :  { %v503_v57 = vpop.f32.mrb[7].mxu1 }
 0x233   :  { %v14184_v61 = vpop.f32.mrb[8].mxu1 }
 0x234   :  { %v523_v14 = vpop.f32.mrb[9].mxu1 }
 0x237   :  { %v14187_v36 = vpop.f32.mrb[10].mxu1 }
 0x238   :  { %v543_v20 = vpop.f32.mrb[11].mxu1 }
 0x23b   :  { %v14190_v24 = vpop.f32.mrb[12].mxu1 }
 0x23c   :  { %v563_v1 = vpop.f32.mrb[13].mxu1 }
 0x23f   :  { %v14193_v51 = vpop.f32.mrb[14].mxu1 }
 0x240   :  { %v583_v10 = vpop.f32.mrb[15].mxu1 }
 0x29a   :  { %v14332_v29 = vpop.f32.mrb[0].mxu0 }
 0x29b   :  { %v19197_v54 = vadd.f32 %v14332_v29, %v14172_v4  ;;  %v1404_v62 = vpop.f32.mrb[1].mxu0 }
 0x29c   :  { %v19199_v6 = vadd.f32 %v1404_v62, %v443_v5 }
 0x29d   :  { %24551 = vst [vmem:[#allocation2_spill] sm:$0xff] %v19197_v54  ;;  %1536 = vrot.lane.b32.xlu1 %v19197_v54, %s18573_s2 }
 0x29e   :  { %24552 = vst [vmem:[#allocation3_spill] sm:$0xff] %v19199_v6  ;;  %v14335_v15 = vpop.f32.mrb[2].mxu0  ;;  %1534 = vrot.lane.b32.xlu0 %v19199_v6, %s18573_s2  ;;  %v1567_v19 = vsel %vm1566_vm1, %v19199_v6, 0 }
 0x29f   :  { %v19207_v38 = vadd.f32 %v14335_v15, %v14175_v8  ;;  %v1416_v39 = vpop.f32.mrb[3].mxu0  ;;  %v19209_v41 = vand.u32 4294901760, %v1567_v19 }
 0x2a0   :  { %v19211_v44 = vadd.f32 %v1416_v39, %v463_v9 }
 0x2a1   :  { %24553 = vst [vmem:[#allocation4_spill] sm:$0xff] %v19207_v38  ;;  %v19214_v25 = vsub.f32 %v1567_v19, %v19209_v41 }
 0x2a2   :  { %24554 = vst [vmem:[#allocation5_spill] sm:$0xff] %v19211_v44  ;;  %v14338_v45 = vpop.f32.mrb[4].mxu0  ;;  %1538 = vrot.lane.b32.xlu1 %v19211_v44, %s18573_s2 }
 0x2a3   :  { %24555 = vst [vmem:[#allocation6_spill] sm:$0xff] %v19214_v25  ;;  %v19218_v21 = vadd.f32 %v14338_v45, %v14178_v26  ;;  %v1428_v13 = vpop.f32.mrb[5].mxu0  ;;  %v24167_v18 = vand.u32 4294901760, %v19214_v25 }
 0x2a4   :  { %v19221_v32 = vadd.f32 %v1428_v13, %v483_v27 }
 0x2a5   :  { %24556 = vst [vmem:[#allocation7_spill] sm:$0xff] %v19218_v21  ;;  %v1715_v30 = vsub.f32 %v19214_v25, %v24167_v18  ;;  %v1571_v18 = vsel %vm1566_vm1, %v19211_v44, 0 }
 0x2a6   :  { %24557 = vst [vmem:[#allocation8_spill] sm:$0xff] %v19221_v32  ;;  %v14341_v55 = vpop.f32.mrb[6].mxu0  ;;  %1540 = vrot.lane.b32.xlu1 %v19207_v38, %s18573_s2  ;;  %1542 = vrot.lane.b32.xlu0 %v19221_v32, %s18573_s2 }
 0x2a7   :  { %v19230_v17 = vadd.f32 %v14341_v55, %v14181_v43  ;;  %v1440_v42 = vpop.f32.mrb[7].mxu0  ;;  %v1716_v52 = vand.u32 4294901760, %v1715_v30 }
 0x2a8   :  { %v19232_v53 = vadd.f32 %v1440_v42, %v503_v57 }
 0x2a9   :  { %24558 = vst [vmem:[#allocation9_spill] sm:$0xff] %v19230_v17  ;;  %14386 = vmatprep.mubr.f32.mxu1 %v1716_v52 }
 0x2aa   :  { %24559 = vst [vmem:[#allocation10_spill] sm:$0xff] %v19232_v53  ;;  %v14344_v56 = vpop.f32.mrb[8].mxu0  ;;  %1544 = vrot.lane.b32.xlu1 %v19218_v21, %s18573_s2  ;;  %1546 = vrot.lane.b32.xlu0 %v19232_v53, %s18573_s2 }
 0x2ab   :  { %v19238_v23 = vadd.f32 %v14344_v56, %v14184_v61  ;;  %v1452_v48 = vpop.f32.mrb[9].mxu0 }
 0x2ac   :  { %v19240_v0 = vadd.f32 %v1452_v48, %v523_v14 }
 0x2ae   :  { %v14347_v40 = vpop.f32.mrb[10].mxu0  ;;  %1548 = vrot.lane.b32.xlu1 %v19230_v17, %s18573_s2  ;;  %1550 = vrot.lane.b32.xlu0 %v19240_v0, %s18573_s2 }
 0x2af   :  { %v19246_v35 = vadd.f32 %v14347_v40, %v14187_v36  ;;  %v1464_v37 = vpop.f32.mrb[11].mxu0 }
 0x2b0   :  { %v19248_v11 = vadd.f32 %v1464_v37, %v543_v20 }
 0x2b2   :  { %v14350_v47 = vpop.f32.mrb[12].mxu0  ;;  %1552 = vrot.lane.b32.xlu1 %v19238_v23, %s18573_s2  ;;  %1554 = vrot.lane.b32.xlu0 %v19248_v11, %s18573_s2 }
 0x2b3   :  { %v19254_v59 = vadd.f32 %v14350_v47, %v14190_v24  ;;  %v1476_v22 = vpop.f32.mrb[13].mxu0 }
 0x2b4   :  { %v19256_v33 = vadd.f32 %v1476_v22, %v563_v1 }
 0x2b5   :  { %24560 = vst [vmem:[#allocation11_spill] sm:$0xff] %v19254_v59 }
 0x2b6   :  { %24561 = vst [vmem:[#allocation12_spill] sm:$0xff] %v19256_v33  ;;  %v14353_v49 = vpop.f32.mrb[14].mxu0  ;;  %1556 = vrot.lane.b32.xlu1 %v19246_v35, %s18573_s2  ;;  %1558 = vrot.lane.b32.xlu0 %v19256_v33, %s18573_s2 }
 0x2b7   :  { %v19262_v34 = vadd.f32 %v14353_v49, %v14193_v51  ;;  %v1488_v46 = vpop.f32.mrb[15].mxu0 }
 0x2b8   :  { %v19264_v31 = vadd.f32 %v1488_v46, %v583_v10 }
 0x2b9   :  { %24562 = vst [vmem:[#allocation13_spill] sm:$0xff] %v19262_v34 }
 0x2ba   :  { %24563 = vst [vmem:[#allocation14_spill] sm:$0xff] %v19264_v31  ;;  %1560 = vrot.lane.b32.xlu1 %v19254_v59, %s18573_s2  ;;  %1562 = vrot.lane.b32.xlu0 %v19264_v31, %s18573_s2 }
 0x2be   :  { %1564 = vrot.lane.b32.xlu1 %v19262_v34, %s18573_s2  ;;  %3061 = vrot.lane.b32.xlu0 %v19199_v6, %s18574_s3 }
 0x2c2   :  { %3063 = vrot.lane.b32.xlu1 %v19197_v54, %s18574_s3  ;;  %3065 = vrot.lane.b32.xlu0 %v19211_v44, %s18574_s3 }
 0x2c6   :  { %3067 = vrot.lane.b32.xlu1 %v19207_v38, %s18574_s3  ;;  %3069 = vrot.lane.b32.xlu0 %v19221_v32, %s18574_s3 }
 0x2ca   :  { %3071 = vrot.lane.b32.xlu1 %v19218_v21, %s18574_s3  ;;  %3073 = vrot.lane.b32.xlu0 %v19232_v53, %s18574_s3 }
 0x2ce   :  { %3075 = vrot.lane.b32.xlu1 %v19230_v17, %s18574_s3  ;;  %3077 = vrot.lane.b32.xlu0 %v19240_v0, %s18574_s3 }
 0x2d2   :  { %3079 = vrot.lane.b32.xlu1 %v19238_v23, %s18574_s3  ;;  %3081 = vrot.lane.b32.xlu0 %v19248_v11, %s18574_s3 }
 0x2d6   :  { %3083 = vrot.lane.b32.xlu1 %v19246_v35, %s18574_s3 }
 0x30f   :  { %v1537_v3 = vpop.permute.xlu1 %1536 }
 0x310   :  { %v1601_v50 = vsel %vm1566_vm1, %v1537_v3, 0  ;;  %v1535_v16 = vpop.permute.xlu0 %1534 }
 0x311   :  { %v1635_v12 = vand.u32 4294901760, %v1601_v50  ;;  %v1599_v60 = vsel %vm1566_vm1, %v1535_v16, 0 }
 0x312   :  { %v1632_v7 = vand.u32 4294901760, %v1599_v60 }
 0x313   :  { %v19298_v58 = vsub.f32 %v1601_v50, %v1635_v12 }
 0x314   :  { %v19300_v28 = vpack.c.bf16 %v1635_v12, %v1632_v7  ;;  %v19302_v63 = vsub.f32 %v1599_v60, %v1632_v7  ;;  %v1539_v2 = vpop.permute.xlu1 %1538 }
 0x315   :  { %v24175_v4 = vand.u32 4294901760, %v19298_v58  ;;  %v1603_v5 = vsel %vm1566_vm1, %v1539_v2, 0 }
 0x316   :  { %24564 = vst [vmem:[#allocation15_spill] sm:$0xff] %v19300_v28  ;;  %v24174_v8 = vand.u32 4294901760, %v19302_v63  ;;  %16515 = vmatprep.subr.bf16.mxu1 %v19300_v28  ;;  %v19310_v9 = vpack.c.bf16 %v19298_v58, %v19302_v63  ;;  %v1638_v26 = vand.u32 4294901760, %v1603_v5 }
 0x317   :  { %16517 = vmatpush3.bf16.xpose.msra.mxu1 %v19300_v28 }
 0x318   :  { %24565 = vst [vmem:[#allocation16_spill] sm:$0xff] %v19310_v9  ;;  %v1541_v27 = vpop.permute.xlu1 %1540  ;;  %v1543_v43 = vpop.permute.xlu0 %1542  ;;  %v19317_v57 = vpack.c.bf16 %v24175_v4, %v24174_v8  ;;  %v19321_v20 = vsub.f32 %v1603_v5, %v1638_v26  ;;  %v19447_v8 = vand.u32 4294901760, %v1571_v18 }
 0x319   :  { %v1605_v61 = vsel %vm1566_vm1, %v1541_v27, 0  ;;  %v1607_v36 = vsel %vm1566_vm1, %v1543_v43, 0 }
 0x31a   :  { %24566 = vst [vmem:[#allocation17_spill] sm:$0xff] %v19317_v57  ;;  %v1641_v14 = vand.u32 4294901760, %v1605_v61  ;;  %v1644_v29 = vand.u32 4294901760, %v1607_v36  ;;  %v24170_v45 = vand.u32 4294901760, %v19321_v20  ;;  %24582 = vst [vmem:[#allocation33_spill] sm:$0xff] %v19447_v8 }
 0x31c   :  { %v19323_v24 = vpack.c.bf16 %v1641_v14, %v1638_v26  ;;  %v19325_v1 = vsub.f32 %v1605_v61, %v1641_v14  ;;  %v1545_v51 = vpop.permute.xlu1 %1544  ;;  %v1547_v10 = vpop.permute.xlu0 %1546  ;;  %v19341_v48 = vsub.f32 %v1607_v36, %v1644_v29 }
 0x31d   :  { %v1609_v62 = vsel %vm1566_vm1, %v1545_v51, 0  ;;  %v1611_v15 = vsel %vm1566_vm1, %v1547_v10, 0 }
 0x31e   :  { %24567 = vst [vmem:[#allocation18_spill] sm:$0xff] %v19323_v24  ;;  %v24171_v19 = vand.u32 4294901760, %v19325_v1  ;;  %v1647_v39 = vand.u32 4294901760, %v1609_v62  ;;  %16519 = vmatprep.subr.bf16.mxu1 %v19323_v24  ;;  %v19335_v13 = vpack.c.bf16 %v19325_v1, %v19321_v20  ;;  %v1650_v42 = vand.u32 4294901760, %v1611_v15 }
 0x31f   :  { %16521 = vmatpush3.bf16.xpose.msra.mxu1 %v19323_v24  ;;  %v24168_v60 = vand.u32 4294901760, %v19341_v48 }
 0x320   :  { %24568 = vst [vmem:[#allocation19_spill] sm:$0xff] %v19335_v13  ;;  %v19337_v30 = vpack.c.bf16 %v1647_v39, %v1644_v29  ;;  %v19339_v55 = vsub.f32 %v1609_v62, %v1647_v39  ;;  %v1549_v52 = vpop.permute.xlu1 %1548  ;;  %v1551_v56 = vpop.permute.xlu0 %1550  ;;  %v19348_v37 = vpack.c.bf16 %v24171_v19, %v24170_v45  ;;  %v19357_v3 = vsub.f32 %v1611_v15, %v1650_v42 }
 0x321   :  { %v1613_v40 = vsel %vm1566_vm1, %v1549_v52, 0  ;;  %v1615_v22 = vsel %vm1566_vm1, %v1551_v56, 0  ;;  %v1569_v62 = vsel %vm1566_vm1, %v19197_v54, 0 }
 0x322   :  { %24569 = vst [vmem:[#allocation20_spill] sm:$0xff] %v19337_v30  ;;  %24570 = vst [vmem:[#allocation21_spill] sm:$0xff] %v19348_v37  ;;  %v1653_v47 = vand.u32 4294901760, %v1613_v40  ;;  %16523 = vmatprep.subr.bf16.mxu1 %v19337_v30  ;;  %v24169_v49 = vand.u32 4294901760, %v19339_v55  ;;  %v19355_v46 = vpack.c.bf16 %v19339_v55, %v19341_v48  ;;  %v1656_v7 = vand.u32 4294901760, %v1615_v22 }
 0x323   :  { %v24172_v36 = vand.u32 4294901760, %v19357_v3 }
 0x324   :  { %24571 = vst [vmem:[#allocation22_spill] sm:$0xff] %v19355_v46  ;;  %v19359_v50 = vsub.f32 %v1613_v40, %v1653_v47  ;;  %v1553_v16 = vpop.permute.xlu1 %1552  ;;  %v1555_v12 = vpop.permute.xlu0 %1554  ;;  %v19363_v5 = vpack.c.bf16 %v1653_v47, %v1650_v42  ;;  %v19376_v14 = vpack.c.bf16 %v24169_v49, %v24168_v60  ;;  %v19384_v15 = vsub.f32 %v1615_v22, %v1656_v7 }
 0x325   :  { %v1617_v2 = vsel %vm1566_vm1, %v1553_v16, 0  ;;  %v1619_v27 = vsel %vm1566_vm1, %v1555_v12, 0  ;;  %v19391_v47 = vand.u32 4294901760, %v1569_v62 }
 0x326   :  { %24572 = vst [vmem:[#allocation23_spill] sm:$0xff] %v19363_v5  ;;  %v1659_v26 = vand.u32 4294901760, %v1617_v2  ;;  %v24173_v43 = vand.u32 4294901760, %v19359_v50  ;;  %v19370_v61 = vpack.c.bf16 %v19359_v50, %v19357_v3  ;;  %24574 = vst [vmem:[#allocation25_spill] sm:$0xff] %v19376_v14  ;;  %v1662_v39 = vand.u32 4294901760, %v1619_v27 }
 0x327   :  { %16525 = vmatpush3.bf16.xpose.msra.mxu1 %v19337_v30  ;;  %24575 = vst [vmem:[#allocation26_spill] sm:$0xff] %v19391_v47  ;;  %v24176_v60 = vand.u32 4294901760, %v19384_v15  ;;  %v19424_v4 = vsub.f32 %v1569_v62, %v19391_v47 }
 0x328   :  { %24573 = vst [vmem:[#allocation24_spill] sm:$0xff] %v19370_v61  ;;  %v19379_v51 = vsub.f32 %v1617_v2, %v1659_v26  ;;  %v1557_v10 = vpop.permute.xlu1 %1556  ;;  %16527 = vmatprep.subr.bf16.mxu1 %v19363_v5  ;;  %v1559_v29 = vpop.permute.xlu0 %1558  ;;  %v19401_v22 = vpack.c.bf16 %v24173_v43, %v24172_v36  ;;  %v19409_v49 = vsub.f32 %v1619_v27, %v1662_v39 }
 0x329   :  { %v1621_v42 = vsel %vm1566_vm1, %v1557_v10, 0  ;;  %v19388_v52 = vsel %vm1566_vm1, %v1559_v29, 0  ;;  %v19417_v36 = vpack.c.bf16 %v1659_v26, %v1656_v7  ;;  %24579 = vst [vmem:[#allocation30_spill] sm:$0xff] %v19424_v4 }
 0x32a   :  { %v1665_v56 = vand.u32 4294901760, %v1621_v42  ;;  %v24177_v40 = vand.u32 4294901760, %v19379_v51  ;;  %v19395_v16 = vpack.c.bf16 %v19379_v51, %v19384_v15  ;;  %24577 = vst [vmem:[#allocation28_spill] sm:$0xff] %v19401_v22  ;;  %v24178_v2 = vand.u32 4294901760, %v19388_v52 }
 0x32b   :  { %24578 = vst [vmem:[#allocation29_spill] sm:$0xff] %v19417_v36  ;;  %v24199_v43 = vand.u32 4294901760, %v19409_v49  ;;  %v19480_v22 = vsub.f32 %v1571_v18, %v19447_v8  ;;  %v24601_v61 = vand.u32 4294901760, %v19388_v52 }
 0x32c   :  { %24576 = vst [vmem:[#allocation27_spill] sm:$0xff] %v19395_v16  ;;  %v19403_v12 = vsub.f32 %v1621_v42, %v1665_v56  ;;  %v1561_v10 = vpop.permute.xlu1 %1560  ;;  %v1563_v29 = vpop.permute.xlu0 %1562  ;;  %v19434_v7 = vpack.c.bf16 %v24177_v40, %v24176_v60  ;;  %v19439_v26 = vsub.f32 %v19388_v52, %v24178_v2  ;;  %v1573_v2 = vsel %vm1566_vm1, %v19207_v38, 0 }
 0x32d   :  { %v19412_v45 = vsel %vm1566_vm1, %v1561_v10, 0  ;;  %v19415_v19 = vsel %vm1566_vm1, %v1563_v29, 0  ;;  %v19482_v57 = vand.u32 4294901760, %v1573_v2 }
 0x32e   :  { %v24181_v42 = vand.u32 4294901760, %v19412_v45  ;;  %v19428_v27 = vpack.c.bf16 %v19403_v12, %v19409_v49  ;;  %24581 = vst [vmem:[#allocation32_spill] sm:$0xff] %v19434_v7  ;;  %v24586_v38 = vand.u32 4294901760, %v19403_v12  ;;  %v24602_v46 = vand.u32 4294901760, %v19412_v45 }
 0x32f   :  { %16529 = vmatpush3.bf16.xpose.msra.mxu1 %v19363_v5  ;;  %24588 = vst [vmem:[#allocation37_spill] sm:$0xff] %v19482_v57  ;;  %v19484_v5 = vpack.c.bf16 %v1665_v56, %v1662_v39 }
 0x330   :  { %24580 = vst [vmem:[#allocation31_spill] sm:$0xff] %v19428_v27  ;;  %v19444_v62 = vsub.f32 %v19412_v45, %v24181_v42  ;;  %16531 = vmatprep.subr.bf16.mxu1 %v19417_v36  ;;  %v1565_v10 = vpop.permute.xlu1 %1564  ;;  %v3062_v29 = vpop.permute.xlu0 %3061  ;;  %v24583_v42 = vand.u32 4294901760, %v19415_v19  ;;  %v19471_v14 = vpack.c.bf16 %v24586_v38, %v24199_v43  ;;  %v19503_v43 = vsel %vm1566_vm1, %v19218_v21, 0 }
 0x331   :  { %v19451_v60 = vsel %vm1566_vm1, %v1565_v10, 0  ;;  %v3110_v40 = vand.u32 4294901760, %v3062_v29  ;;  %24589 = vst [vmem:[#allocation38_spill] sm:$0xff] %v19484_v5  ;;  %v24595_v27 = vand.u32 4294901760, %v19424_v4 }
 0x332   :  { %v19459_v44 = vsub.f32 %v19415_v19, %v24583_v42  ;;  %v24200_v6 = vand.u32 4294901760, %v19451_v60  ;;  %v19465_v10 = vpack.c.bf16 %v19444_v62, %v19439_v26  ;;  %24587 = vst [vmem:[#allocation36_spill] sm:$0xff] %v19471_v14  ;;  %v24591_v14 = vand.u32 4294901760, %v19439_v26 }
 0x333   :  { %v3352_v7 = vsub.f32 %v3062_v29, %v3110_v40  ;;  %v24592_v18 = vand.u32 4294901760, %v19444_v62  ;;  %v19509_v25 = vsub.f32 %v19424_v4, %v24595_v27 }
 0x334   :  { %24584 = vst [vmem:[#allocation34_spill] sm:$0xff] %v19459_v44  ;;  %24585 = vst [vmem:[#allocation35_spill] sm:$0xff] %v19465_v10  ;;  %v19477_v42 = vsub.f32 %v19451_v60, %v24200_v6  ;;  %v3064_v29 = vpop.permute.xlu1 %3063  ;;  %v3066_v37 = vpop.permute.xlu0 %3065 }
 0x335   :  { %v3353_v30 = vand.u32 4294901760, %v3352_v7  ;;  %v3113_v24 = vand.u32 4294901760, %v3064_v29  ;;  %v3116_v38 = vand.u32 4294901760, %v3066_v37  ;;  %v19496_v28 = vpack.c.bf16 %v24592_v18, %v24591_v14 }
 0x336   :  { %v19490_v6 = vpack.c.bf16 %v19477_v42, %v19459_v44  ;;  %v19512_v14 = vsub.f32 %v1573_v2, %v19482_v57  ;;  %v19538_v57 = vpack.c.bf16 %v24602_v46, %v24601_v61 }
 0x337   :  { %24593 = vst [vmem:[#allocation40_spill] sm:$0xff] %v19496_v28  ;;  %v19498_v10 = vpack.c.bf16 %v3113_v24, %v3110_v40  ;;  %v3359_v39 = vsub.f32 %v3064_v29, %v3113_v24  ;;  %v3366_v56 = vsub.f32 %v3066_v37, %v3116_v38  ;;  %16533 = vmatpush3.bf16.xpose.msra.mxu1 %v19417_v36  ;;  %v19516_v24 = vsel %vm1566_vm1, %v19221_v32, 0 }
 0x338   :  { %24590 = vst [vmem:[#allocation39_spill] sm:$0xff] %v19490_v6  ;;  %16535 = vmatprep.subr.bf16.mxu1 %v19484_v5  ;;  %v3068_v54 = vpop.permute.xlu1 %3067  ;;  %v3070_v6 = vpop.permute.xlu0 %3069  ;;  %v24596_v37 = vand.u32 4294901760, %v19459_v44  ;;  %v24597_v40 = vand.u32 4294901760, %v19477_v42  ;;  %v3354_v27 = vsub.f32 %v3352_v7, %v3353_v30  ;;  %v19528_v32 = vand.u32 4294901760, %v19503_v43 }
 0x339   :  { %24594 = vst [vmem:[#allocation41_spill] sm:$0xff] %v19498_v10  ;;  %v3360_v18 = vand.u32 4294901760, %v3359_v39  ;;  %v3119_v21 = vand.u32 4294901760, %v3068_v54  ;;  %v3122_v28 = vand.u32 4294901760, %v3070_v6  ;;  %16707 = vmatprep.subr.bf16.mxu0 %v19498_v10  ;;  %v3367_v36 = vand.u32 4294901760, %v3366_v56 }
 0x33a   :  { %v19522_v29 = vpack.c.bf16 %v24597_v40, %v24596_v37  ;;  %16709 = vmatpush3.bf16.msra.mxu0 %v19498_v10  ;;  %v19530_v4 = vpack.c.bf16 %v3359_v39, %v3352_v7  ;;  %v19541_v2 = vand.u32 4294901760, %v19516_v24  ;;  %v19545_v7 = vsel %vm1566_vm1, %v19230_v17, 0 }
 0x33b   :  { %v19532_v16 = vpack.c.bf16 %v3119_v21, %v3116_v38  ;;  %v3373_v37 = vsub.f32 %v3068_v54, %v3119_v21  ;;  %v3380_v40 = vsub.f32 %v3070_v6, %v3122_v28  ;;  %v19547_v38 = vpack.c.bf16 %v3360_v18, %v3353_v30 }
 0x33c   :  { %24598 = vst [vmem:[#allocation42_spill] sm:$0xff] %v19522_v29  ;;  %24599 = vst [vmem:[#allocation43_spill] sm:$0xff] %v19530_v4  ;;  %v3361_v29 = vsub.f32 %v3359_v39, %v3360_v18  ;;  %v3072_v13 = vpop.permute.xlu1 %3071  ;;  %v3074_v10 = vpop.permute.xlu0 %3073  ;;  %v3355_v52 = vand.u32 4294901760, %v3354_v27  ;;  %v3368_v61 = vsub.f32 %v3366_v56, %v3367_v36  ;;  %v24606_v27 = vand.u32 4294901760, %v19298_v58 }
 0x33d   :  { %24600 = vst [vmem:[#allocation44_spill] sm:$0xff] %v19532_v16  ;;  %24603 = vst [vmem:[#allocation45_spill] sm:$0xff] %v19547_v38  ;;  %v3374_v54 = vand.u32 4294901760, %v3373_v37  ;;  %v3125_v6 = vand.u32 4294901760, %v3072_v13  ;;  %v3128_v21 = vand.u32 4294901760, %v3074_v10  ;;  %16711 = vmatprep.subr.bf16.mxu0 %v19532_v16  ;;  %v3381_v45 = vand.u32 4294901760, %v3380_v40 }
 0x33e   :  { %16713 = vmatpush3.bf16.msra.mxu0 %v19532_v16  ;;  %v3362_v46 = vand.u32 4294901760, %v3361_v29  ;;  %v19551_v39 = vpack.c.bf16 %v3373_v37, %v3366_v56  ;;  %v19560_v47 = vsub.f32 %v19298_v58, %v24606_v27  ;;  %v19564_v56 = vsel %vm1566_vm1, %v19232_v53, 0 }
 0x33f   :  { %v19553_v4 = vpack.c.bf16 %v3125_v6, %v3122_v28  ;;  %v3387_v8 = vsub.f32 %v3072_v13, %v3125_v6  ;;  %v3394_v17 = vsub.f32 %v3074_v10, %v3128_v21  ;;  %16537 = vmatpush3.bf16.xpose.msra.mxu1 %v19484_v5  ;;  %v3375_v30 = vsub.f32 %v3373_v37, %v3374_v54 }
 0x340   :  { %24604 = vst [vmem:[#allocation46_spill] sm:$0xff] %v19551_v39  ;;  %16539 = vmatprep.subr.bf16.mxu1 %v19538_v57  ;;  %v3076_v18 = vpop.permute.xlu1 %3075  ;;  %v3078_v38 = vpop.permute.xlu0 %3077  ;;  %v19566_v28 = vpack.c.bf16 %v3362_v46, %v3355_v52  ;;  %v19568_v13 = vpack.c.bf16 %v3374_v54, %v3367_v36  ;;  %v3369_v16 = vand.u32 4294901760, %v3368_v61  ;;  %v3382_v58 = vsub.f32 %v3380_v40, %v3381_v45 }
 0x341   :  { %24605 = vst [vmem:[#allocation47_spill] sm:$0xff] %v19553_v4  ;;  %v3388_v10 = vand.u32 4294901760, %v3387_v8  ;;  %v3395_v29 = vand.u32 4294901760, %v3394_v17  ;;  %v3131_v37 = vand.u32 4294901760, %v3076_v18  ;;  %v3134_v6 = vand.u32 4294901760, %v3078_v38  ;;  %16715 = vmatprep.subr.bf16.mxu0 %v19553_v4 }
 0x342   :  { %24607 = vst [vmem:[#allocation48_spill] sm:$0xff] %v19566_v28  ;;  %24608 = vst [vmem:[#allocation49_spill] sm:$0xff] %v19568_v13  ;;  %16717 = vmatpush3.bf16.msra.mxu0 %v19553_v4  ;;  %v3376_v39 = vand.u32 4294901760, %v3375_v30  ;;  %v19572_v27 = vpack.c.bf16 %v3387_v8, %v3380_v40  ;;  %v24611_v13 = vand.u32 4294901760, %v19302_v63 }
 0x343   :  { %v19574_v5 = vpack.c.bf16 %v3131_v37, %v3128_v21  ;;  %v3401_v53 = vsub.f32 %v3076_v18, %v3131_v37  ;;  %v3408_v52 = vsub.f32 %v3078_v38, %v3134_v6  ;;  %v3389_v46 = vsub.f32 %v3387_v8, %v3388_v10 }
 0x344   :  { %24609 = vst [vmem:[#allocation50_spill] sm:$0xff] %v19572_v27  ;;  %v3080_v36 = vpop.permute.xlu1 %3079  ;;  %v3082_v54 = vpop.permute.xlu0 %3081  ;;  %v1876_v28 = vsub.f32 %v19302_v63, %v24611_v13  ;;  %v19579_v9 = vpack.c.bf16 %v3376_v39, %v3369_v16  ;;  %v3396_v44 = vsub.f32 %v3394_v17, %v3395_v29  ;;  %v19581_v4 = vpack.c.bf16 %v3388_v10, %v3381_v45 }
 0x345   :  { %24610 = vst [vmem:[#allocation51_spill] sm:$0xff] %v19574_v5  ;;  %v3402_v61 = vand.u32 4294901760, %v3401_v53  ;;  %v3409_v30 = vand.u32 4294901760, %v3408_v52  ;;  %v3137_v40 = vand.u32 4294901760, %v3080_v36  ;;  %v3140_v27 = vand.u32 4294901760, %v3082_v54  ;;  %16719 = vmatprep.subr.bf16.mxu0 %v19574_v5 }
 0x346   :  { %24612 = vst [vmem:[#allocation52_spill] sm:$0xff] %v19581_v4  ;;  %v24613_v38 = vand.u32 4294901760, %v19415_v19  ;;  %v24614_v8 = vand.u32 4294901760, %v19451_v60  ;;  %16721 = vmatpush3.bf16.msra.mxu0 %v19574_v5  ;;  %v3383_v63 = vand.u32 4294901760, %v3382_v58  ;;  %v3390_v16 = vand.u32 4294901760, %v3389_v46 }
 0x347   :  { %v19591_v39 = vpack.c.bf16 %v3401_v53, %v3394_v17  ;;  %v19593_v45 = vpack.c.bf16 %v3137_v40, %v3134_v6  ;;  %v3415_v18 = vsub.f32 %v3080_v36, %v3137_v40  ;;  %v3422_v13 = vsub.f32 %v3082_v54, %v3140_v27  ;;  %16541 = vmatpush3.bf16.xpose.msra.mxu1 %v19538_v57 }
 0x348   :  { %v19588_v21 = vpack.c.bf16 %v24614_v8, %v24613_v38  ;;  %v3403_v10 = vsub.f32 %v3401_v53, %v3402_v61  ;;  %v3084_v37 = vpop.permute.xlu1 %3083  ;;  %v19597_v19 = vpack.c.bf16 %v3390_v16, %v3383_v63  ;;  %v3397_v60 = vand.u32 4294901760, %v3396_v44 }
 0x349   :  { %24615 = vst [vmem:[#allocation53_spill] sm:$0xff] %v19591_v39  ;;  %24616 = vst [vmem:[#allocation54_spill] sm:$0xff] %v19593_v45  ;;  %v3410_v38 = vsub.f32 %v3408_v52, %v3409_v30  ;;  %v19599_v8 = vpack.c.bf16 %v3402_v61, %v3395_v29  ;;  %v3416_v58 = vand.u32 4294901760, %v3415_v18  ;;  %v3423_v46 = vand.u32 4294901760, %v3422_v13  ;;  %16723 = vmatprep.subr.bf16.mxu0 %v19593_v45 }
 0x34a   :  { %16543 = vmatprep.subr.bf16.mxu1 %v19588_v21  ;;  %v3143_v17 = vand.u32 4294901760, %v3084_v37  ;;  %v3404_v6 = vand.u32 4294901760, %v3403_v10  ;;  %16725 = vmatpush3.bf16.msra.mxu0 %v19593_v45  ;;  %v1877_v36 = vand.u32 4294901760, %v1876_v28  ;;  %v1884_v53 = vand.u32 4294901760, %v19560_v47 }
 0x34b   :  { %24617 = vst [vmem:[#allocation55_spill] sm:$0xff] %v19599_v8  ;;  %v19605_v54 = vand.u32 4294901760, %v19564_v56  ;;  %v19607_v40 = vpack.c.bf16 %v3415_v18, %v3408_v52  ;;  %v3417_v63 = vsub.f32 %v3415_v18, %v3416_v58  ;;  %v19615_v16 = vsub.f32 %v19516_v24, %v19541_v2 }
 0x34c   :  { %v19609_v44 = vpack.c.bf16 %v3143_v17, %v3140_v27  ;;  %v3429_v29 = vsub.f32 %v3084_v37, %v3143_v17  ;;  %v19611_v61 = vpack.c.bf16 %v3404_v6, %v3397_v60  ;;  %v1583_v28 = vsel %vm1566_vm1, %v19240_v0, 0 }
 0x34d   :  { %24618 = vst [vmem:[#allocation56_spill] sm:$0xff] %v19607_v40  ;;  %v3411_v10 = vand.u32 4294901760, %v3410_v38  ;;  %v19619_v47 = vpack.c.bf16 %v3416_v58, %v3409_v30  ;;  %v3418_v52 = vand.u32 4294901760, %v3417_v63  ;;  %v3424_v27 = vsub.f32 %v3422_v13, %v3423_v46 }
 0x34e   :  { %24619 = vst [vmem:[#allocation57_spill] sm:$0xff] %v19609_v44  ;;  %v3430_v8 = vand.u32 4294901760, %v3429_v29  ;;  %16727 = vmatprep.subr.bf16.mxu0 %v19609_v44  ;;  %v19622_v4 = vpack.c.bf16 %v3429_v29, %v3422_v13  ;;  %v16546_v18 = vpack.c.bf16 %v1884_v53, %v1877_v36  ;;  %v24622_v37 = vand.u32 4294901760, %v19325_v1 }
 0x34f   :  { %24620 = vst [vmem:[#allocation58_spill] sm:$0xff] %v19619_v47  ;;  %16729 = vmatpush3.bf16.msra.mxu0 %v19609_v44  ;;  %v19630_v60 = vsub.f32 %v19503_v43, %v19528_v32  ;;  %v19633_v30 = vand.u32 4294901760, %v19545_v7  ;;  %16545 = vmatpush3.bf16.xpose.msra.mxu1 %v19588_v21  ;;  %v19638_v13 = vsub.f32 %v19564_v56, %v19605_v54  ;;  %v19648_v36 = vand.u32 4294901760, %v1583_v28 }
 0x350   :  { %24621 = vst [vmem:[#allocation59_spill] sm:$0xff] %v19622_v4  ;;  %v1897_v24 = vsub.f32 %v19325_v1, %v24622_v37  ;;  %v19640_v38 = vpack.c.bf16 %v3418_v52, %v3411_v10  ;;  %v3431_v58 = vsub.f32 %v3429_v29, %v3430_v8  ;;  %v19642_v17 = vpack.c.bf16 %v3430_v8, %v3423_v46 }
 0x351   :  { %16547 = vmatprep.subr.bf16.mxu1 %v16546_v18  ;;  %v24625_v1 = vand.u32 4294901760, %v19321_v20  ;;  %v1585_v53 = vsel %vm1566_vm1, %v19238_v23, 0  ;;  %v24626_v56 = vand.u32 4294901760, %v19480_v22  ;;  %v3425_v8 = vand.u32 4294901760, %v3424_v27 }
 0x352   :  { %24623 = vst [vmem:[#allocation60_spill] sm:$0xff] %v19640_v38  ;;  %24624 = vst [vmem:[#allocation61_spill] sm:$0xff] %v19642_v17  ;;  %v3432_v46 = vand.u32 4294901760, %v3431_v58  ;;  %v1898_v10 = vand.u32 4294901760, %v1897_v24  ;;  %v19664_v6 = vand.u32 4294901760, %v1585_v53  ;;  %v24628_v24 = vand.u32 4294901760, %v19512_v14 }
 0x353   :  { %v1890_v43 = vsub.f32 %v19321_v20, %v24625_v1  ;;  %v1735_v63 = vsub.f32 %v19480_v22, %v24626_v56  ;;  %v1587_v20 = vsel %vm1566_vm1, %v19248_v11, 0  ;;  %v19662_v1 = vsub.f32 %v19545_v7, %v19633_v30 }
 0x354   :  { %v19666_v17 = vpack.c.bf16 %v3432_v46, %v3425_v8  ;;  %v1726_v56 = vand.u32 4294901760, %v19509_v25  ;;  %v1745_v58 = vsub.f32 %v19512_v14, %v24628_v24  ;;  %v19673_v52 = vsub.f32 %v1583_v28, %v19648_v36 }
 0x355   :  { %v1891_v27 = vand.u32 4294901760, %v1890_v43  ;;  %v1736_v29 = vand.u32 4294901760, %v1735_v63  ;;  %v24629_v37 = vand.u32 4294901760, %v19615_v16  ;;  %v19678_v47 = vand.u32 4294901760, %v1587_v20 }
 0x356   :  { %24627 = vst [vmem:[#allocation62_spill] sm:$0xff] %v19666_v17  ;;  %v1589_v8 = vsel %vm1566_vm1, %v19246_v35, 0  ;;  %14387 = vmatmul.mubr.f32.vlgmr.msra.gmra.mrb[16].mxu1 %v1726_v56  ;;  %v24630_v43 = vand.u32 4294901760, %v19339_v55  ;;  %v1591_v28 = vsel %vm1566_vm1, %v19256_v33, 0  ;;  %v24631_v63 = vand.u32 4294901760, %v19630_v60 }
 0x357   :  { %v1755_v7 = vsub.f32 %v19615_v16, %v24629_v37  ;;  %v16550_v25 = vpack.c.bf16 %v1898_v10, %v1891_v27  ;;  %14389 = vmatprep.mubr.f32.mxu1 %v1736_v29  ;;  %16549 = vmatpush3.bf16.xpose.msra.mxu1 %v16546_v18  ;;  %v24632_v24 = vand.u32 4294901760, %v19638_v13  ;;  %v19695_v10 = vsub.f32 %v1585_v53, %v19664_v6 }
 0x358   :  { %v1911_v46 = vsub.f32 %v19339_v55, %v24630_v43  ;;  %v1765_v37 = vsub.f32 %v19630_v60, %v24631_v63  ;;  %v1746_v55 = vand.u32 4294901760, %v1745_v58  ;;  %v24633_v27 = vand.u32 4294901760, %v19341_v48 }
 0x359   :  { %v1775_v44 = vsub.f32 %v19638_v13, %v24632_v24  ;;  %16551 = vmatprep.subr.bf16.mxu1 %v16550_v25  ;;  %v19701_v43 = vand.u32 4294901760, %v1589_v8  ;;  %v1756_v63 = vand.u32 4294901760, %v1755_v7  ;;  %v19704_v45 = vsub.f32 %v1587_v20, %v19678_v47 }
 0x35a   :  { %v1904_v29 = vsub.f32 %v19341_v48, %v24633_v27  ;;  %v19706_v24 = vand.u32 4294901760, %v1591_v28  ;;  %v1593_v53 = vsel %vm1566_vm1, %v19254_v59, 0  ;;  %14390 = vmatmul.mubr.f32.gmra.mrb[18].mxu1 %v1746_v55  ;;  %v1912_v56 = vand.u32 4294901760, %v1911_v46 }
 0x35b   :  { %v1595_v58 = vsel %vm1566_vm1, %v19264_v31, 0  ;;  %14392 = vmatprep.mubr.f32.mxu1 %v1756_v63  ;;  %v1766_v48 = vand.u32 4294901760, %v1765_v37  ;;  %v1776_v27 = vand.u32 4294901760, %v1775_v44  ;;  %v24634_v18 = vand.u32 4294901760, %v19662_v1 }
 0x35c   :  { %v1905_v5 = vand.u32 4294901760, %v1904_v29  ;;  %v24635_v4 = vand.u32 4294901760, %v19673_v52  ;;  %v19720_v55 = vsub.f32 %v1589_v8, %v19701_v43  ;;  %v19722_v46 = vand.u32 4294901760, %v1593_v53 }
 0x35d   :  { %v1785_v7 = vsub.f32 %v19662_v1, %v24634_v18  ;;  %v19726_v44 = vsub.f32 %v1591_v28, %v19706_v24  ;;  %v19728_v37 = vand.u32 4294901760, %v1595_v58  ;;  %v1597_v18 = vsel %vm1566_vm1, %v19262_v34, 0 }
 0x35e   :  { %v1795_v40 = vsub.f32 %v19673_v52, %v24635_v4  ;;  %14393 = vmatmul.mubr.f32.gmra.mrb[20].mxu1 %v1766_v48  ;;  %v16554_v29 = vpack.c.bf16 %v1912_v56, %v1905_v5  ;;  %v24636_v20 = vand.u32 4294901760, %v19359_v50  ;;  %v24637_v39 = vand.u32 4294901760, %v19695_v10 }
 0x35f   :  { %14395 = vmatprep.mubr.f32.mxu1 %v1776_v27  ;;  %16553 = vmatpush3.bf16.xpose.msra.mxu1 %v16550_v25  ;;  %v1786_v8 = vand.u32 4294901760, %v1785_v7  ;;  %v24638_v28 = vand.u32 4294901760, %v19357_v3  ;;  %v24266_v38 = vand.u32 4294901760, %v19720_v55  ;;  %v19743_v5 = vsub.f32 %v1593_v53, %v19722_v46 }
 0x360   :  { %v1925_v4 = vsub.f32 %v19359_v50, %v24636_v20  ;;  %v1805_v63 = vsub.f32 %v19695_v10, %v24637_v39  ;;  %16555 = vmatprep.subr.bf16.mxu1 %v16554_v29  ;;  %v19745_v56 = vand.u32 4294901760, %v1597_v18  ;;  %v1796_v50 = vand.u32 4294901760, %v1795_v40 }
 0x361   :  { %v1918_v17 = vsub.f32 %v19357_v3, %v24638_v28  ;;  %v24639_v25 = vand.u32 4294901760, %v19704_v45  ;;  %v24265_v27 = vand.u32 4294901760, %v19726_v44  ;;  %v19752_v39 = vsub.f32 %v1595_v58, %v19728_v37 }
 0x362   :  { %14396 = vmatmul.mubr.f32.gmra.mrb[22].mxu1 %v1786_v8  ;;  %v1926_v7 = vand.u32 4294901760, %v1925_v4  ;;  %v1806_v3 = vand.u32 4294901760, %v1805_v63  ;;  %v1825_v53 = vsub.f32 %v19720_v55, %v24266_v38  ;;  %v1844_v40 = vand.u32 4294901760, %v19743_v5 }
 0x363   :  { %v1815_v48 = vsub.f32 %v19704_v45, %v24639_v25  ;;  %14398 = vmatprep.mubr.f32.mxu1 %v1796_v50  ;;  %v1919_v20 = vand.u32 4294901760, %v1918_v17  ;;  %v19759_v28 = vsub.f32 %v1597_v18, %v19745_v56  ;;  %v1835_v58 = vsub.f32 %v19726_v44, %v24265_v27 }
 0x364   :  { %v1854_v8 = vand.u32 4294901760, %v19752_v39  ;;  %v24640_v17 = vand.u32 4294901760, %v19379_v51  ;;  %v1826_v50 = vand.u32 4294901760, %v1825_v53  ;;  %v1845_v18 = vsub.f32 %v19743_v5, %v1844_v40 }
 0x365   :  { %v1816_v25 = vand.u32 4294901760, %v1815_v48  ;;  %v16558_v4 = vpack.c.bf16 %v1926_v7, %v1919_v20  ;;  %v24641_v48 = vand.u32 4294901760, %v19384_v15  ;;  %v1864_v38 = vand.u32 4294901760, %v19759_v28 }
 0x366   :  { %14399 = vmatmul.mubr.f32.gmra.mrb[24].mxu1 %v1806_v3  ;;  %v1939_v63 = vsub.f32 %v19379_v51, %v24640_v17  ;;  %v1836_v3 = vand.u32 4294901760, %v1835_v58  ;;  %v1855_v7 = vsub.f32 %v19752_v39, %v1854_v8 }
 0x367   :  { %14401 = vmatprep.mubr.f32.mxu1 %v1816_v25  ;;  %16557 = vmatpush3.bf16.xpose.msra.mxu1 %v16554_v29  ;;  %v1932_v27 = vsub.f32 %v19384_v15, %v24641_v48  ;;  %v1846_v29 = vand.u32 4294901760, %v1845_v18  ;;  %v1865_v53 = vsub.f32 %v19759_v28, %v1864_v38  ;;  %v24642_v15 = vand.u32 4294901760, %v19403_v12 }
 0x368   :  { %16559 = vmatprep.subr.bf16.mxu1 %v16558_v4  ;;  %v1940_v51 = vand.u32 4294901760, %v1939_v63  ;;  %v1856_v25 = vand.u32 4294901760, %v1855_v7  ;;  %v24643_v63 = vand.u32 4294901760, %v19409_v49  ;;  %v24644_v7 = vand.u32 4294901760, %v19444_v62 }
 0x369   :  { %v1933_v20 = vand.u32 4294901760, %v1932_v27  ;;  %v1953_v58 = vsub.f32 %v19403_v12, %v24642_v15  ;;  %v1866_v48 = vand.u32 4294901760, %v1865_v53  ;;  %v24645_v12 = vand.u32 4294901760, %v19439_v26  ;;  %v24647_v15 = vld [vmem:[#allocation34_spill] sm:$0xff] }
 0x36a   :  { %14402 = vmatmul.mubr.f32.gmra.mrb[26].mxu1 %v1826_v50  ;;  %v1946_v50 = vsub.f32 %v19409_v49, %v24643_v63  ;;  %v24646_v49 = vand.u32 4294901760, %v19477_v42 }
 0x36b   :  { %14404 = vmatprep.mubr.f32.mxu1 %v1836_v3  ;;  %v16562_v17 = vpack.c.bf16 %v1940_v51, %v1933_v20  ;;  %v1954_v27 = vand.u32 4294901760, %v1953_v58  ;;  %v1967_v51 = vsub.f32 %v19444_v62, %v24644_v7  ;;  %v24648_v58 = vand.u32 4294901760, %v24647_v15  ;;  %v24655_v7 = vld [vmem:[#allocation24_spill] sm:$0xff] }
 0x36c   :  { %v1947_v18 = vand.u32 4294901760, %v1946_v50  ;;  %v24650_v50 = vld [vmem:[#allocation26_spill] sm:$0xff] }
 0x36e   :  { %14405 = vmatmul.mubr.f32.gmra.mrb[28].mxu1 %v1846_v29  ;;  %v16566_v3 = vpack.c.bf16 %v1954_v27, %v1947_v18  ;;  %v1968_v29 = vand.u32 4294901760, %v1967_v51  ;;  %v24651_v27 = vld [vmem:[#allocation33_spill] sm:$0xff]  ;;  %v24656_v51 = vld [vmem:[#allocation27_spill] sm:$0xff] }
 0x36f   :  { %14407 = vmatprep.mubr.f32.mxu1 %v1856_v25  ;;  %16561 = vmatpush3.bf16.xpose.msra.mxu1 %v16558_v4  ;;  %v1960_v4 = vsub.f32 %v19439_v26, %v24645_v12  ;;  %v1981_v25 = vsub.f32 %v19477_v42, %v24646_v49  ;;  %v24649_v26 = vld [vmem:[#allocation16_spill] sm:$0xff]  ;;  %v24652_v42 = vld [vmem:[#allocation19_spill] sm:$0xff]  ;;  %v24653_v18 = vld [vmem:[#allocation37_spill] sm:$0xff] }
 0x370   :  { %16563 = vmatprep.subr.bf16.mxu1 %v16562_v17  ;;  %v24657_v12 = vld [vmem:[#allocation6_spill] sm:$0xff] }
 0x371   :  { %v1961_v20 = vand.u32 4294901760, %v1960_v4  ;;  %v1982_v62 = vand.u32 4294901760, %v1981_v25  ;;  %v24658_v4 = vld [vmem:[#allocation31_spill] sm:$0xff]  ;;  %v24662_v49 = vld [vmem:[#allocation30_spill] sm:$0xff] }
 0x372   :  { %14408 = vmatmul.mubr.f32.gmra.mrb[30].mxu1 %v1866_v48  ;;  %v1974_v48 = vsub.f32 %v24647_v15, %v24648_v58  ;;  %v24663_v25 = vld [vmem:[#allocation18_spill] sm:$0xff]  ;;  %v24664_v15 = vld [vmem:[#allocation20_spill] sm:$0xff]  ;;  %v24665_v58 = vld [vmem:[#allocation23_spill] sm:$0xff] }
 0x373   :  { %14442 = vmatprep.mubr.f32.mxu1 %v19209_v41  ;;  %v16570_v53 = vpack.c.bf16 %v1968_v29, %v1961_v20  ;;  %v24659_v29 = vld [vmem:[#allocation35_spill] sm:$0xff] }
 0x374   :  { %v24660_v20 = vld [vmem:[#allocation39_spill] sm:$0xff] }
 0x377   :  { %16565 = vmatpush3.bf16.xpose.msra.mxu1 %v16562_v17  ;;  %v1975_v17 = vand.u32 4294901760, %v1974_v48  ;;  %v24666_v48 = vld [vmem:[#allocation29_spill] sm:$0xff] }
 0x378   :  { %16567 = vmatprep.subr.bf16.mxu1 %v16566_v3 }
 0x379   :  { %v16574_v63 = vpack.c.bf16 %v1982_v62, %v1975_v17  ;;  %v24667_v62 = vand.u32 4294901760, %v24657_v12  ;;  %v24668_v17 = vld [vmem:[#allocation38_spill] sm:$0xff] }
 0x37f   :  { %16569 = vmatpush3.bf16.xpose.msra.mxu1 %v16566_v3  ;;  %v24654_v3 = vld [vmem:[#allocation22_spill] sm:$0xff] }
 0x380   :  { %16571 = vmatprep.subr.bf16.mxu1 %v16570_v53 }
 0x387   :  { %16573 = vmatpush3.bf16.xpose.msra.mxu1 %v16570_v53  ;;  %v24661_v53 = vld [vmem:[#allocation15_spill] sm:$0xff] }
 0x388   :  { %16575 = vmatprep.subr.bf16.mxu1 %v16574_v63 }
 0x38f   :  { %16577 = vmatpush3.bf16.xpose.msra.mxu1 %v16574_v63  ;;  %v24669_v63 = vld [vmem:[#allocation17_spill] sm:$0xff] }
 0x390   :  { %16579 = vmatprep.subr.bf16.mxu1 %v24649_v26 }
 0x396   :  { %14443 = vmatmul.mubr.f32.vlgmr.msra.gmra.mrb[16].mxu1 %v24650_v50 }
 0x397   :  { %14445 = vmatprep.mubr.f32.mxu1 %v24651_v27  ;;  %16581 = vmatpush3.bf16.xpose.msra.mxu1 %v24649_v26  ;;  %v24670_v26 = vand.u32 4294901760, %v24662_v49 }
 0x398   :  { %16583 = vmatprep.subr.bf16.mxu1 %v24652_v42 }
 0x39a   :  { %14446 = vmatmul.mubr.f32.gmra.mrb[18].mxu1 %v24653_v18 }
 0x39b   :  { %14448 = vmatprep.mubr.f32.mxu1 %v19541_v2 }
 0x39e   :  { %14449 = vmatmul.mubr.f32.gmra.mrb[20].mxu1 %v19528_v32 }
 0x39f   :  { %14451 = vmatprep.mubr.f32.mxu1 %v19605_v54  ;;  %16585 = vmatpush3.bf16.xpose.msra.mxu1 %v24652_v42  ;;  %v24671_v42 = vand.u32 4294901760, %v19480_v22 }
 0x3a0   :  { %16587 = vmatprep.subr.bf16.mxu1 %v24654_v3 }
 0x3a2   :  { %14452 = vmatmul.mubr.f32.gmra.mrb[22].mxu1 %v19633_v30 }
 0x3a3   :  { %14454 = vmatprep.mubr.f32.mxu1 %v19648_v36 }
 0x3a6   :  { %14455 = vmatmul.mubr.f32.gmra.mrb[24].mxu1 %v19664_v6 }
 0x3a7   :  { %14457 = vmatprep.mubr.f32.mxu1 %v19678_v47  ;;  %16589 = vmatpush3.bf16.xpose.msra.mxu1 %v24654_v3  ;;  %v24672_v3 = vld [vmem:[#allocation21_spill] sm:$0xff] }
 0x3a8   :  { %16591 = vmatprep.subr.bf16.mxu1 %v24655_v7 }
 0x3aa   :  { %14458 = vmatmul.mubr.f32.gmra.mrb[26].mxu1 %v19701_v43 }
 0x3ab   :  { %14460 = vmatprep.mubr.f32.mxu1 %v19706_v24 }
 0x3ae   :  { %14461 = vmatmul.mubr.f32.gmra.mrb[28].mxu1 %v19722_v46 }
 0x3af   :  { %14463 = vmatprep.mubr.f32.mxu1 %v19728_v37  ;;  %16593 = vmatpush3.bf16.xpose.msra.mxu1 %v24655_v7  ;;  %v24673_v7 = vand.u32 4294901760, %v19512_v14 }
 0x3b0   :  { %16595 = vmatprep.subr.bf16.mxu1 %v24656_v51 }
 0x3b2   :  { %14464 = vmatmul.mubr.f32.gmra.mrb[30].mxu1 %v19745_v56 }
 0x3b3   :  { %14498 = vmatprep.mubr.f32.mxu1 %v24657_v12  ;;  %v24675_v12 = vand.u32 4294901760, %v19630_v60 }
 0x3b7   :  { %16597 = vmatpush3.bf16.xpose.msra.mxu1 %v24656_v51  ;;  %v24674_v51 = vand.u32 4294901760, %v19615_v16 }
 0x3b8   :  { %16599 = vmatprep.subr.bf16.mxu1 %v24658_v4 }
 0x3bf   :  { %16601 = vmatpush3.bf16.xpose.msra.mxu1 %v24658_v4  ;;  %v24676_v4 = vand.u32 4294901760, %v19638_v13 }
 0x3c0   :  { %16603 = vmatprep.subr.bf16.mxu1 %v24659_v29 }
 0x3c7   :  { %16605 = vmatpush3.bf16.xpose.msra.mxu1 %v24659_v29  ;;  %v24678_v29 = vand.u32 4294901760, %v19662_v1 }
 0x3c8   :  { %16607 = vmatprep.subr.bf16.mxu1 %v24660_v20 }
 0x3cf   :  { %16609 = vmatpush3.bf16.xpose.msra.mxu1 %v24660_v20  ;;  %v24679_v20 = vand.u32 4294901760, %v19673_v52 }
 0x3d0   :  { %16611 = vmatprep.subr.bf16.mxu1 %v24661_v53 }
 0x3d6   :  { %14499 = vmatmul.mubr.f32.vlgmr.msra.gmra.mrb[16].mxu1 %v24662_v49  ;;  %v24684_v49 = vand.u32 4294901760, %v19726_v44 }
 0x3d7   :  { %14501 = vmatprep.mubr.f32.mxu1 %v19480_v22  ;;  %16613 = vmatpush3.bf16.xpose.msra.mxu1 %v24661_v53  ;;  %v24677_v22 = vld [vmem:[#allocation25_spill] sm:$0xff] }
 0x3d8   :  { %16615 = vmatprep.subr.bf16.mxu1 %v24663_v25 }
 0x3da   :  { %14502 = vmatmul.mubr.f32.gmra.mrb[18].mxu1 %v19512_v14  ;;  %v24680_v14 = vand.u32 4294901760, %v19695_v10 }
 0x3db   :  { %14504 = vmatprep.mubr.f32.mxu1 %v19615_v16  ;;  %v24681_v16 = vand.u32 4294901760, %v19704_v45 }
 0x3de   :  { %14505 = vmatmul.mubr.f32.gmra.mrb[20].mxu1 %v19630_v60  ;;  %v24682_v60 = vld [vmem:[#allocation28_spill] sm:$0xff] }
 0x3df   :  { %14507 = vmatprep.mubr.f32.mxu1 %v19638_v13  ;;  %16617 = vmatpush3.bf16.xpose.msra.mxu1 %v24663_v25  ;;  %v24683_v13 = vand.u32 4294901760, %v19720_v55 }
 0x3e0   :  { %16619 = vmatprep.subr.bf16.mxu1 %v24664_v15 }
 0x3e2   :  { %14508 = vmatmul.mubr.f32.gmra.mrb[22].mxu1 %v19662_v1  ;;  %v24687_v1 = vld [vmem:[#allocation40_spill] sm:$0xff] }
 0x3e3   :  { %14510 = vmatprep.mubr.f32.mxu1 %v19673_v52  ;;  %v24686_v52 = vld [vmem:[#allocation36_spill] sm:$0xff] }
 0x3e6   :  { %14511 = vmatmul.mubr.f32.gmra.mrb[24].mxu1 %v19695_v10  ;;  %v24688_v10 = vld [vmem:[#allocation42_spill] sm:$0xff] }
 0x3e7   :  { %14513 = vmatprep.mubr.f32.mxu1 %v19704_v45  ;;  %16621 = vmatpush3.bf16.xpose.msra.mxu1 %v24664_v15  ;;  %v24685_v45 = vld [vmem:[#allocation32_spill] sm:$0xff] }
 0x3e8   :  { %16623 = vmatprep.subr.bf16.mxu1 %v24665_v58 }
 0x3ea   :  { %14514 = vmatmul.mubr.f32.gmra.mrb[26].mxu1 %v19720_v55 }
 0x3eb   :  { %14516 = vmatprep.mubr.f32.mxu1 %v19726_v44 }
 0x3ee   :  { %14517 = vmatmul.mubr.f32.gmra.mrb[28].mxu1 %v19743_v5  ;;  %v1502_v5 = vld [vmem:[%s24154_s1 + $0x20] sm:$0xff] }
 0x3ef   :  { %14519 = vmatprep.mubr.f32.mxu1 %v19752_v39  ;;  %16625 = vmatpush3.bf16.xpose.msra.mxu1 %v24665_v58 }
 0x3f0   :  { %16627 = vmatprep.subr.bf16.mxu1 %v24666_v48 }
 0x3f2   :  { %14520 = vmatmul.mubr.f32.gmra.mrb[30].mxu1 %v19759_v28 }
 0x3f3   :  { %14554 = vmatprep.mubr.f32.mxu1 %v24667_v62 }
 0x3f7   :  { %16629 = vmatpush3.bf16.xpose.msra.mxu1 %v24666_v48 }
 0x3f8   :  { %16631 = vmatprep.subr.bf16.mxu1 %v24668_v17 }
 0x3ff   :  { %16633 = vmatpush3.bf16.xpose.msra.mxu1 %v24668_v17 }
 0x400   :  { %16635 = vmatprep.subr.bf16.mxu1 %v19538_v57 }
 0x407   :  { %16637 = vmatpush3.bf16.xpose.msra.mxu1 %v19538_v57 }
 0x408   :  { %16639 = vmatprep.subr.bf16.mxu1 %v19588_v21 }
 0x40f   :  { %16641 = vmatpush3.bf16.xpose.msra.mxu1 %v19588_v21 }
 0x410   :  { %16643 = vmatprep.subr.bf16.mxu1 %v24669_v63 }
 0x416   :  { %14555 = vmatmul.mubr.f32.vlgmr.msra.gmra.mrb[16].mxu1 %v24670_v26  ;;  %v1511_v26 = vld [vmem:[%s24154_s1 + $0x68] sm:$0xff] }
 0x417   :  { %14557 = vmatprep.mubr.f32.mxu1 %v24671_v42  ;;  %16645 = vmatpush3.bf16.xpose.msra.mxu1 %v24669_v63  ;;  %v1508_v42 = vld [vmem:[%s24154_s1 + $0x50] sm:$0xff] }
 0x418   :  { %16647 = vmatprep.subr.bf16.mxu1 %v24672_v3 }
 0x41a   :  { %14558 = vmatmul.mubr.f32.gmra.mrb[18].mxu1 %v24673_v7 }
 0x41b   :  { %14560 = vmatprep.mubr.f32.mxu1 %v24674_v51 }
 0x41e   :  { %14561 = vmatmul.mubr.f32.gmra.mrb[20].mxu1 %v24675_v12 }
 0x41f   :  { %14563 = vmatprep.mubr.f32.mxu1 %v24676_v4  ;;  %16649 = vmatpush3.bf16.xpose.msra.mxu1 %v24672_v3  ;;  %v1513_v4 = vld [vmem:[%s24154_s1 + $0x78] sm:$0xff] }
 0x420   :  { %16651 = vmatprep.subr.bf16.mxu1 %v24677_v22 }
 0x422   :  { %14564 = vmatmul.mubr.f32.gmra.mrb[22].mxu1 %v24678_v29 }
 0x423   :  { %14566 = vmatprep.mubr.f32.mxu1 %v24679_v20 }
 0x426   :  { %14567 = vmatmul.mubr.f32.gmra.mrb[24].mxu1 %v24680_v14 }
 0x427   :  { %14569 = vmatprep.mubr.f32.mxu1 %v24681_v16  ;;  %16653 = vmatpush3.bf16.xpose.msra.mxu1 %v24677_v22  ;;  %v1510_v22 = vld [vmem:[%s24154_s1 + $0x60] sm:$0xff] }
 0x428   :  { %16655 = vmatprep.subr.bf16.mxu1 %v24682_v60 }
 0x42a   :  { %14570 = vmatmul.mubr.f32.gmra.mrb[26].mxu1 %v24683_v13 }
 0x42b   :  { %14572 = vmatprep.mubr.f32.mxu1 %v24684_v49 }
 0x42e   :  { %14573 = vmatmul.mubr.f32.gmra.mrb[28].mxu1 %v1844_v40 }
 0x42f   :  { %14575 = vmatprep.mubr.f32.mxu1 %v1854_v8  ;;  %16657 = vmatpush3.bf16.xpose.msra.mxu1 %v24682_v60  ;;  %v1507_v8 = vld [vmem:[%s24154_s1 + $0x48] sm:$0xff]  ;;  %v1512_v60 = vld [vmem:[%s24154_s1 + $0x70] sm:$0xff] }
 0x430   :  { %16659 = vmatprep.subr.bf16.mxu1 %v24685_v45 }
 0x432   :  { %14576 = vmatmul.mubr.f32.gmra.mrb[30].mxu1 %v1864_v38 }
 0x433   :  { %14610 = vmatprep.mubr.f32.mxu1 %v19209_v41 }
 0x437   :  { %16661 = vmatpush3.bf16.xpose.msra.mxu1 %v24685_v45 }
 0x438   :  { %16663 = vmatprep.subr.bf16.mxu1 %v24686_v52 }
 0x43f   :  { %16665 = vmatpush3.bf16.xpose.msra.mxu1 %v24686_v52 }
 0x440   :  { %16667 = vmatprep.subr.bf16.mxu1 %v24687_v1 }
 0x447   :  { %16669 = vmatpush3.bf16.xpose.msra.mxu1 %v24687_v1 }
 0x448   :  { %16671 = vmatprep.subr.bf16.mxu1 %v24688_v10 }
 0x44f   :  { %16673 = vmatpush3.bf16.xpose.msra.mxu1 %v24688_v10 }
 0x450   :  { %16675 = vmatprep.subr.bf16.mxu1 %v24661_v53 }
 0x456   :  { %14611 = vmatmul.mubr.f32.vlgmr.msra.gmra.mrb[16].mxu1 %v24650_v50 }
 0x457   :  { %14613 = vmatprep.mubr.f32.mxu1 %v24651_v27  ;;  %16677 = vmatpush3.bf16.xpose.msra.mxu1 %v24661_v53 }
 0x458   :  { %16679 = vmatprep.subr.bf16.mxu1 %v24663_v25 }
 0x45a   :  { %14614 = vmatmul.mubr.f32.gmra.mrb[18].mxu1 %v24653_v18 }
 0x45b   :  { %14616 = vmatprep.mubr.f32.mxu1 %v19541_v2 }
 0x45e   :  { %14617 = vmatmul.mubr.f32.gmra.mrb[20].mxu1 %v19528_v32 }
 0x45f   :  { %14619 = vmatprep.mubr.f32.mxu1 %v19605_v54  ;;  %16681 = vmatpush3.bf16.xpose.msra.mxu1 %v24663_v25 }
 0x460   :  { %16683 = vmatprep.subr.bf16.mxu1 %v24664_v15 }
 0x462   :  { %14620 = vmatmul.mubr.f32.gmra.mrb[22].mxu1 %v19633_v30 }
 0x463   :  { %14622 = vmatprep.mubr.f32.mxu1 %v19648_v36 }
 0x466   :  { %14623 = vmatmul.mubr.f32.gmra.mrb[24].mxu1 %v19664_v6 }
 0x467   :  { %14625 = vmatprep.mubr.f32.mxu1 %v19678_v47  ;;  %16685 = vmatpush3.bf16.xpose.msra.mxu1 %v24664_v15  ;;  %v1509_v15 = vld [vmem:[%s24154_s1 + $0x58] sm:$0xff] }
 0x468   :  { %16687 = vmatprep.subr.bf16.mxu1 %v24665_v58 }
 0x46a   :  { %14626 = vmatmul.mubr.f32.gmra.mrb[26].mxu1 %v19701_v43 }
 0x46b   :  { %14628 = vmatprep.mubr.f32.mxu1 %v19706_v24 }
 0x46e   :  { %14629 = vmatmul.mubr.f32.gmra.mrb[28].mxu1 %v19722_v46 }
 0x46f   :  { %14631 = vmatprep.mubr.f32.mxu1 %v19728_v37  ;;  %16689 = vmatpush3.bf16.xpose.msra.mxu1 %v24665_v58  ;;  %v1506_v58 = vld [vmem:[%s24154_s1 + $0x40] sm:$0xff] }
 0x470   :  { %16691 = vmatprep.subr.bf16.mxu1 %v24666_v48 }
 0x472   :  { %14632 = vmatmul.mubr.f32.gmra.mrb[30].mxu1 %v19745_v56 }
 0x473   :  { %14666 = vmatprep.mubr.f32.mxu1 %v19209_v41  ;;  %v1499_v41 = vld [vmem:[%s24154_s1 + $0x8] sm:$0xff] }
 0x477   :  { %16693 = vmatpush3.bf16.xpose.msra.mxu1 %v24666_v48 }
 0x478   :  { %16695 = vmatprep.subr.bf16.mxu1 %v24668_v17 }
 0x47f   :  { %16697 = vmatpush3.bf16.xpose.msra.mxu1 %v24668_v17 }
 0x480   :  { %16699 = vmatprep.subr.bf16.mxu1 %v19538_v57 }
 0x487   :  { %16701 = vmatpush3.bf16.xpose.msra.mxu1 %v19538_v57 }
 0x488   :  { %16703 = vmatprep.subr.bf16.mxu1 %v19588_v21 }
 0x48f   :  { %16705 = vmatpush3.bf16.xpose.msra.mxu1 %v19588_v21 }
 0x496   :  { %14667 = vmatmul.mubr.f32.vlgmr.msra.gmra.mrb[16].mxu1 %v24650_v50  ;;  %v1504_v50 = vld [vmem:[%s24154_s1 + $0x30] sm:$0xff] }
 0x497   :  { %14669 = vmatprep.mubr.f32.mxu1 %v24651_v27 }
 0x49a   :  { %14670 = vmatmul.mubr.f32.gmra.mrb[18].mxu1 %v24653_v18 }
 0x49b   :  { %14672 = vmatprep.mubr.f32.mxu1 %v19541_v2 }
 0x49e   :  { %14673 = vmatmul.mubr.f32.gmra.mrb[20].mxu1 %v19528_v32  ;;  %v1498_v32 = vld [vmem:[%s24154_s1] sm:$0xff] }
 0x49f   :  { %14675 = vmatprep.mubr.f32.mxu1 %v19605_v54 }
 0x4a2   :  { %14676 = vmatmul.mubr.f32.gmra.mrb[22].mxu1 %v19633_v30 }
 0x4a3   :  { %14678 = vmatprep.mubr.f32.mxu1 %v19648_v36  ;;  %v1503_v36 = vld [vmem:[%s24154_s1 + $0x28] sm:$0xff] }
 0x4a6   :  { %14679 = vmatmul.mubr.f32.gmra.mrb[24].mxu1 %v19664_v6 }
 0x4a7   :  { %14681 = vmatprep.mubr.f32.mxu1 %v19678_v47  ;;  %v1501_v47 = vld [vmem:[%s24154_s1 + $0x18] sm:$0xff] }
 0x4aa   :  { %14682 = vmatmul.mubr.f32.gmra.mrb[26].mxu1 %v19701_v43  ;;  %v1500_v43 = vld [vmem:[%s24154_s1 + $0x10] sm:$0xff] }
 0x4ab   :  { %14684 = vmatprep.mubr.f32.mxu1 %v19706_v24 }
 0x4ae   :  { %14685 = vmatmul.mubr.f32.gmra.mrb[28].mxu1 %v19722_v46 }
 0x4af   :  { %14687 = vmatprep.mubr.f32.mxu1 %v19728_v37  ;;  %v1505_v37 = vld [vmem:[%s24154_s1 + $0x38] sm:$0xff] }
 0x4b2   :  { %14688 = vmatmul.mubr.f32.gmra.mrb[30].mxu1 %v19745_v56 }
 0x569   :  { %v14668_v57 = vpop.f32.mrb[16].mxu1 }
 0x56a   :  { %v19965_v2 = vadd.f32 %v14668_v57, %v1499_v41  ;;  %v2823_v21 = vpop.f32.mrb[17].mxu1 }
 0x56b   :  { %v19967_v54 = vadd.f32 %v2823_v21, %v1498_v32 }
 0x56c   :  { %2919 = vmax.xlane.f32.xlu1 %v19965_v2 }
 0x56d   :  { %v14671_v30 = vpop.f32.mrb[18].mxu1  ;;  %2917 = vmax.xlane.f32.xlu0 %v19967_v54 }
 0x56e   :  { %v19974_v38 = vadd.f32 %v14671_v30, %v1501_v47  ;;  %v2835_v6 = vpop.f32.mrb[19].mxu1 }
 0x56f   :  { %v19985_v44 = vadd.f32 %v2835_v6, %v1500_v43 }
 0x571   :  { %v14674_v24 = vpop.f32.mrb[20].mxu1  ;;  %2923 = vmax.xlane.f32.xlu0 %v19974_v38 }
 0x572   :  { %v19983_v55 = vadd.f32 %v14674_v24, %v1503_v36  ;;  %v2847_v46 = vpop.f32.mrb[21].mxu1 }
 0x573   :  { %v19997_v28 = vadd.f32 %v2847_v46, %v1502_v5 }
 0x574   :  { %2927 = vmax.xlane.f32.xlu1 %v19983_v55 }
 0x575   :  { %v14677_v56 = vpop.f32.mrb[22].mxu1  ;;  %2921 = vmax.xlane.f32.xlu0 %v19985_v44 }
 0x576   :  { %v19995_v39 = vadd.f32 %v14677_v56, %v1505_v37  ;;  %v2859_v40 = vpop.f32.mrb[23].mxu1 }
 0x577   :  { %v20009_v25 = vadd.f32 %v2859_v40, %v1504_v50 }
 0x578   :  { %2931 = vmax.xlane.f32.xlu1 %v19995_v39 }
 0x579   :  { %v14680_v27 = vpop.f32.mrb[24].mxu1  ;;  %2925 = vmax.xlane.f32.xlu0 %v19997_v28 }
 0x57a   :  { %v20007_v18 = vadd.f32 %v14680_v27, %v1507_v8  ;;  %v2871_v53 = vpop.f32.mrb[25].mxu1 }
 0x57b   :  { %v20021_v63 = vadd.f32 %v2871_v53, %v1506_v58 }
 0x57c   :  { %2935 = vmax.xlane.f32.xlu1 %v20007_v18 }
 0x57d   :  { %v14683_v48 = vpop.f32.mrb[26].mxu1  ;;  %2929 = vmax.xlane.f32.xlu0 %v20009_v25 }
 0x57e   :  { %v20019_v62 = vadd.f32 %v14683_v48, %v1509_v15  ;;  %v2883_v17 = vpop.f32.mrb[27].mxu1 }
 0x57f   :  { %v20033_v12 = vadd.f32 %v2883_v17, %v1508_v42 }
 0x580   :  { %2939 = vmax.xlane.f32.xlu1 %v20019_v62 }
 0x581   :  { %v14686_v3 = vpop.f32.mrb[28].mxu1  ;;  %2933 = vmax.xlane.f32.xlu0 %v20021_v63 }
 0x582   :  { %v20031_v7 = vadd.f32 %v14686_v3, %v1511_v26  ;;  %v2895_v51 = vpop.f32.mrb[29].mxu1 }
 0x583   :  { %v20045_v16 = vadd.f32 %v2895_v51, %v1510_v22 }
 0x584   :  { %2943 = vmax.xlane.f32.xlu1 %v20031_v7 }
 0x585   :  { %v14689_v29 = vpop.f32.mrb[30].mxu1  ;;  %2937 = vmax.xlane.f32.xlu0 %v20033_v12 }
 0x586   :  { %v20043_v20 = vadd.f32 %v14689_v29, %v1513_v4  ;;  %v2907_v14 = vpop.f32.mrb[31].mxu1 }
 0x587   :  { %v20052_v13 = vadd.f32 %v2907_v14, %v1512_v60 }
 0x588   :  { %2947 = vmax.xlane.f32.xlu1 %v20043_v20 }
 0x589   :  { %2941 = vmax.xlane.f32.xlu0 %v20045_v16 }
 0x58d   :  { %2945 = vmax.xlane.f32.xlu0 %v20052_v13 }
 0x599   :  { %3087 = vrot.lane.b32.xlu1 %v19254_v59, %s18574_s3 }
 0x5a3   :  { %3085 = vrot.lane.b32.xlu0 %v19256_v33, %s18574_s3 }
 0x5f9   :  { %v2920_v49 = vpop.xlane.xlu1 %2919 }
 0x5fa   :  { %v2950_v45 = vsub.f32 %v19965_v2, %v2920_v49  ;;  %v2918_v52 = vpop.xlane.xlu0 %2917 }
 0x5fb   :  { %v2949_v1 = vsub.f32 %v19967_v54, %v2918_v52 }
 0x5fc   :  { %v2967_v10 = vmul.f32 1.442695, %v2950_v45 }
 0x5fd   :  { %v2965_v41 = vmul.f32 1.442695, %v2949_v1 }
 0x5fe   :  { %18312 = vpow2.f32 %v2967_v10  ;;  %v2924_v32 = vpop.xlane.xlu0 %2923 }
 0x5ff   :  { %18314 = vpow2.f32 %v2965_v41  ;;  %v2952_v57 = vsub.f32 %v19974_v38, %v2924_v32 }
 0x601   :  { %v2971_v21 = vmul.f32 1.442695, %v2952_v57  ;;  %v2928_v47 = vpop.xlane.xlu1 %2927 }
 0x602   :  { %v2954_v30 = vsub.f32 %v19983_v55, %v2928_v47  ;;  %v2922_v6 = vpop.xlane.xlu0 %2921 }
 0x603   :  { %18316 = vpow2.f32 %v2971_v21  ;;  %v2951_v36 = vsub.f32 %v19985_v44, %v2922_v6 }
 0x604   :  { %v2975_v43 = vmul.f32 1.442695, %v2954_v30 }
 0x605   :  { %v2969_v2 = vmul.f32 1.442695, %v2951_v36  ;;  %v2932_v24 = vpop.xlane.xlu1 %2931 }
 0x606   :  { %18318 = vpow2.f32 %v2975_v43  ;;  %v2956_v54 = vsub.f32 %v19995_v39, %v2932_v24  ;;  %v2926_v46 = vpop.xlane.xlu0 %2925 }
 0x607   :  { %18320 = vpow2.f32 %v2969_v2  ;;  %v2953_v37 = vsub.f32 %v19997_v28, %v2926_v46 }
 0x608   :  { %v20066_v5 = vpop.eup %18312  ;;  %v2979_v38 = vmul.f32 1.442695, %v2956_v54 }
 0x609   :  { %v20068_v56 = vpop.eup %18314  ;;  %v2973_v55 = vmul.f32 1.442695, %v2953_v37  ;;  %v2936_v40 = vpop.xlane.xlu1 %2935  ;;  %2999 = vadd.xlane.f32.xlu1 %v20066_v5 }
 0x60a   :  { %18322 = vpow2.f32 %v2979_v38  ;;  %v2958_v44 = vsub.f32 %v20007_v18, %v2936_v40  ;;  %2997 = vadd.xlane.f32.xlu0 %v20068_v56  ;;  %v2930_v8 = vpop.xlane.xlu0 %2929 }
 0x60b   :  { %18324 = vpow2.f32 %v2973_v55  ;;  %v2955_v39 = vsub.f32 %v20009_v25, %v2930_v8 }
 0x60c   :  { %v2983_v50 = vmul.f32 1.442695, %v2958_v44 }
 0x60d   :  { %v20074_v28 = vpop.eup %18316  ;;  %v2977_v27 = vmul.f32 1.442695, %v2955_v39  ;;  %v2940_v53 = vpop.xlane.xlu1 %2939 }
 0x60e   :  { %18326 = vpow2.f32 %v2983_v50  ;;  %v2960_v15 = vsub.f32 %v20019_v62, %v2940_v53  ;;  %3003 = vadd.xlane.f32.xlu0 %v20074_v28  ;;  %v2934_v58 = vpop.xlane.xlu0 %2933  ;;  %v24691_v53 = vld [vmem:[#allocation3_spill] sm:$0xff] }
 0x60f   :  { %18328 = vpow2.f32 %v2977_v27  ;;  %v2957_v18 = vsub.f32 %v20021_v63, %v2934_v58  ;;  %v24693_v58 = vld [vmem:[#allocation2_spill] sm:$0xff] }
 0x610   :  { %v20079_v48 = vpop.eup %18318  ;;  %v2987_v17 = vmul.f32 1.442695, %v2960_v15  ;;  %v24692_v15 = vld [vmem:[#allocation5_spill] sm:$0xff] }
 0x611   :  { %v20081_v26 = vpop.eup %18320  ;;  %v2981_v25 = vmul.f32 1.442695, %v2957_v18  ;;  %v2944_v42 = vpop.xlane.xlu1 %2943  ;;  %v24694_v18 = vld [vmem:[#allocation8_spill] sm:$0xff] }
 0x612   :  { %18330 = vpow2.f32 %v2987_v17  ;;  %v2962_v3 = vsub.f32 %v20031_v7, %v2944_v42  ;;  %3007 = vadd.xlane.f32.xlu0 %v20079_v48  ;;  %3001 = vadd.xlane.f32.xlu1 %v20081_v26  ;;  %v2938_v62 = vpop.xlane.xlu0 %2937  ;;  %v24695_v17 = vld [vmem:[#allocation4_spill] sm:$0xff]  ;;  %v24697_v42 = vld [vmem:[#allocation7_spill] sm:$0xff] }
 0x613   :  { %18332 = vpow2.f32 %v2981_v25  ;;  %v2959_v51 = vsub.f32 %v20033_v12, %v2938_v62  ;;  %v24696_v25 = vld [vmem:[#allocation10_spill] sm:$0xff] }
 0x614   :  { %v20087_v4 = vpop.eup %18322  ;;  %v2991_v63 = vmul.f32 1.442695, %v2962_v3  ;;  %v24698_v3 = vld [vmem:[#allocation9_spill] sm:$0xff] }
 0x615   :  { %v20089_v22 = vpop.eup %18324  ;;  %v2985_v29 = vmul.f32 1.442695, %v2959_v51  ;;  %v2948_v14 = vpop.xlane.xlu1 %2947 }
 0x616   :  { %18334 = vpow2.f32 %v2991_v63  ;;  %v2964_v60 = vsub.f32 %v20043_v20, %v2948_v14  ;;  %3011 = vadd.xlane.f32.xlu0 %v20087_v4  ;;  %3005 = vadd.xlane.f32.xlu1 %v20089_v22  ;;  %v2942_v7 = vpop.xlane.xlu0 %2941 }
 0x617   :  { %18336 = vpow2.f32 %v2985_v29  ;;  %v2961_v49 = vsub.f32 %v20045_v16, %v2942_v7 }
 0x618   :  { %v20095_v45 = vpop.eup %18326  ;;  %v2995_v12 = vmul.f32 1.442695, %v2964_v60 }
 0x619   :  { %v20097_v52 = vpop.eup %18328  ;;  %v2989_v1 = vmul.f32 1.442695, %v2961_v49  ;;  %v3088_v10 = vpop.permute.xlu1 %3087 }
 0x61a   :  { %18338 = vpow2.f32 %v2995_v12  ;;  %v3149_v41 = vand.u32 4294901760, %v3088_v10  ;;  %3015 = vadd.xlane.f32.xlu0 %v20095_v45  ;;  %3009 = vadd.xlane.f32.xlu1 %v20097_v52  ;;  %v2946_v20 = vpop.xlane.xlu0 %2945 }
 0x61b   :  { %18340 = vpow2.f32 %v2989_v1  ;;  %v2963_v32 = vsub.f32 %v20052_v13, %v2946_v20 }
 0x61c   :  { %v20102_v57 = vpop.eup %18330  ;;  %v3443_v16 = vsub.f32 %v3088_v10, %v3149_v41 }
 0x61d   :  { %v20104_v21 = vpop.eup %18332  ;;  %v2993_v47 = vmul.f32 1.442695, %v2963_v32 }
 0x61e   :  { %3019 = vadd.xlane.f32.xlu0 %v20102_v57  ;;  %3013 = vadd.xlane.f32.xlu1 %v20104_v21  ;;  %v3086_v30 = vpop.permute.xlu0 %3085  ;;  %v3444_v6 = vand.u32 4294901760, %v3443_v16 }
 0x61f   :  { %18342 = vpow2.f32 %v2993_v47  ;;  %v3146_v36 = vand.u32 4294901760, %v3086_v30 }
 0x620   :  { %v20108_v43 = vpop.eup %18334  ;;  %v3445_v46 = vsub.f32 %v3443_v16, %v3444_v6 }
 0x621   :  { %v20110_v2 = vpop.eup %18336  ;;  %v20112_v24 = vpack.c.bf16 %v3149_v41, %v3146_v36  ;;  %v3436_v13 = vsub.f32 %v3086_v30, %v3146_v36 }
 0x622   :  { %3023 = vadd.xlane.f32.xlu0 %v20108_v43  ;;  %3017 = vadd.xlane.f32.xlu1 %v20110_v2  ;;  %v3446_v39 = vand.u32 4294901760, %v3445_v46 }
 0x623   :  { %24689 = vst [vmem:[#allocation34_spill] sm:$0xff] %v20112_v24  ;;  %v3437_v54 = vand.u32 4294901760, %v3436_v13  ;;  %16731 = vmatprep.subr.bf16.mxu0 %v20112_v24  ;;  %v20117_v37 = vpack.c.bf16 %v3443_v16, %v3436_v13 }
 0x624   :  { %v20119_v38 = vpop.eup %18338  ;;  %16733 = vmatpush3.bf16.msra.mxu0 %v20112_v24 }
 0x625   :  { %v20122_v55 = vpop.eup %18340  ;;  %v3438_v40 = vsub.f32 %v3436_v13, %v3437_v54  ;;  %v20124_v44 = vpack.c.bf16 %v3444_v6, %v3437_v54 }
 0x626   :  { %3027 = vadd.xlane.f32.xlu0 %v20119_v38  ;;  %3021 = vadd.xlane.f32.xlu1 %v20122_v55 }
 0x627   :  { %24690 = vst [vmem:[#allocation16_spill] sm:$0xff] %v20124_v44  ;;  %v3439_v8 = vand.u32 4294901760, %v3438_v40 }
 0x629   :  { %v20128_v50 = vpop.eup %18342  ;;  %v20130_v27 = vpack.c.bf16 %v3446_v39, %v3439_v8 }
 0x62a   :  { %3025 = vadd.xlane.f32.xlu1 %v20128_v50 }
 0x63b   :  { %3091 = vrot.lane.b32.xlu1 %v19262_v34, %s18574_s3 }
 0x63c   :  { %3089 = vrot.lane.b32.xlu0 %v19264_v31, %s18574_s3  ;;  %s18576_s3 = smov 112  }
 0x63f   :  { %4427 = vrot.lane.b32.xlu1 %v24691_v53, %s18575_s30 }
 0x640   :  { %4431 = vrot.lane.b32.xlu0 %v24692_v15, %s18575_s30 }
 0x643   :  { %4429 = vrot.lane.b32.xlu1 %v24693_v58, %s18575_s30 }
 0x644   :  { %4435 = vrot.lane.b32.xlu0 %v24694_v18, %s18575_s30 }
 0x647   :  { %4433 = vrot.lane.b32.xlu1 %v24695_v17, %s18575_s30 }
 0x648   :  { %4439 = vrot.lane.b32.xlu0 %v24696_v25, %s18575_s30 }
 0x64b   :  { %4437 = vrot.lane.b32.xlu1 %v24697_v42, %s18575_s30 }
 0x64c   :  { %4443 = vrot.lane.b32.xlu0 %v19240_v0, %s18575_s30 }
 0x64f   :  { %4441 = vrot.lane.b32.xlu1 %v24698_v3, %s18575_s30 }
 0x650   :  { %4447 = vrot.lane.b32.xlu0 %v19248_v11, %s18575_s30 }
 0x653   :  { %4445 = vrot.lane.b32.xlu1 %v19238_v23, %s18575_s30 }
 0x654   :  { %4451 = vrot.lane.b32.xlu0 %v19256_v33, %s18575_s30 }
 0x657   :  { %4449 = vrot.lane.b32.xlu1 %v19246_v35, %s18575_s30 }
 0x658   :  { %4455 = vrot.lane.b32.xlu0 %v19264_v31, %s18575_s30 }
 0x65b   :  { %4453 = vrot.lane.b32.xlu1 %v19254_v59, %s18575_s30 }
 0x65c   :  { %4395 = vrot.lane.b32.xlu0 %v24691_v53, %s18576_s3 }
 0x65f   :  { %4457 = vrot.lane.b32.xlu1 %v19262_v34, %s18575_s30 }
 0x660   :  { %4399 = vrot.lane.b32.xlu0 %v24692_v15, %s18576_s3 }
 0x663   :  { %4397 = vrot.lane.b32.xlu1 %v24693_v58, %s18576_s3 }
 0x664   :  { %4403 = vrot.lane.b32.xlu0 %v24694_v18, %s18576_s3 }
 0x667   :  { %4401 = vrot.lane.b32.xlu1 %v24695_v17, %s18576_s3 }
 0x668   :  { %4407 = vrot.lane.b32.xlu0 %v24696_v25, %s18576_s3 }
 0x66b   :  { %4405 = vrot.lane.b32.xlu1 %v24697_v42, %s18576_s3 }
 0x66c   :  { %4411 = vrot.lane.b32.xlu0 %v19240_v0, %s18576_s3 }
 0x66f   :  { %4409 = vrot.lane.b32.xlu1 %v24698_v3, %s18576_s3 }
 0x670   :  { %4415 = vrot.lane.b32.xlu0 %v19248_v11, %s18576_s3 }
 0x673   :  { %4413 = vrot.lane.b32.xlu1 %v19238_v23, %s18576_s3 }
 0x674   :  { %4419 = vrot.lane.b32.xlu0 %v19256_v33, %s18576_s3 }
 0x677   :  { %4417 = vrot.lane.b32.xlu1 %v19246_v35, %s18576_s3 }
 0x678   :  { %4423 = vrot.lane.b32.xlu0 %v19264_v31, %s18576_s3 }
 0x67b   :  { %4421 = vrot.lane.b32.xlu1 %v19254_v59, %s18576_s3 }
 0x67c   :  { %5953 = vrot.lane.b32.xlu0 %v24691_v53, %s18577_s4 }
 0x67f   :  { %4425 = vrot.lane.b32.xlu1 %v19262_v34, %s18576_s3 }
 0x680   :  { %5957 = vrot.lane.b32.xlu0 %v24692_v15, %s18577_s4 }
 0x683   :  { %5955 = vrot.lane.b32.xlu1 %v24693_v58, %s18577_s4 }
 0x684   :  { %5961 = vrot.lane.b32.xlu0 %v24694_v18, %s18577_s4 }
 0x687   :  { %5959 = vrot.lane.b32.xlu1 %v24695_v17, %s18577_s4 }
 0x688   :  { %5965 = vrot.lane.b32.xlu0 %v24696_v25, %s18577_s4 }
 0x68b   :  { %5963 = vrot.lane.b32.xlu1 %v24697_v42, %s18577_s4 }
 0x68c   :  { %5969 = vrot.lane.b32.xlu0 %v19240_v0, %s18577_s4 }
 0x68f   :  { %5967 = vrot.lane.b32.xlu1 %v24698_v3, %s18577_s4 }
 0x690   :  { %5973 = vrot.lane.b32.xlu0 %v19248_v11, %s18577_s4 }
 0x693   :  { %5971 = vrot.lane.b32.xlu1 %v19238_v23, %s18577_s4 }
 0x696   :  { %v3000_v62 = vpop.xlane.xlu1 %2999 }
 0x697   :  { %18344 = vrcp.f32 %v3000_v62  ;;  %5975 = vrot.lane.b32.xlu1 %v19246_v35, %s18577_s4  ;;  %v2998_v51 = vpop.xlane.xlu0 %2997 }
 0x698   :  { %18346 = vrcp.f32 %v2998_v51 }
 0x69b   :  { %v3004_v63 = vpop.xlane.xlu0 %3003 }
 0x69c   :  { %18348 = vrcp.f32 %v3004_v63 }
 0x69f   :  { %v3002_v29 = vpop.xlane.xlu1 %3001  ;;  %v3008_v0 = vpop.xlane.xlu0 %3007 }
 0x6a0   :  { %18350 = vrcp.f32 %v3002_v29 }
 0x6a1   :  { %v18345_v14 = vpop.eup %18344  ;;  %18352 = vrcp.f32 %v3008_v0 }
 0x6a2   :  { %v18347_v60 = vpop.eup %18346  ;;  %v3032_v23 = vmul.f32 %v18345_v14, %v20066_v5 }
 0x6a3   :  { %v3006_v7 = vpop.xlane.xlu1 %3005  ;;  %v3012_v11 = vpop.xlane.xlu0 %3011  ;;  %v3030_v49 = vmul.f32 %v18347_v60, %v20068_v56 }
 0x6a4   :  { %18354 = vrcp.f32 %v3006_v7  ;;  %v20201_v32 = vand.u32 4294901760, %v3032_v23 }
 0x6a5   :  { %18356 = vrcp.f32 %v3012_v11  ;;  %v20195_v12 = vand.u32 4294901760, %v3030_v49 }
 0x6a6   :  { %v18349_v35 = vpop.eup %18348 }
 0x6a7   :  { %v3010_v1 = vpop.xlane.xlu1 %3009  ;;  %v3016_v10 = vpop.xlane.xlu0 %3015  ;;  %v20198_v41 = vsub.f32 %v3030_v49, %v20195_v12  ;;  %v3036_v20 = vmul.f32 %v18349_v35, %v20074_v28  ;;  %v20211_v28 = vsub.f32 %v3032_v23, %v20201_v32 }
 0x6a8   :  { %18358 = vrcp.f32 %v3010_v1 }
 0x6a9   :  { %24699 = vst [vmem:[#allocation26_spill] sm:$0xff] %v20198_v41  ;;  %18360 = vrcp.f32 %v3016_v10  ;;  %v24272_v56 = vand.u32 4294901760, %v20198_v41  ;;  %v20204_v5 = vand.u32 4294901760, %v3036_v20  ;;  %24700 = vst [vmem:[#allocation33_spill] sm:$0xff] %v20211_v28  ;;  %v24271_v17 = vand.u32 4294901760, %v20211_v28 }
 0x6aa   :  { %v18351_v16 = vpop.eup %18350 }
 0x6ab   :  { %v18353_v47 = vpop.eup %18352  ;;  %v3014_v30 = vpop.xlane.xlu1 %3013  ;;  %v3193_v36 = vsub.f32 %v20198_v41, %v24272_v56  ;;  %v3034_v13 = vmul.f32 %v18351_v16, %v20081_v26  ;;  %v20217_v39 = vsub.f32 %v3036_v20, %v20204_v5 }
 0x6ac   :  { %v3020_v6 = vpop.xlane.xlu0 %3019  ;;  %18362 = vrcp.f32 %v3014_v30  ;;  %v3040_v54 = vmul.f32 %v18353_v47, %v20079_v48 }
 0x6ad   :  { %18364 = vrcp.f32 %v3020_v6  ;;  %v3194_v46 = vand.u32 4294901760, %v3193_v36  ;;  %v20214_v40 = vand.u32 4294901760, %v3034_v13  ;;  %24701 = vst [vmem:[#allocation19_spill] sm:$0xff] %v20217_v39  ;;  %v24269_v51 = vand.u32 4294901760, %v20217_v39 }
 0x6ae   :  { %v18355_v8 = vpop.eup %18354  ;;  %v20219_v53 = vand.u32 4294901760, %v3040_v54 }
 0x6af   :  { %v18357_v15 = vpop.eup %18356  ;;  %v3018_v58 = vpop.xlane.xlu1 %3017  ;;  %14722 = vmatprep.mubr.f32.mxu0 %v3194_v46  ;;  %v3038_v18 = vmul.f32 %v18355_v8, %v20089_v22  ;;  %v20224_v48 = vsub.f32 %v3034_v13, %v20214_v40 }
 0x6b0   :  { %v3024_v26 = vpop.xlane.xlu0 %3023  ;;  %18366 = vrcp.f32 %v3018_v58  ;;  %v3044_v25 = vmul.f32 %v18357_v15, %v20087_v4  ;;  %v20230_v3 = vsub.f32 %v3040_v54, %v20219_v53  ;;  %v20242_v4 = vsub.f32 %v20211_v28, %v24271_v17 }
 0x6b1   :  { %24702 = vst [vmem:[#allocation37_spill] sm:$0xff] %v20224_v48  ;;  %v20227_v42 = vand.u32 4294901760, %v3038_v18  ;;  %v24270_v7 = vand.u32 4294901760, %v20224_v48 }
 0x6b2   :  { %24703 = vst [vmem:[#allocation22_spill] sm:$0xff] %v20230_v3  ;;  %v18359_v62 = vpop.eup %18358  ;;  %v20233_v63 = vand.u32 4294901760, %v3044_v25  ;;  %v24267_v49 = vand.u32 4294901760, %v20230_v3 }
 0x6b3   :  { %v18361_v29 = vpop.eup %18360  ;;  %v3022_v22 = vpop.xlane.xlu1 %3021  ;;  %v20236_v14 = vsub.f32 %v3038_v18, %v20227_v42  ;;  %v3042_v60 = vmul.f32 %v18359_v62, %v20097_v52  ;;  %v20252_v52 = vsub.f32 %v20217_v39, %v24269_v51  ;;  %v20268_v13 = vsub.f32 %v20224_v48, %v24270_v7 }
 0x6b4   :  { %v3028_v0 = vpop.xlane.xlu0 %3027  ;;  %18368 = vrcp.f32 %v3022_v22  ;;  %v3048_v11 = vmul.f32 %v18361_v29, %v20095_v45  ;;  %v20256_v10 = vsub.f32 %v3044_v25, %v20233_v63  ;;  %v20276_v46 = vsub.f32 %v20230_v3, %v24267_v49 }
 0x6b5   :  { %24704 = vst [vmem:[#allocation24_spill] sm:$0xff] %v20236_v14  ;;  %18370 = vrcp.f32 %v3024_v26  ;;  %v20247_v23 = vand.u32 4294901760, %v3042_v60  ;;  %v24268_v1 = vand.u32 4294901760, %v20236_v14  ;;  %v3214_v49 = vand.u32 4294901760, %v20268_v13 }
 0x6b6   :  { %v18363_v35 = vpop.eup %18362  ;;  %24705 = vst [vmem:[#allocation27_spill] sm:$0xff] %v20256_v10  ;;  %v20258_v20 = vand.u32 4294901760, %v3048_v11  ;;  %v24273_v18 = vand.u32 4294901760, %v20256_v10 }
 0x6b7   :  { %v18365_v16 = vpop.eup %18364  ;;  %v3026_v45 = vpop.xlane.xlu1 %3025  ;;  %v20261_v30 = vsub.f32 %v3042_v60, %v20247_v23  ;;  %v3046_v6 = vmul.f32 %v18363_v35, %v20104_v21  ;;  %v20285_v26 = vsub.f32 %v20236_v14, %v24268_v1  ;;  %v24745_v14 = vld [vmem:[#allocation62_spill] sm:$0xff] }
 0x6b8   :  { %v3090_v47 = vpop.permute.xlu0 %3089  ;;  %v20271_v54 = vsub.f32 %v3048_v11, %v20258_v20  ;;  %18372 = vrcp.f32 %v3026_v45  ;;  %v3052_v21 = vmul.f32 %v18365_v16, %v20102_v57 }
 0x6b9   :  { %24706 = vst [vmem:[#allocation6_spill] sm:$0xff] %v20261_v30  ;;  %v20278_v8 = vand.u32 4294901760, %v3046_v6  ;;  %18374 = vrcp.f32 %v3028_v0  ;;  %v3152_v25 = vand.u32 4294901760, %v3090_v47  ;;  %v24275_v22 = vand.u32 4294901760, %v20261_v30 }
 0x6ba   :  { %24707 = vst [vmem:[#allocation31_spill] sm:$0xff] %v20271_v54  ;;  %v18367_v15 = vpop.eup %18366  ;;  %v20290_v11 = vand.u32 4294901760, %v3052_v21  ;;  %v24277_v16 = vand.u32 4294901760, %v20271_v54  ;;  %v3234_v7 = vand.u32 4294901760, %v20285_v26 }
 0x6bb   :  { %v3092_v62 = vpop.permute.xlu1 %3091  ;;  %v3050_v60 = vmul.f32 %v18367_v15, %v20110_v2  ;;  %v20296_v35 = vsub.f32 %v3046_v6, %v20278_v8  ;;  %v20310_v6 = vsub.f32 %v20256_v10, %v24273_v18  ;;  %v20315_v56 = vsub.f32 %v3090_v47, %v3152_v25 }
 0x6bc   :  { %v4432_v29 = vpop.permute.xlu0 %4431  ;;  %24708 = vst [vmem:[#allocation35_spill] sm:$0xff] %v20290_v11  ;;  %v3155_v57 = vand.u32 4294901760, %v3092_v62  ;;  %v20325_v26 = vsub.f32 %v20261_v30, %v24275_v22 }
 0x6bd   :  { %v20293_v0 = vsel %vm1566_vm1, %v4432_v29, 0  ;;  %24709 = vst [vmem:[#allocation39_spill] sm:$0xff] %v20296_v35  ;;  %v20302_v51 = vand.u32 4294901760, %v3050_v60  ;;  %v20313_v29 = vsub.f32 %v3052_v21, %v20290_v11 }
 0x6be   :  { %v24274_v45 = vand.u32 4294901760, %v20293_v0  ;;  %v18369_v2 = vpop.eup %18368  ;;  %v20304_v15 = vpack.c.bf16 %v3155_v57, %v3152_v25  ;;  %v20337_v25 = vsub.f32 %v20271_v54, %v24277_v16 }
 0x6bf   :  { %24711 = vst [vmem:[#allocation30_spill] sm:$0xff] %v20313_v29  ;;  %v18371_v17 = vpop.eup %18370  ;;  %v4428_v1 = vpop.permute.xlu1 %4427  ;;  %v3054_v18 = vmul.f32 %v18369_v2, %v20122_v55  ;;  %v20344_v55 = vsub.f32 %v3050_v60, %v20302_v51 }
 0x6c0   :  { %24710 = vst [vmem:[#allocation15_spill] sm:$0xff] %v20304_v15  ;;  %v20320_v13 = vsub.f32 %v20293_v0, %v24274_v45  ;;  %v4436_v58 = vpop.permute.xlu0 %4435  ;;  %v4491_v21 = vsel %vm1566_vm1, %v4428_v1, 0  ;;  %16735 = vmatprep.subr.bf16.mxu0 %v20304_v15  ;;  %v20339_v45 = vsub.f32 %v3092_v62, %v3155_v57  ;;  %v24713_v1 = vld [vmem:[#allocation48_spill] sm:$0xff]  ;;  %v3056_v16 = vmul.f32 %v18371_v17, %v20108_v43 }
 0x6c1   :  { %v20330_v36 = vsel %vm1566_vm1, %v4436_v58, 0  ;;  %v4524_v22 = vand.u32 4294901760, %v4491_v21  ;;  %16737 = vmatpush3.bf16.msra.mxu0 %v20304_v15  ;;  %24712 = vst [vmem:[#allocation18_spill] sm:$0xff] %v20344_v55  ;;  %v20349_v47 = vand.u32 4294901760, %v3054_v18  ;;  %v3254_v58 = vand.u32 4294901760, %v20325_v26 }
 0x6c2   :  { %v24284_v31 = vand.u32 4294901760, %v20330_v36  ;;  %16739 = vmatprep.subr.bf16.mxu0 %v24713_v1  ;;  %v18373_v62 = vpop.eup %18372  ;;  %v24715_v43 = vand.u32 4294901760, %v20242_v4  ;;  %v24716_v17 = vand.u32 4294901760, %v20296_v35 }
 0x6c3   :  { %24714 = vst [vmem:[#allocation20_spill] sm:$0xff] %v20349_v47  ;;  %v20353_v34 = vsub.f32 %v4491_v21, %v4524_v22  ;;  %v4430_v33 = vpop.permute.xlu1 %4429  ;;  %v18375_v44 = vpop.eup %18374 }
 0x6c4   :  { %v20358_v60 = vsub.f32 %v20330_v36, %v24284_v31  ;;  %v4440_v59 = vpop.permute.xlu0 %4439  ;;  %v4493_v2 = vsel %vm1566_vm1, %v4430_v33, 0  ;;  %14723 = vmatmul.mubr.f32.vlgmr.msra.gmra.mrb[16].mxu0 %v24715_v43  ;;  %v20370_v21 = vsub.f32 %v20296_v35, %v24716_v17  ;;  %v24717_v33 = vand.u32 4294901760, %v20313_v29 }
 0x6c5   :  { %v20363_v15 = vsel %vm1566_vm1, %v4440_v59, 0  ;;  %v4527_v24 = vand.u32 4294901760, %v4493_v2  ;;  %14725 = vmatprep.mubr.f32.mxu0 %v3214_v49  ;;  %16741 = vmatpush3.bf16.msra.mxu0 %v24713_v1  ;;  %v20384_v43 = vsub.f32 %v3054_v18, %v20349_v47  ;;  %v20386_v17 = vand.u32 4294901760, %v3056_v16 }
 0x6c6   :  { %v24291_v26 = vand.u32 4294901760, %v20363_v15  ;;  %16743 = vmatprep.subr.bf16.mxu0 %v19579_v9  ;;  %v20381_v4 = vsub.f32 %v20313_v29, %v24717_v33  ;;  %v3058_v31 = vmul.f32 %v18373_v62, %v20128_v50  ;;  %v24721_v50 = vand.u32 4294901760, %v20252_v52 }
 0x6c7   :  { %24718 = vst [vmem:[#allocation23_spill] sm:$0xff] %v20384_v43  ;;  %24719 = vst [vmem:[#allocation29_spill] sm:$0xff] %v20386_v17  ;;  %v20390_v57 = vpack.c.bf16 %v4527_v24, %v4524_v22  ;;  %v20392_v1 = vsub.f32 %v4493_v2, %v4527_v24  ;;  %v4434_v33 = vpop.permute.xlu1 %4433  ;;  %v20407_v24 = vsub.f32 %v3056_v16, %v20386_v17 }
 0x6c8   :  { %v20397_v59 = vsub.f32 %v20363_v15, %v24291_v26  ;;  %v4444_v29 = vpop.permute.xlu0 %4443  ;;  %v4497_v18 = vsel %vm1566_vm1, %v4434_v33, 0  ;;  %14726 = vmatmul.mubr.f32.gmra.mrb[18].mxu0 %v24721_v50  ;;  %v3274_v26 = vand.u32 4294901760, %v20370_v21  ;;  %v24723_v33 = vand.u32 4294901760, %v20344_v55 }
 0x6c9   :  { %24720 = vst [vmem:[#allocation38_spill] sm:$0xff] %v20390_v57  ;;  %v20401_v54 = vsel %vm1566_vm1, %v4444_v29, 0  ;;  %24722 = vst [vmem:[#allocation17_spill] sm:$0xff] %v20407_v24  ;;  %v4533_v2 = vand.u32 4294901760, %v4497_v18  ;;  %14728 = vmatprep.mubr.f32.mxu0 %v3234_v7  ;;  %16745 = vmatpush3.bf16.msra.mxu0 %v19579_v9  ;;  %v20421_v50 = vand.u32 4294901760, %v3058_v31  ;;  %v24725_v7 = vand.u32 4294901760, %v20315_v56 }
 0x6ca   :  { %v24296_v62 = vand.u32 4294901760, %v20401_v54  ;;  %v20415_v29 = vsub.f32 %v20344_v55, %v24723_v33  ;;  %16899 = vmatprep.subr.bf16.mxu1 %v20390_v57  ;;  %16747 = vmatprep.subr.bf16.mxu0 %v19597_v19  ;;  %v24726_v21 = vand.u32 4294901760, %v20293_v0  ;;  %v3060_v55 = vmul.f32 %v18375_v44, %v20119_v38 }
 0x6cb   :  { %24724 = vst [vmem:[#allocation21_spill] sm:$0xff] %v20421_v50  ;;  %v20426_v9 = vsub.f32 %v20315_v56, %v24725_v7  ;;  %v20432_v33 = vsub.f32 %v4497_v18, %v4533_v2  ;;  %16901 = vmatpush3.bf16.xpose.msra.mxu1 %v20390_v57  ;;  %v4438_v16 = vpop.permute.xlu1 %4437  ;;  %v24728_v0 = vand.u32 4294901760, %v20276_v46  ;;  %v24729_v18 = vand.u32 4294901760, %v20384_v43 }
 0x6cc   :  { %v20430_v49 = vpack.c.bf16 %v4533_v2, %v24726_v21  ;;  %v20437_v52 = vsub.f32 %v20401_v54, %v24296_v62  ;;  %v4448_v22 = vpop.permute.xlu0 %4447  ;;  %v4501_v7 = vsel %vm1566_vm1, %v4438_v16, 0  ;;  %v3294_v44 = vand.u32 4294901760, %v20415_v29 }
 0x6cd   :  { %v20443_v35 = vsel %vm1566_vm1, %v4448_v22, 0  ;;  %14729 = vmatmul.mubr.f32.gmra.mrb[20].mxu0 %v24728_v0  ;;  %v20450_v2 = vsub.f32 %v20384_v43, %v24729_v18  ;;  %v4539_v57 = vand.u32 4294901760, %v4501_v7  ;;  %v3453_v16 = vand.u32 4294901760, %v20426_v9 }
 0x6ce   :  { %24727 = vst [vmem:[#allocation25_spill] sm:$0xff] %v20430_v49  ;;  %v24299_v38 = vand.u32 4294901760, %v20443_v35  ;;  %14731 = vmatprep.mubr.f32.mxu0 %v3254_v58  ;;  %16749 = vmatpush3.bf16.msra.mxu0 %v19597_v19  ;;  %v20462_v0 = vand.u32 4294901760, %v3060_v55  ;;  %v20472_v62 = vsub.f32 %v3058_v31, %v20421_v50  ;;  %v24732_v22 = vand.u32 4294901760, %v20339_v45 }
 0x6cf   :  { %16903 = vmatprep.subr.bf16.mxu1 %v20430_v49  ;;  %16751 = vmatprep.subr.bf16.mxu0 %v19611_v61  ;;  %v20464_v18 = vsub.f32 %v4501_v7, %v4539_v57  ;;  %v4442_v58 = vpop.permute.xlu1 %4441  ;;  %v24733_v7 = vand.u32 4294901760, %v20310_v6  ;;  %v24734_v43 = vand.u32 4294901760, %v20407_v24  ;;  %v24735_v6 = vand.u32 4294901760, %v20330_v36 }
 0x6d0   :  { %24730 = vst [vmem:[#allocation28_spill] sm:$0xff] %v20462_v0  ;;  %v20469_v19 = vsub.f32 %v20443_v35, %v24299_v38  ;;  %v4452_v29 = vpop.permute.xlu0 %4451  ;;  %24731 = vst [vmem:[#allocation32_spill] sm:$0xff] %v20472_v62  ;;  %v3459_v46 = vsub.f32 %v20339_v45, %v24732_v22  ;;  %v4505_v9 = vsel %vm1566_vm1, %v4442_v58, 0  ;;  %v3314_v38 = vand.u32 4294901760, %v20450_v2  ;;  %v24737_v2 = vld [vmem:[#allocation60_spill] sm:$0xff] }
 0x6d1   :  { %v20479_v21 = vsel %vm1566_vm1, %v4452_v29, 0  ;;  %14732 = vmatmul.mubr.f32.gmra.mrb[22].mxu0 %v24733_v7  ;;  %v20487_v10 = vsub.f32 %v20407_v24, %v24734_v43  ;;  %v4545_v22 = vand.u32 4294901760, %v4505_v9  ;;  %v20495_v29 = vpack.c.bf16 %v4539_v57, %v24735_v6 }
 0x6d2   :  { %14734 = vmatprep.mubr.f32.mxu0 %v3274_v26  ;;  %16753 = vmatpush3.bf16.msra.mxu0 %v19611_v61  ;;  %v20499_v7 = vsub.f32 %v3060_v55, %v20462_v0  ;;  %v24738_v43 = vand.u32 4294901760, %v20315_v56  ;;  %v24739_v31 = vand.u32 4294901760, %v20339_v45  ;;  %v24741_v58 = vand.u32 4294901760, %v20353_v34 }
 0x6d3   :  { %24736 = vst [vmem:[#allocation36_spill] sm:$0xff] %v20495_v29  ;;  %16755 = vmatprep.subr.bf16.mxu0 %v24737_v2  ;;  %v20510_v61 = vsub.f32 %v4505_v9, %v4545_v22  ;;  %v24742_v36 = vand.u32 4294901760, %v20479_v21  ;;  %16905 = vmatpush3.bf16.xpose.msra.mxu1 %v20430_v49  ;;  %v4446_v55 = vpop.permute.xlu1 %4445  ;;  %v3460_v49 = vand.u32 4294901760, %v3459_v46  ;;  %v24747_v46 = vand.u32 4294901760, %v20432_v33 }
 0x6d4   :  { %v20505_v30 = vpack.c.bf16 %v24739_v31, %v24738_v43  ;;  %v4768_v26 = vsub.f32 %v20353_v34, %v24741_v58  ;;  %v4456_v6 = vpop.permute.xlu0 %4455  ;;  %v24743_v31 = vand.u32 4294901760, %v20392_v1  ;;  %16907 = vmatprep.subr.bf16.mxu1 %v20495_v29  ;;  %v24744_v58 = vand.u32 4294901760, %v20337_v25 }
 0x6d5   :  { %v20515_v57 = vsub.f32 %v20479_v21, %v24742_v36  ;;  %v20527_v9 = vsel %vm1566_vm1, %v4456_v6, 0  ;;  %v3324_v36 = vand.u32 4294901760, %v20487_v10  ;;  %v24746_v25 = vand.u32 4294901760, %v20320_v13 }
 0x6d6   :  { %24740 = vst [vmem:[#allocation40_spill] sm:$0xff] %v20505_v30  ;;  %v4775_v43 = vsub.f32 %v20392_v1, %v24743_v31  ;;  %v20523_v30 = vsel %vm1566_vm1, %v4446_v55, 0  ;;  %14735 = vmatmul.mubr.f32.gmra.mrb[24].mxu0 %v24744_v58  ;;  %v24322_v31 = vand.u32 4294901760, %v20527_v9  ;;  %v4769_v6 = vand.u32 4294901760, %v4768_v26 }
 0x6d7   :  { %v24319_v3 = vand.u32 4294901760, %v20523_v30  ;;  %14737 = vmatprep.mubr.f32.mxu0 %v3294_v44  ;;  %16757 = vmatpush3.bf16.msra.mxu0 %v24737_v2  ;;  %v4782_v10 = vsub.f32 %v20320_v13, %v24746_v25  ;;  %v4789_v58 = vsub.f32 %v20432_v33, %v24747_v46  ;;  %v4450_v26 = vpop.permute.xlu1 %4449  ;;  %v24748_v24 = vand.u32 4294901760, %v20472_v62 }
 0x6d8   :  { %16759 = vmatprep.subr.bf16.mxu0 %v24745_v14  ;;  %v4776_v39 = vand.u32 4294901760, %v4775_v43  ;;  %v20552_v2 = vsub.f32 %v20527_v9, %v24322_v31  ;;  %v4396_v43 = vpop.permute.xlu0 %4395  ;;  %v24749_v55 = vand.u32 4294901760, %v20358_v60  ;;  %v20561_v48 = vsel %vm1566_vm1, %v4450_v26, 0 }
 0x6d9   :  { %v20547_v44 = vsub.f32 %v20523_v30, %v24319_v3  ;;  %v3333_v25 = vsub.f32 %v20472_v62, %v24748_v24  ;;  %v4459_v3 = vsel %vm1566_vm1, %v4396_v43, 0  ;;  %v24750_v28 = vand.u32 4294901760, %v20381_v4 }
 0x6da   :  { %v4796_v46 = vsub.f32 %v20358_v60, %v24749_v55  ;;  %v16766_v31 = vpack.c.bf16 %v3460_v49, %v3453_v16  ;;  %v20566_v41 = vpack.c.bf16 %v4776_v39, %v4769_v6  ;;  %v24752_v0 = vand.u32 4294901760, %v20363_v15 }
 0x6db   :  { %14738 = vmatmul.mubr.f32.gmra.mrb[26].mxu0 %v24750_v28  ;;  %v24332_v24 = vand.u32 4294901760, %v20510_v61  ;;  %v24331_v62 = vand.u32 4294901760, %v20561_v48  ;;  %v20574_v55 = vand.u32 4294901760, %v4459_v3  ;;  %v24755_v28 = vand.u32 4294901760, %v20499_v7  ;;  %16909 = vmatpush3.bf16.xpose.msra.mxu1 %v20495_v29 }
 0x6dc   :  { %24751 = vst [vmem:[#allocation42_spill] sm:$0xff] %v20566_v41  ;;  %v20570_v50 = vpack.c.bf16 %v4545_v22, %v24752_v0  ;;  %14740 = vmatprep.mubr.f32.mxu0 %v3314_v38  ;;  %16761 = vmatpush3.bf16.msra.mxu0 %v24745_v14  ;;  %v4783_v4 = vand.u32 4294901760, %v4782_v10  ;;  %v4790_v49 = vand.u32 4294901760, %v4789_v58  ;;  %v24756_v15 = vand.u32 4294901760, %v20464_v18  ;;  %v4454_v14 = vpop.permute.xlu1 %4453  ;;  %v4400_v22 = vpop.permute.xlu0 %4399  ;;  %v24872_v41 = vld [vmem:[#allocation24_spill] sm:$0xff] }
 0x6dd   :  { %24754 = vst [vmem:[#allocation5_spill] sm:$0xff] %v20574_v55  ;;  %16763 = vmatprep.subr.bf16.mxu0 %v20130_v27  ;;  %v3343_v39 = vsub.f32 %v20499_v7, %v24755_v28  ;;  %v20587_v0 = vsub.f32 %v20561_v48, %v24331_v62  ;;  %v20590_v38 = vsub.f32 %v4459_v3, %v20574_v55  ;;  %v3334_v6 = vand.u32 4294901760, %v3333_v25 }
 0x6de   :  { %24753 = vst [vmem:[#allocation3_spill] sm:$0xff] %v20570_v50  ;;  %v4803_v16 = vsub.f32 %v20464_v18, %v24756_v15  ;;  %v4797_v26 = vand.u32 4294901760, %v4796_v46  ;;  %v20594_v10 = vsel %vm1566_vm1, %v4454_v14, 0  ;;  %16911 = vmatprep.subr.bf16.mxu1 %v20570_v50  ;;  %v20597_v58 = vpack.c.bf16 %v4790_v49, %v4783_v4 }
 0x6df   :  { %24757 = vst [vmem:[#allocation2_spill] sm:$0xff] %v20590_v38  ;;  %14741 = vmatmul.mubr.f32.gmra.mrb[28].mxu0 %v3324_v36  ;;  %v24759_v28 = vand.u32 4294901760, %v20397_v59  ;;  %v24336_v15 = vand.u32 4294901760, %v20590_v38  ;;  %v24333_v62 = vand.u32 4294901760, %v20594_v10  ;;  %v3344_v46 = vand.u32 4294901760, %v3343_v39 }
 0x6e0   :  { %24758 = vst [vmem:[#allocation8_spill] sm:$0xff] %v20597_v58  ;;  %v4804_v43 = vand.u32 4294901760, %v4803_v16  ;;  %14743 = vmatprep.mubr.f32.mxu0 %v3334_v6  ;;  %16765 = vmatpush3.bf16.msra.mxu0 %v20130_v27  ;;  %v4817_v36 = vsub.f32 %v20510_v61, %v24332_v24  ;;  %v4458_v16 = vpop.permute.xlu1 %4457  ;;  %v4404_v6 = vpop.permute.xlu0 %4403  ;;  %v24762_v4 = vand.u32 4294901760, %v20401_v54  ;;  %v24767_v54 = vand.u32 4294901760, %v20547_v44 }
 0x6e1   :  { %v4810_v3 = vsub.f32 %v20397_v59, %v24759_v28  ;;  %16767 = vmatprep.subr.bf16.mxu0 %v16766_v31  ;;  %v20615_v49 = vsub.f32 %v20594_v10, %v24333_v62  ;;  %v4607_v27 = vsub.f32 %v20590_v38, %v24336_v15  ;;  %v20621_v39 = vsel %vm1566_vm1, %v4458_v16, 0 }
 0x6e2   :  { %v20606_v14 = vpack.c.bf16 %v4804_v43, %v4797_v26  ;;  %v4818_v43 = vand.u32 4294901760, %v4817_v36  ;;  %v24761_v28 = vand.u32 4294901760, %v20437_v52  ;;  %v24763_v62 = vand.u32 4294901760, %v20523_v30 }
 0x6e3   :  { %14744 = vmatmul.mubr.f32.gmra.mrb[30].mxu0 %v3344_v46  ;;  %v4811_v26 = vand.u32 4294901760, %v4810_v3  ;;  %v24337_v15 = vand.u32 4294901760, %v20621_v39  ;;  %v24344_v3 = vand.u32 4294901760, %v20615_v49  ;;  %v24765_v46 = vld [vmem:[#allocation43_spill] sm:$0xff]  ;;  %v4608_v36 = vand.u32 4294901760, %v4607_v27  ;;  %16913 = vmatpush3.bf16.xpose.msra.mxu1 %v20570_v50 }
 0x6e4   :  { %24760 = vst [vmem:[#allocation4_spill] sm:$0xff] %v20606_v14  ;;  %v4824_v24 = vsub.f32 %v20437_v52, %v24761_v28  ;;  %v20630_v25 = vpack.c.bf16 %v24763_v62, %v24762_v4  ;;  %16769 = vmatpush3.bf16.msra.mxu0 %v16766_v31  ;;  %14778 = vmatprep.mubr.f32.mxu0 %v20195_v12  ;;  %v4398_v31 = vpop.permute.xlu1 %4397  ;;  %v4408_v4 = vpop.permute.xlu0 %4407  ;;  %v4463_v38 = vsel %vm1566_vm1, %v4400_v22, 0  ;;  %v24772_v29 = vand.u32 4294901760, %v20515_v57 }
 0x6e5   :  { %16771 = vmatprep.subr.bf16.mxu0 %v24765_v46  ;;  %v20637_v16 = vpack.c.bf16 %v4818_v43, %v4811_v26  ;;  %v4831_v30 = vsub.f32 %v20547_v44, %v24767_v54  ;;  %v20645_v62 = vsub.f32 %v20621_v39, %v24337_v15  ;;  %15058 = vmatprep.mubr.f32.mxu1 %v4608_v36  ;;  %v24768_v43 = vand.u32 4294901760, %v20469_v19 }
 0x6e6   :  { %24764 = vst [vmem:[#allocation10_spill] sm:$0xff] %v20630_v25  ;;  %16915 = vmatprep.subr.bf16.mxu1 %v20630_v25  ;;  %v4825_v27 = vand.u32 4294901760, %v4824_v24  ;;  %v4859_v15 = vsub.f32 %v20615_v49, %v24344_v3  ;;  %v24770_v24 = vand.u32 4294901760, %v20587_v0 }
 0x6e7   :  { %24766 = vst [vmem:[#allocation7_spill] sm:$0xff] %v20637_v16  ;;  %v4832_v26 = vand.u32 4294901760, %v4831_v30  ;;  %v4838_v54 = vsub.f32 %v20469_v19, %v24768_v43  ;;  %14779 = vmatmul.mubr.f32.vlgmr.msra.gmra.mrb[16].mxu0 %v20201_v32  ;;  %v24771_v30 = vld [vmem:[#allocation46_spill] sm:$0xff]  ;;  %v4852_v16 = vsub.f32 %v20515_v57, %v24772_v29 }
 0x6e8   :  { %14781 = vmatprep.mubr.f32.mxu0 %v20214_v40  ;;  %16773 = vmatpush3.bf16.msra.mxu0 %v24765_v46  ;;  %v4845_v36 = vsub.f32 %v20587_v0, %v24770_v24  ;;  %v4402_v43 = vpop.permute.xlu1 %4401  ;;  %v4412_v50 = vpop.permute.xlu0 %4411  ;;  %v24776_v24 = vand.u32 4294901760, %v20645_v62  ;;  %v20685_v46 = vand.u32 4294901760, %v4463_v38 }
 0x6e9   :  { %v20660_v28 = vpack.c.bf16 %v4832_v26, %v4825_v27  ;;  %16775 = vmatprep.subr.bf16.mxu0 %v24771_v30  ;;  %v4839_v55 = vand.u32 4294901760, %v4838_v54  ;;  %v24773_v27 = vand.u32 4294901760, %v20443_v35  ;;  %v24774_v26 = vand.u32 4294901760, %v20561_v48  ;;  %v24779_v35 = vld [vmem:[#allocation50_spill] sm:$0xff] }
 0x6ea   :  { %v4846_v3 = vand.u32 4294901760, %v4845_v36  ;;  %v4873_v22 = vsub.f32 %v20645_v62, %v24776_v24  ;;  %v4853_v29 = vand.u32 4294901760, %v4852_v16  ;;  %v4860_v36 = vand.u32 4294901760, %v4859_v15  ;;  %24778 = vst [vmem:[#allocation62_spill] sm:$0xff] %v20685_v46 }
 0x6eb   :  { %24769 = vst [vmem:[#allocation9_spill] sm:$0xff] %v20660_v28  ;;  %v20675_v28 = vpack.c.bf16 %v24774_v26, %v24773_v27  ;;  %14782 = vmatmul.mubr.f32.gmra.mrb[18].mxu0 %v20204_v5  ;;  %16917 = vmatpush3.bf16.xpose.msra.mxu1 %v20630_v25  ;;  %v4467_v26 = vsel %vm1566_vm1, %v4404_v6, 0  ;;  %v4461_v24 = vsel %vm1566_vm1, %v4398_v31, 0  ;;  %v24781_v15 = vand.u32 4294901760, %v20552_v2 }
 0x6ec   :  { %14784 = vmatprep.mubr.f32.mxu0 %v20227_v42  ;;  %16777 = vmatpush3.bf16.msra.mxu0 %v24771_v30  ;;  %v20683_v54 = vpack.c.bf16 %v4846_v3, %v4839_v55  ;;  %v4406_v48 = vpop.permute.xlu1 %4405  ;;  %v4416_v27 = vpop.permute.xlu0 %4415  ;;  %v20692_v14 = vpack.c.bf16 %v4860_v36, %v4853_v29  ;;  %v4471_v55 = vsel %vm1566_vm1, %v4408_v4, 0  ;;  %v4874_v16 = vand.u32 4294901760, %v4873_v22  ;;  %v24786_v29 = vld [vmem:[#allocation53_spill] sm:$0xff] }
 0x6ed   :  { %24775 = vst [vmem:[#allocation48_spill] sm:$0xff] %v20675_v28  ;;  %16779 = vmatprep.subr.bf16.mxu0 %v24779_v35  ;;  %16919 = vmatprep.subr.bf16.mxu1 %v20675_v28  ;;  %v4866_v3 = vsub.f32 %v20552_v2, %v24781_v15  ;;  %v20703_v6 = vpack.c.bf16 %v20392_v1, %v20353_v34  ;;  %v20708_v30 = vand.u32 4294901760, %v4467_v26  ;;  %v20710_v4 = vand.u32 4294901760, %v4461_v24 }
 0x6ee   :  { %24777 = vst [vmem:[#allocation60_spill] sm:$0xff] %v20683_v54  ;;  %24780 = vst [vmem:[#allocation43_spill] sm:$0xff] %v20692_v14  ;;  %v20706_v31 = vsub.f32 %v4463_v38, %v20685_v46  ;;  %v20715_v25 = vpack.c.bf16 %v20432_v33, %v20320_v13  ;;  %v20717_v22 = vand.u32 4294901760, %v4471_v55  ;;  %v24790_v38 = vand.u32 4294901760, %v20594_v10 }
 0x6ef   :  { %14785 = vmatmul.mubr.f32.gmra.mrb[20].mxu0 %v20219_v53  ;;  %24782 = vst [vmem:[#allocation46_spill] sm:$0xff] %v20703_v6  ;;  %24784 = vst [vmem:[#allocation63_spill] sm:$0xff] %v20708_v30  ;;  %v4867_v15 = vand.u32 4294901760, %v4866_v3  ;;  %v24789_v6 = vand.u32 4294901760, %v20479_v21  ;;  %v4465_v14 = vsel %vm1566_vm1, %v4402_v43, 0  ;;  %v4475_v54 = vsel %vm1566_vm1, %v4412_v50, 0 }
 0x6f0   :  { %14787 = vmatprep.mubr.f32.mxu0 %v20247_v23  ;;  %16781 = vmatpush3.bf16.msra.mxu0 %v24779_v35  ;;  %24783 = vst [vmem:[#allocation50_spill] sm:$0xff] %v20706_v31  ;;  %24785 = vst [vmem:[#allocation64_spill] sm:$0xff] %v20710_v4  ;;  %v4410_v36 = vpop.permute.xlu1 %4409  ;;  %v4420_v35 = vpop.permute.xlu0 %4419  ;;  %v20734_v3 = vpack.c.bf16 %v20464_v18, %v20358_v60  ;;  %v20738_v10 = vsub.f32 %v4467_v26, %v20708_v30  ;;  %v24796_v43 = vld [vmem:[#allocation56_spill] sm:$0xff]  ;;  %v24801_v21 = vand.u32 4294901760, %v20527_v9 }
 0x6f1   :  { %16783 = vmatprep.subr.bf16.mxu0 %v24786_v29  ;;  %24787 = vst [vmem:[#allocation53_spill] sm:$0xff] %v20715_v25  ;;  %24788 = vst [vmem:[#allocation65_spill] sm:$0xff] %v20717_v22  ;;  %v20723_v46 = vpack.c.bf16 %v24790_v38, %v24789_v6  ;;  %v20730_v25 = vpack.c.bf16 %v4874_v16, %v4867_v15  ;;  %v20741_v6 = vsub.f32 %v4461_v24, %v20710_v4 }
 0x6f2   :  { %24793 = vst [vmem:[#allocation68_spill] sm:$0xff] %v20734_v3  ;;  %24794 = vst [vmem:[#allocation69_spill] sm:$0xff] %v20738_v10  ;;  %v20748_v16 = vsub.f32 %v4471_v55, %v20717_v22  ;;  %v4469_v15 = vsel %vm1566_vm1, %v4406_v48, 0  ;;  %v20754_v26 = vpack.c.bf16 %v20510_v61, %v20397_v59  ;;  %v20756_v24 = vand.u32 4294901760, %v4465_v14 }
 0x6f3   :  { %24791 = vst [vmem:[#allocation66_spill] sm:$0xff] %v20723_v46  ;;  %14788 = vmatmul.mubr.f32.gmra.mrb[22].mxu0 %v20233_v63  ;;  %24792 = vst [vmem:[#allocation67_spill] sm:$0xff] %v20730_v25  ;;  %16921 = vmatpush3.bf16.xpose.msra.mxu1 %v20675_v28  ;;  %v20758_v38 = vand.u32 4294901760, %v4475_v54  ;;  %v24802_v28 = vand.u32 4294901760, %v20621_v39  ;;  %v4479_v48 = vsel %vm1566_vm1, %v4416_v27, 0  ;;  %v20776_v3 = vpack.c.bf16 %v20587_v0, %v20469_v19 }
 0x6f4   :  { %14790 = vmatprep.mubr.f32.mxu0 %v20278_v8  ;;  %16785 = vmatpush3.bf16.msra.mxu0 %v24786_v29  ;;  %24795 = vst [vmem:[#allocation70_spill] sm:$0xff] %v20741_v6  ;;  %v4414_v50 = vpop.permute.xlu1 %4413  ;;  %v20745_v29 = vpop.permute.xlu0 %4423  ;;  %24797 = vst [vmem:[#allocation56_spill] sm:$0xff] %v20748_v16  ;;  %v20796_v39 = vpack.c.bf16 %v20615_v49, %v20515_v57  ;;  %v20800_v9 = vpack.c.bf16 %v20645_v62, %v20552_v2  ;;  %v4473_v30 = vsel %vm1566_vm1, %v4410_v36, 0 }
 0x6f5   :  { %16787 = vmatprep.subr.bf16.mxu0 %v24796_v43  ;;  %16923 = vmatprep.subr.bf16.mxu1 %v20723_v46  ;;  %24798 = vst [vmem:[#allocation71_spill] sm:$0xff] %v20754_v26  ;;  %24799 = vst [vmem:[#allocation72_spill] sm:$0xff] %v20756_v24  ;;  %v20765_v55 = vpack.c.bf16 %v24802_v28, %v24801_v21  ;;  %v20772_v26 = vpack.c.bf16 %v20547_v44, %v20437_v52  ;;  %v20780_v28 = vand.u32 4294901760, %v4469_v15  ;;  %v24807_v21 = vld [vmem:[#allocation59_spill] sm:$0xff] }
 0x6f6   :  { %24800 = vst [vmem:[#allocation73_spill] sm:$0xff] %v20758_v38  ;;  %24805 = vst [vmem:[#allocation76_spill] sm:$0xff] %v20776_v3  ;;  %v20803_v4 = vsub.f32 %v4465_v14, %v20756_v24  ;;  %v20806_v25 = vsub.f32 %v4475_v54, %v20758_v38  ;;  %v4483_v3 = vsel %vm1566_vm1, %v4420_v35, 0  ;;  %v24815_v14 = vand.u32 4294901760, %v20353_v34 }
 0x6f7   :  { %14791 = vmatmul.mubr.f32.gmra.mrb[24].mxu0 %v20258_v20  ;;  %24803 = vst [vmem:[#allocation74_spill] sm:$0xff] %v20765_v55  ;;  %24804 = vst [vmem:[#allocation75_spill] sm:$0xff] %v20772_v26  ;;  %v24816_v54 = vand.u32 4294901760, %v20392_v1  ;;  %v24818_v36 = vand.u32 4294901760, %v20320_v13  ;;  %v24819_v38 = vand.u32 4294901760, %v20432_v33  ;;  %v20833_v24 = vsub.f32 %v4469_v15, %v20780_v28 }
 0x6f8   :  { %14793 = vmatprep.mubr.f32.mxu0 %v20302_v51  ;;  %16789 = vmatpush3.bf16.msra.mxu0 %v24796_v43  ;;  %24806 = vst [vmem:[#allocation77_spill] sm:$0xff] %v20780_v28  ;;  %v20783_v27 = vpop.permute.xlu1 %4417  ;;  %v20785_v22 = vpop.permute.xlu0 %5953  ;;  %v24808_v43 = vand.u32 4294901760, %v20706_v31  ;;  %24809 = vst [vmem:[#allocation59_spill] sm:$0xff] %v20796_v39  ;;  %v16798_v1 = vpack.c.bf16 %v20339_v45, %v20315_v56  ;;  %v24822_v13 = vand.u32 4294901760, %v20738_v10  ;;  %v24826_v56 = vand.u32 4294901760, %v20464_v18 }
 0x6f9   :  { %16791 = vmatprep.subr.bf16.mxu0 %v24807_v21  ;;  %24810 = vst [vmem:[#allocation78_spill] sm:$0xff] %v20800_v9  ;;  %24811 = vst [vmem:[#allocation79_spill] sm:$0xff] %v20803_v4  ;;  %v20824_v9 = vpack.c.bf16 %v24816_v54, %v24815_v14  ;;  %v20830_v35 = vpack.c.bf16 %v24819_v38, %v24818_v36  ;;  %v24823_v38 = vand.u32 4294901760, %v20741_v6  ;;  %v24825_v54 = vand.u32 4294901760, %v20358_v60 }
 0x6fa   :  { %v20790_v26 = vsub.f32 %v20706_v31, %v24808_v43  ;;  %24812 = vst [vmem:[#allocation80_spill] sm:$0xff] %v20806_v25  ;;  %v20808_v43 = vand.u32 4294901760, %v4479_v48  ;;  %v24814_v31 = vand.u32 4294901760, %v20785_v22  ;;  %24821 = vst [vmem:[#allocation84_spill] sm:$0xff] %v20833_v24  ;;  %v20846_v33 = vsub.f32 %v20738_v10, %v24822_v13  ;;  %v24862_v10 = vld [vmem:[#allocation37_spill] sm:$0xff] }
 0x6fb   :  { %14794 = vmatmul.mubr.f32.gmra.mrb[26].mxu0 %v20290_v11  ;;  %24817 = vst [vmem:[#allocation82_spill] sm:$0xff] %v20824_v9  ;;  %24820 = vst [vmem:[#allocation83_spill] sm:$0xff] %v20830_v35  ;;  %16925 = vmatpush3.bf16.xpose.msra.mxu1 %v20723_v46  ;;  %v20851_v15 = vsub.f32 %v20741_v6, %v24823_v38  ;;  %v20861_v45 = vpack.c.bf16 %v24826_v56, %v24825_v54  ;;  %v20865_v35 = vand.u32 4294901760, %v4483_v3  ;;  %v24832_v54 = vld [vmem:[#allocation21_spill] sm:$0xff]  ;;  %v24897_v11 = vld [vmem:[#allocation54_spill] sm:$0xff] }
 0x6fc   :  { %24813 = vst [vmem:[#allocation81_spill] sm:$0xff] %v20808_v43  ;;  %v20816_v39 = vsub.f32 %v20785_v22, %v24814_v31  ;;  %14796 = vmatprep.mubr.f32.mxu0 %v20349_v47  ;;  %16793 = vmatpush3.bf16.msra.mxu0 %v24807_v21  ;;  %v20837_v31 = vpop.permute.xlu1 %4421  ;;  %v20839_v34 = vpop.permute.xlu0 %5957  ;;  %v20853_v21 = vand.u32 4294901760, %v4473_v30  ;;  %v24829_v38 = vand.u32 4294901760, %v20748_v16  ;;  %v20874_v14 = vsub.f32 %v4479_v48, %v20808_v43 }
 0x6fd   :  { %16795 = vmatprep.subr.bf16.mxu0 %v20117_v37  ;;  %16927 = vmatprep.subr.bf16.mxu1 %v20765_v55  ;;  %24827 = vst [vmem:[#allocation86_spill] sm:$0xff] %v20861_v45  ;;  %24828 = vst [vmem:[#allocation87_spill] sm:$0xff] %v20865_v35  ;;  %v24831_v60 = vand.u32 4294901760, %v20839_v34  ;;  %v24833_v13 = vand.u32 4294901760, %v20397_v59  ;;  %v24834_v36 = vand.u32 4294901760, %v20510_v61  ;;  %v4477_v45 = vsel %vm1566_vm1, %v4414_v50, 0 }
 0x6fe   :  { %24824 = vst [vmem:[#allocation85_spill] sm:$0xff] %v20853_v21  ;;  %v20871_v9 = vsub.f32 %v20748_v16, %v24829_v38  ;;  %24830 = vst [vmem:[#allocation88_spill] sm:$0xff] %v20874_v14  ;;  %v24836_v16 = vand.u32 4294901760, %v20437_v52  ;;  %v24839_v59 = vand.u32 4294901760, %v20469_v19  ;;  %v24840_v61 = vand.u32 4294901760, %v20587_v0  ;;  %v24847_v0 = vld [vmem:[#allocation28_spill] sm:$0xff] }
 0x6ff   :  { %14797 = vmatmul.mubr.f32.gmra.mrb[28].mxu0 %v20386_v17  ;;  %v20879_v18 = vsub.f32 %v20839_v34, %v24831_v60  ;;  %v20888_v38 = vpack.c.bf16 %v24834_v36, %v24833_v13  ;;  %v20909_v13 = vsub.f32 %v4473_v30, %v20853_v21  ;;  %v4487_v50 = vsel %vm1566_vm1, %v20745_v29, 0  ;;  %v24882_v17 = vld [vmem:[#allocation6_spill] sm:$0xff] }
 0x700   :  { %14799 = vmatprep.mubr.f32.mxu0 %v24832_v54  ;;  %16797 = vmatpush3.bf16.msra.mxu0 %v20117_v37  ;;  %v20892_v46 = vpop.permute.xlu1 %4425  ;;  %v20894_v60 = vpop.permute.xlu0 %5961  ;;  %v24837_v37 = vand.u32 4294901760, %v20547_v44  ;;  %v20906_v36 = vpack.c.bf16 %v24840_v61, %v24839_v59  ;;  %v24843_v52 = vand.u32 4294901760, %v20515_v57  ;;  %v24844_v44 = vand.u32 4294901760, %v20615_v49 }
 0x701   :  { %24835 = vst [vmem:[#allocation89_spill] sm:$0xff] %v20888_v38  ;;  %16799 = vmatprep.subr.bf16.mxu0 %v16798_v1  ;;  %24842 = vst [vmem:[#allocation92_spill] sm:$0xff] %v20909_v13  ;;  %v24385_v48 = vand.u32 4294901760, %v20894_v60  ;;  %v20921_v19 = vsub.f32 %v4483_v3, %v20865_v35  ;;  %v24849_v29 = vand.u32 4294901760, %v20806_v25  ;;  %v24850_v57 = vand.u32 4294901760, %v20552_v2 }
 0x702   :  { %v20900_v56 = vpack.c.bf16 %v24837_v37, %v24836_v16  ;;  %24841 = vst [vmem:[#allocation91_spill] sm:$0xff] %v20906_v36  ;;  %v20918_v16 = vpack.c.bf16 %v24844_v44, %v24843_v52  ;;  %v24848_v37 = vand.u32 4294901760, %v20803_v4  ;;  %v24851_v49 = vand.u32 4294901760, %v20645_v62  ;;  %v24856_v62 = vld [vmem:[#allocation41_spill] sm:$0xff] }
 0x703   :  { %24846 = vst [vmem:[#allocation94_spill] sm:$0xff] %v20921_v19  ;;  %14800 = vmatmul.mubr.f32.gmra.mrb[30].mxu0 %v24847_v0  ;;  %v20932_v59 = vsub.f32 %v20806_v25, %v24849_v29  ;;  %v4618_v3 = vand.u32 4294901760, %v20851_v15  ;;  %v20941_v52 = vand.u32 4294901760, %v4477_v45  ;;  %v20946_v44 = vsub.f32 %v20894_v60, %v24385_v48  ;;  %16929 = vmatpush3.bf16.xpose.msra.mxu1 %v20765_v55  ;;  %v24858_v55 = vld [vmem:[#allocation33_spill] sm:$0xff] }
 0x704   :  { %24838 = vst [vmem:[#allocation90_spill] sm:$0xff] %v20900_v56  ;;  %24845 = vst [vmem:[#allocation93_spill] sm:$0xff] %v20918_v16  ;;  %v20927_v30 = vsub.f32 %v20803_v4, %v24848_v37  ;;  %v20938_v61 = vpack.c.bf16 %v24851_v49, %v24850_v57  ;;  %16801 = vmatpush3.bf16.msra.mxu0 %v16798_v1  ;;  %v24854_v37 = vld [vmem:[#allocation26_spill] sm:$0xff]  ;;  %v20951_v16 = vand.u32 4294901760, %v4487_v50  ;;  %v5956_v15 = vpop.permute.xlu1 %5955  ;;  %v20955_v57 = vpop.permute.xlu0 %5965  ;;  %v24857_v49 = vand.u32 4294901760, %v20833_v24 }
 0x705   :  { %24853 = vst [vmem:[#allocation96_spill] sm:$0xff] %v20941_v52  ;;  %14834 = vmatprep.mubr.f32.mxu0 %v24854_v37  ;;  %16803 = vmatprep.subr.bf16.mxu0 %v24856_v62  ;;  %v4481_v2 = vsel %vm1566_vm1, %v20783_v27, 0  ;;  %v24400_v36 = vand.u32 4294901760, %v20955_v57  ;;  %v6245_v38 = vand.u32 4294901760, %v20816_v39  ;;  %v20973_v1 = vsub.f32 %v4477_v45, %v20941_v52  ;;  %v24867_v52 = vld [vmem:[#allocation19_spill] sm:$0xff] }
 0x706   :  { %24852 = vst [vmem:[#allocation95_spill] sm:$0xff] %v20938_v61  ;;  %24855 = vst [vmem:[#allocation26_spill] sm:$0xff] %v20951_v16  ;;  %v20960_v48 = vsub.f32 %v20833_v24, %v24857_v49  ;;  %v6005_v61 = vand.u32 4294901760, %v5956_v15  ;;  %v24860_v29 = vand.u32 4294901760, %v20785_v22  ;;  %v20986_v4 = vsub.f32 %v4487_v50, %v20951_v16 }
 0x707   :  { %14835 = vmatmul.mubr.f32.vlgmr.msra.gmra.mrb[16].mxu0 %v24858_v55  ;;  %24859 = vst [vmem:[#allocation41_spill] sm:$0xff] %v20973_v1  ;;  %v20982_v56 = vsub.f32 %v20955_v57, %v24400_v36  ;;  %v20988_v25 = vand.u32 4294901760, %v4481_v2  ;;  %v24865_v36 = vld [vmem:[#allocation44_spill] sm:$0xff]  ;;  %v24866_v16 = vand.u32 4294901760, %v20909_v13  ;;  %v6246_v22 = vsub.f32 %v20816_v39, %v6245_v38 }
 0x708   :  { %v20977_v24 = vpack.c.bf16 %v6005_v61, %v24860_v29  ;;  %v6251_v27 = vsub.f32 %v5956_v15, %v6005_v61  ;;  %14837 = vmatprep.mubr.f32.mxu0 %v24862_v10  ;;  %16805 = vmatpush3.bf16.msra.mxu0 %v24856_v62  ;;  %v5960_v45 = vpop.permute.xlu1 %5959  ;;  %v20991_v49 = vpop.permute.xlu0 %5969  ;;  %v24864_v61 = vand.u32 4294901760, %v20874_v14  ;;  %v6259_v43 = vand.u32 4294901760, %v20879_v18 }
 0x709   :  { %24863 = vst [vmem:[#allocation37_spill] sm:$0xff] %v20988_v25  ;;  %16807 = vmatprep.subr.bf16.mxu0 %v24865_v36  ;;  %v6011_v6 = vand.u32 4294901760, %v5960_v45  ;;  %v21005_v35 = vsub.f32 %v20909_v13, %v24866_v16  ;;  %v24870_v16 = vand.u32 4294901760, %v20839_v34  ;;  %v21025_v0 = vsub.f32 %v4481_v2, %v20988_v25  ;;  %v24877_v34 = vld [vmem:[#allocation22_spill] sm:$0xff] }
 0x70a   :  { %24861 = vst [vmem:[#allocation33_spill] sm:$0xff] %v20977_v24  ;;  %v20997_v29 = vsub.f32 %v20874_v14, %v24864_v61  ;;  %v6252_v15 = vand.u32 4294901760, %v6251_v27  ;;  %17091 = vmatprep.subr.bf16.mxu1 %v20977_v24  ;;  %v24868_v61 = vand.u32 4294901760, %v20921_v19  ;;  %v21016_v50 = vpack.c.bf16 %v6251_v27, %v20816_v39  ;;  %15059 = vmatmul.mubr.f32.vlgmr.msra.gmra.mrb[32].mxu1 %v4618_v3 }
 0x70b   :  { %14838 = vmatmul.mubr.f32.gmra.mrb[18].mxu0 %v24867_v52  ;;  %v21021_v13 = vpack.c.bf16 %v6011_v6, %v24870_v16  ;;  %v6265_v58 = vsub.f32 %v5960_v45, %v6011_v6  ;;  %v24873_v54 = vand.u32 4294901760, %v20991_v49  ;;  %v4485_v6 = vsel %vm1566_vm1, %v20837_v31, 0  ;;  %v24875_v45 = vld [vmem:[#allocation47_spill] sm:$0xff]  ;;  %17093 = vmatpush3.bf16.msra.mxu1 %v20977_v24 }
 0x70c   :  { %v21013_v14 = vsub.f32 %v20921_v19, %v24868_v61  ;;  %24869 = vst [vmem:[#allocation44_spill] sm:$0xff] %v21016_v50  ;;  %v6253_v28 = vsub.f32 %v6251_v27, %v6252_v15  ;;  %14840 = vmatprep.mubr.f32.mxu0 %v24872_v41  ;;  %16809 = vmatpush3.bf16.msra.mxu0 %v24865_v36  ;;  %v5964_v39 = vpop.permute.xlu1 %5963  ;;  %v21033_v27 = vpop.permute.xlu0 %5973  ;;  %v24876_v21 = vand.u32 4294901760, %v20790_v26  ;;  %v6273_v19 = vand.u32 4294901760, %v20946_v44 }
 0x70d   :  { %24871 = vst [vmem:[#allocation19_spill] sm:$0xff] %v21021_v13  ;;  %v21030_v61 = vsub.f32 %v20991_v49, %v24873_v54  ;;  %v21036_v16 = vpack.c.bf16 %v6252_v15, %v6245_v38  ;;  %v6266_v2 = vand.u32 4294901760, %v6265_v58  ;;  %16811 = vmatprep.subr.bf16.mxu0 %v24875_v45  ;;  %v6017_v54 = vand.u32 4294901760, %v5964_v39  ;;  %17095 = vmatprep.subr.bf16.mxu1 %v21021_v13 }
 0x70e   :  { %15061 = vmatprep.mubr.f32.mxu1 %v24876_v21  ;;  %v6254_v50 = vand.u32 4294901760, %v6253_v28  ;;  %v6260_v3 = vsub.f32 %v20879_v18, %v6259_v43  ;;  %v6247_v38 = vand.u32 4294901760, %v6246_v22  ;;  %v21048_v15 = vpack.c.bf16 %v6265_v58, %v20879_v18 }
 0x70f   :  { %24874 = vst [vmem:[#allocation24_spill] sm:$0xff] %v21036_v16  ;;  %14841 = vmatmul.mubr.f32.gmra.mrb[20].mxu0 %v24877_v34  ;;  %v6267_v31 = vsub.f32 %v6265_v58, %v6266_v2  ;;  %v6279_v16 = vsub.f32 %v5964_v39, %v6017_v54  ;;  %v24879_v26 = vand.u32 4294901760, %v20973_v1  ;;  %v24880_v21 = vand.u32 4294901760, %v20894_v60  ;;  %v24886_v60 = vld [vmem:[#allocation51_spill] sm:$0xff]  ;;  %17097 = vmatpush3.bf16.msra.mxu1 %v21021_v13 }
 0x710   :  { %24878 = vst [vmem:[#allocation47_spill] sm:$0xff] %v21048_v15  ;;  %14843 = vmatprep.mubr.f32.mxu0 %v24882_v17  ;;  %16813 = vmatpush3.bf16.msra.mxu0 %v24875_v45  ;;  %v5968_v18 = vpop.permute.xlu1 %5967  ;;  %v4678_v58 = vand.u32 4294901760, %v21005_v35  ;;  %v21064_v22 = vpack.c.bf16 %v6254_v50, %v6247_v38  ;;  %v21066_v39 = vpack.c.bf16 %v6266_v2, %v6259_v43  ;;  %v21068_v25 = vand.u32 4294901760, %v4485_v6 }
 0x711   :  { %v21055_v28 = vsub.f32 %v20973_v1, %v24879_v26  ;;  %v21059_v24 = vpack.c.bf16 %v6017_v54, %v24880_v21  ;;  %v6280_v15 = vand.u32 4294901760, %v6279_v16  ;;  %v24885_v26 = vand.u32 4294901760, %v20927_v30  ;;  %16815 = vmatprep.subr.bf16.mxu0 %v24886_v60 }
 0x712   :  { %24883 = vst [vmem:[#allocation6_spill] sm:$0xff] %v21064_v22  ;;  %24884 = vst [vmem:[#allocation97_spill] sm:$0xff] %v21066_v39  ;;  %v6023_v54 = vand.u32 4294901760, %v5968_v18  ;;  %v6268_v21 = vand.u32 4294901760, %v6267_v31  ;;  %v6274_v1 = vsub.f32 %v20946_v44, %v6273_v19  ;;  %v6287_v47 = vand.u32 4294901760, %v20982_v56  ;;  %v24890_v39 = vld [vmem:[#allocation27_spill] sm:$0xff] }
 0x713   :  { %24881 = vst [vmem:[#allocation22_spill] sm:$0xff] %v21059_v24  ;;  %15062 = vmatmul.mubr.f32.gmra.mrb[34].mxu1 %v24885_v26  ;;  %v24887_v35 = vand.u32 4294901760, %v20846_v33  ;;  %v6261_v43 = vand.u32 4294901760, %v6260_v3  ;;  %v21079_v50 = vpack.c.bf16 %v6279_v16, %v20946_v44  ;;  %v6301_v30 = vand.u32 4294901760, %v21030_v61  ;;  %14844 = vmatmul.mubr.f32.gmra.mrb[22].mxu0 %v24890_v39  ;;  %v24893_v44 = vld [vmem:[#allocation39_spill] sm:$0xff] }
 0x714   :  { %v6281_v2 = vsub.f32 %v6279_v16, %v6280_v15  ;;  %v24889_v38 = vand.u32 4294901760, %v21033_v27  ;;  %v6293_v26 = vsub.f32 %v5968_v18, %v6023_v54  ;;  %v4489_v33 = vsel %vm1566_vm1, %v20892_v46, 0  ;;  %17099 = vmatprep.subr.bf16.mxu1 %v21059_v24  ;;  %14846 = vmatprep.mubr.f32.mxu0 %v24893_v44  ;;  %v5972_v16 = vpop.permute.xlu1 %5971 }
 0x715   :  { %15064 = vmatprep.mubr.f32.mxu1 %v24887_v35  ;;  %24888 = vst [vmem:[#allocation51_spill] sm:$0xff] %v21079_v50  ;;  %v24891_v35 = vand.u32 4294901760, %v20955_v57  ;;  %v21096_v13 = vpack.c.bf16 %v6268_v21, %v6261_v43  ;;  %v21098_v50 = vpack.c.bf16 %v6280_v15, %v6273_v19  ;;  %16817 = vmatpush3.bf16.msra.mxu0 %v24886_v60  ;;  %v24896_v46 = vand.u32 4294901760, %v20960_v48 }
 0x716   :  { %v21085_v31 = vsub.f32 %v21033_v27, %v24889_v38  ;;  %v6294_v38 = vand.u32 4294901760, %v6293_v26  ;;  %v6029_v57 = vand.u32 4294901760, %v5972_v16  ;;  %v6288_v22 = vsub.f32 %v20982_v56, %v6287_v47  ;;  %16819 = vmatprep.subr.bf16.mxu0 %v24897_v11  ;;  %17101 = vmatpush3.bf16.msra.mxu1 %v21059_v24 }
 0x717   :  { %v21092_v3 = vpack.c.bf16 %v6023_v54, %v24891_v35  ;;  %24894 = vst [vmem:[#allocation39_spill] sm:$0xff] %v21096_v13  ;;  %24895 = vst [vmem:[#allocation98_spill] sm:$0xff] %v21098_v50  ;;  %15065 = vmatmul.mubr.f32.gmra.mrb[36].mxu1 %v24896_v46  ;;  %v6282_v54 = vand.u32 4294901760, %v6281_v2  ;;  %v21105_v35 = vsub.f32 %v4485_v6, %v21068_v25  ;;  %v24898_v19 = vand.u32 4294901760, %v20871_v9  ;;  %v24900_v2 = vld [vmem:[#allocation31_spill] sm:$0xff] }
 0x718   :  { %v6275_v15 = vand.u32 4294901760, %v6274_v1  ;;  %v21112_v21 = vpack.c.bf16 %v6293_v26, %v20982_v56  ;;  %v21114_v43 = vand.u32 4294901760, %v4489_v33  ;;  %v6302_v48 = vsub.f32 %v21030_v61, %v6301_v30  ;;  %14847 = vmatmul.mubr.f32.gmra.mrb[24].mxu0 %v24900_v2  ;;  %v24903_v56 = vld [vmem:[#allocation18_spill] sm:$0xff]  ;;  %v5976_v1 = vpop.permute.xlu1 %5975 }
 0x719   :  { %24892 = vst [vmem:[#allocation27_spill] sm:$0xff] %v21092_v3  ;;  %15067 = vmatprep.mubr.f32.mxu1 %v24898_v19  ;;  %v6295_v46 = vsub.f32 %v6293_v26, %v6294_v38  ;;  %v6307_v6 = vsub.f32 %v5972_v16, %v6029_v57  ;;  %v6315_v18 = vand.u32 4294901760, %v21085_v31  ;;  %v24901_v50 = vand.u32 4294901760, %v20991_v49  ;;  %17103 = vmatprep.subr.bf16.mxu1 %v21092_v3  ;;  %v24909_v49 = vld [vmem:[#allocation30_spill] sm:$0xff] }
 0x71a   :  { %24899 = vst [vmem:[#allocation54_spill] sm:$0xff] %v21112_v21  ;;  %14849 = vmatprep.mubr.f32.mxu0 %v24903_v56  ;;  %v21126_v19 = vpack.c.bf16 %v6282_v54, %v6275_v15  ;;  %v21128_v21 = vpack.c.bf16 %v6294_v38, %v6287_v47  ;;  %16821 = vmatpush3.bf16.msra.mxu0 %v24897_v11  ;;  %v6035_v16 = vand.u32 4294901760, %v5976_v1  ;;  %v24907_v54 = vand.u32 4294901760, %v20932_v59 }
 0x71b   :  { %v21122_v9 = vpack.c.bf16 %v6029_v57, %v24901_v50  ;;  %v6308_v26 = vand.u32 4294901760, %v6307_v6  ;;  %15068 = vmatmul.mubr.f32.gmra.mrb[38].mxu1 %v4678_v58  ;;  %v6296_v24 = vand.u32 4294901760, %v6295_v46  ;;  %v21132_v13 = vpack.c.bf16 %v6307_v6, %v21030_v61  ;;  %v24906_v57 = vld [vmem:[#allocation57_spill] sm:$0xff] }
 0x71c   :  { %24904 = vst [vmem:[#allocation18_spill] sm:$0xff] %v21128_v21  ;;  %16823 = vmatprep.subr.bf16.mxu0 %v24906_v57  ;;  %15070 = vmatprep.mubr.f32.mxu1 %v24907_v54  ;;  %v24908_v47 = vand.u32 4294901760, %v21025_v0  ;;  %v6289_v15 = vand.u32 4294901760, %v6288_v22  ;;  %v21143_v58 = vsub.f32 %v4489_v33, %v21114_v43  ;;  %v6321_v61 = vsub.f32 %v5976_v1, %v6035_v16  ;;  %v24912_v54 = vld [vmem:[#allocation23_spill] sm:$0xff] }
 0x71d   :  { %24902 = vst [vmem:[#allocation31_spill] sm:$0xff] %v21122_v9  ;;  %24905 = vst [vmem:[#allocation99_spill] sm:$0xff] %v21132_v13  ;;  %v6309_v46 = vsub.f32 %v6307_v6, %v6308_v26  ;;  %17105 = vmatpush3.bf16.msra.mxu1 %v21092_v3  ;;  %14850 = vmatmul.mubr.f32.gmra.mrb[26].mxu0 %v24909_v49  ;;  %v4698_v50 = vand.u32 4294901760, %v21055_v28  ;;  %v24910_v21 = vand.u32 4294901760, %v21033_v27  ;;  %v6303_v33 = vand.u32 4294901760, %v6302_v48  ;;  %v25007_v3 = vld [vmem:[#allocation82_spill] sm:$0xff] }
 0x71e   :  { %v4717_v38 = vsub.f32 %v21025_v0, %v24908_v47  ;;  %17107 = vmatprep.subr.bf16.mxu1 %v21122_v9  ;;  %14852 = vmatprep.mubr.f32.mxu0 %v24912_v54  ;;  %v21154_v22 = vpack.c.bf16 %v6296_v24, %v6289_v15  ;;  %v21156_v47 = vpack.c.bf16 %v6308_v26, %v6301_v30  ;;  %v6322_v1 = vand.u32 4294901760, %v6321_v61  ;;  %v24919_v26 = vld [vmem:[#allocation17_spill] sm:$0xff] }
 0x71f   :  { %v21150_v59 = vpack.c.bf16 %v6035_v16, %v24910_v21  ;;  %v6316_v6 = vsub.f32 %v21085_v31, %v6315_v18  ;;  %16825 = vmatpush3.bf16.msra.mxu0 %v24906_v57  ;;  %15071 = vmatmul.mubr.f32.gmra.mrb[40].mxu1 %v4698_v50  ;;  %v6310_v28 = vand.u32 4294901760, %v6309_v46  ;;  %v21161_v27 = vpack.c.bf16 %v6321_v61, %v21085_v31  ;;  %v24916_v21 = vld [vmem:[#allocation34_spill] sm:$0xff] }
 0x720   :  { %24913 = vst [vmem:[#allocation30_spill] sm:$0xff] %v21154_v22  ;;  %24914 = vst [vmem:[#allocation23_spill] sm:$0xff] %v21156_v47  ;;  %16827 = vmatprep.subr.bf16.mxu0 %v24916_v21  ;;  %v24917_v16 = vand.u32 4294901760, %v20997_v29  ;;  %v24918_v24 = vand.u32 4294901760, %v21105_v35  ;;  %v6323_v48 = vsub.f32 %v6321_v61, %v6322_v1  ;;  %v4718_v15 = vand.u32 4294901760, %v4717_v38  ;;  %v24922_v29 = vld [vmem:[#allocation32_spill] sm:$0xff] }
 0x721   :  { %24911 = vst [vmem:[#allocation57_spill] sm:$0xff] %v21150_v59  ;;  %24915 = vst [vmem:[#allocation100_spill] sm:$0xff] %v21161_v27  ;;  %17109 = vmatpush3.bf16.msra.mxu1 %v21122_v9  ;;  %14853 = vmatmul.mubr.f32.gmra.mrb[28].mxu0 %v24919_v26  ;;  %v21171_v50 = vpack.c.bf16 %v6310_v28, %v6303_v33  ;;  %v21173_v46 = vpack.c.bf16 %v6322_v1, %v6315_v18  ;;  %v6317_v38 = vand.u32 4294901760, %v6316_v6  ;;  %v24924_v28 = vld [vmem:[#allocation15_spill] sm:$0xff]  ;;  %v24928_v6 = vld [vmem:[#allocation45_spill] sm:$0xff] }
 0x722   :  { %15073 = vmatprep.mubr.f32.mxu1 %v24917_v16  ;;  %v4737_v30 = vsub.f32 %v21105_v35, %v24918_v24  ;;  %17111 = vmatprep.subr.bf16.mxu1 %v21150_v59  ;;  %v4728_v16 = vand.u32 4294901760, %v21013_v14  ;;  %v24923_v24 = vand.u32 4294901760, %v20986_v4  ;;  %v6324_v33 = vand.u32 4294901760, %v6323_v48  ;;  %v25004_v47 = vld [vmem:[#allocation48_spill] sm:$0xff]  ;;  %v25006_v9 = vld [vmem:[#allocation74_spill] sm:$0xff] }
 0x723   :  { %24920 = vst [vmem:[#allocation34_spill] sm:$0xff] %v21171_v50  ;;  %24921 = vst [vmem:[#allocation17_spill] sm:$0xff] %v21173_v46  ;;  %14855 = vmatprep.mubr.f32.mxu0 %v24922_v29  ;;  %16829 = vmatpush3.bf16.msra.mxu0 %v24916_v21  ;;  %v24926_v14 = vand.u32 4294901760, %v24854_v37  ;;  %v24929_v48 = vand.u32 4294901760, %v24858_v55  ;;  %v24931_v37 = vld [vmem:[#allocation49_spill] sm:$0xff]  ;;  %v24935_v55 = vand.u32 4294901760, %v24877_v34 }
 0x724   :  { %v4747_v61 = vsub.f32 %v20986_v4, %v24923_v24  ;;  %15074 = vmatmul.mubr.f32.gmra.mrb[42].mxu1 %v4718_v15  ;;  %16831 = vmatprep.subr.bf16.mxu0 %v24924_v28  ;;  %v4738_v18 = vand.u32 4294901760, %v4737_v30  ;;  %v21186_v1 = vpack.c.bf16 %v6324_v33, %v6317_v38  ;;  %v24927_v24 = vand.u32 4294901760, %v21143_v58  ;;  %v24937_v33 = vld [vmem:[#allocation55_spill] sm:$0xff] }
 0x725   :  { %15076 = vmatprep.mubr.f32.mxu1 %v4728_v16  ;;  %17113 = vmatpush3.bf16.msra.mxu1 %v21150_v59  ;;  %v24930_v16 = vand.u32 4294901760, %v24862_v10  ;;  %v24933_v38 = vand.u32 4294901760, %v24872_v41  ;;  %v24936_v10 = vand.u32 4294901760, %v24882_v17  ;;  %v24939_v41 = vand.u32 4294901760, %v24893_v44  ;;  %v25005_v59 = vld [vmem:[#allocation66_spill] sm:$0xff] }
 0x726   :  { %14856 = vmatmul.mubr.f32.gmra.mrb[30].mxu0 %v20499_v7  ;;  %24925 = vst [vmem:[#allocation32_spill] sm:$0xff] %v21186_v1  ;;  %v4748_v31 = vand.u32 4294901760, %v4747_v61  ;;  %v4757_v15 = vsub.f32 %v21143_v58, %v24927_v24  ;;  %v24932_v61 = vand.u32 4294901760, %v24867_v52  ;;  %v24938_v52 = vand.u32 4294901760, %v24890_v39  ;;  %v24946_v24 = vld [vmem:[#allocation16_spill] sm:$0xff] }
 0x727   :  { %14890 = vmatprep.mubr.f32.mxu0 %v24926_v14  ;;  %16833 = vmatpush3.bf16.msra.mxu0 %v24924_v28  ;;  %v24941_v34 = vand.u32 4294901760, %v24900_v2  ;;  %v24942_v17 = vand.u32 4294901760, %v24903_v56  ;;  %v24943_v14 = vld [vmem:[#allocation61_spill] sm:$0xff]  ;;  %v24944_v39 = vand.u32 4294901760, %v24909_v49  ;;  %v24945_v44 = vand.u32 4294901760, %v24912_v54  ;;  %v24969_v54 = vld [vmem:[#allocation72_spill] sm:$0xff] }
 0x728   :  { %15077 = vmatmul.mubr.f32.gmra.mrb[44].mxu1 %v4738_v18  ;;  %16835 = vmatprep.subr.bf16.mxu0 %v24928_v6  ;;  %v4758_v30 = vand.u32 4294901760, %v4757_v15  ;;  %v24940_v18 = vld [vmem:[#allocation58_spill] sm:$0xff]  ;;  %v24947_v2 = vand.u32 4294901760, %v24919_v26  ;;  %v24948_v56 = vand.u32 4294901760, %v24922_v29  ;;  %v24949_v15 = vld [vmem:[#allocation40_spill] sm:$0xff]  ;;  %v24950_v49 = vand.u32 4294901760, %v20499_v7 }
 0x729   :  { %15079 = vmatprep.mubr.f32.mxu1 %v4748_v31  ;;  %v24934_v31 = vld [vmem:[#allocation52_spill] sm:$0xff]  ;;  %v24951_v7 = vld [vmem:[#allocation35_spill] sm:$0xff]  ;;  %v24971_v26 = vld [vmem:[#allocation77_spill] sm:$0xff] }
 0x72a   :  { %14891 = vmatmul.mubr.f32.vlgmr.msra.gmra.mrb[16].mxu0 %v24929_v48  ;;  %v24972_v29 = vld [vmem:[#allocation65_spill] sm:$0xff] }
 0x72b   :  { %14893 = vmatprep.mubr.f32.mxu0 %v24930_v16  ;;  %16837 = vmatpush3.bf16.msra.mxu0 %v24928_v6  ;;  %v24974_v6 = vld [vmem:[#allocation85_spill] sm:$0xff] }
 0x72c   :  { %15080 = vmatmul.mubr.f32.gmra.mrb[46].mxu1 %v4758_v30  ;;  %16839 = vmatprep.subr.bf16.mxu0 %v24931_v37  ;;  %v24975_v48 = vld [vmem:[#allocation73_spill] sm:$0xff]  ;;  %v24976_v30 = vld [vmem:[#allocation96_spill] sm:$0xff] }
 0x72d   :  { %v24977_v16 = vld [vmem:[#allocation81_spill] sm:$0xff] }
 0x72e   :  { %14894 = vmatmul.mubr.f32.gmra.mrb[18].mxu0 %v24932_v61  ;;  %v24979_v61 = vld [vmem:[#allocation37_spill] sm:$0xff] }
 0x72f   :  { %14896 = vmatprep.mubr.f32.mxu0 %v24933_v38  ;;  %16841 = vmatpush3.bf16.msra.mxu0 %v24931_v37  ;;  %v24978_v37 = vld [vmem:[#allocation71_spill] sm:$0xff] }
 0x730   :  { %16843 = vmatprep.subr.bf16.mxu0 %v24934_v31  ;;  %v24980_v38 = vld [vmem:[#allocation87_spill] sm:$0xff] }
 0x732   :  { %14897 = vmatmul.mubr.f32.gmra.mrb[20].mxu0 %v24935_v55  ;;  %v24982_v55 = vld [vmem:[#allocation75_spill] sm:$0xff] }
 0x733   :  { %14899 = vmatprep.mubr.f32.mxu0 %v24936_v10  ;;  %16845 = vmatpush3.bf16.msra.mxu0 %v24934_v31  ;;  %v24981_v31 = vld [vmem:[#allocation26_spill] sm:$0xff] }
 0x734   :  { %16847 = vmatprep.subr.bf16.mxu0 %v24937_v33  ;;  %v24983_v10 = vld [vmem:[#allocation2_spill] sm:$0xff] }
 0x735   :  { %v25003_v46 = vand.u32 4294901760, %v24983_v10 }
 0x736   :  { %14900 = vmatmul.mubr.f32.gmra.mrb[22].mxu0 %v24938_v52  ;;  %v24985_v52 = vld [vmem:[#allocation59_spill] sm:$0xff] }
 0x737   :  { %14902 = vmatprep.mubr.f32.mxu0 %v24939_v41  ;;  %16849 = vmatpush3.bf16.msra.mxu0 %v24937_v33  ;;  %v24984_v33 = vld [vmem:[#allocation76_spill] sm:$0xff]  ;;  %v24986_v41 = vld [vmem:[#allocation78_spill] sm:$0xff] }
 0x738   :  { %16851 = vmatprep.subr.bf16.mxu0 %v24940_v18 }
 0x73a   :  { %14903 = vmatmul.mubr.f32.gmra.mrb[24].mxu0 %v24941_v34 }
 0x73b   :  { %14905 = vmatprep.mubr.f32.mxu0 %v24942_v17  ;;  %16853 = vmatpush3.bf16.msra.mxu0 %v24940_v18 }
 0x73c   :  { %16855 = vmatprep.subr.bf16.mxu0 %v24943_v14 }
 0x73e   :  { %14906 = vmatmul.mubr.f32.gmra.mrb[26].mxu0 %v24944_v39  ;;  %v24987_v39 = vld [vmem:[#allocation38_spill] sm:$0xff] }
 0x73f   :  { %14908 = vmatprep.mubr.f32.mxu0 %v24945_v44  ;;  %16857 = vmatpush3.bf16.msra.mxu0 %v24943_v14 }
 0x740   :  { %16859 = vmatprep.subr.bf16.mxu0 %v24946_v24 }
 0x742   :  { %14909 = vmatmul.mubr.f32.gmra.mrb[28].mxu0 %v24947_v2 }
 0x743   :  { %14911 = vmatprep.mubr.f32.mxu0 %v24948_v56  ;;  %16861 = vmatpush3.bf16.msra.mxu0 %v24946_v24 }
 0x744   :  { %16863 = vmatprep.subr.bf16.mxu0 %v24949_v15 }
 0x746   :  { %14912 = vmatmul.mubr.f32.gmra.mrb[30].mxu0 %v24950_v49  ;;  %v24989_v49 = vld [vmem:[#allocation50_spill] sm:$0xff] }
 0x747   :  { %16865 = vmatpush3.bf16.msra.mxu0 %v24949_v15  ;;  %14946 = vmatprep.mubr.f32.mxu0 %v20195_v12  ;;  %v24988_v15 = vld [vmem:[#allocation70_spill] sm:$0xff] }
 0x748   :  { %16867 = vmatprep.subr.bf16.mxu0 %v24856_v62  ;;  %v25008_v27 = vand.u32 4294901760, %v24988_v15 }
 0x74a   :  { %14947 = vmatmul.mubr.f32.vlgmr.msra.gmra.mrb[16].mxu0 %v20201_v32 }
 0x74b   :  { %14949 = vmatprep.mubr.f32.mxu0 %v20214_v40  ;;  %16869 = vmatpush3.bf16.msra.mxu0 %v24856_v62  ;;  %v24953_v62 = vld [vmem:[#allocation29_spill] sm:$0xff] }
 0x74c   :  { %16871 = vmatprep.subr.bf16.mxu0 %v24865_v36 }
 0x74e   :  { %14950 = vmatmul.mubr.f32.gmra.mrb[18].mxu0 %v20204_v5 }
 0x74f   :  { %14952 = vmatprep.mubr.f32.mxu0 %v20227_v42  ;;  %16873 = vmatpush3.bf16.msra.mxu0 %v24865_v36  ;;  %v24952_v36 = vld [vmem:[#allocation20_spill] sm:$0xff] }
 0x750   :  { %16875 = vmatprep.subr.bf16.mxu0 %v24875_v45 }
 0x752   :  { %14953 = vmatmul.mubr.f32.gmra.mrb[20].mxu0 %v20219_v53 }
 0x753   :  { %14955 = vmatprep.mubr.f32.mxu0 %v20247_v23  ;;  %16877 = vmatpush3.bf16.msra.mxu0 %v24875_v45  ;;  %v24954_v45 = vld [vmem:[#allocation21_spill] sm:$0xff] }
 0x754   :  { %16879 = vmatprep.subr.bf16.mxu0 %v24886_v60 }
 0x756   :  { %14956 = vmatmul.mubr.f32.gmra.mrb[22].mxu0 %v20233_v63 }
 0x757   :  { %14958 = vmatprep.mubr.f32.mxu0 %v20278_v8  ;;  %16881 = vmatpush3.bf16.msra.mxu0 %v24886_v60  ;;  %v24955_v60 = vld [vmem:[#allocation28_spill] sm:$0xff] }
 0x758   :  { %16883 = vmatprep.subr.bf16.mxu0 %v24897_v11 }
 0x75a   :  { %14959 = vmatmul.mubr.f32.gmra.mrb[24].mxu0 %v20258_v20 }
 0x75b   :  { %14961 = vmatprep.mubr.f32.mxu0 %v20302_v51  ;;  %16885 = vmatpush3.bf16.msra.mxu0 %v24897_v11  ;;  %v24956_v11 = vld [vmem:[#allocation42_spill] sm:$0xff] }
 0x75c   :  { %16887 = vmatprep.subr.bf16.mxu0 %v24906_v57 }
 0x75e   :  { %14962 = vmatmul.mubr.f32.gmra.mrb[26].mxu0 %v24951_v7 }
 0x75f   :  { %14964 = vmatprep.mubr.f32.mxu0 %v24952_v36  ;;  %16889 = vmatpush3.bf16.msra.mxu0 %v24906_v57  ;;  %v24957_v57 = vld [vmem:[#allocation8_spill] sm:$0xff] }
 0x760   :  { %16891 = vmatprep.subr.bf16.mxu0 %v24916_v21 }
 0x762   :  { %14965 = vmatmul.mubr.f32.gmra.mrb[28].mxu0 %v24953_v62 }
 0x763   :  { %14967 = vmatprep.mubr.f32.mxu0 %v24954_v45  ;;  %16893 = vmatpush3.bf16.msra.mxu0 %v24916_v21  ;;  %v24970_v21 = vld [vmem:[#allocation63_spill] sm:$0xff] }
 0x764   :  { %16895 = vmatprep.subr.bf16.mxu0 %v24924_v28 }
 0x766   :  { %14968 = vmatmul.mubr.f32.gmra.mrb[30].mxu0 %v24955_v60 }
 0x767   :  { %16897 = vmatpush3.bf16.msra.mxu0 %v24924_v28  ;;  %15002 = vmatprep.mubr.f32.mxu0 %v20195_v12  ;;  %v24958_v12 = vld [vmem:[#allocation4_spill] sm:$0xff] }
 0x768   :  { %16931 = vmatprep.subr.bf16.mxu0 %v24956_v11  ;;  %v24973_v28 = vld [vmem:[#allocation68_spill] sm:$0xff] }
 0x76a   :  { %15003 = vmatmul.mubr.f32.vlgmr.msra.gmra.mrb[16].mxu0 %v20201_v32  ;;  %v24959_v32 = vld [vmem:[#allocation7_spill] sm:$0xff] }
 0x76b   :  { %15005 = vmatprep.mubr.f32.mxu0 %v20214_v40  ;;  %v24961_v40 = vld [vmem:[#allocation9_spill] sm:$0xff] }
 0x76e   :  { %15006 = vmatmul.mubr.f32.gmra.mrb[18].mxu0 %v20204_v5  ;;  %v24960_v5 = vld [vmem:[#allocation5_spill] sm:$0xff] }
 0x76f   :  { %15008 = vmatprep.mubr.f32.mxu0 %v20227_v42  ;;  %v24963_v42 = vld [vmem:[#allocation43_spill] sm:$0xff] }
 0x770   :  { %16933 = vmatpush3.bf16.xpose.msra.mxu0 %v24956_v11 }
 0x771   :  { %16935 = vmatprep.subr.bf16.mxu0 %v24957_v57 }
 0x772   :  { %15009 = vmatmul.mubr.f32.gmra.mrb[20].mxu0 %v20219_v53  ;;  %v24962_v53 = vld [vmem:[#allocation60_spill] sm:$0xff] }
 0x773   :  { %15011 = vmatprep.mubr.f32.mxu0 %v20247_v23  ;;  %v24966_v23 = vld [vmem:[#allocation64_spill] sm:$0xff] }
 0x776   :  { %15012 = vmatmul.mubr.f32.gmra.mrb[22].mxu0 %v20233_v63  ;;  %v24965_v63 = vld [vmem:[#allocation46_spill] sm:$0xff] }
 0x777   :  { %15014 = vmatprep.mubr.f32.mxu0 %v20278_v8  ;;  %v24968_v8 = vld [vmem:[#allocation53_spill] sm:$0xff] }
 0x778   :  { %16937 = vmatpush3.bf16.xpose.msra.mxu0 %v24957_v57 }
 0x779   :  { %16939 = vmatprep.subr.bf16.mxu0 %v24958_v12 }
 0x77a   :  { %15015 = vmatmul.mubr.f32.gmra.mrb[24].mxu0 %v20258_v20  ;;  %v24967_v20 = vld [vmem:[#allocation62_spill] sm:$0xff] }
 0x77b   :  { %15017 = vmatprep.mubr.f32.mxu0 %v20302_v51  ;;  %v24964_v51 = vld [vmem:[#allocation67_spill] sm:$0xff] }
 0x77e   :  { %15018 = vmatmul.mubr.f32.gmra.mrb[26].mxu0 %v24951_v7  ;;  %v24990_v7 = vld [vmem:[#allocation25_spill] sm:$0xff] }
 0x77f   :  { %15020 = vmatprep.mubr.f32.mxu0 %v24952_v36 }
 0x780   :  { %16941 = vmatpush3.bf16.xpose.msra.mxu0 %v24958_v12  ;;  %v24993_v12 = vld [vmem:[#allocation84_spill] sm:$0xff] }
 0x781   :  { %16943 = vmatprep.subr.bf16.mxu0 %v24959_v32  ;;  %v25013_v50 = vand.u32 4294901760, %v24993_v12 }
 0x782   :  { %15021 = vmatmul.mubr.f32.gmra.mrb[28].mxu0 %v24953_v62 }
 0x783   :  { %15023 = vmatprep.mubr.f32.mxu0 %v24954_v45  ;;  %v24991_v45 = vld [vmem:[#allocation79_spill] sm:$0xff] }
 0x784   :  { %v25011_v13 = vand.u32 4294901760, %v24991_v45 }
 0x786   :  { %15024 = vmatmul.mubr.f32.gmra.mrb[30].mxu0 %v24955_v60  ;;  %v24992_v60 = vld [vmem:[#allocation69_spill] sm:$0xff] }
 0x787   :  { %15114 = vmatprep.mubr.f32.mxu0 %v24960_v5  ;;  %v25012_v1 = vand.u32 4294901760, %v24992_v60 }
 0x788   :  { %16945 = vmatpush3.bf16.xpose.msra.mxu0 %v24959_v32  ;;  %v24994_v32 = vld [vmem:[#allocation56_spill] sm:$0xff] }
 0x789   :  { %16947 = vmatprep.subr.bf16.mxu0 %v24961_v40  ;;  %v25014_v22 = vand.u32 4294901760, %v24994_v32 }
 0x790   :  { %16949 = vmatpush3.bf16.xpose.msra.mxu0 %v24961_v40  ;;  %v24995_v40 = vld [vmem:[#allocation36_spill] sm:$0xff] }
 0x791   :  { %16951 = vmatprep.subr.bf16.mxu0 %v24962_v53 }
 0x798   :  { %16953 = vmatpush3.bf16.xpose.msra.mxu0 %v24962_v53 }
 0x799   :  { %16955 = vmatprep.subr.bf16.mxu0 %v24963_v42 }
 0x7a0   :  { %16957 = vmatpush3.bf16.xpose.msra.mxu0 %v24963_v42 }
 0x7a1   :  { %16959 = vmatprep.subr.bf16.mxu0 %v24964_v51 }
 0x7a8   :  { %16961 = vmatpush3.bf16.xpose.msra.mxu0 %v24964_v51  ;;  %v24996_v51 = vld [vmem:[#allocation92_spill] sm:$0xff] }
 0x7a9   :  { %16963 = vmatprep.subr.bf16.mxu0 %v24965_v63 }
 0x7af   :  { %15115 = vmatmul.mubr.f32.vlgmr.msra.gmra.mrb[32].mxu0 %v24966_v23 }
 0x7b0   :  { %15117 = vmatprep.mubr.f32.mxu0 %v24967_v20  ;;  %16965 = vmatpush3.bf16.xpose.msra.mxu0 %v24965_v63  ;;  %v24997_v63 = vld [vmem:[#allocation80_spill] sm:$0xff] }
 0x7b1   :  { %16967 = vmatprep.subr.bf16.mxu0 %v24968_v8 }
 0x7b3   :  { %15118 = vmatmul.mubr.f32.gmra.mrb[34].mxu0 %v24969_v54 }
 0x7b4   :  { %15120 = vmatprep.mubr.f32.mxu0 %v24970_v21 }
 0x7b7   :  { %15121 = vmatmul.mubr.f32.gmra.mrb[36].mxu0 %v24971_v26 }
 0x7b8   :  { %15123 = vmatprep.mubr.f32.mxu0 %v24972_v29  ;;  %16969 = vmatpush3.bf16.xpose.msra.mxu0 %v24968_v8 }
 0x7b9   :  { %16971 = vmatprep.subr.bf16.mxu0 %v24973_v28 }
 0x7bb   :  { %15124 = vmatmul.mubr.f32.gmra.mrb[38].mxu0 %v24974_v6 }
 0x7bc   :  { %15126 = vmatprep.mubr.f32.mxu0 %v24975_v48 }
 0x7bf   :  { %15127 = vmatmul.mubr.f32.gmra.mrb[40].mxu0 %v24976_v30 }
 0x7c0   :  { %15129 = vmatprep.mubr.f32.mxu0 %v24977_v16  ;;  %16973 = vmatpush3.bf16.xpose.msra.mxu0 %v24973_v28  ;;  %v24998_v28 = vld [vmem:[#allocation41_spill] sm:$0xff] }
 0x7c1   :  { %16975 = vmatprep.subr.bf16.mxu0 %v24978_v37 }
 0x7c3   :  { %15130 = vmatmul.mubr.f32.gmra.mrb[42].mxu0 %v24979_v61 }
 0x7c4   :  { %15132 = vmatprep.mubr.f32.mxu0 %v24980_v38 }
 0x7c7   :  { %15133 = vmatmul.mubr.f32.gmra.mrb[44].mxu0 %v21068_v25 }
 0x7c8   :  { %15135 = vmatprep.mubr.f32.mxu0 %v24981_v31  ;;  %16977 = vmatpush3.bf16.xpose.msra.mxu0 %v24978_v37 }
 0x7c9   :  { %16979 = vmatprep.subr.bf16.mxu0 %v24982_v55 }
 0x7cb   :  { %15136 = vmatmul.mubr.f32.gmra.mrb[46].mxu0 %v21114_v43 }
 0x7cc   :  { %15170 = vmatprep.mubr.f32.mxu0 %v24983_v10  ;;  %v25010_v10 = vld [vmem:[#allocation83_spill] sm:$0xff] }
 0x7d0   :  { %16981 = vmatpush3.bf16.xpose.msra.mxu0 %v24982_v55  ;;  %v24999_v55 = vld [vmem:[#allocation88_spill] sm:$0xff] }
 0x7d1   :  { %16983 = vmatprep.subr.bf16.mxu0 %v24984_v33 }
 0x7d8   :  { %16985 = vmatpush3.bf16.xpose.msra.mxu0 %v24984_v33  ;;  %v25000_v33 = vld [vmem:[#allocation3_spill] sm:$0xff] }
 0x7d9   :  { %16987 = vmatprep.subr.bf16.mxu0 %v24985_v52 }
 0x7dd   :  { %v21336_v18 = vpop.f32.mrb[32].mxu1 }
 0x7de   :  { %v21338_v34 = vpop.f32.mrb[33].mxu1 }
 0x7e0   :  { %16989 = vmatpush3.bf16.xpose.msra.mxu0 %v24985_v52  ;;  %v25001_v52 = vld [vmem:[#allocation94_spill] sm:$0xff] }
 0x7e1   :  { %16991 = vmatprep.subr.bf16.mxu0 %v24986_v41 }
 0x7e6   :  { %v21340_v17 = vpop.f32.mrb[34].mxu1 }
 0x7e7   :  { %v21342_v14 = vpop.f32.mrb[35].mxu1 }
 0x7e8   :  { %16993 = vmatpush3.bf16.xpose.msra.mxu0 %v24986_v41  ;;  %v25002_v41 = vld [vmem:[#allocation10_spill] sm:$0xff] }
 0x7e9   :  { %16995 = vmatprep.subr.bf16.mxu0 %v24987_v39 }
 0x7ea   :  { %v21346_v44 = vpop.f32.mrb[36].mxu1 }
 0x7eb   :  { %v21348_v24 = vpop.f32.mrb[37].mxu1 }
 0x7ee   :  { %v21350_v2 = vpop.f32.mrb[38].mxu1 }
 0x7ef   :  { %v21352_v56 = vpop.f32.mrb[39].mxu1  ;;  %15171 = vmatmul.mubr.f32.vlgmr.msra.gmra.mrb[32].mxu0 %v24988_v15  ;;  %v25017_v15 = vand.u32 4294901760, %v24997_v63 }
 0x7f0   :  { %15173 = vmatprep.mubr.f32.mxu0 %v24989_v49  ;;  %16997 = vmatpush3.bf16.xpose.msra.mxu0 %v24987_v39 }
 0x7f1   :  { %16999 = vmatprep.subr.bf16.mxu0 %v24990_v7 }
 0x7f2   :  { %v21358_v36 = vpop.f32.mrb[40].mxu1 }
 0x7f3   :  { %v21360_v62 = vpop.f32.mrb[41].mxu1  ;;  %15174 = vmatmul.mubr.f32.gmra.mrb[34].mxu0 %v24991_v45  ;;  %v25020_v45 = vld [vmem:[#allocation89_spill] sm:$0xff] }
 0x7f4   :  { %15176 = vmatprep.mubr.f32.mxu0 %v24992_v60 }
 0x7f7   :  { %v21364_v11 = vpop.f32.mrb[42].mxu1  ;;  %15177 = vmatmul.mubr.f32.gmra.mrb[36].mxu0 %v24993_v12  ;;  %v25021_v12 = vand.u32 4294901760, %v21025_v0 }
 0x7f8   :  { %v21366_v57 = vpop.f32.mrb[43].mxu1  ;;  %15179 = vmatprep.mubr.f32.mxu0 %v24994_v32  ;;  %17001 = vmatpush3.bf16.xpose.msra.mxu0 %v24990_v7  ;;  %v25022_v32 = vand.u32 4294901760, %v25001_v52 }
 0x7f9   :  { %17003 = vmatprep.subr.bf16.mxu0 %v24995_v40 }
 0x7fb   :  { %v21372_v53 = vpop.f32.mrb[44].mxu1  ;;  %15180 = vmatmul.mubr.f32.gmra.mrb[38].mxu0 %v24996_v51 }
 0x7fc   :  { %v21374_v42 = vpop.f32.mrb[45].mxu1  ;;  %15182 = vmatprep.mubr.f32.mxu0 %v24997_v63 }
 0x7ff   :  { %v21378_v8 = vpop.f32.mrb[46].mxu1  ;;  %15183 = vmatmul.mubr.f32.gmra.mrb[40].mxu0 %v24998_v28 }
 0x800   :  { %v21381_v37 = vpop.f32.mrb[47].mxu1  ;;  %15185 = vmatprep.mubr.f32.mxu0 %v24999_v55  ;;  %17005 = vmatpush3.bf16.xpose.msra.mxu0 %v24995_v40 }
 0x801   :  { %17007 = vmatprep.subr.bf16.mxu0 %v25000_v33 }
 0x803   :  { %15186 = vmatmul.mubr.f32.gmra.mrb[42].mxu0 %v21025_v0 }
 0x804   :  { %15188 = vmatprep.mubr.f32.mxu0 %v25001_v52  ;;  %v25026_v52 = vand.u32 4294901760, %v21143_v58 }
 0x807   :  { %15189 = vmatmul.mubr.f32.gmra.mrb[44].mxu0 %v21105_v35 }
 0x808   :  { %15191 = vmatprep.mubr.f32.mxu0 %v20986_v4  ;;  %17009 = vmatpush3.bf16.xpose.msra.mxu0 %v25000_v33 }
 0x809   :  { %17011 = vmatprep.subr.bf16.mxu0 %v25002_v41 }
 0x80b   :  { %15192 = vmatmul.mubr.f32.gmra.mrb[46].mxu0 %v21143_v58 }
 0x80c   :  { %15226 = vmatprep.mubr.f32.mxu0 %v25003_v46  ;;  %v25009_v46 = vand.u32 4294901760, %v24989_v49 }
 0x810   :  { %17013 = vmatpush3.bf16.xpose.msra.mxu0 %v25002_v41 }
 0x811   :  { %17015 = vmatprep.subr.bf16.mxu0 %v25004_v47 }
 0x818   :  { %17017 = vmatpush3.bf16.xpose.msra.mxu0 %v25004_v47 }
 0x819   :  { %17019 = vmatprep.subr.bf16.mxu0 %v25005_v59 }
 0x820   :  { %17021 = vmatpush3.bf16.xpose.msra.mxu0 %v25005_v59 }
 0x821   :  { %17023 = vmatprep.subr.bf16.mxu0 %v25006_v9 }
 0x828   :  { %17025 = vmatpush3.bf16.xpose.msra.mxu0 %v25006_v9 }
 0x829   :  { %17027 = vmatprep.subr.bf16.mxu0 %v25007_v3 }
 0x82f   :  { %15227 = vmatmul.mubr.f32.vlgmr.msra.gmra.mrb[32].mxu0 %v25008_v27  ;;  %v25015_v27 = vld [vmem:[#allocation86_spill] sm:$0xff] }
 0x830   :  { %15229 = vmatprep.mubr.f32.mxu0 %v25009_v46  ;;  %17029 = vmatpush3.bf16.xpose.msra.mxu0 %v25007_v3  ;;  %v25016_v3 = vand.u32 4294901760, %v24996_v51 }
 0x831   :  { %17031 = vmatprep.subr.bf16.mxu0 %v25010_v10 }
 0x833   :  { %15230 = vmatmul.mubr.f32.gmra.mrb[34].mxu0 %v25011_v13 }
 0x834   :  { %15232 = vmatprep.mubr.f32.mxu0 %v25012_v1  ;;  %v25018_v1 = vand.u32 4294901760, %v24998_v28  ;;  %v25023_v28 = vand.u32 4294901760, %v21105_v35 }
 0x837   :  { %15233 = vmatmul.mubr.f32.gmra.mrb[36].mxu0 %v25013_v50  ;;  %v25019_v50 = vand.u32 4294901760, %v24999_v55  ;;  %v25024_v55 = vand.u32 4294901760, %v20986_v4 }
 0x838   :  { %15235 = vmatprep.mubr.f32.mxu0 %v25014_v22  ;;  %17033 = vmatpush3.bf16.xpose.msra.mxu0 %v25010_v10  ;;  %v25025_v10 = vld [vmem:[#allocation90_spill] sm:$0xff] }
 0x839   :  { %17035 = vmatprep.subr.bf16.mxu0 %v25015_v27 }
 0x83b   :  { %15236 = vmatmul.mubr.f32.gmra.mrb[38].mxu0 %v25016_v3  ;;  %v25029_v3 = vld [vmem:[#allocation91_spill] sm:$0xff] }
 0x83c   :  { %15238 = vmatprep.mubr.f32.mxu0 %v25017_v15 }
 0x83d   :  { %v21423_v13 = vpop.f32.mrb[16].mxu0 }
 0x83e   :  { %v21425_v49 = vpop.f32.mrb[17].mxu0 }
 0x83f   :  { %15239 = vmatmul.mubr.f32.gmra.mrb[40].mxu0 %v25018_v1 }
 0x840   :  { %15241 = vmatprep.mubr.f32.mxu0 %v25019_v50  ;;  %17037 = vmatpush3.bf16.xpose.msra.mxu0 %v25015_v27 }
 0x841   :  { %v21432_v22 = vpop.f32.mrb[18].mxu0  ;;  %17039 = vmatprep.subr.bf16.mxu0 %v25020_v45 }
 0x842   :  { %v21435_v60 = vpop.f32.mrb[19].mxu0 }
 0x843   :  { %15242 = vmatmul.mubr.f32.gmra.mrb[42].mxu0 %v25021_v12 }
 0x844   :  { %15244 = vmatprep.mubr.f32.mxu0 %v25022_v32  ;;  %v25036_v32 = vld [vmem:[#allocation95_spill] sm:$0xff] }
 0x845   :  { %v21441_v51 = vpop.f32.mrb[20].mxu0 }
 0x846   :  { %v21443_v63 = vpop.f32.mrb[21].mxu0 }
 0x847   :  { %15245 = vmatmul.mubr.f32.gmra.mrb[44].mxu0 %v25023_v28 }
 0x848   :  { %15247 = vmatprep.mubr.f32.mxu0 %v25024_v55  ;;  %17041 = vmatpush3.bf16.xpose.msra.mxu0 %v25020_v45  ;;  %v25034_v45 = vld [vmem:[#allocation93_spill] sm:$0xff] }
 0x849   :  { %v21450_v46 = vpop.f32.mrb[22].mxu0  ;;  %17043 = vmatprep.subr.bf16.mxu0 %v25025_v10 }
 0x84a   :  { %v21453_v0 = vpop.f32.mrb[23].mxu0 }
 0x84b   :  { %15248 = vmatmul.mubr.f32.gmra.mrb[46].mxu0 %v25026_v52 }
 0x84c   :  { %15282 = vmatprep.mubr.f32.mxu0 %v24960_v5 }
 0x84d   :  { %v21458_v27 = vpop.f32.mrb[24].mxu0 }
 0x84e   :  { %25027 = vst [vmem:[#allocation15_spill] sm:$0xff] %v21458_v27  ;;  %v21460_v35 = vpop.f32.mrb[25].mxu0 }
 0x850   :  { %17045 = vmatpush3.bf16.xpose.msra.mxu0 %v25025_v10 }
 0x851   :  { %v21463_v4 = vpop.f32.mrb[26].mxu0  ;;  %17047 = vmatprep.subr.bf16.mxu0 %v25029_v3 }
 0x852   :  { %25028 = vst [vmem:[#allocation45_spill] sm:$0xff] %v21463_v4  ;;  %v21466_v15 = vpop.f32.mrb[27].mxu0 }
 0x853   :  { %25030 = vst [vmem:[#allocation49_spill] sm:$0xff] %v21466_v15 }
 0x855   :  { %v21468_v1 = vpop.f32.mrb[28].mxu0 }
 0x856   :  { %25031 = vst [vmem:[#allocation52_spill] sm:$0xff] %v21468_v1  ;;  %v21470_v50 = vpop.f32.mrb[29].mxu0 }
 0x857   :  { %25032 = vst [vmem:[#allocation55_spill] sm:$0xff] %v21470_v50 }
 0x858   :  { %17049 = vmatpush3.bf16.xpose.msra.mxu0 %v25029_v3 }
 0x859   :  { %v21473_v58 = vpop.f32.mrb[30].mxu0  ;;  %17051 = vmatprep.subr.bf16.mxu0 %v25034_v45 }
 0x85a   :  { %25033 = vst [vmem:[#allocation58_spill] sm:$0xff] %v21473_v58  ;;  %v21476_v12 = vpop.f32.mrb[31].mxu0 }
 0x85b   :  { %25035 = vst [vmem:[#allocation61_spill] sm:$0xff] %v21476_v12 }
 0x860   :  { %17053 = vmatpush3.bf16.xpose.msra.mxu0 %v25034_v45 }
 0x861   :  { %17055 = vmatprep.subr.bf16.mxu0 %v25036_v32 }
 0x868   :  { %17057 = vmatpush3.bf16.xpose.msra.mxu0 %v25036_v32 }
 0x869   :  { %17059 = vmatprep.subr.bf16.mxu0 %v24987_v39 }
 0x86f   :  { %15283 = vmatmul.mubr.f32.vlgmr.msra.gmra.mrb[32].mxu0 %v24966_v23 }
 0x870   :  { %15285 = vmatprep.mubr.f32.mxu0 %v24967_v20  ;;  %17061 = vmatpush3.bf16.xpose.msra.mxu0 %v24987_v39 }
 0x871   :  { %17063 = vmatprep.subr.bf16.mxu0 %v24990_v7 }
 0x873   :  { %15286 = vmatmul.mubr.f32.gmra.mrb[34].mxu0 %v24969_v54 }
 0x874   :  { %15288 = vmatprep.mubr.f32.mxu0 %v24970_v21 }
 0x877   :  { %15289 = vmatmul.mubr.f32.gmra.mrb[36].mxu0 %v24971_v26 }
 0x878   :  { %15291 = vmatprep.mubr.f32.mxu0 %v24972_v29  ;;  %17065 = vmatpush3.bf16.xpose.msra.mxu0 %v24990_v7  ;;  %v18542_v7 = vld [vmem:[%s24154_s1 + $0x38] sm:$0xff] }
 0x879   :  { %17067 = vmatprep.subr.bf16.mxu0 %v24995_v40 }
 0x87b   :  { %15292 = vmatmul.mubr.f32.gmra.mrb[38].mxu0 %v24974_v6 }
 0x87c   :  { %15294 = vmatprep.mubr.f32.mxu0 %v24975_v48 }
 0x87f   :  { %15295 = vmatmul.mubr.f32.gmra.mrb[40].mxu0 %v24976_v30 }
 0x880   :  { %15297 = vmatprep.mubr.f32.mxu0 %v24977_v16  ;;  %17069 = vmatpush3.bf16.xpose.msra.mxu0 %v24995_v40 }
 0x881   :  { %17071 = vmatprep.subr.bf16.mxu0 %v25000_v33 }
 0x883   :  { %15298 = vmatmul.mubr.f32.gmra.mrb[42].mxu0 %v24979_v61 }
 0x884   :  { %15300 = vmatprep.mubr.f32.mxu0 %v24980_v38 }
 0x887   :  { %15301 = vmatmul.mubr.f32.gmra.mrb[44].mxu0 %v21068_v25 }
 0x888   :  { %15303 = vmatprep.mubr.f32.mxu0 %v24981_v31  ;;  %17073 = vmatpush3.bf16.xpose.msra.mxu0 %v25000_v33 }
 0x889   :  { %17075 = vmatprep.subr.bf16.mxu0 %v25002_v41 }
 0x88b   :  { %15304 = vmatmul.mubr.f32.gmra.mrb[46].mxu0 %v21114_v43 }
 0x88c   :  { %15338 = vmatprep.mubr.f32.mxu0 %v24960_v5 }
 0x890   :  { %17077 = vmatpush3.bf16.xpose.msra.mxu0 %v25002_v41 }
 0x891   :  { %17079 = vmatprep.subr.bf16.mxu0 %v25004_v47 }
 0x898   :  { %17081 = vmatpush3.bf16.xpose.msra.mxu0 %v25004_v47  ;;  %v18537_v47 = vld [vmem:[%s24154_s1] sm:$0xff] }
 0x899   :  { %17083 = vmatprep.subr.bf16.mxu0 %v25005_v59  ;;  %v4611_v5 = vadd.f32 %v18537_v47, %v21338_v34 }
 0x8a0   :  { %17085 = vmatpush3.bf16.xpose.msra.mxu0 %v25005_v59 }
 0x8a1   :  { %17087 = vmatprep.subr.bf16.mxu0 %v25006_v9 }
 0x8a8   :  { %17089 = vmatpush3.bf16.xpose.msra.mxu0 %v25006_v9  ;;  %v18536_v9 = vld [vmem:[%s24154_s1 + $0x8] sm:$0xff] }
 0x8a9   :  { %v4621_v59 = vadd.f32 %v18536_v9, %v21336_v18 }
 0x8af   :  { %15339 = vmatmul.mubr.f32.vlgmr.msra.gmra.mrb[32].mxu0 %v24966_v23 }
 0x8b0   :  { %15341 = vmatprep.mubr.f32.mxu0 %v24967_v20 }
 0x8b3   :  { %15342 = vmatmul.mubr.f32.gmra.mrb[34].mxu0 %v24969_v54 }
 0x8b4   :  { %15344 = vmatprep.mubr.f32.mxu0 %v24970_v21 }
 0x8b7   :  { %15345 = vmatmul.mubr.f32.gmra.mrb[36].mxu0 %v24971_v26  ;;  %v18539_v26 = vld [vmem:[%s24154_s1 + $0x10] sm:$0xff] }
 0x8b8   :  { %15347 = vmatprep.mubr.f32.mxu0 %v24972_v29  ;;  %v4631_v29 = vadd.f32 %v18539_v26, %v21342_v14 }
 0x8bb   :  { %15348 = vmatmul.mubr.f32.gmra.mrb[38].mxu0 %v24974_v6 }
 0x8bc   :  { %15350 = vmatprep.mubr.f32.mxu0 %v24975_v48 }
 0x8bf   :  { %15351 = vmatmul.mubr.f32.gmra.mrb[40].mxu0 %v24976_v30 }
 0x8c0   :  { %15353 = vmatprep.mubr.f32.mxu0 %v24977_v16 }
 0x8c3   :  { %15354 = vmatmul.mubr.f32.gmra.mrb[42].mxu0 %v24979_v61  ;;  %v18540_v61 = vld [vmem:[%s24154_s1 + $0x28] sm:$0xff] }
 0x8c4   :  { %15356 = vmatprep.mubr.f32.mxu0 %v24980_v38  ;;  %v4661_v38 = vadd.f32 %v18540_v61, %v21346_v44  ;;  %v4681_v44 = vadd.f32 %v18542_v7, %v21350_v2  ;;  %v18544_v2 = vld [vmem:[%s24154_s1 + $0x48] sm:$0xff] }
 0x8c5   :  { %v4701_v10 = vadd.f32 %v18544_v2, %v21358_v36  ;;  %v18546_v36 = vld [vmem:[%s24154_s1 + $0x58] sm:$0xff] }
 0x8c7   :  { %15357 = vmatmul.mubr.f32.gmra.mrb[44].mxu0 %v21068_v25 }
 0x8c8   :  { %15359 = vmatprep.mubr.f32.mxu0 %v24981_v31  ;;  %v18541_v31 = vld [vmem:[%s24154_s1 + $0x20] sm:$0xff] }
 0x8c9   :  { %v4651_v18 = vadd.f32 %v18541_v31, %v21348_v24  ;;  %v18543_v24 = vld [vmem:[%s24154_s1 + $0x30] sm:$0xff] }
 0x8ca   :  { %v4671_v40 = vadd.f32 %v18543_v24, %v21352_v56  ;;  %v18545_v56 = vld [vmem:[%s24154_s1 + $0x40] sm:$0xff] }
 0x8cb   :  { %15360 = vmatmul.mubr.f32.gmra.mrb[46].mxu0 %v21114_v43  ;;  %v18538_v43 = vld [vmem:[%s24154_s1 + $0x18] sm:$0xff]  ;;  %v4691_v52 = vadd.f32 %v18545_v56, %v21360_v62  ;;  %v18547_v62 = vld [vmem:[%s24154_s1 + $0x50] sm:$0xff] }
 0x8cc   :  { %v4641_v21 = vadd.f32 %v18538_v43, %v21340_v17  ;;  %v4711_v47 = vadd.f32 %v18547_v62, %v21366_v57  ;;  %v18549_v57 = vld [vmem:[%s24154_s1 + $0x60] sm:$0xff] }
 0x8cd   :  { %v4731_v26 = vadd.f32 %v18549_v57, %v21374_v42  ;;  %v18551_v42 = vld [vmem:[%s24154_s1 + $0x70] sm:$0xff] }
 0x8ce   :  { %v4751_v31 = vadd.f32 %v18551_v42, %v21381_v37 }
 0x982   :  { %v15340_v23 = vpop.f32.mrb[32].mxu0 }
 0x983   :  { %v21536_v20 = vadd.f32 %v15340_v23, %v4621_v59  ;;  %v5715_v25 = vpop.f32.mrb[33].mxu0  ;;  %v4721_v59 = vadd.f32 %v18546_v36, %v21364_v11  ;;  %v18548_v11 = vld [vmem:[%s24154_s1 + $0x68] sm:$0xff] }
 0x984   :  { %v21538_v54 = vadd.f32 %v5715_v25, %v4611_v5 }
 0x985   :  { %5811 = vmax.xlane.f32.xlu1 %v21536_v20 }
 0x986   :  { %v15343_v6 = vpop.f32.mrb[34].mxu0  ;;  %5809 = vmax.xlane.f32.xlu0 %v21538_v54 }
 0x987   :  { %v21550_v48 = vadd.f32 %v15343_v6, %v4641_v21  ;;  %v5727_v30 = vpop.f32.mrb[35].mxu0  ;;  %v4741_v21 = vadd.f32 %v18548_v11, %v21372_v53  ;;  %v18550_v53 = vld [vmem:[%s24154_s1 + $0x78] sm:$0xff] }
 0x988   :  { %v21552_v16 = vadd.f32 %v5727_v30, %v4631_v29 }
 0x98a   :  { %v15346_v34 = vpop.f32.mrb[36].mxu0  ;;  %5815 = vmax.xlane.f32.xlu0 %v21550_v48 }
 0x98b   :  { %v21563_v17 = vadd.f32 %v15346_v34, %v4661_v38  ;;  %v5739_v14 = vpop.f32.mrb[37].mxu0  ;;  %v4761_v38 = vadd.f32 %v18550_v53, %v21378_v8  ;;  %v25037_v8 = vld [vmem:[#allocation11_spill] sm:$0xff] }
 0x98c   :  { %v21565_v39 = vadd.f32 %v5739_v14, %v4651_v18 }
 0x98d   :  { %5819 = vmax.xlane.f32.xlu1 %v21563_v17 }
 0x98e   :  { %v15349_v33 = vpop.f32.mrb[38].mxu0  ;;  %5813 = vmax.xlane.f32.xlu0 %v21552_v16 }
 0x98f   :  { %v21577_v41 = vadd.f32 %v15349_v33, %v4681_v44  ;;  %v5751_v28 = vpop.f32.mrb[39].mxu0  ;;  %v25038_v44 = vld [vmem:[#allocation12_spill] sm:$0xff] }
 0x990   :  { %v21579_v55 = vadd.f32 %v5751_v28, %v4671_v40 }
 0x991   :  { %5823 = vmax.xlane.f32.xlu1 %v21577_v41 }
 0x992   :  { %v15352_v3 = vpop.f32.mrb[40].mxu0  ;;  %5817 = vmax.xlane.f32.xlu0 %v21565_v39 }
 0x993   :  { %v21591_v45 = vadd.f32 %v15352_v3, %v4701_v10  ;;  %v5763_v32 = vpop.f32.mrb[41].mxu0 }
 0x994   :  { %v21593_v9 = vadd.f32 %v5763_v32, %v4691_v52 }
 0x995   :  { %5827 = vmax.xlane.f32.xlu1 %v21591_v45 }
 0x996   :  { %v15355_v5 = vpop.f32.mrb[42].mxu0  ;;  %5821 = vmax.xlane.f32.xlu0 %v21579_v55 }
 0x997   :  { %v21605_v23 = vadd.f32 %v15355_v5, %v4721_v59  ;;  %v5775_v25 = vpop.f32.mrb[43].mxu0 }
 0x998   :  { %v21607_v43 = vadd.f32 %v5775_v25, %v4711_v47 }
 0x999   :  { %5831 = vmax.xlane.f32.xlu1 %v21605_v23 }
 0x99a   :  { %v15358_v29 = vpop.f32.mrb[44].mxu0  ;;  %5825 = vmax.xlane.f32.xlu0 %v21593_v9 }
 0x99b   :  { %v21619_v6 = vadd.f32 %v15358_v29, %v4741_v21  ;;  %v5787_v30 = vpop.f32.mrb[45].mxu0 }
 0x99c   :  { %v21621_v61 = vadd.f32 %v5787_v30, %v4731_v26 }
 0x99d   :  { %5835 = vmax.xlane.f32.xlu1 %v21619_v6 }
 0x99e   :  { %v15361_v18 = vpop.f32.mrb[46].mxu0  ;;  %5829 = vmax.xlane.f32.xlu0 %v21607_v43 }
 0x99f   :  { %v21633_v34 = vadd.f32 %v15361_v18, %v4761_v38  ;;  %v5799_v14 = vpop.f32.mrb[47].mxu0 }
 0x9a0   :  { %v21635_v7 = vadd.f32 %v5799_v14, %v4751_v31 }
 0x9a1   :  { %5839 = vmax.xlane.f32.xlu1 %v21633_v34 }
 0x9a2   :  { %5833 = vmax.xlane.f32.xlu0 %v21621_v61 }
 0x9a6   :  { %5837 = vmax.xlane.f32.xlu0 %v21635_v7 }
 0x9b2   :  { %5979 = vrot.lane.b32.xlu1 %v25037_v8, %s18577_s4 }
 0x9bc   :  { %5977 = vrot.lane.b32.xlu0 %v25038_v44, %s18577_s4 }
 0xa12   :  { %v5812_v37 = vpop.xlane.xlu1 %5811 }
 0xa13   :  { %v5842_v24 = vsub.f32 %v21536_v20, %v5812_v37  ;;  %v5810_v40 = vpop.xlane.xlu0 %5809 }
 0xa14   :  { %v5841_v33 = vsub.f32 %v21538_v54, %v5810_v40 }
 0xa15   :  { %v5859_v28 = vmul.f32 1.442695, %v5842_v24 }
 0xa16   :  { %v5857_v2 = vmul.f32 1.442695, %v5841_v33 }
 0xa17   :  { %18376 = vpow2.f32 %v5859_v28  ;;  %v5816_v10 = vpop.xlane.xlu0 %5815 }
 0xa18   :  { %18378 = vpow2.f32 %v5857_v2  ;;  %v5844_v56 = vsub.f32 %v21550_v48, %v5816_v10 }
 0xa1a   :  { %v5863_v52 = vmul.f32 1.442695, %v5844_v56  ;;  %v5820_v3 = vpop.xlane.xlu1 %5819 }
 0xa1b   :  { %v5846_v32 = vsub.f32 %v21563_v17, %v5820_v3  ;;  %v5814_v36 = vpop.xlane.xlu0 %5813 }
 0xa1c   :  { %18380 = vpow2.f32 %v5863_v52  ;;  %v5843_v59 = vsub.f32 %v21552_v16, %v5814_v36 }
 0xa1d   :  { %v5867_v62 = vmul.f32 1.442695, %v5846_v32 }
 0xa1e   :  { %v5861_v20 = vmul.f32 1.442695, %v5843_v59  ;;  %v5824_v47 = vpop.xlane.xlu1 %5823 }
 0xa1f   :  { %18382 = vpow2.f32 %v5867_v62  ;;  %v5848_v54 = vsub.f32 %v21577_v41, %v5824_v47  ;;  %v5818_v5 = vpop.xlane.xlu0 %5817 }
 0xa20   :  { %18384 = vpow2.f32 %v5861_v20  ;;  %v5845_v25 = vsub.f32 %v21565_v39, %v5818_v5 }
 0xa21   :  { %v21651_v11 = vpop.eup %18376  ;;  %v5871_v48 = vmul.f32 1.442695, %v5848_v54 }
 0xa22   :  { %v21653_v21 = vpop.eup %18378  ;;  %v5865_v17 = vmul.f32 1.442695, %v5845_v25  ;;  %v5828_v57 = vpop.xlane.xlu1 %5827  ;;  %5891 = vadd.xlane.f32.xlu1 %v21651_v11 }
 0xa23   :  { %18386 = vpow2.f32 %v5871_v48  ;;  %v5850_v16 = vsub.f32 %v21591_v45, %v5828_v57  ;;  %5889 = vadd.xlane.f32.xlu0 %v21653_v21  ;;  %v5822_v26 = vpop.xlane.xlu0 %5821 }
 0xa24   :  { %18388 = vpow2.f32 %v5865_v17  ;;  %v5847_v41 = vsub.f32 %v21579_v55, %v5822_v26 }
 0xa25   :  { %v5875_v29 = vmul.f32 1.442695, %v5850_v16 }
 0xa26   :  { %v21659_v39 = vpop.eup %18380  ;;  %v5869_v30 = vmul.f32 1.442695, %v5847_v41  ;;  %v5832_v53 = vpop.xlane.xlu1 %5831 }
 0xa27   :  { %18390 = vpow2.f32 %v5875_v29  ;;  %v5852_v38 = vsub.f32 %v21605_v23, %v5832_v53  ;;  %5895 = vadd.xlane.f32.xlu0 %v21659_v39  ;;  %v5826_v42 = vpop.xlane.xlu0 %5825 }
 0xa28   :  { %18392 = vpow2.f32 %v5869_v30  ;;  %v5849_v45 = vsub.f32 %v21593_v9, %v5826_v42 }
 0xa29   :  { %v21664_v31 = vpop.eup %18382  ;;  %v5879_v18 = vmul.f32 1.442695, %v5852_v38 }
 0xa2a   :  { %v21666_v14 = vpop.eup %18384  ;;  %v5873_v55 = vmul.f32 1.442695, %v5849_v45  ;;  %v5836_v8 = vpop.xlane.xlu1 %5835 }
 0xa2b   :  { %18394 = vpow2.f32 %v5879_v18  ;;  %v5854_v44 = vsub.f32 %v21619_v6, %v5836_v8  ;;  %5899 = vadd.xlane.f32.xlu0 %v21664_v31  ;;  %5893 = vadd.xlane.f32.xlu1 %v21666_v14  ;;  %v5830_v23 = vpop.xlane.xlu0 %5829  ;;  %v25039_v8 = vld [vmem:[#allocation13_spill] sm:$0xff] }
 0xa2c   :  { %18396 = vpow2.f32 %v5873_v55  ;;  %v5851_v37 = vsub.f32 %v21607_v43, %v5830_v23 }
 0xa2d   :  { %v21672_v24 = vpop.eup %18386  ;;  %v5883_v9 = vmul.f32 1.442695, %v5854_v44  ;;  %v25040_v44 = vld [vmem:[#allocation14_spill] sm:$0xff] }
 0xa2e   :  { %v21674_v40 = vpop.eup %18388  ;;  %v5877_v33 = vmul.f32 1.442695, %v5851_v37  ;;  %v5840_v28 = vpop.xlane.xlu1 %5839 }
 0xa2f   :  { %18398 = vpow2.f32 %v5883_v9  ;;  %v5856_v2 = vsub.f32 %v21633_v34, %v5840_v28  ;;  %5903 = vadd.xlane.f32.xlu0 %v21672_v24  ;;  %5897 = vadd.xlane.f32.xlu1 %v21674_v40  ;;  %v5834_v6 = vpop.xlane.xlu0 %5833 }
 0xa30   :  { %18400 = vpow2.f32 %v5877_v33  ;;  %v5853_v10 = vsub.f32 %v21621_v61, %v5834_v6 }
 0xa31   :  { %v21680_v56 = vpop.eup %18390  ;;  %v5887_v43 = vmul.f32 1.442695, %v5856_v2 }
 0xa32   :  { %v21682_v52 = vpop.eup %18392  ;;  %v5881_v3 = vmul.f32 1.442695, %v5853_v10  ;;  %v5980_v32 = vpop.permute.xlu1 %5979 }
 0xa33   :  { %18402 = vpow2.f32 %v5887_v43  ;;  %v6041_v36 = vand.u32 4294901760, %v5980_v32  ;;  %5907 = vadd.xlane.f32.xlu0 %v21680_v56  ;;  %5901 = vadd.xlane.f32.xlu1 %v21682_v52  ;;  %v5838_v34 = vpop.xlane.xlu0 %5837 }
 0xa34   :  { %18404 = vpow2.f32 %v5881_v3  ;;  %v5855_v59 = vsub.f32 %v21635_v7, %v5838_v34 }
 0xa35   :  { %v21687_v62 = vpop.eup %18394  ;;  %v6335_v61 = vsub.f32 %v5980_v32, %v6041_v36 }
 0xa36   :  { %v21689_v20 = vpop.eup %18396  ;;  %v5885_v47 = vmul.f32 1.442695, %v5855_v59 }
 0xa37   :  { %5911 = vadd.xlane.f32.xlu0 %v21687_v62  ;;  %5905 = vadd.xlane.f32.xlu1 %v21689_v20  ;;  %v5978_v54 = vpop.permute.xlu0 %5977  ;;  %v6336_v5 = vand.u32 4294901760, %v6335_v61 }
 0xa38   :  { %18406 = vpow2.f32 %v5885_v47  ;;  %v6038_v25 = vand.u32 4294901760, %v5978_v54 }
 0xa39   :  { %v21693_v48 = vpop.eup %18398  ;;  %v6337_v16 = vsub.f32 %v6335_v61, %v6336_v5 }
 0xa3a   :  { %v21695_v17 = vpop.eup %18400  ;;  %v21697_v57 = vpack.c.bf16 %v6041_v36, %v6038_v25  ;;  %v6328_v7 = vsub.f32 %v5978_v54, %v6038_v25 }
 0xa3b   :  { %5915 = vadd.xlane.f32.xlu0 %v21693_v48  ;;  %5909 = vadd.xlane.f32.xlu1 %v21695_v17  ;;  %v6338_v45 = vand.u32 4294901760, %v6337_v16 }
 0xa3c   :  { %v6329_v26 = vand.u32 4294901760, %v6328_v7  ;;  %17115 = vmatprep.subr.bf16.mxu1 %v21697_v57  ;;  %v21702_v41 = vpack.c.bf16 %v6335_v61, %v6328_v7 }
 0xa3d   :  { %v21704_v29 = vpop.eup %18402  ;;  %17117 = vmatpush3.bf16.msra.mxu1 %v21697_v57 }
 0xa3e   :  { %v21707_v30 = vpop.eup %18404  ;;  %v6330_v53 = vsub.f32 %v6328_v7, %v6329_v26  ;;  %v21709_v38 = vpack.c.bf16 %v6336_v5, %v6329_v26 }
 0xa3f   :  { %5919 = vadd.xlane.f32.xlu0 %v21704_v29  ;;  %5913 = vadd.xlane.f32.xlu1 %v21707_v30 }
 0xa40   :  { %v6331_v42 = vand.u32 4294901760, %v6330_v53 }
 0xa42   :  { %v21713_v18 = vpop.eup %18406  ;;  %v21715_v55 = vpack.c.bf16 %v6338_v45, %v6331_v42 }
 0xa43   :  { %5917 = vadd.xlane.f32.xlu1 %v21713_v18 }
 0xa54   :  { %5983 = vrot.lane.b32.xlu1 %v25039_v8, %s18577_s4 }
 0xa55   :  { %5981 = vrot.lane.b32.xlu0 %v25040_v44, %s18577_s4 }
 0xaaf   :  { %v5892_v37 = vpop.xlane.xlu1 %5891 }
 0xab0   :  { %v5890_v23 = vpop.xlane.xlu0 %5889 }
 0xab1   :  { %18408 = vrcp.f32 %v5890_v23 }
 0xab2   :  { %18410 = vrcp.f32 %v5892_v37 }
 0xab4   :  { %v5896_v9 = vpop.xlane.xlu0 %5895 }
 0xab8   :  { %v5894_v33 = vpop.xlane.xlu1 %5893  ;;  %v5900_v28 = vpop.xlane.xlu0 %5899 }
 0xab9   :  { %18412 = vrcp.f32 %v5894_v33 }
 0xaba   :  { %18414 = vrcp.f32 %v5896_v9 }
 0xabb   :  { %v18409_v2 = vpop.eup %18408 }
 0xabc   :  { %v5898_v6 = vpop.xlane.xlu1 %5897  ;;  %v5904_v10 = vpop.xlane.xlu0 %5903  ;;  %v5922_v43 = vmul.f32 %v18409_v2, %v21653_v21 }
 0xabd   :  { %18416 = vrcp.f32 %v5898_v6  ;;  %v18411_v59 = vpop.eup %18410 }
 0xabe   :  { %v21723_v3 = vand.u32 4294901760, %v5922_v43  ;;  %18418 = vrcp.f32 %v5900_v28  ;;  %v5924_v25 = vmul.f32 %v18411_v59, %v21651_v11 }
 0xac0   :  { %v5902_v32 = vpop.xlane.xlu1 %5901  ;;  %v5908_v36 = vpop.xlane.xlu0 %5907  ;;  %v21726_v34 = vsub.f32 %v5922_v43, %v21723_v3  ;;  %v21734_v8 = vand.u32 4294901760, %v5924_v25 }
 0xac1   :  { %18420 = vrcp.f32 %v5902_v32 }
 0xac2   :  { %v24463_v61 = vand.u32 4294901760, %v21726_v34  ;;  %18422 = vrcp.f32 %v5904_v10  ;;  %v21741_v2 = vsub.f32 %v5924_v25, %v21734_v8 }
 0xac3   :  { %v18413_v21 = vpop.eup %18412 }
 0xac4   :  { %v5906_v47 = vpop.xlane.xlu1 %5905  ;;  %v5912_v54 = vpop.xlane.xlu0 %5911  ;;  %v6085_v5 = vsub.f32 %v21726_v34, %v24463_v61  ;;  %v5926_v45 = vmul.f32 %v18413_v21, %v21666_v14 }
 0xac5   :  { %v18415_v7 = vpop.eup %18414  ;;  %18424 = vrcp.f32 %v5906_v47  ;;  %v24462_v47 = vand.u32 4294901760, %v21741_v2 }
 0xac6   :  { %v6086_v16 = vand.u32 4294901760, %v6085_v5  ;;  %18426 = vrcp.f32 %v5908_v36  ;;  %v5928_v44 = vmul.f32 %v18415_v7, %v21659_v39  ;;  %v21738_v28 = vand.u32 4294901760, %v5926_v45 }
 0xac7   :  { %v18417_v26 = vpop.eup %18416 }
 0xac8   :  { %v5910_v53 = vpop.xlane.xlu1 %5909  ;;  %15394 = vmatprep.mubr.f32.mxu1 %v6086_v16  ;;  %v5916_v42 = vpop.xlane.xlu0 %5915  ;;  %v5930_v37 = vmul.f32 %v18417_v26, %v21674_v40  ;;  %v21743_v6 = vand.u32 4294901760, %v5928_v44  ;;  %v21750_v36 = vsub.f32 %v5926_v45, %v21738_v28 }
 0xac9   :  { %v18419_v23 = vpop.eup %18418  ;;  %18428 = vrcp.f32 %v5910_v53 }
 0xaca   :  { %v5932_v14 = vmul.f32 %v18419_v23, %v21664_v31  ;;  %18430 = vrcp.f32 %v5912_v54  ;;  %v21746_v10 = vand.u32 4294901760, %v5930_v37  ;;  %v21754_v5 = vsub.f32 %v5928_v44, %v21743_v6 }
 0xacb   :  { %v18421_v11 = vpop.eup %18420  ;;  %v24464_v26 = vand.u32 4294901760, %v21750_v36 }
 0xacc   :  { %v5914_v9 = vpop.xlane.xlu1 %5913  ;;  %v5920_v33 = vpop.xlane.xlu0 %5919  ;;  %v5934_v40 = vmul.f32 %v18421_v11, %v21682_v52  ;;  %v21756_v21 = vand.u32 4294901760, %v5932_v14  ;;  %v21759_v31 = vsub.f32 %v5930_v37, %v21746_v10  ;;  %v24465_v23 = vand.u32 4294901760, %v21754_v5 }
 0xacd   :  { %v18423_v39 = vpop.eup %18422  ;;  %18432 = vrcp.f32 %v5914_v9 }
 0xace   :  { %18434 = vrcp.f32 %v5916_v42  ;;  %v5936_v54 = vmul.f32 %v18423_v39, %v21672_v24  ;;  %v21762_v7 = vand.u32 4294901760, %v5934_v40  ;;  %v6095_v42 = vsub.f32 %v21741_v2, %v24462_v47 }
 0xacf   :  { %v18425_v59 = vpop.eup %18424  ;;  %v21771_v24 = vsub.f32 %v5932_v14, %v21756_v21 }
 0xad0   :  { %v5918_v43 = vpop.xlane.xlu1 %5917  ;;  %v5982_v32 = vpop.permute.xlu0 %5981  ;;  %v5938_v53 = vmul.f32 %v18425_v59, %v21689_v20  ;;  %v21774_v11 = vand.u32 4294901760, %v5936_v54  ;;  %v21784_v59 = vsub.f32 %v5934_v40, %v21762_v7  ;;  %v6115_v40 = vsub.f32 %v21754_v5, %v24465_v23 }
 0xad1   :  { %v18427_v52 = vpop.eup %18426  ;;  %18436 = vrcp.f32 %v5918_v43  ;;  %v6044_v25 = vand.u32 4294901760, %v5982_v32 }
 0xad2   :  { %18438 = vrcp.f32 %v5920_v33  ;;  %v5940_v9 = vmul.f32 %v18427_v52, %v21680_v56  ;;  %v6105_v33 = vsub.f32 %v21750_v36, %v24464_v26  ;;  %v21789_v14 = vand.u32 4294901760, %v5938_v53 }
 0xad3   :  { %v18429_v45 = vpop.eup %18428  ;;  %v21777_v39 = vsub.f32 %v5982_v32, %v6044_v25  ;;  %v6096_v32 = vand.u32 4294901760, %v6095_v42  ;;  %v24466_v26 = vand.u32 4294901760, %v21784_v59 }
 0xad4   :  { %v5984_v16 = vpop.permute.xlu1 %5983  ;;  %v18431_v47 = vpop.eup %18430  ;;  %v5942_v61 = vmul.f32 %v18429_v45, %v21695_v17  ;;  %v25041_v45 = vld [vmem:[#allocation6_spill] sm:$0xff]  ;;  %v6106_v58 = vand.u32 4294901760, %v6105_v33  ;;  %v21812_v52 = vsub.f32 %v5938_v53, %v21789_v14 }
 0xad5   :  { %v6047_v44 = vand.u32 4294901760, %v5984_v16  ;;  %v5944_v56 = vmul.f32 %v18431_v47, %v21687_v62  ;;  %v25043_v1 = vand.u32 4294901760, %v21777_v39  ;;  %v6116_v62 = vand.u32 4294901760, %v6115_v40 }
 0xad6   :  { %v25045_v47 = vand.u32 4294901760, %v21771_v24 }
 0xad7   :  { %v21779_v20 = vpack.c.bf16 %v6047_v44, %v6044_v25  ;;  %v21781_v43 = vsub.f32 %v5984_v16, %v6047_v44  ;;  %v18433_v37 = vpop.eup %18432  ;;  %v21800_v25 = vsub.f32 %v5936_v54, %v21774_v11  ;;  %v21802_v16 = vand.u32 4294901760, %v5940_v9 }
 0xad8   :  { %v25042_v44 = vand.u32 4294901760, %v21759_v31  ;;  %v18435_v23 = vpop.eup %18434  ;;  %v21814_v54 = vand.u32 4294901760, %v5942_v61  ;;  %v5946_v12 = vmul.f32 %v18433_v37, %v21707_v30  ;;  %v6135_v53 = vsub.f32 %v21771_v24, %v25045_v47  ;;  %v25046_v37 = vld [vmem:[#allocation39_spill] sm:$0xff] }
 0xad9   :  { %17119 = vmatprep.subr.bf16.mxu1 %v21779_v20  ;;  %v25044_v50 = vand.u32 4294901760, %v21781_v43  ;;  %v21829_v30 = vsub.f32 %v5940_v9, %v21802_v16 }
 0xada   :  { %17121 = vmatpush3.bf16.msra.mxu1 %v21779_v20  ;;  %v6125_v42 = vsub.f32 %v21759_v31, %v25042_v44  ;;  %v21840_v47 = vsub.f32 %v5942_v61, %v21814_v54  ;;  %v21842_v33 = vand.u32 4294901760, %v5946_v12 }
 0xadb   :  { %17123 = vmatprep.subr.bf16.mxu1 %v25041_v45  ;;  %v18437_v17 = vpop.eup %18436  ;;  %v21821_v44 = vpack.c.bf16 %v25044_v50, %v25043_v1  ;;  %v6145_v1 = vsub.f32 %v21784_v59, %v24466_v26  ;;  %v21835_v50 = vand.u32 4294901760, %v5944_v56  ;;  %v25047_v26 = vand.u32 4294901760, %v21800_v25 }
 0xadc   :  { %v18439_v40 = vpop.eup %18438  ;;  %v5950_v9 = vmul.f32 %v18437_v17, %v21713_v18  ;;  %v25048_v17 = vand.u32 4294901760, %v21812_v52 }
 0xadd   :  { %15395 = vmatmul.mubr.f32.vlgmr.msra.gmra.mrb[48].mxu1 %v6096_v32  ;;  %v6126_v32 = vand.u32 4294901760, %v6125_v42  ;;  %v6136_v42 = vand.u32 4294901760, %v6135_v53  ;;  %v6155_v4 = vsub.f32 %v21800_v25, %v25047_v26  ;;  %v21852_v61 = vsub.f32 %v5944_v56, %v21835_v50 }
 0xade   :  { %15397 = vmatprep.mubr.f32.mxu1 %v6106_v58  ;;  %17125 = vmatpush3.bf16.msra.mxu1 %v25041_v45  ;;  %v5948_v58 = vmul.f32 %v18435_v23, %v21693_v48  ;;  %v24467_v48 = vand.u32 4294901760, %v21829_v30  ;;  %v6146_v23 = vand.u32 4294901760, %v6145_v1  ;;  %v5952_v18 = vmul.f32 %v18439_v40, %v21704_v29 }
 0xadf   :  { %17127 = vmatprep.subr.bf16.mxu1 %v25046_v37  ;;  %v24468_v53 = vand.u32 4294901760, %v21840_v47  ;;  %v21862_v26 = vsub.f32 %v5946_v12, %v21842_v33  ;;  %v6156_v56 = vand.u32 4294901760, %v6155_v4  ;;  %v24469_v1 = vand.u32 4294901760, %v21852_v61 }
 0xae0   :  { %v21854_v45 = vand.u32 4294901760, %v5948_v58  ;;  %v6175_v29 = vsub.f32 %v21829_v30, %v24467_v48  ;;  %v21875_v12 = vand.u32 4294901760, %v5952_v18  ;;  %v25054_v48 = vld [vmem:[#allocation32_spill] sm:$0xff] }
 0xae1   :  { %15398 = vmatmul.mubr.f32.gmra.mrb[50].mxu1 %v6116_v62  ;;  %v6165_v62 = vsub.f32 %v21812_v52, %v25048_v17 }
 0xae2   :  { %15400 = vmatprep.mubr.f32.mxu1 %v6126_v32  ;;  %17129 = vmatpush3.bf16.msra.mxu1 %v25046_v37  ;;  %v21864_v37 = vand.u32 4294901760, %v5950_v9  ;;  %v25049_v32 = vld [vmem:[#allocation30_spill] sm:$0xff]  ;;  %v21873_v40 = vsub.f32 %v5948_v58, %v21854_v45  ;;  %v6176_v58 = vand.u32 4294901760, %v6175_v29 }
 0xae3   :  { %17131 = vmatprep.subr.bf16.mxu1 %v21126_v19  ;;  %v6166_v17 = vand.u32 4294901760, %v6165_v62  ;;  %v6195_v62 = vsub.f32 %v21852_v61, %v24469_v1  ;;  %v25053_v1 = vand.u32 4294901760, %v21777_v39 }
 0xae4   :  { %v21882_v4 = vsub.f32 %v5950_v9, %v21864_v37  ;;  %v25051_v9 = vand.u32 4294901760, %v21862_v26  ;;  %v25055_v15 = vand.u32 4294901760, %v21873_v40 }
 0xae5   :  { %15401 = vmatmul.mubr.f32.gmra.mrb[52].mxu1 %v6136_v42  ;;  %v6185_v42 = vsub.f32 %v21840_v47, %v24468_v53  ;;  %v21891_v53 = vsub.f32 %v5952_v18, %v21875_v12  ;;  %v6344_v18 = vsub.f32 %v21777_v39, %v25053_v1 }
 0xae6   :  { %15403 = vmatprep.mubr.f32.mxu1 %v6146_v23  ;;  %17133 = vmatpush3.bf16.msra.mxu1 %v21126_v19  ;;  %v25050_v23 = vld [vmem:[#allocation34_spill] sm:$0xff] }
 0xae7   :  { %17135 = vmatprep.subr.bf16.mxu1 %v25049_v32  ;;  %v6186_v19 = vand.u32 4294901760, %v6185_v42  ;;  %v6196_v42 = vand.u32 4294901760, %v6195_v62 }
 0xae9   :  { %15404 = vmatmul.mubr.f32.gmra.mrb[54].mxu1 %v6156_v56  ;;  %v6205_v56 = vsub.f32 %v21862_v26, %v25051_v9  ;;  %v6215_v9 = vsub.f32 %v21873_v40, %v25055_v15 }
 0xaea   :  { %15406 = vmatprep.mubr.f32.mxu1 %v6166_v17  ;;  %17137 = vmatpush3.bf16.msra.mxu1 %v25049_v32  ;;  %v25052_v32 = vand.u32 4294901760, %v21781_v43  ;;  %v6234_v17 = vand.u32 4294901760, %v21891_v53 }
 0xaeb   :  { %17139 = vmatprep.subr.bf16.mxu1 %v25050_v23  ;;  %v6206_v27 = vand.u32 4294901760, %v6205_v56  ;;  %v6216_v1 = vand.u32 4294901760, %v6215_v9  ;;  %v25062_v9 = vld [vmem:[#allocation100_spill] sm:$0xff] }
 0xaec   :  { %v6351_v29 = vsub.f32 %v21781_v43, %v25052_v32  ;;  %v25056_v32 = vand.u32 4294901760, %v21882_v4  ;;  %v6235_v15 = vsub.f32 %v21891_v53, %v6234_v17 }
 0xaed   :  { %15407 = vmatmul.mubr.f32.gmra.mrb[56].mxu1 %v6176_v58  ;;  %v6345_v58 = vand.u32 4294901760, %v6344_v18  ;;  %v25061_v18 = vld [vmem:[#allocation99_spill] sm:$0xff] }
 0xaee   :  { %15409 = vmatprep.mubr.f32.mxu1 %v6186_v19  ;;  %17141 = vmatpush3.bf16.msra.mxu1 %v25050_v23  ;;  %v6225_v19 = vsub.f32 %v21882_v4, %v25056_v32  ;;  %v6352_v23 = vand.u32 4294901760, %v6351_v29  ;;  %v25060_v29 = vld [vmem:[#allocation54_spill] sm:$0xff]  ;;  %v17182_v32 = vpack.c.bf16 %v21781_v43, %v21777_v39  ;;  %v25066_v39 = vld [vmem:[#allocation27_spill] sm:$0xff] }
 0xaef   :  { %17143 = vmatprep.subr.bf16.mxu1 %v25054_v48  ;;  %v25067_v43 = vld [vmem:[#allocation31_spill] sm:$0xff] }
 0xaf0   :  { %v6226_v62 = vand.u32 4294901760, %v6225_v19  ;;  %v17150_v56 = vpack.c.bf16 %v6352_v23, %v6345_v58  ;;  %v25063_v19 = vld [vmem:[#allocation33_spill] sm:$0xff]  ;;  %v25064_v23 = vld [vmem:[#allocation19_spill] sm:$0xff]  ;;  %v25069_v58 = vand.u32 4294901760, %v21726_v34 }
 0xaf1   :  { %15410 = vmatmul.mubr.f32.gmra.mrb[58].mxu1 %v6196_v42  ;;  %v6236_v42 = vand.u32 4294901760, %v6235_v15  ;;  %v25070_v15 = vld [vmem:[#allocation24_spill] sm:$0xff] }
 0xaf2   :  { %15412 = vmatprep.mubr.f32.mxu1 %v6206_v27  ;;  %17145 = vmatpush3.bf16.msra.mxu1 %v25054_v48  ;;  %v25057_v27 = vld [vmem:[#allocation44_spill] sm:$0xff]  ;;  %v25058_v48 = vld [vmem:[#allocation47_spill] sm:$0xff] }
 0xaf3   :  { %17147 = vmatprep.subr.bf16.mxu1 %v21715_v55 }
 0xaf5   :  { %15413 = vmatmul.mubr.f32.gmra.mrb[60].mxu1 %v6216_v1  ;;  %v25068_v1 = vld [vmem:[#allocation57_spill] sm:$0xff] }
 0xaf6   :  { %15415 = vmatprep.mubr.f32.mxu1 %v6226_v62  ;;  %17149 = vmatpush3.bf16.msra.mxu1 %v21715_v55  ;;  %v25059_v55 = vld [vmem:[#allocation51_spill] sm:$0xff]  ;;  %v25071_v62 = vand.u32 4294901760, %v21741_v2 }
 0xaf7   :  { %17151 = vmatprep.subr.bf16.mxu1 %v17150_v56 }
 0xaf9   :  { %15416 = vmatmul.mubr.f32.gmra.mrb[62].mxu1 %v6236_v42  ;;  %v25073_v42 = vld [vmem:[#allocation97_spill] sm:$0xff] }
 0xafa   :  { %17153 = vmatpush3.bf16.msra.mxu1 %v17150_v56  ;;  %15450 = vmatprep.mubr.f32.mxu1 %v21723_v3  ;;  %v25072_v56 = vand.u32 4294901760, %v21750_v36 }
 0xafb   :  { %17155 = vmatprep.subr.bf16.mxu1 %v25057_v27 }
 0xafd   :  { %15451 = vmatmul.mubr.f32.vlgmr.msra.gmra.mrb[48].mxu1 %v21734_v8 }
 0xafe   :  { %15453 = vmatprep.mubr.f32.mxu1 %v21738_v28  ;;  %17157 = vmatpush3.bf16.msra.mxu1 %v25057_v27  ;;  %v25074_v27 = vand.u32 4294901760, %v21754_v5 }
 0xaff   :  { %17159 = vmatprep.subr.bf16.mxu1 %v25058_v48 }
 0xb01   :  { %15454 = vmatmul.mubr.f32.gmra.mrb[50].mxu1 %v21743_v6 }
 0xb02   :  { %15456 = vmatprep.mubr.f32.mxu1 %v21746_v10  ;;  %17161 = vmatpush3.bf16.msra.mxu1 %v25058_v48  ;;  %v25075_v48 = vand.u32 4294901760, %v21759_v31 }
 0xb03   :  { %17163 = vmatprep.subr.bf16.mxu1 %v25059_v55 }
 0xb05   :  { %15457 = vmatmul.mubr.f32.gmra.mrb[52].mxu1 %v21756_v21 }
 0xb06   :  { %15459 = vmatprep.mubr.f32.mxu1 %v21762_v7  ;;  %17165 = vmatpush3.bf16.msra.mxu1 %v25059_v55  ;;  %v25079_v55 = vld [vmem:[#allocation18_spill] sm:$0xff] }
 0xb07   :  { %17167 = vmatprep.subr.bf16.mxu1 %v25060_v29 }
 0xb09   :  { %15460 = vmatmul.mubr.f32.gmra.mrb[54].mxu1 %v21774_v11 }
 0xb0a   :  { %15462 = vmatprep.mubr.f32.mxu1 %v21789_v14  ;;  %17169 = vmatpush3.bf16.msra.mxu1 %v25060_v29  ;;  %v25082_v29 = vld [vmem:[#allocation23_spill] sm:$0xff] }
 0xb0b   :  { %17171 = vmatprep.subr.bf16.mxu1 %v25061_v18 }
 0xb0d   :  { %15463 = vmatmul.mubr.f32.gmra.mrb[56].mxu1 %v21802_v16 }
 0xb0e   :  { %15465 = vmatprep.mubr.f32.mxu1 %v21814_v54  ;;  %17173 = vmatpush3.bf16.msra.mxu1 %v25061_v18  ;;  %v25085_v18 = vld [vmem:[#allocation17_spill] sm:$0xff] }
 0xb0f   :  { %17175 = vmatprep.subr.bf16.mxu1 %v25062_v9 }
 0xb11   :  { %15466 = vmatmul.mubr.f32.gmra.mrb[58].mxu1 %v21835_v50 }
 0xb12   :  { %15468 = vmatprep.mubr.f32.mxu1 %v21842_v33  ;;  %17177 = vmatpush3.bf16.msra.mxu1 %v25062_v9 }
 0xb13   :  { %17179 = vmatprep.subr.bf16.mxu1 %v21702_v41 }
 0xb15   :  { %15469 = vmatmul.mubr.f32.gmra.mrb[60].mxu1 %v21854_v45 }
 0xb16   :  { %15471 = vmatprep.mubr.f32.mxu1 %v21864_v37  ;;  %17181 = vmatpush3.bf16.msra.mxu1 %v21702_v41  ;;  %v25065_v41 = vld [vmem:[#allocation22_spill] sm:$0xff] }
 0xb17   :  { %17183 = vmatprep.subr.bf16.mxu1 %v17182_v32 }
 0xb19   :  { %15472 = vmatmul.mubr.f32.gmra.mrb[62].mxu1 %v21875_v12 }
 0xb1a   :  { %17185 = vmatpush3.bf16.msra.mxu1 %v17182_v32  ;;  %15506 = vmatprep.mubr.f32.mxu1 %v21726_v34  ;;  %v25076_v34 = vld [vmem:[#allocation98_spill] sm:$0xff] }
 0xb1b   :  { %17187 = vmatprep.subr.bf16.mxu1 %v25063_v19 }
 0xb1d   :  { %15507 = vmatmul.mubr.f32.vlgmr.msra.gmra.mrb[48].mxu1 %v21741_v2  ;;  %v25077_v2 = vand.u32 4294901760, %v21771_v24 }
 0xb1e   :  { %15509 = vmatprep.mubr.f32.mxu1 %v21750_v36  ;;  %17189 = vmatpush3.bf16.msra.mxu1 %v25063_v19  ;;  %v25078_v36 = vand.u32 4294901760, %v21784_v59 }
 0xb1f   :  { %17191 = vmatprep.subr.bf16.mxu1 %v25064_v23 }
 0xb21   :  { %15510 = vmatmul.mubr.f32.gmra.mrb[50].mxu1 %v21754_v5  ;;  %v25080_v5 = vand.u32 4294901760, %v21800_v25 }
 0xb22   :  { %15512 = vmatprep.mubr.f32.mxu1 %v21759_v31  ;;  %17193 = vmatpush3.bf16.msra.mxu1 %v25064_v23  ;;  %v25081_v31 = vand.u32 4294901760, %v21812_v52 }
 0xb23   :  { %17195 = vmatprep.subr.bf16.mxu1 %v25065_v41 }
 0xb25   :  { %15513 = vmatmul.mubr.f32.gmra.mrb[52].mxu1 %v21771_v24  ;;  %v25083_v24 = vand.u32 4294901760, %v21829_v30 }
 0xb26   :  { %15515 = vmatprep.mubr.f32.mxu1 %v21784_v59  ;;  %17197 = vmatpush3.bf16.msra.mxu1 %v25065_v41  ;;  %v25084_v59 = vand.u32 4294901760, %v21840_v47 }
 0xb27   :  { %17199 = vmatprep.subr.bf16.mxu1 %v25066_v39 }
 0xb29   :  { %15516 = vmatmul.mubr.f32.gmra.mrb[54].mxu1 %v21800_v25  ;;  %v25086_v25 = vand.u32 4294901760, %v21852_v61 }
 0xb2a   :  { %15518 = vmatprep.mubr.f32.mxu1 %v21812_v52  ;;  %17201 = vmatpush3.bf16.msra.mxu1 %v25066_v39  ;;  %v25087_v52 = vand.u32 4294901760, %v21862_v26 }
 0xb2b   :  { %17203 = vmatprep.subr.bf16.mxu1 %v25067_v43 }
 0xb2d   :  { %15519 = vmatmul.mubr.f32.gmra.mrb[56].mxu1 %v21829_v30  ;;  %v25088_v30 = vand.u32 4294901760, %v21873_v40 }
 0xb2e   :  { %15521 = vmatprep.mubr.f32.mxu1 %v21840_v47  ;;  %17205 = vmatpush3.bf16.msra.mxu1 %v25067_v43  ;;  %v25089_v47 = vand.u32 4294901760, %v21882_v4 }
 0xb2f   :  { %17207 = vmatprep.subr.bf16.mxu1 %v25068_v1 }
 0xb31   :  { %15522 = vmatmul.mubr.f32.gmra.mrb[58].mxu1 %v21852_v61 }
 0xb32   :  { %15524 = vmatprep.mubr.f32.mxu1 %v21862_v26  ;;  %17209 = vmatpush3.bf16.msra.mxu1 %v25068_v1 }
 0xb33   :  { %17211 = vmatprep.subr.bf16.mxu1 %v21697_v57 }
 0xb35   :  { %15525 = vmatmul.mubr.f32.gmra.mrb[60].mxu1 %v21873_v40 }
 0xb36   :  { %15527 = vmatprep.mubr.f32.mxu1 %v21882_v4  ;;  %17213 = vmatpush3.bf16.msra.mxu1 %v21697_v57 }
 0xb37   :  { %17215 = vmatprep.subr.bf16.mxu1 %v21779_v20 }
 0xb39   :  { %15528 = vmatmul.mubr.f32.gmra.mrb[62].mxu1 %v21891_v53 }
 0xb3a   :  { %17217 = vmatpush3.bf16.msra.mxu1 %v21779_v20  ;;  %15562 = vmatprep.mubr.f32.mxu1 %v25069_v58 }
 0xb3b   :  { %17219 = vmatprep.subr.bf16.mxu1 %v25070_v15 }
 0xb3d   :  { %15563 = vmatmul.mubr.f32.vlgmr.msra.gmra.mrb[48].mxu1 %v25071_v62 }
 0xb3e   :  { %15565 = vmatprep.mubr.f32.mxu1 %v25072_v56  ;;  %17221 = vmatpush3.bf16.msra.mxu1 %v25070_v15 }
 0xb3f   :  { %17223 = vmatprep.subr.bf16.mxu1 %v25073_v42 }
 0xb41   :  { %15566 = vmatmul.mubr.f32.gmra.mrb[50].mxu1 %v25074_v27 }
 0xb42   :  { %15568 = vmatprep.mubr.f32.mxu1 %v25075_v48  ;;  %17225 = vmatpush3.bf16.msra.mxu1 %v25073_v42 }
 0xb43   :  { %17227 = vmatprep.subr.bf16.mxu1 %v25076_v34 }
 0xb45   :  { %15569 = vmatmul.mubr.f32.gmra.mrb[52].mxu1 %v25077_v2 }
 0xb46   :  { %15571 = vmatprep.mubr.f32.mxu1 %v25078_v36  ;;  %17229 = vmatpush3.bf16.msra.mxu1 %v25076_v34 }
 0xb47   :  { %17231 = vmatprep.subr.bf16.mxu1 %v25079_v55 }
 0xb49   :  { %15572 = vmatmul.mubr.f32.gmra.mrb[54].mxu1 %v25080_v5 }
 0xb4a   :  { %15574 = vmatprep.mubr.f32.mxu1 %v25081_v31  ;;  %17233 = vmatpush3.bf16.msra.mxu1 %v25079_v55 }
 0xb4b   :  { %17235 = vmatprep.subr.bf16.mxu1 %v25082_v29 }
 0xb4d   :  { %15575 = vmatmul.mubr.f32.gmra.mrb[56].mxu1 %v25083_v24 }
 0xb4e   :  { %15577 = vmatprep.mubr.f32.mxu1 %v25084_v59  ;;  %17237 = vmatpush3.bf16.msra.mxu1 %v25082_v29 }
 0xb4f   :  { %17239 = vmatprep.subr.bf16.mxu1 %v25085_v18 }
 0xb51   :  { %15578 = vmatmul.mubr.f32.gmra.mrb[58].mxu1 %v25086_v25 }
 0xb52   :  { %15580 = vmatprep.mubr.f32.mxu1 %v25087_v52  ;;  %17241 = vmatpush3.bf16.msra.mxu1 %v25085_v18 }
 0xb53   :  { %17243 = vmatprep.subr.bf16.mxu1 %v21709_v38 }
 0xb55   :  { %15581 = vmatmul.mubr.f32.gmra.mrb[60].mxu1 %v25088_v30 }
 0xb56   :  { %15583 = vmatprep.mubr.f32.mxu1 %v25089_v47  ;;  %17245 = vmatpush3.bf16.msra.mxu1 %v21709_v38  ;;  %v1516_v38 = vld [vmem:[%s24155_s5 + $0x10] sm:$0xff] }
 0xb57   :  { %17247 = vmatprep.subr.bf16.mxu1 %v21821_v44  ;;  %v7336_v61 = vand.u32 4294901760, %v1516_v38 }
 0xb59   :  { %15584 = vmatmul.mubr.f32.gmra.mrb[62].mxu1 %v6234_v17 }
 0xb5a   :  { %17249 = vmatpush3.bf16.msra.mxu1 %v21821_v44  ;;  %15618 = vmatprep.mubr.f32.mxu1 %v21723_v3  ;;  %v1517_v44 = vld [vmem:[%s24155_s5 + $0x18] sm:$0xff] }
 0xb5b   :  { %17251 = vmatprep.subr.bf16.mxu1 %v25063_v19  ;;  %v7339_v53 = vand.u32 4294901760, %v1517_v44 }
 0xb5d   :  { %15619 = vmatmul.mubr.f32.vlgmr.msra.gmra.mrb[48].mxu1 %v21734_v8  ;;  %v22066_v26 = vpack.c.bf16 %v7339_v53, %v7336_v61 }
 0xb5e   :  { %15621 = vmatprep.mubr.f32.mxu1 %v21738_v28  ;;  %17253 = vmatpush3.bf16.msra.mxu1 %v25063_v19 }
 0xb5f   :  { %17255 = vmatprep.subr.bf16.mxu1 %v25064_v23 }
 0xb61   :  { %15622 = vmatmul.mubr.f32.gmra.mrb[50].mxu1 %v21743_v6 }
 0xb62   :  { %15624 = vmatprep.mubr.f32.mxu1 %v21746_v10  ;;  %17257 = vmatpush3.bf16.msra.mxu1 %v25064_v23 }
 0xb63   :  { %17259 = vmatprep.subr.bf16.mxu1 %v25065_v41 }
 0xb65   :  { %15625 = vmatmul.mubr.f32.gmra.mrb[52].mxu1 %v21756_v21 }
 0xb66   :  { %15627 = vmatprep.mubr.f32.mxu1 %v21762_v7  ;;  %17261 = vmatpush3.bf16.msra.mxu1 %v25065_v41 }
 0xb67   :  { %17263 = vmatprep.subr.bf16.mxu1 %v25066_v39 }
 0xb69   :  { %15628 = vmatmul.mubr.f32.gmra.mrb[54].mxu1 %v21774_v11 }
 0xb6a   :  { %15630 = vmatprep.mubr.f32.mxu1 %v21789_v14  ;;  %17265 = vmatpush3.bf16.msra.mxu1 %v25066_v39 }
 0xb6b   :  { %17267 = vmatprep.subr.bf16.mxu1 %v25067_v43 }
 0xb6d   :  { %15631 = vmatmul.mubr.f32.gmra.mrb[56].mxu1 %v21802_v16 }
 0xb6e   :  { %15633 = vmatprep.mubr.f32.mxu1 %v21814_v54  ;;  %17269 = vmatpush3.bf16.msra.mxu1 %v25067_v43 }
 0xb6f   :  { %17271 = vmatprep.subr.bf16.mxu1 %v25068_v1 }
 0xb71   :  { %15634 = vmatmul.mubr.f32.gmra.mrb[58].mxu1 %v21835_v50 }
 0xb72   :  { %15636 = vmatprep.mubr.f32.mxu1 %v21842_v33  ;;  %17273 = vmatpush3.bf16.msra.mxu1 %v25068_v1 }
 0xb73   :  { %17275 = vmatprep.subr.bf16.mxu1 %v21697_v57 }
 0xb75   :  { %15637 = vmatmul.mubr.f32.gmra.mrb[60].mxu1 %v21854_v45 }
 0xb76   :  { %15639 = vmatprep.mubr.f32.mxu1 %v21864_v37  ;;  %17277 = vmatpush3.bf16.msra.mxu1 %v21697_v57  ;;  %v22088_v57 = vsub.f32 %v1516_v38, %v7336_v61 }
 0xb77   :  { %17279 = vmatprep.subr.bf16.mxu1 %v21779_v20 }
 0xb79   :  { %15640 = vmatmul.mubr.f32.gmra.mrb[62].mxu1 %v21875_v12 }
 0xb7a   :  { %17281 = vmatpush3.bf16.msra.mxu1 %v21779_v20  ;;  %15674 = vmatprep.mubr.f32.mxu1 %v21723_v3  ;;  %v22090_v3 = vsub.f32 %v1517_v44, %v7339_v53 }
 0xb7b   :  { %17283 = vmatprep.subr.bf16.mxu1 %v22066_v26 }
 0xb7c   :  { %v22102_v20 = vpack.c.bf16 %v22090_v3, %v22088_v57 }
 0xb7d   :  { %15675 = vmatmul.mubr.f32.vlgmr.msra.gmra.mrb[48].mxu1 %v21734_v8  ;;  %v7565_v8 = vand.u32 4294901760, %v22088_v57 }
 0xb7e   :  { %15677 = vmatprep.mubr.f32.mxu1 %v21738_v28  ;;  %17285 = vmatpush3.bf16.msra.mxu1 %v22066_v26  ;;  %v7572_v28 = vand.u32 4294901760, %v22090_v3 }
 0xb81   :  { %15678 = vmatmul.mubr.f32.gmra.mrb[50].mxu1 %v21743_v6  ;;  %v7566_v6 = vsub.f32 %v22088_v57, %v7565_v8 }
 0xb82   :  { %15680 = vmatprep.mubr.f32.mxu1 %v21746_v10  ;;  %v7573_v10 = vsub.f32 %v22090_v3, %v7572_v28 }
 0xb85   :  { %15681 = vmatmul.mubr.f32.gmra.mrb[52].mxu1 %v21756_v21  ;;  %v7567_v21 = vand.u32 4294901760, %v7566_v6 }
 0xb86   :  { %15683 = vmatprep.mubr.f32.mxu1 %v21762_v7  ;;  %v7574_v7 = vand.u32 4294901760, %v7573_v10 }
 0xb89   :  { %15684 = vmatmul.mubr.f32.gmra.mrb[54].mxu1 %v21774_v11  ;;  %v17286_v11 = vpack.c.bf16 %v7574_v7, %v7567_v21 }
 0xb8a   :  { %15686 = vmatprep.mubr.f32.mxu1 %v21789_v14 }
 0xb8b   :  { %17287 = vmatprep.subr.bf16.mxu1 %v17286_v11 }
 0xb8d   :  { %15687 = vmatmul.mubr.f32.gmra.mrb[56].mxu1 %v21802_v16 }
 0xb8e   :  { %15689 = vmatprep.mubr.f32.mxu1 %v21814_v54 }
 0xb91   :  { %15690 = vmatmul.mubr.f32.gmra.mrb[58].mxu1 %v21835_v50 }
 0xb92   :  { %15692 = vmatprep.mubr.f32.mxu1 %v21842_v33 }
 0xb95   :  { %15693 = vmatmul.mubr.f32.gmra.mrb[60].mxu1 %v21854_v45 }
 0xb96   :  { %15695 = vmatprep.mubr.f32.mxu1 %v21864_v37 }
 0xb99   :  { %15696 = vmatmul.mubr.f32.gmra.mrb[62].mxu1 %v21875_v12 }
 0xc50   :  { %v15676_v14 = vpop.f32.mrb[48].mxu1 }
 0xc51   :  { %v7291_v16 = vsel %vm1566_vm1, %v15676_v14, 0  ;;  %v7193_v54 = vpop.f32.mrb[49].mxu1 }
 0xc52   :  { %v22105_v33 = vand.u32 4294901760, %v7291_v16  ;;  %v7288_v50 = vsel %vm1566_vm1, %v7193_v54, 0 }
 0xc53   :  { %v22108_v45 = vand.u32 4294901760, %v7288_v50 }
 0xc54   :  { %v22111_v37 = vsub.f32 %v7291_v16, %v22105_v33  ;;  %v15679_v40 = vpop.f32.mrb[50].mxu1 }
 0xc55   :  { %v22114_v12 = vsub.f32 %v7288_v50, %v22108_v45  ;;  %v7297_v4 = vsel %vm1566_vm1, %v15679_v40, 0  ;;  %v7205_v17 = vpop.f32.mrb[51].mxu1 }
 0xc56   :  { %v7414_v9 = vand.u32 4294901760, %v22111_v37  ;;  %v22118_v32 = vand.u32 4294901760, %v7297_v4  ;;  %v7294_v19 = vsel %vm1566_vm1, %v7205_v17, 0 }
 0xc57   :  { %v7404_v23 = vand.u32 4294901760, %v22114_v12  ;;  %v22122_v41 = vand.u32 4294901760, %v7294_v19 }
 0xc58   :  { %v7415_v39 = vsub.f32 %v22111_v37, %v7414_v9  ;;  %v22128_v43 = vsub.f32 %v7297_v4, %v22118_v32  ;;  %v15682_v1 = vpop.f32.mrb[52].mxu1 }
 0xc59   :  { %v22131_v58 = vsub.f32 %v7294_v19, %v22122_v41  ;;  %v7303_v15 = vsel %vm1566_vm1, %v15682_v1, 0  ;;  %v7217_v62 = vpop.f32.mrb[53].mxu1  ;;  %v7405_v56 = vsub.f32 %v22114_v12, %v7404_v23 }
 0xc5a   :  { %v7434_v42 = vand.u32 4294901760, %v22128_v43  ;;  %v22138_v27 = vand.u32 4294901760, %v7303_v15  ;;  %v7300_v48 = vsel %vm1566_vm1, %v7217_v62, 0  ;;  %v7416_v55 = vand.u32 4294901760, %v7415_v39 }
 0xc5b   :  { %v7424_v34 = vand.u32 4294901760, %v22131_v58  ;;  %v22142_v2 = vand.u32 4294901760, %v7300_v48  ;;  %v7406_v36 = vand.u32 4294901760, %v7405_v56 }
 0xc5c   :  { %v22145_v5 = vsub.f32 %v7303_v15, %v22138_v27  ;;  %v15685_v31 = vpop.f32.mrb[54].mxu1  ;;  %v7435_v29 = vsub.f32 %v22128_v43, %v7434_v42 }
 0xc5d   :  { %v22151_v24 = vsub.f32 %v7300_v48, %v22142_v2  ;;  %v7309_v59 = vsel %vm1566_vm1, %v15685_v31, 0  ;;  %v7229_v18 = vpop.f32.mrb[55].mxu1  ;;  %15702 = vmatprep.mubr.f32.mxu1 %v7406_v36  ;;  %v7425_v25 = vsub.f32 %v22131_v58, %v7424_v34 }
 0xc5e   :  { %v24476_v52 = vand.u32 4294901760, %v22145_v5  ;;  %v22158_v30 = vand.u32 4294901760, %v7309_v59  ;;  %v7306_v47 = vsel %vm1566_vm1, %v7229_v18, 0  ;;  %15703 = vmatmul.mubr.f32.vlgmr.msra.gmra.mrb[64].mxu1 %v7416_v55  ;;  %v7436_v10 = vand.u32 4294901760, %v7435_v29 }
 0xc5f   :  { %v7444_v38 = vand.u32 4294901760, %v22151_v24  ;;  %v22162_v44 = vand.u32 4294901760, %v7306_v47  ;;  %17289 = vmatpush3.bf16.msra.mxu1 %v17286_v11  ;;  %v7426_v61 = vand.u32 4294901760, %v7425_v25  ;;  %v25090_v57 = vand.u32 4294901760, %v22145_v5 }
 0xc60   :  { %v22165_v53 = vsub.f32 %v7309_v59, %v22158_v30  ;;  %v15688_v6 = vpop.f32.mrb[56].mxu1  ;;  %v7455_v21 = vsub.f32 %v22145_v5, %v24476_v52  ;;  %17291 = vmatprep.subr.bf16.mxu1 %v22102_v20 }
 0xc61   :  { %v22172_v7 = vsub.f32 %v7306_v47, %v22162_v44  ;;  %v7315_v14 = vsel %vm1566_vm1, %v15688_v6, 0  ;;  %v7241_v16 = vpop.f32.mrb[57].mxu1  ;;  %15705 = vmatprep.mubr.f32.mxu1 %v7426_v61  ;;  %v7445_v11 = vsub.f32 %v22151_v24, %v7444_v38 }
 0xc62   :  { %v24473_v54 = vand.u32 4294901760, %v22165_v53  ;;  %v22179_v50 = vand.u32 4294901760, %v7315_v14  ;;  %v7312_v40 = vsel %vm1566_vm1, %v7241_v16, 0  ;;  %15706 = vmatmul.mubr.f32.gmra.mrb[66].mxu1 %v7436_v10  ;;  %v7456_v15 = vand.u32 4294901760, %v7455_v21 }
 0xc63   :  { %v24475_v4 = vand.u32 4294901760, %v22172_v7  ;;  %v22183_v17 = vand.u32 4294901760, %v7312_v40  ;;  %v7446_v19 = vand.u32 4294901760, %v7445_v11  ;;  %v25091_v3 = vand.u32 4294901760, %v22172_v7 }
 0xc64   :  { %v22186_v39 = vsub.f32 %v7315_v14, %v22179_v50  ;;  %v15691_v1 = vpop.f32.mrb[58].mxu1  ;;  %v7475_v62 = vsub.f32 %v22165_v53, %v24473_v54 }
 0xc65   :  { %v22192_v56 = vsub.f32 %v7312_v40, %v22183_v17  ;;  %v7321_v48 = vsel %vm1566_vm1, %v15691_v1, 0  ;;  %v7253_v36 = vpop.f32.mrb[59].mxu1  ;;  %15708 = vmatprep.mubr.f32.mxu1 %v7446_v19  ;;  %v7465_v55 = vsub.f32 %v22172_v7, %v24475_v4 }
 0xc66   :  { %v24470_v31 = vand.u32 4294901760, %v22186_v39  ;;  %v22199_v29 = vand.u32 4294901760, %v7321_v48  ;;  %v7318_v59 = vsel %vm1566_vm1, %v7253_v36, 0  ;;  %15709 = vmatmul.mubr.f32.gmra.mrb[68].mxu1 %v7456_v15  ;;  %v7476_v10 = vand.u32 4294901760, %v7475_v62 }
 0xc67   :  { %v24471_v18 = vand.u32 4294901760, %v22192_v56  ;;  %v22203_v25 = vand.u32 4294901760, %v7318_v59  ;;  %v7466_v47 = vand.u32 4294901760, %v7465_v55 }
 0xc68   :  { %v22206_v61 = vsub.f32 %v7321_v48, %v22199_v29  ;;  %v15694_v6 = vpop.f32.mrb[60].mxu1  ;;  %v7495_v21 = vsub.f32 %v22186_v39, %v24470_v31 }
 0xc69   :  { %v22212_v14 = vsub.f32 %v7318_v59, %v22203_v25  ;;  %v7327_v16 = vsel %vm1566_vm1, %v15694_v6, 0  ;;  %v7265_v11 = vpop.f32.mrb[61].mxu1  ;;  %15711 = vmatprep.mubr.f32.mxu1 %v7466_v47  ;;  %v7485_v40 = vsub.f32 %v22192_v56, %v24471_v18 }
 0xc6a   :  { %v24472_v19 = vand.u32 4294901760, %v22206_v61  ;;  %v22219_v1 = vand.u32 4294901760, %v7327_v16  ;;  %v7324_v15 = vsel %vm1566_vm1, %v7265_v11, 0  ;;  %15712 = vmatmul.mubr.f32.gmra.mrb[70].mxu1 %v7476_v10  ;;  %v7496_v47 = vand.u32 4294901760, %v7495_v21 }
 0xc6b   :  { %v24474_v62 = vand.u32 4294901760, %v22212_v14  ;;  %v22223_v48 = vand.u32 4294901760, %v7324_v15  ;;  %v7486_v36 = vand.u32 4294901760, %v7485_v40 }
 0xc6c   :  { %v22226_v55 = vsub.f32 %v7327_v16, %v22219_v1  ;;  %v15697_v59 = vpop.f32.mrb[62].mxu1  ;;  %v7515_v6 = vsub.f32 %v22206_v61, %v24472_v19 }
 0xc6d   :  { %v22232_v31 = vsub.f32 %v7324_v15, %v22223_v48  ;;  %v7333_v11 = vsel %vm1566_vm1, %v15697_v59, 0  ;;  %v7277_v10 = vpop.f32.mrb[63].mxu1  ;;  %15714 = vmatprep.mubr.f32.mxu1 %v7486_v36  ;;  %v7505_v40 = vsub.f32 %v22212_v14, %v24474_v62 }
 0xc6e   :  { %v24477_v16 = vand.u32 4294901760, %v22226_v55  ;;  %v22239_v18 = vand.u32 4294901760, %v7333_v11  ;;  %v7330_v21 = vsel %vm1566_vm1, %v7277_v10, 0  ;;  %15715 = vmatmul.mubr.f32.gmra.mrb[72].mxu1 %v7496_v47  ;;  %v7516_v36 = vand.u32 4294901760, %v7515_v6 }
 0xc6f   :  { %v7524_v19 = vand.u32 4294901760, %v22232_v31  ;;  %v22243_v54 = vand.u32 4294901760, %v7330_v21  ;;  %v7506_v15 = vand.u32 4294901760, %v7505_v40 }
 0xc70   :  { %v22246_v59 = vsub.f32 %v7333_v11, %v22239_v18  ;;  %v7535_v62 = vsub.f32 %v22226_v55, %v24477_v16 }
 0xc71   :  { %v22252_v4 = vsub.f32 %v7330_v21, %v22243_v54  ;;  %15717 = vmatprep.mubr.f32.mxu1 %v7506_v15  ;;  %v7525_v47 = vsub.f32 %v22232_v31, %v7524_v19 }
 0xc72   :  { %v7554_v10 = vand.u32 4294901760, %v22246_v59  ;;  %15718 = vmatmul.mubr.f32.gmra.mrb[74].mxu1 %v7516_v36  ;;  %v7536_v52 = vand.u32 4294901760, %v7535_v62  ;;  %v25098_v36 = vld [vmem:[#allocation15_spill] sm:$0xff] }
 0xc73   :  { %v7544_v40 = vand.u32 4294901760, %v22252_v4  ;;  %v7526_v11 = vand.u32 4294901760, %v7525_v47  ;;  %v8467_v47 = vsel %vm1566_vm1, %v25098_v36, 0 }
 0xc74   :  { %v7555_v6 = vsub.f32 %v22246_v59, %v7554_v10 }
 0xc75   :  { %15720 = vmatprep.mubr.f32.mxu1 %v7526_v11  ;;  %v7545_v21 = vsub.f32 %v22252_v4, %v7544_v40 }
 0xc76   :  { %15721 = vmatmul.mubr.f32.gmra.mrb[76].mxu1 %v7536_v52  ;;  %v7556_v16 = vand.u32 4294901760, %v7555_v6  ;;  %v25099_v6 = vld [vmem:[#allocation49_spill] sm:$0xff] }
 0xc77   :  { %v7546_v15 = vand.u32 4294901760, %v7545_v21 }
 0xc79   :  { %15723 = vmatprep.mubr.f32.mxu1 %v7546_v15 }
 0xc7a   :  { %15724 = vmatmul.mubr.f32.gmra.mrb[78].mxu1 %v7556_v16 }
 0xc7b   :  { %15730 = vmatprep.mubr.f32.mxu1 %v22108_v45 }
 0xc7e   :  { %15731 = vmatmul.mubr.f32.vlgmr.msra.gmra.mrb[64].mxu1 %v22105_v33 }
 0xc7f   :  { %15733 = vmatprep.mubr.f32.mxu1 %v22122_v41  ;;  %17293 = vmatpush3.bf16.msra.mxu1 %v22102_v20  ;;  %v17298_v20 = vpack.c.bf16 %v7572_v28, %v7565_v8  ;;  %v25092_v8 = vand.u32 4294901760, %v22165_v53  ;;  %v25093_v28 = vand.u32 4294901760, %v22192_v56 }
 0xc80   :  { %17295 = vmatprep.subr.bf16.mxu1 %v22066_v26 }
 0xc82   :  { %15734 = vmatmul.mubr.f32.gmra.mrb[66].mxu1 %v22118_v32 }
 0xc83   :  { %15736 = vmatprep.mubr.f32.mxu1 %v22142_v2 }
 0xc86   :  { %15737 = vmatmul.mubr.f32.gmra.mrb[68].mxu1 %v22138_v27 }
 0xc87   :  { %15739 = vmatprep.mubr.f32.mxu1 %v22162_v44 }
 0xc8a   :  { %15740 = vmatmul.mubr.f32.gmra.mrb[70].mxu1 %v22158_v30 }
 0xc8b   :  { %15742 = vmatprep.mubr.f32.mxu1 %v22183_v17 }
 0xc8e   :  { %15743 = vmatmul.mubr.f32.gmra.mrb[72].mxu1 %v22179_v50 }
 0xc8f   :  { %15745 = vmatprep.mubr.f32.mxu1 %v22203_v25 }
 0xc92   :  { %15746 = vmatmul.mubr.f32.gmra.mrb[74].mxu1 %v22199_v29 }
 0xc93   :  { %15748 = vmatprep.mubr.f32.mxu1 %v22223_v48 }
 0xc96   :  { %15749 = vmatmul.mubr.f32.gmra.mrb[76].mxu1 %v22219_v1 }
 0xc97   :  { %15751 = vmatprep.mubr.f32.mxu1 %v22243_v54 }
 0xc9a   :  { %15752 = vmatmul.mubr.f32.gmra.mrb[78].mxu1 %v22239_v18 }
 0xc9b   :  { %15758 = vmatprep.mubr.f32.mxu1 %v22114_v12  ;;  %v25095_v12 = vand.u32 4294901760, %v22212_v14 }
 0xc9e   :  { %15759 = vmatmul.mubr.f32.vlgmr.msra.gmra.mrb[64].mxu1 %v22111_v37  ;;  %v25094_v37 = vand.u32 4294901760, %v22186_v39 }
 0xc9f   :  { %15761 = vmatprep.mubr.f32.mxu1 %v22131_v58  ;;  %17297 = vmatpush3.bf16.msra.mxu1 %v22066_v26  ;;  %v25097_v58 = vand.u32 4294901760, %v22226_v55 }
 0xca0   :  { %17299 = vmatprep.subr.bf16.mxu1 %v17298_v20 }
 0xca2   :  { %15762 = vmatmul.mubr.f32.gmra.mrb[66].mxu1 %v22128_v43  ;;  %v1515_v43 = vld [vmem:[%s24155_s5 + $0x8] sm:$0xff] }
 0xca3   :  { %15764 = vmatprep.mubr.f32.mxu1 %v22151_v24 }
 0xca6   :  { %15765 = vmatmul.mubr.f32.gmra.mrb[68].mxu1 %v22145_v5 }
 0xca7   :  { %15767 = vmatprep.mubr.f32.mxu1 %v22172_v7 }
 0xcaa   :  { %15768 = vmatmul.mubr.f32.gmra.mrb[70].mxu1 %v22165_v53 }
 0xcab   :  { %15770 = vmatprep.mubr.f32.mxu1 %v22192_v56 }
 0xcae   :  { %15771 = vmatmul.mubr.f32.gmra.mrb[72].mxu1 %v22186_v39 }
 0xcaf   :  { %15773 = vmatprep.mubr.f32.mxu1 %v22212_v14  ;;  %v8461_v14 = vsel %vm1566_vm1, %v21450_v46, 0 }
 0xcb0   :  { %v22452_v16 = vand.u32 4294901760, %v8461_v14 }
 0xcb2   :  { %15774 = vmatmul.mubr.f32.gmra.mrb[74].mxu1 %v22206_v61 }
 0xcb3   :  { %15776 = vmatprep.mubr.f32.mxu1 %v22232_v31  ;;  %v8440_v31 = vsel %vm1566_vm1, %v21425_v49, 0 }
 0xcb6   :  { %15777 = vmatmul.mubr.f32.gmra.mrb[76].mxu1 %v22226_v55 }
 0xcb7   :  { %15779 = vmatprep.mubr.f32.mxu1 %v22252_v4 }
 0xcba   :  { %15780 = vmatmul.mubr.f32.gmra.mrb[78].mxu1 %v22246_v59 }
 0xcbb   :  { %15786 = vmatprep.mubr.f32.mxu1 %v7404_v23  ;;  %v1514_v23 = vld [vmem:[%s24155_s5] sm:$0xff] }
 0xcbe   :  { %15787 = vmatmul.mubr.f32.vlgmr.msra.gmra.mrb[64].mxu1 %v7414_v9  ;;  %v25096_v9 = vand.u32 4294901760, %v22206_v61 }
 0xcbf   :  { %15789 = vmatprep.mubr.f32.mxu1 %v7424_v34  ;;  %17301 = vmatpush3.bf16.msra.mxu1 %v17298_v20  ;;  %v8491_v34 = vand.u32 4294901760, %v1515_v43  ;;  %v22472_v20 = vsub.f32 %v8461_v14, %v22452_v16 }
 0xcc0   :  { %17303 = vmatprep.subr.bf16.mxu1 %v22066_v26 }
 0xcc1   :  { %v22358_v52 = vsub.f32 %v1515_v43, %v8491_v34 }
 0xcc2   :  { %15790 = vmatmul.mubr.f32.gmra.mrb[66].mxu1 %v7434_v42  ;;  %v8488_v42 = vand.u32 4294901760, %v1514_v23 }
 0xcc3   :  { %15792 = vmatprep.mubr.f32.mxu1 %v7444_v38  ;;  %v8724_v38 = vand.u32 4294901760, %v22358_v52 }
 0xcc4   :  { %v22344_v5 = vpack.c.bf16 %v8491_v34, %v8488_v42  ;;  %v22356_v24 = vsub.f32 %v1514_v23, %v8488_v42  ;;  %v8626_v34 = vand.u32 4294901760, %v22472_v20 }
 0xcc5   :  { %v8725_v7 = vsub.f32 %v22358_v52, %v8724_v38 }
 0xcc6   :  { %15793 = vmatmul.mubr.f32.gmra.mrb[68].mxu1 %v25090_v57  ;;  %v22474_v57 = vand.u32 4294901760, %v8467_v47 }
 0xcc7   :  { %15795 = vmatprep.mubr.f32.mxu1 %v25091_v3  ;;  %v8726_v39 = vand.u32 4294901760, %v8725_v7 }
 0xcca   :  { %15796 = vmatmul.mubr.f32.gmra.mrb[70].mxu1 %v25092_v8 }
 0xccb   :  { %15798 = vmatprep.mubr.f32.mxu1 %v25093_v28 }
 0xcce   :  { %15799 = vmatmul.mubr.f32.gmra.mrb[72].mxu1 %v25094_v37  ;;  %v25100_v37 = vld [vmem:[#allocation45_spill] sm:$0xff] }
 0xccf   :  { %15801 = vmatprep.mubr.f32.mxu1 %v25095_v12  ;;  %v8473_v12 = vsel %vm1566_vm1, %v25100_v37, 0 }
 0xcd2   :  { %15802 = vmatmul.mubr.f32.gmra.mrb[74].mxu1 %v25096_v9 }
 0xcd3   :  { %15804 = vmatprep.mubr.f32.mxu1 %v7524_v19 }
 0xcd6   :  { %15805 = vmatmul.mubr.f32.gmra.mrb[76].mxu1 %v25097_v58  ;;  %v25101_v58 = vld [vmem:[#allocation55_spill] sm:$0xff] }
 0xcd7   :  { %15807 = vmatprep.mubr.f32.mxu1 %v7544_v40  ;;  %v8476_v42 = vsel %vm1566_vm1, %v25101_v58, 0 }
 0xcda   :  { %15808 = vmatmul.mubr.f32.gmra.mrb[78].mxu1 %v7554_v10 }
 0xcdb   :  { %15814 = vmatprep.mubr.f32.mxu1 %v22108_v45 }
 0xcde   :  { %15815 = vmatmul.mubr.f32.vlgmr.msra.gmra.mrb[64].mxu1 %v22105_v33 }
 0xcdf   :  { %15817 = vmatprep.mubr.f32.mxu1 %v22122_v41  ;;  %17305 = vmatpush3.bf16.msra.mxu1 %v22066_v26  ;;  %v8717_v26 = vand.u32 4294901760, %v22356_v24 }
 0xce0   :  { %17307 = vmatprep.subr.bf16.mxu1 %v22344_v5 }
 0xce1   :  { %v8718_v53 = vsub.f32 %v22356_v24, %v8717_v26 }
 0xce2   :  { %15818 = vmatmul.mubr.f32.gmra.mrb[66].mxu1 %v22118_v32 }
 0xce3   :  { %15820 = vmatprep.mubr.f32.mxu1 %v22142_v2  ;;  %v8719_v4 = vand.u32 4294901760, %v8718_v53  ;;  %v22498_v53 = vsub.f32 %v8467_v47, %v22474_v57 }
 0xce5   :  { %v22376_v56 = vpack.c.bf16 %v8726_v39, %v8719_v4  ;;  %v22505_v39 = vand.u32 4294901760, %v8473_v12 }
 0xce6   :  { %15821 = vmatmul.mubr.f32.gmra.mrb[68].mxu1 %v22138_v27 }
 0xce7   :  { %15823 = vmatprep.mubr.f32.mxu1 %v22162_v44  ;;  %v22525_v36 = vsub.f32 %v8473_v12, %v22505_v39 }
 0xcea   :  { %15824 = vmatmul.mubr.f32.gmra.mrb[70].mxu1 %v22158_v30 }
 0xceb   :  { %15826 = vmatprep.mubr.f32.mxu1 %v22183_v17 }
 0xcee   :  { %15827 = vmatmul.mubr.f32.gmra.mrb[72].mxu1 %v22179_v50 }
 0xcef   :  { %15829 = vmatprep.mubr.f32.mxu1 %v22203_v25 }
 0xcf2   :  { %15830 = vmatmul.mubr.f32.gmra.mrb[74].mxu1 %v22199_v29 }
 0xcf3   :  { %15832 = vmatprep.mubr.f32.mxu1 %v22223_v48 }
 0xcf6   :  { %15833 = vmatmul.mubr.f32.gmra.mrb[76].mxu1 %v22219_v1 }
 0xcf7   :  { %15835 = vmatprep.mubr.f32.mxu1 %v22243_v54 }
 0xcfa   :  { %15836 = vmatmul.mubr.f32.gmra.mrb[78].mxu1 %v22239_v18 }
 0xcfb   :  { %15842 = vmatprep.mubr.f32.mxu1 %v22108_v45  ;;  %v22390_v45 = vand.u32 4294901760, %v8440_v31 }
 0xcfd   :  { %v22399_v49 = vsub.f32 %v8440_v31, %v22390_v45 }
 0xcfe   :  { %15843 = vmatmul.mubr.f32.vlgmr.msra.gmra.mrb[64].mxu1 %v22105_v33  ;;  %v8443_v33 = vsel %vm1566_vm1, %v21423_v13, 0  ;;  %v8452_v13 = vsel %vm1566_vm1, %v21443_v63, 0  ;;  %v8458_v63 = vsel %vm1566_vm1, %v21453_v0, 0 }
 0xcff   :  { %15845 = vmatprep.mubr.f32.mxu1 %v22122_v41  ;;  %17309 = vmatpush3.bf16.msra.mxu1 %v22344_v5  ;;  %v8446_v41 = vsel %vm1566_vm1, %v21435_v60, 0  ;;  %v22420_v61 = vand.u32 4294901760, %v8452_v13  ;;  %v22434_v19 = vand.u32 4294901760, %v8458_v63 }
 0xd00   :  { %17311 = vmatprep.subr.bf16.mxu1 %v22376_v56 }
 0xd01   :  { %v22438_v0 = vsub.f32 %v8452_v13, %v22420_v61  ;;  %v22516_v13 = vand.u32 4294901760, %v8476_v42 }
 0xd02   :  { %15846 = vmatmul.mubr.f32.gmra.mrb[66].mxu1 %v22118_v32  ;;  %v22395_v32 = vand.u32 4294901760, %v8443_v33 }
 0xd03   :  { %15848 = vmatprep.mubr.f32.mxu1 %v22142_v2  ;;  %v22403_v2 = vand.u32 4294901760, %v8446_v41  ;;  %v8596_v10 = vand.u32 4294901760, %v22438_v0 }
 0xd04   :  { %v22409_v60 = vsub.f32 %v8443_v33, %v22395_v32 }
 0xd05   :  { %v8597_v43 = vsub.f32 %v22438_v0, %v8596_v10 }
 0xd06   :  { %15849 = vmatmul.mubr.f32.gmra.mrb[68].mxu1 %v22138_v27  ;;  %v8449_v27 = vsel %vm1566_vm1, %v21432_v22, 0  ;;  %v22418_v22 = vsub.f32 %v8446_v41, %v22403_v2 }
 0xd07   :  { %15851 = vmatprep.mubr.f32.mxu1 %v22162_v44  ;;  %v8455_v44 = vsel %vm1566_vm1, %v21441_v51, 0 }
 0xd08   :  { %v8576_v62 = vand.u32 4294901760, %v22418_v22 }
 0xd0a   :  { %15852 = vmatmul.mubr.f32.gmra.mrb[70].mxu1 %v22158_v30  ;;  %v22412_v30 = vand.u32 4294901760, %v8449_v27  ;;  %v8577_v11 = vsub.f32 %v22418_v22, %v8576_v62 }
 0xd0b   :  { %15854 = vmatprep.mubr.f32.mxu1 %v22183_v17  ;;  %v8556_v17 = vand.u32 4294901760, %v22399_v49 }
 0xd0c   :  { %v22430_v51 = vsub.f32 %v8449_v27, %v22412_v30  ;;  %v8578_v23 = vand.u32 4294901760, %v8577_v11  ;;  %v25102_v27 = vld [vmem:[#allocation52_spill] sm:$0xff] }
 0xd0e   :  { %15855 = vmatmul.mubr.f32.gmra.mrb[72].mxu1 %v22179_v50  ;;  %v8566_v50 = vand.u32 4294901760, %v22409_v60  ;;  %v8586_v59 = vand.u32 4294901760, %v22430_v51 }
 0xd0f   :  { %15857 = vmatprep.mubr.f32.mxu1 %v22203_v25  ;;  %v22426_v25 = vand.u32 4294901760, %v8455_v44 }
 0xd10   :  { %v8567_v46 = vsub.f32 %v22409_v60, %v8566_v50  ;;  %v8587_v28 = vsub.f32 %v22430_v51, %v8586_v59 }
 0xd11   :  { %v22450_v55 = vsub.f32 %v8455_v44, %v22426_v25  ;;  %v8598_v44 = vand.u32 4294901760, %v8597_v43 }
 0xd12   :  { %15858 = vmatmul.mubr.f32.gmra.mrb[74].mxu1 %v22199_v29  ;;  %v8464_v29 = vsel %vm1566_vm1, %v21460_v35, 0  ;;  %v22457_v35 = vsub.f32 %v8458_v63, %v22434_v19  ;;  %v8568_v21 = vand.u32 4294901760, %v8567_v46  ;;  %v8588_v31 = vand.u32 4294901760, %v8587_v28  ;;  %v25103_v63 = vld [vmem:[#allocation61_spill] sm:$0xff] }
 0xd13   :  { %15860 = vmatprep.mubr.f32.mxu1 %v22223_v48  ;;  %v8557_v48 = vsub.f32 %v22399_v49, %v8556_v17  ;;  %v8606_v15 = vand.u32 4294901760, %v22450_v55  ;;  %v8482_v14 = vsel %vm1566_vm1, %v25103_v63, 0  ;;  %v8627_v46 = vsub.f32 %v22472_v20, %v8626_v34 }
 0xd14   :  { %v8616_v3 = vand.u32 4294901760, %v22457_v35  ;;  %v22538_v37 = vand.u32 4294901760, %v8482_v14 }
 0xd15   :  { %v8558_v40 = vand.u32 4294901760, %v8557_v48  ;;  %v8607_v7 = vsub.f32 %v22450_v55, %v8606_v15  ;;  %v8628_v12 = vand.u32 4294901760, %v8627_v46 }
 0xd16   :  { %15861 = vmatmul.mubr.f32.gmra.mrb[76].mxu1 %v22219_v1  ;;  %v22461_v1 = vand.u32 4294901760, %v8464_v29  ;;  %v8617_v33 = vsub.f32 %v22457_v35, %v8616_v3 }
 0xd17   :  { %15863 = vmatprep.mubr.f32.mxu1 %v22243_v54  ;;  %v8470_v54 = vsel %vm1566_vm1, %v25099_v6, 0  ;;  %v8608_v48 = vand.u32 4294901760, %v8607_v7 }
 0xd18   :  { %v22478_v8 = vsub.f32 %v8464_v29, %v22461_v1  ;;  %v22489_v9 = vand.u32 4294901760, %v8470_v54  ;;  %v8646_v29 = vand.u32 4294901760, %v22498_v53 }
 0xd1a   :  { %15864 = vmatmul.mubr.f32.gmra.mrb[78].mxu1 %v22239_v18  ;;  %v22485_v18 = vpack.c.bf16 %v22358_v52, %v22356_v24  ;;  %v8636_v4 = vand.u32 4294901760, %v22478_v8  ;;  %v22512_v41 = vsub.f32 %v8470_v54, %v22489_v9  ;;  %v22534_v54 = vsub.f32 %v8476_v42, %v22516_v13 }
 0xd1b   :  { %15870 = vmatprep.mubr.f32.mxu1 %v8558_v40  ;;  %v8618_v40 = vand.u32 4294901760, %v8617_v33  ;;  %v8647_v42 = vsub.f32 %v22498_v53, %v8646_v29 }
 0xd1c   :  { %v8637_v11 = vsub.f32 %v22478_v8, %v8636_v4  ;;  %v8656_v6 = vand.u32 4294901760, %v22512_v41  ;;  %v8676_v7 = vand.u32 4294901760, %v22534_v54 }
 0xd1d   :  { %v8648_v63 = vand.u32 4294901760, %v8647_v42 }
 0xd1e   :  { %15871 = vmatmul.mubr.f32.vlgmr.msra.gmra.mrb[64].mxu1 %v8568_v21  ;;  %v25104_v21 = vld [vmem:[#allocation58_spill] sm:$0xff]  ;;  %v8638_v33 = vand.u32 4294901760, %v8637_v11 }
 0xd1f   :  { %15873 = vmatprep.mubr.f32.mxu1 %v8578_v23  ;;  %17313 = vmatpush3.bf16.msra.mxu1 %v22376_v56  ;;  %v8479_v56 = vsel %vm1566_vm1, %v25102_v27, 0  ;;  %v8485_v28 = vsel %vm1566_vm1, %v25104_v21, 0  ;;  %v8666_v23 = vand.u32 4294901760, %v22525_v36  ;;  %v8657_v27 = vsub.f32 %v22512_v41, %v8656_v6 }
 0xd20   :  { %17315 = vmatprep.subr.bf16.mxu1 %v22485_v18  ;;  %v22527_v47 = vand.u32 4294901760, %v8479_v56  ;;  %v22544_v58 = vand.u32 4294901760, %v8485_v28 }
 0xd21   :  { %v8658_v46 = vand.u32 4294901760, %v8657_v27 }
 0xd22   :  { %15874 = vmatmul.mubr.f32.gmra.mrb[66].mxu1 %v8588_v31  ;;  %v22542_v43 = vsub.f32 %v8479_v56, %v22527_v47  ;;  %v22551_v31 = vsub.f32 %v8482_v14, %v22538_v37 }
 0xd23   :  { %15876 = vmatprep.mubr.f32.mxu1 %v8598_v44  ;;  %v22558_v44 = vsub.f32 %v8485_v28, %v22544_v58 }
 0xd24   :  { %v8686_v56 = vand.u32 4294901760, %v22542_v43  ;;  %v8696_v14 = vand.u32 4294901760, %v22551_v31 }
 0xd25   :  { %v8706_v11 = vand.u32 4294901760, %v22558_v44 }
 0xd26   :  { %15877 = vmatmul.mubr.f32.gmra.mrb[68].mxu1 %v8608_v48  ;;  %v8667_v48 = vsub.f32 %v22525_v36, %v8666_v23  ;;  %v8687_v28 = vsub.f32 %v22542_v43, %v8686_v56  ;;  %v8697_v42 = vsub.f32 %v22551_v31, %v8696_v14 }
 0xd27   :  { %15879 = vmatprep.mubr.f32.mxu1 %v8618_v40  ;;  %v8677_v40 = vsub.f32 %v22534_v54, %v8676_v7  ;;  %v8707_v27 = vsub.f32 %v22558_v44, %v8706_v11 }
 0xd28   :  { %v8668_v21 = vand.u32 4294901760, %v8667_v48 }
 0xd29   :  { %v8708_v48 = vand.u32 4294901760, %v8707_v27 }
 0xd2a   :  { %15880 = vmatmul.mubr.f32.gmra.mrb[70].mxu1 %v8628_v12  ;;  %v8678_v12 = vand.u32 4294901760, %v8677_v40 }
 0xd2b   :  { %15882 = vmatprep.mubr.f32.mxu1 %v8638_v33  ;;  %v8688_v33 = vand.u32 4294901760, %v8687_v28 }
 0xd2e   :  { %15883 = vmatmul.mubr.f32.gmra.mrb[72].mxu1 %v8648_v63  ;;  %v8698_v63 = vand.u32 4294901760, %v8697_v42 }
 0xd2f   :  { %15885 = vmatprep.mubr.f32.mxu1 %v8658_v46 }
 0xd32   :  { %15886 = vmatmul.mubr.f32.gmra.mrb[74].mxu1 %v8668_v21  ;;  %v18562_v21 = vld [vmem:[%s24150_s0 + $0x58] sm:$0xff] }
 0xd33   :  { %15888 = vmatprep.mubr.f32.mxu1 %v8678_v12  ;;  %v18563_v12 = vld [vmem:[%s24150_s0 + $0x50] sm:$0xff] }
 0xd36   :  { %15889 = vmatmul.mubr.f32.gmra.mrb[76].mxu1 %v8688_v33 }
 0xd37   :  { %15891 = vmatprep.mubr.f32.mxu1 %v8698_v63 }
 0xd3a   :  { %15892 = vmatmul.mubr.f32.gmra.mrb[78].mxu1 %v8708_v48 }
 0xd3b   :  { %15898 = vmatprep.mubr.f32.mxu1 %v22390_v45 }
 0xd3e   :  { %15899 = vmatmul.mubr.f32.vlgmr.msra.gmra.mrb[64].mxu1 %v22395_v32 }
 0xd3f   :  { %15901 = vmatprep.mubr.f32.mxu1 %v22403_v2  ;;  %17317 = vmatpush3.bf16.msra.mxu1 %v22485_v18  ;;  %v17322_v18 = vpack.c.bf16 %v8724_v38, %v8717_v26 }
 0xd40   :  { %17319 = vmatprep.subr.bf16.mxu1 %v22344_v5 }
 0xd42   :  { %15902 = vmatmul.mubr.f32.gmra.mrb[66].mxu1 %v22412_v30 }
 0xd43   :  { %15904 = vmatprep.mubr.f32.mxu1 %v22420_v61 }
 0xd46   :  { %15905 = vmatmul.mubr.f32.gmra.mrb[68].mxu1 %v22426_v25 }
 0xd47   :  { %15907 = vmatprep.mubr.f32.mxu1 %v22434_v19 }
 0xd4a   :  { %15908 = vmatmul.mubr.f32.gmra.mrb[70].mxu1 %v22452_v16 }
 0xd4b   :  { %15910 = vmatprep.mubr.f32.mxu1 %v22461_v1 }
 0xd4e   :  { %15911 = vmatmul.mubr.f32.gmra.mrb[72].mxu1 %v22474_v57 }
 0xd4f   :  { %15913 = vmatprep.mubr.f32.mxu1 %v22489_v9 }
 0xd52   :  { %15914 = vmatmul.mubr.f32.gmra.mrb[74].mxu1 %v22505_v39 }
 0xd53   :  { %15916 = vmatprep.mubr.f32.mxu1 %v22516_v13 }
 0xd56   :  { %15917 = vmatmul.mubr.f32.gmra.mrb[76].mxu1 %v22527_v47 }
 0xd57   :  { %15919 = vmatprep.mubr.f32.mxu1 %v22538_v37 }
 0xd5a   :  { %15920 = vmatmul.mubr.f32.gmra.mrb[78].mxu1 %v22544_v58 }
 0xd5b   :  { %15926 = vmatprep.mubr.f32.mxu1 %v22399_v49  ;;  %v18553_v49 = vld [vmem:[%s24150_s0] sm:$0xff] }
 0xd5e   :  { %15927 = vmatmul.mubr.f32.vlgmr.msra.gmra.mrb[64].mxu1 %v22409_v60 }
 0xd5f   :  { %15929 = vmatprep.mubr.f32.mxu1 %v22418_v22  ;;  %17321 = vmatpush3.bf16.msra.mxu1 %v22344_v5 }
 0xd60   :  { %17323 = vmatprep.subr.bf16.mxu1 %v17322_v18 }
 0xd62   :  { %15930 = vmatmul.mubr.f32.gmra.mrb[66].mxu1 %v22430_v51 }
 0xd63   :  { %15932 = vmatprep.mubr.f32.mxu1 %v22438_v0 }
 0xd66   :  { %15933 = vmatmul.mubr.f32.gmra.mrb[68].mxu1 %v22450_v55 }
 0xd67   :  { %15935 = vmatprep.mubr.f32.mxu1 %v22457_v35 }
 0xd6a   :  { %15936 = vmatmul.mubr.f32.gmra.mrb[70].mxu1 %v22472_v20  ;;  %v18557_v20 = vld [vmem:[%s24150_s0 + $0x20] sm:$0xff] }
 0xd6b   :  { %15938 = vmatprep.mubr.f32.mxu1 %v22478_v8 }
 0xd6e   :  { %15939 = vmatmul.mubr.f32.gmra.mrb[72].mxu1 %v22498_v53 }
 0xd6f   :  { %15941 = vmatprep.mubr.f32.mxu1 %v22512_v41 }
 0xd72   :  { %15942 = vmatmul.mubr.f32.gmra.mrb[74].mxu1 %v22525_v36 }
 0xd73   :  { %15944 = vmatprep.mubr.f32.mxu1 %v22534_v54 }
 0xd76   :  { %15945 = vmatmul.mubr.f32.gmra.mrb[76].mxu1 %v22542_v43  ;;  %v18560_v43 = vld [vmem:[%s24150_s0 + $0x48] sm:$0xff] }
 0xd77   :  { %15947 = vmatprep.mubr.f32.mxu1 %v22551_v31 }
 0xd7a   :  { %15948 = vmatmul.mubr.f32.gmra.mrb[78].mxu1 %v22558_v44 }
 0xd7b   :  { %15954 = vmatprep.mubr.f32.mxu1 %v8556_v17 }
 0xd7e   :  { %15955 = vmatmul.mubr.f32.vlgmr.msra.gmra.mrb[64].mxu1 %v8566_v50 }
 0xd7f   :  { %15957 = vmatprep.mubr.f32.mxu1 %v8576_v62  ;;  %17325 = vmatpush3.bf16.msra.mxu1 %v17322_v18 }
 0xd80   :  { %17327 = vmatprep.subr.bf16.mxu1 %v22344_v5 }
 0xd82   :  { %15958 = vmatmul.mubr.f32.gmra.mrb[66].mxu1 %v8586_v59 }
 0xd83   :  { %15960 = vmatprep.mubr.f32.mxu1 %v8596_v10  ;;  %v18556_v10 = vld [vmem:[%s24150_s0 + $0x28] sm:$0xff] }
 0xd86   :  { %15961 = vmatmul.mubr.f32.gmra.mrb[68].mxu1 %v8606_v15 }
 0xd87   :  { %15963 = vmatprep.mubr.f32.mxu1 %v8616_v3 }
 0xd8a   :  { %15964 = vmatmul.mubr.f32.gmra.mrb[70].mxu1 %v8626_v34 }
 0xd8b   :  { %15966 = vmatprep.mubr.f32.mxu1 %v8636_v4 }
 0xd8e   :  { %15967 = vmatmul.mubr.f32.gmra.mrb[72].mxu1 %v8646_v29 }
 0xd8f   :  { %15969 = vmatprep.mubr.f32.mxu1 %v8656_v6 }
 0xd92   :  { %15970 = vmatmul.mubr.f32.gmra.mrb[74].mxu1 %v8666_v23 }
 0xd93   :  { %15972 = vmatprep.mubr.f32.mxu1 %v8676_v7  ;;  %v18561_v7 = vld [vmem:[%s24150_s0 + $0x40] sm:$0xff] }
 0xd96   :  { %15973 = vmatmul.mubr.f32.gmra.mrb[76].mxu1 %v8686_v56 }
 0xd97   :  { %15975 = vmatprep.mubr.f32.mxu1 %v8696_v14 }
 0xd9a   :  { %15976 = vmatmul.mubr.f32.gmra.mrb[78].mxu1 %v8706_v11 }
 0xd9b   :  { %15982 = vmatprep.mubr.f32.mxu1 %v22390_v45 }
 0xd9e   :  { %15983 = vmatmul.mubr.f32.vlgmr.msra.gmra.mrb[64].mxu1 %v22395_v32 }
 0xd9f   :  { %15985 = vmatprep.mubr.f32.mxu1 %v22403_v2  ;;  %17329 = vmatpush3.bf16.msra.mxu1 %v22344_v5  ;;  %v22685_v5 = vld [vmem:[%s24156_s6] ss:$0 sm:$0xff] }
 0xda2   :  { %15986 = vmatmul.mubr.f32.gmra.mrb[66].mxu1 %v22412_v30 }
 0xda3   :  { %15988 = vmatprep.mubr.f32.mxu1 %v22420_v61 }
 0xda6   :  { %15989 = vmatmul.mubr.f32.gmra.mrb[68].mxu1 %v22426_v25 }
 0xda7   :  { %15991 = vmatprep.mubr.f32.mxu1 %v22434_v19 }
 0xdaa   :  { %15992 = vmatmul.mubr.f32.gmra.mrb[70].mxu1 %v22452_v16 }
 0xdab   :  { %15994 = vmatprep.mubr.f32.mxu1 %v22461_v1 }
 0xdae   :  { %15995 = vmatmul.mubr.f32.gmra.mrb[72].mxu1 %v22474_v57 }
 0xdaf   :  { %15997 = vmatprep.mubr.f32.mxu1 %v22489_v9 }
 0xdb2   :  { %15998 = vmatmul.mubr.f32.gmra.mrb[74].mxu1 %v22505_v39 }
 0xdb3   :  { %16000 = vmatprep.mubr.f32.mxu1 %v22516_v13 }
 0xdb6   :  { %16001 = vmatmul.mubr.f32.gmra.mrb[76].mxu1 %v22527_v47 }
 0xdb7   :  { %16003 = vmatprep.mubr.f32.mxu1 %v22538_v37 }
 0xdba   :  { %16004 = vmatmul.mubr.f32.gmra.mrb[78].mxu1 %v22544_v58 }
 0xdbb   :  { %16010 = vmatprep.mubr.f32.mxu1 %v22390_v45  ;;  %v18552_v45 = vld [vmem:[%s24150_s0 + $0x8] sm:$0xff] }
 0xdbe   :  { %16011 = vmatmul.mubr.f32.vlgmr.msra.gmra.mrb[64].mxu1 %v22395_v32 }
 0xdbf   :  { %16013 = vmatprep.mubr.f32.mxu1 %v22403_v2 }
 0xdc2   :  { %16014 = vmatmul.mubr.f32.gmra.mrb[66].mxu1 %v22412_v30 }
 0xdc3   :  { %16016 = vmatprep.mubr.f32.mxu1 %v22420_v61 }
 0xdc6   :  { %16017 = vmatmul.mubr.f32.gmra.mrb[68].mxu1 %v22426_v25  ;;  %v18554_v25 = vld [vmem:[%s24150_s0 + $0x18] sm:$0xff] }
 0xdc7   :  { %16019 = vmatprep.mubr.f32.mxu1 %v22434_v19  ;;  %v18555_v19 = vld [vmem:[%s24150_s0 + $0x10] sm:$0xff] }
 0xdca   :  { %16020 = vmatmul.mubr.f32.gmra.mrb[70].mxu1 %v22452_v16 }
 0xdcb   :  { %16022 = vmatprep.mubr.f32.mxu1 %v22461_v1 }
 0xdce   :  { %16023 = vmatmul.mubr.f32.gmra.mrb[72].mxu1 %v22474_v57 }
 0xdcf   :  { %16025 = vmatprep.mubr.f32.mxu1 %v22489_v9 }
 0xdd2   :  { %16026 = vmatmul.mubr.f32.gmra.mrb[74].mxu1 %v22505_v39  ;;  %v18558_v39 = vld [vmem:[%s24150_s0 + $0x38] sm:$0xff] }
 0xdd3   :  { %16028 = vmatprep.mubr.f32.mxu1 %v22516_v13  ;;  %v18559_v13 = vld [vmem:[%s24150_s0 + $0x30] sm:$0xff] }
 0xdd6   :  { %16029 = vmatmul.mubr.f32.gmra.mrb[76].mxu1 %v22527_v47 }
 0xdd7   :  { %16031 = vmatprep.mubr.f32.mxu1 %v22538_v37 }
 0xdda   :  { %16032 = vmatmul.mubr.f32.gmra.mrb[78].mxu1 %v22544_v58 }
 0xe91   :  { %v16012_v24 = vpop.f32.mrb[64].mxu1 }
 0xe92   :  { %v9599_v52 = vadd.f32 %v16012_v24, %v22685_v5  ;;  %v9497_v26 = vpop.f32.mrb[65].mxu1 }
 0xe93   :  { %v9598_v38 = vadd.f32 %v22685_v5, %v9497_v26 }
 0xe94   :  { %v22692_v32 = vadd.f32 %v18552_v45, %v9599_v52  ;;  %v18564_v52 = vld [vmem:[%s24150_s0 + $0x68] sm:$0xff] }
 0xe95   :  { %v22697_v2 = vadd.f32 %v18553_v49, %v9598_v38  ;;  %v16015_v60 = vpop.f32.mrb[66].mxu1  ;;  %v18565_v38 = vld [vmem:[%s24150_s0 + $0x60] sm:$0xff] }
 0xe96   :  { %25105 = vst [vmem:[#allocation16_spill] sm:$0xff] %v22692_v32  ;;  %v9601_v30 = vadd.f32 %v16015_v60, %v22685_v5  ;;  %v9509_v17 = vpop.f32.mrb[67].mxu1  ;;  %v9635_v22 = vsel %vm62_vm0, %v22692_v32, 0.0 }
 0xe97   :  { %25106 = vst [vmem:[#allocation40_spill] sm:$0xff] %v22697_v2  ;;  %v9600_v61 = vadd.f32 %v22685_v5, %v9509_v17  ;;  %9636 = vadd.xlane.f32.xlu0 %v9635_v22  ;;  %v9632_v50 = vsel %vm62_vm0, %v22697_v2, 0.0 }
 0xe98   :  { %v22708_v51 = vadd.f32 %v18554_v25, %v9601_v30  ;;  %9633 = vadd.xlane.f32.xlu1 %v9632_v50  ;;  %v18566_v50 = vld [vmem:[%s24150_s0 + $0x78] sm:$0xff] }
 0xe99   :  { %v22713_v62 = vadd.f32 %v18555_v19, %v9600_v61  ;;  %v16018_v0 = vpop.f32.mrb[68].mxu1  ;;  %v18567_v19 = vld [vmem:[%s24150_s0 + $0x70] sm:$0xff] }
 0xe9a   :  { %25107 = vst [vmem:[#allocation35_spill] sm:$0xff] %v22708_v51  ;;  %v9603_v55 = vadd.f32 %v16018_v0, %v22685_v5  ;;  %v9521_v16 = vpop.f32.mrb[69].mxu1  ;;  %v9641_v59 = vsel %vm62_vm0, %v22708_v51, 0.0 }
 0xe9b   :  { %25108 = vst [vmem:[#allocation20_spill] sm:$0xff] %v22713_v62  ;;  %v9602_v35 = vadd.f32 %v22685_v5, %v9521_v16  ;;  %v9638_v1 = vsel %vm62_vm0, %v22713_v62, 0.0 }
 0xe9c   :  { %v22724_v15 = vadd.f32 %v18556_v10, %v9603_v55  ;;  %9642 = vadd.xlane.f32.xlu1 %v9641_v59  ;;  %9639 = vadd.xlane.f32.xlu0 %v9638_v1 }
 0xe9d   :  { %v22729_v57 = vadd.f32 %v18557_v20, %v9602_v35  ;;  %v16021_v3 = vpop.f32.mrb[70].mxu1 }
 0xe9e   :  { %25109 = vst [vmem:[#allocation29_spill] sm:$0xff] %v22724_v15  ;;  %v9605_v8 = vadd.f32 %v16021_v3, %v22685_v5  ;;  %v9533_v9 = vpop.f32.mrb[71].mxu1  ;;  %v9647_v34 = vsel %vm62_vm0, %v22724_v15, 0.0 }
 0xe9f   :  { %25110 = vst [vmem:[#allocation21_spill] sm:$0xff] %v22729_v57  ;;  %v9604_v53 = vadd.f32 %v22685_v5, %v9533_v9  ;;  %v9644_v4 = vsel %vm62_vm0, %v22729_v57, 0.0 }
 0xea0   :  { %v22740_v41 = vadd.f32 %v18558_v39, %v9605_v8  ;;  %9648 = vadd.xlane.f32.xlu1 %v9647_v34  ;;  %9645 = vadd.xlane.f32.xlu0 %v9644_v4 }
 0xea1   :  { %v22745_v29 = vadd.f32 %v18559_v13, %v9604_v53  ;;  %v16024_v36 = vpop.f32.mrb[72].mxu1 }
 0xea2   :  { %25111 = vst [vmem:[#allocation28_spill] sm:$0xff] %v22740_v41  ;;  %v9607_v47 = vadd.f32 %v16024_v36, %v22685_v5  ;;  %v9545_v6 = vpop.f32.mrb[73].mxu1  ;;  %v9653_v54 = vsel %vm62_vm0, %v22740_v41, 0.0 }
 0xea3   :  { %25112 = vst [vmem:[#allocation42_spill] sm:$0xff] %v22745_v29  ;;  %v9606_v37 = vadd.f32 %v22685_v5, %v9545_v6  ;;  %v9650_v23 = vsel %vm62_vm0, %v22745_v29, 0.0 }
 0xea4   :  { %v22756_v58 = vadd.f32 %v18560_v43, %v9607_v47  ;;  %9654 = vadd.xlane.f32.xlu1 %v9653_v54  ;;  %9651 = vadd.xlane.f32.xlu0 %v9650_v23 }
 0xea5   :  { %v22761_v31 = vadd.f32 %v18561_v7, %v9606_v37  ;;  %v16027_v56 = vpop.f32.mrb[74].mxu1 }
 0xea6   :  { %25113 = vst [vmem:[#allocation8_spill] sm:$0xff] %v22756_v58  ;;  %v9609_v44 = vadd.f32 %v16027_v56, %v22685_v5  ;;  %v9557_v14 = vpop.f32.mrb[75].mxu1  ;;  %v9659_v46 = vsel %vm62_vm0, %v22756_v58, 0.0 }
 0xea7   :  { %25114 = vst [vmem:[#allocation4_spill] sm:$0xff] %v22761_v31  ;;  %v9608_v40 = vadd.f32 %v22685_v5, %v9557_v14  ;;  %v9656_v11 = vsel %vm62_vm0, %v22761_v31, 0.0 }
 0xea8   :  { %v22772_v28 = vadd.f32 %v18562_v21, %v9609_v44  ;;  %9660 = vadd.xlane.f32.xlu1 %v9659_v46  ;;  %9657 = vadd.xlane.f32.xlu0 %v9656_v11 }
 0xea9   :  { %v22777_v42 = vadd.f32 %v18563_v12, %v9608_v40  ;;  %v16030_v33 = vpop.f32.mrb[76].mxu1 }
 0xeaa   :  { %25115 = vst [vmem:[#allocation7_spill] sm:$0xff] %v22772_v28  ;;  %v9611_v27 = vadd.f32 %v16030_v33, %v22685_v5  ;;  %v9569_v63 = vpop.f32.mrb[77].mxu1  ;;  %v9665_v48 = vsel %vm62_vm0, %v22772_v28, 0.0 }
 0xeab   :  { %25116 = vst [vmem:[#allocation5_spill] sm:$0xff] %v22777_v42  ;;  %v9610_v18 = vadd.f32 %v22685_v5, %v9569_v63  ;;  %v9662_v24 = vsel %vm62_vm0, %v22777_v42, 0.0 }
 0xeac   :  { %v22788_v26 = vadd.f32 %v18564_v52, %v9611_v27  ;;  %9666 = vadd.xlane.f32.xlu1 %v9665_v48  ;;  %9663 = vadd.xlane.f32.xlu0 %v9662_v24 }
 0xead   :  { %v22793_v45 = vadd.f32 %v18565_v38, %v9610_v18  ;;  %v16033_v49 = vpop.f32.mrb[78].mxu1 }
 0xeae   :  { %25117 = vst [vmem:[#allocation9_spill] sm:$0xff] %v22788_v26  ;;  %v9613_v60 = vadd.f32 %v16033_v49, %v22685_v5  ;;  %v9581_v30 = vpop.f32.mrb[79].mxu1  ;;  %v9671_v17 = vsel %vm62_vm0, %v22788_v26, 0.0 }
 0xeaf   :  { %25118 = vst [vmem:[#allocation60_spill] sm:$0xff] %v22793_v45  ;;  %v9612_v22 = vadd.f32 %v22685_v5, %v9581_v30  ;;  %v9668_v61 = vsel %vm62_vm0, %v22793_v45, 0.0 }
 0xeb0   :  { %v22804_v25 = vadd.f32 %v18566_v50, %v9613_v60  ;;  %9672 = vadd.xlane.f32.xlu1 %v9671_v17  ;;  %9669 = vadd.xlane.f32.xlu0 %v9668_v61 }
 0xeb1   :  { %v22809_v0 = vadd.f32 %v18567_v19, %v9612_v22 }
 0xeb2   :  { %25119 = vst [vmem:[#allocation43_spill] sm:$0xff] %v22804_v25  ;;  %v9677_v5 = vsel %vm62_vm0, %v22804_v25, 0.0 }
 0xeb3   :  { %25120 = vst [vmem:[#allocation67_spill] sm:$0xff] %v22809_v0  ;;  %v9674_v55 = vsel %vm62_vm0, %v22809_v0, 0.0 }
 0xeb4   :  { %9678 = vadd.xlane.f32.xlu1 %v9677_v5  ;;  %9675 = vadd.xlane.f32.xlu0 %v9674_v55 }
 0xf24   :  { %v9637_v16 = vpop.xlane.xlu0 %9636 }
 0xf25   :  { %v9681_v59 = vmul.f32 0.03125, %v9637_v16  ;;  %v9634_v35 = vpop.xlane.xlu1 %9633 }
 0xf26   :  { %v9680_v1 = vmul.f32 0.03125, %v9634_v35 }
 0xf27   :  { %v22816_v10 = vsub.f32 %v22692_v32, %v9681_v59 }
 0xf28   :  { %v22819_v20 = vsub.f32 %v22697_v2, %v9680_v1 }
 0xf29   :  { %v9643_v3 = vpop.xlane.xlu1 %9642  ;;  %v9640_v8 = vpop.xlane.xlu0 %9639  ;;  %v9713_v9 = vmul.f32 %v22816_v10, %v22816_v10 }
 0xf2a   :  { %v9683_v34 = vmul.f32 0.03125, %v9643_v3  ;;  %v9682_v53 = vmul.f32 0.03125, %v9640_v8  ;;  %v9712_v4 = vmul.f32 %v22819_v20, %v22819_v20 }
 0xf2b   :  { %v9731_v39 = vsel %vm62_vm0, %v9713_v9, 0.0 }
 0xf2c   :  { %v22827_v13 = vsub.f32 %v22708_v51, %v9683_v34  ;;  %v22830_v36 = vsub.f32 %v22713_v62, %v9682_v53  ;;  %9732 = vadd.xlane.f32.xlu1 %v9731_v39  ;;  %v9728_v47 = vsel %vm62_vm0, %v9712_v4, 0.0 }
 0xf2d   :  { %v9649_v6 = vpop.xlane.xlu1 %9648  ;;  %v9646_v54 = vpop.xlane.xlu0 %9645  ;;  %9729 = vadd.xlane.f32.xlu0 %v9728_v47 }
 0xf2e   :  { %v9685_v37 = vmul.f32 0.03125, %v9649_v6  ;;  %v9684_v23 = vmul.f32 0.03125, %v9646_v54  ;;  %v9715_v43 = vmul.f32 %v22827_v13, %v22827_v13  ;;  %v9714_v7 = vmul.f32 %v22830_v36, %v22830_v36 }
 0xf30   :  { %v22838_v56 = vsub.f32 %v22724_v15, %v9685_v37  ;;  %v22841_v44 = vsub.f32 %v22729_v57, %v9684_v23  ;;  %v9737_v14 = vsel %vm62_vm0, %v9715_v43, 0.0  ;;  %v9734_v46 = vsel %vm62_vm0, %v9714_v7, 0.0 }
 0xf31   :  { %v9655_v40 = vpop.xlane.xlu1 %9654  ;;  %v9652_v11 = vpop.xlane.xlu0 %9651  ;;  %9738 = vadd.xlane.f32.xlu1 %v9737_v14  ;;  %9735 = vadd.xlane.f32.xlu0 %v9734_v46 }
 0xf32   :  { %v9687_v21 = vmul.f32 0.03125, %v9655_v40  ;;  %v9686_v12 = vmul.f32 0.03125, %v9652_v11  ;;  %v9717_v33 = vmul.f32 %v22838_v56, %v22838_v56  ;;  %v9716_v27 = vmul.f32 %v22841_v44, %v22841_v44 }
 0xf34   :  { %v22850_v63 = vsub.f32 %v22740_v41, %v9687_v21  ;;  %v22853_v48 = vsub.f32 %v22745_v29, %v9686_v12  ;;  %v9743_v18 = vsel %vm62_vm0, %v9717_v33, 0.0  ;;  %v9740_v24 = vsel %vm62_vm0, %v9716_v27, 0.0 }
 0xf35   :  { %v9661_v52 = vpop.xlane.xlu1 %9660  ;;  %v9658_v38 = vpop.xlane.xlu0 %9657  ;;  %9744 = vadd.xlane.f32.xlu1 %v9743_v18  ;;  %9741 = vadd.xlane.f32.xlu0 %v9740_v24 }
 0xf36   :  { %v9689_v49 = vmul.f32 0.03125, %v9661_v52  ;;  %v9688_v60 = vmul.f32 0.03125, %v9658_v38  ;;  %v9719_v30 = vmul.f32 %v22850_v63, %v22850_v63  ;;  %v9718_v17 = vmul.f32 %v22853_v48, %v22853_v48 }
 0xf38   :  { %v22862_v22 = vsub.f32 %v22756_v58, %v9689_v49  ;;  %v22865_v61 = vsub.f32 %v22761_v31, %v9688_v60  ;;  %v9749_v50 = vsel %vm62_vm0, %v9719_v30, 0.0  ;;  %v9746_v19 = vsel %vm62_vm0, %v9718_v17, 0.0  ;;  %v9884_v30 = vld [vmem:[%s24157_s9] sm:$0xff]  ;;  %v9885_v17 = vld [vmem:[%s24157_s9 + $0x8] sm:$0xff] }
 0xf39   :  { %v9667_v5 = vpop.xlane.xlu1 %9666  ;;  %v9664_v55 = vpop.xlane.xlu0 %9663  ;;  %9750 = vadd.xlane.f32.xlu1 %v9749_v50  ;;  %9747 = vadd.xlane.f32.xlu0 %v9746_v19  ;;  %v9944_v50 = vand.u32 4294901760, %v9884_v30  ;;  %v9947_v19 = vand.u32 4294901760, %v9885_v17 }
 0xf3a   :  { %v9691_v16 = vmul.f32 0.03125, %v9667_v5  ;;  %v9690_v59 = vmul.f32 0.03125, %v9664_v55  ;;  %v9721_v35 = vmul.f32 %v22862_v22, %v22862_v22  ;;  %v9720_v1 = vmul.f32 %v22865_v61, %v22865_v61  ;;  %v9886_v55 = vld [vmem:[%s24157_s9 + $0x10] sm:$0xff] }
 0xf3b   :  { %v22917_v5 = vpack.c.bf16 %v9947_v19, %v9944_v50 }
 0xf3c   :  { %v22874_v3 = vsub.f32 %v22772_v28, %v9691_v16  ;;  %v22877_v8 = vsub.f32 %v22777_v42, %v9690_v59  ;;  %v9755_v9 = vsel %vm62_vm0, %v9721_v35, 0.0  ;;  %v9752_v34 = vsel %vm62_vm0, %v9720_v1, 0.0  ;;  %v9887_v16 = vld [vmem:[%s24157_s9 + $0x18] sm:$0xff] }
 0xf3d   :  { %v9673_v53 = vpop.xlane.xlu1 %9672  ;;  %v9670_v4 = vpop.xlane.xlu0 %9669  ;;  %9756 = vadd.xlane.f32.xlu1 %v9755_v9  ;;  %9753 = vadd.xlane.f32.xlu0 %v9752_v34  ;;  %v9950_v59 = vand.u32 4294901760, %v9886_v55  ;;  %v9953_v35 = vand.u32 4294901760, %v9887_v16  ;;  %v22931_v9 = vsub.f32 %v9884_v30, %v9944_v50  ;;  %v22933_v34 = vsub.f32 %v9885_v17, %v9947_v19 }
 0xf3e   :  { %v9693_v39 = vmul.f32 0.03125, %v9673_v53  ;;  %v9692_v47 = vmul.f32 0.03125, %v9670_v4  ;;  %v9723_v6 = vmul.f32 %v22874_v3, %v22874_v3  ;;  %v9722_v54 = vmul.f32 %v22877_v8, %v22877_v8  ;;  %17331 = vmatprep.subr.bf16.mxu0 %v22917_v5 }
 0xf3f   :  { %17333 = vmatpush3.bf16.msra.mxu0 %v22917_v5  ;;  %v22927_v1 = vpack.c.bf16 %v9953_v35, %v9950_v59  ;;  %v24487_v53 = vand.u32 4294901760, %v22931_v9  ;;  %v24480_v4 = vand.u32 4294901760, %v22933_v34 }
 0xf40   :  { %v22886_v37 = vsub.f32 %v22788_v26, %v9693_v39  ;;  %v22889_v23 = vsub.f32 %v22793_v45, %v9692_v47  ;;  %v9761_v43 = vsel %vm62_vm0, %v9723_v6, 0.0  ;;  %v9758_v7 = vsel %vm62_vm0, %v9722_v54, 0.0 }
 0xf41   :  { %9762 = vadd.xlane.f32.xlu1 %v9761_v43  ;;  %v9679_v14 = vpop.xlane.xlu1 %9678  ;;  %9759 = vadd.xlane.f32.xlu0 %v9758_v7  ;;  %v9676_v46 = vpop.xlane.xlu0 %9675  ;;  %v10176_v39 = vsub.f32 %v22931_v9, %v24487_v53  ;;  %v10183_v47 = vsub.f32 %v22933_v34, %v24480_v4  ;;  %v22946_v7 = vsub.f32 %v9886_v55, %v9950_v59 }
 0xf42   :  { %v9695_v40 = vmul.f32 0.03125, %v9679_v14  ;;  %v9694_v11 = vmul.f32 0.03125, %v9676_v46  ;;  %v9725_v21 = vmul.f32 %v22886_v37, %v22886_v37  ;;  %v9724_v12 = vmul.f32 %v22889_v23, %v22889_v23  ;;  %17335 = vmatprep.subr.bf16.mxu0 %v22927_v1 }
 0xf43   :  { %17337 = vmatpush3.bf16.msra.mxu0 %v22927_v1  ;;  %v10177_v6 = vand.u32 4294901760, %v10176_v39  ;;  %v10184_v54 = vand.u32 4294901760, %v10183_v47  ;;  %v22948_v14 = vsub.f32 %v9887_v16, %v9953_v35  ;;  %v24479_v46 = vand.u32 4294901760, %v22946_v7 }
 0xf44   :  { %v22898_v33 = vsub.f32 %v22804_v25, %v9695_v40  ;;  %v22901_v27 = vsub.f32 %v22809_v0, %v9694_v11  ;;  %v9767_v18 = vsel %vm62_vm0, %v9725_v21, 0.0  ;;  %v9764_v24 = vsel %vm62_vm0, %v9724_v12, 0.0 }
 0xf45   :  { %9768 = vadd.xlane.f32.xlu1 %v9767_v18  ;;  %9765 = vadd.xlane.f32.xlu0 %v9764_v24  ;;  %v22943_v43 = vpack.c.bf16 %v10184_v54, %v10177_v6  ;;  %v24478_v40 = vand.u32 4294901760, %v22948_v14  ;;  %v10190_v11 = vsub.f32 %v22946_v7, %v24479_v46 }
 0xf46   :  { %v9727_v52 = vmul.f32 %v22898_v33, %v22898_v33  ;;  %v9726_v38 = vmul.f32 %v22901_v27, %v22901_v27 }
 0xf47   :  { %17339 = vmatprep.subr.bf16.mxu0 %v22943_v43  ;;  %v10197_v21 = vsub.f32 %v22948_v14, %v24478_v40  ;;  %v10191_v12 = vand.u32 4294901760, %v10190_v11 }
 0xf48   :  { %v9773_v49 = vsel %vm62_vm0, %v9727_v52, 0.0  ;;  %v9770_v60 = vsel %vm62_vm0, %v9726_v38, 0.0  ;;  %v22962_v52 = vpack.c.bf16 %v22933_v34, %v22931_v9  ;;  %v22966_v38 = vpack.c.bf16 %v22948_v14, %v22946_v7 }
 0xf49   :  { %9774 = vadd.xlane.f32.xlu1 %v9773_v49  ;;  %9771 = vadd.xlane.f32.xlu0 %v9770_v60  ;;  %v10198_v18 = vand.u32 4294901760, %v10197_v21 }
 0xf4b   :  { %v22958_v24 = vpack.c.bf16 %v10198_v18, %v10191_v12 }
 0xfb9   :  { %v9733_v49 = vpop.xlane.xlu1 %9732 }
 0xfba   :  { %v9777_v60 = vmul.f32 0.03125, %v9733_v49  ;;  %v9730_v30 = vpop.xlane.xlu0 %9729 }
 0xfbb   :  { %v9776_v17 = vmul.f32 0.03125, %v9730_v30 }
 0xfbc   :  { %v9793_v50 = vadd.f32 1e-05, %v9777_v60 }
 0xfbd   :  { %v9792_v19 = vadd.f32 1e-05, %v9776_v17 }
 0xfbe   :  { %18440 = vrsqrt.f32 %v9793_v50  ;;  %v9739_v55 = vpop.xlane.xlu1 %9738  ;;  %v9736_v16 = vpop.xlane.xlu0 %9735 }
 0xfbf   :  { %18442 = vrsqrt.f32 %v9792_v19  ;;  %v9779_v59 = vmul.f32 0.03125, %v9739_v55  ;;  %v9778_v35 = vmul.f32 0.03125, %v9736_v16  ;;  %v22971_v19 = vld [vmem:[%s24158_s7] ss:$0 sm:$0xff] }
 0xfc1   :  { %v9795_v39 = vadd.f32 1e-05, %v9779_v59  ;;  %v9794_v47 = vadd.f32 1e-05, %v9778_v35 }
 0xfc2   :  { %v9745_v6 = vpop.xlane.xlu1 %9744  ;;  %v9742_v54 = vpop.xlane.xlu0 %9741 }
 0xfc3   :  { %18444 = vrsqrt.f32 %v9795_v39  ;;  %v9781_v11 = vmul.f32 0.03125, %v9745_v6  ;;  %v9780_v21 = vmul.f32 0.03125, %v9742_v54  ;;  %v22977_v39 = vld [vmem:[%s24159_s8] ss:$0 sm:$0xff] }
 0xfc4   :  { %18446 = vrsqrt.f32 %v9794_v47 }
 0xfc5   :  { %v9797_v12 = vadd.f32 1e-05, %v9781_v11  ;;  %v9796_v18 = vadd.f32 1e-05, %v9780_v21 }
 0xfc6   :  { %v9751_v49 = vpop.xlane.xlu1 %9750  ;;  %v9748_v30 = vpop.xlane.xlu0 %9747 }
 0xfc7   :  { %18448 = vrsqrt.f32 %v9797_v12  ;;  %v9783_v60 = vmul.f32 0.03125, %v9751_v49  ;;  %v9782_v17 = vmul.f32 0.03125, %v9748_v30 }
 0xfc8   :  { %v18441_v50 = vpop.eup %18440  ;;  %18450 = vrsqrt.f32 %v9796_v18 }
 0xfc9   :  { %v18443_v55 = vpop.eup %18442  ;;  %v9825_v16 = vmul.f32 %v18441_v50, %v22816_v10  ;;  %v9799_v59 = vadd.f32 1e-05, %v9783_v60  ;;  %v9798_v35 = vadd.f32 1e-05, %v9782_v17 }
 0xfca   :  { %v9824_v47 = vmul.f32 %v18443_v55, %v22819_v20  ;;  %v9757_v6 = vpop.xlane.xlu1 %9756  ;;  %v9754_v54 = vpop.xlane.xlu0 %9753 }
 0xfcb   :  { %v9847_v11 = vmul.f32 %v22971_v19, %v9825_v16  ;;  %18452 = vrsqrt.f32 %v9799_v59  ;;  %v9785_v21 = vmul.f32 0.03125, %v9757_v6  ;;  %v9784_v12 = vmul.f32 0.03125, %v9754_v54 }
 0xfcc   :  { %18454 = vrsqrt.f32 %v9798_v35  ;;  %v9846_v18 = vmul.f32 %v22971_v19, %v9824_v47 }
 0xfcd   :  { %v18445_v10 = vpop.eup %18444  ;;  %v9869_v49 = vadd.f32 %v22977_v39, %v9847_v11  ;;  %v9801_v30 = vadd.f32 1e-05, %v9785_v21  ;;  %v9800_v60 = vadd.f32 1e-05, %v9784_v12 }
 0xfce   :  { %v18447_v17 = vpop.eup %18446  ;;  %v9827_v50 = vmul.f32 %v18445_v10, %v22827_v13  ;;  %v9763_v40 = vpop.xlane.xlu1 %9762  ;;  %v9868_v55 = vadd.f32 %v22977_v39, %v9846_v18 }
 0xfcf   :  { %v9760_v20 = vpop.xlane.xlu0 %9759  ;;  %v9826_v16 = vmul.f32 %v18447_v17, %v22830_v36  ;;  %18456 = vrsqrt.f32 %v9801_v30  ;;  %v9787_v59 = vmul.f32 0.03125, %v9763_v40  ;;  %v9899_v47 = vsel %vm62_vm0, %v9869_v49, 0 }
 0xfd0   :  { %v9786_v6 = vmul.f32 0.03125, %v9760_v20  ;;  %18458 = vrsqrt.f32 %v9800_v60  ;;  %v9896_v35 = vsel %vm62_vm0, %v9868_v55, 0  ;;  %v9849_v54 = vmul.f32 %v22971_v19, %v9827_v50 }
 0xfd1   :  { %v18449_v11 = vpop.eup %18448  ;;  %v9803_v21 = vadd.f32 1e-05, %v9787_v59  ;;  %v22989_v13 = vand.u32 4294901760, %v9896_v35  ;;  %v22991_v10 = vand.u32 4294901760, %v9899_v47  ;;  %v9848_v60 = vmul.f32 %v22971_v19, %v9826_v16 }
 0xfd2   :  { %v9802_v12 = vadd.f32 1e-05, %v9786_v6  ;;  %v18451_v18 = vpop.eup %18450  ;;  %v9829_v36 = vmul.f32 %v18449_v11, %v22838_v56  ;;  %v9769_v30 = vpop.xlane.xlu1 %9768  ;;  %v9871_v17 = vadd.f32 %v22977_v39, %v9849_v54 }
 0xfd3   :  { %v9766_v40 = vpop.xlane.xlu0 %9765  ;;  %v9828_v49 = vmul.f32 %v18451_v18, %v22841_v44  ;;  %18460 = vrsqrt.f32 %v9803_v21  ;;  %v9789_v50 = vmul.f32 0.03125, %v9769_v30  ;;  %v22998_v55 = vsub.f32 %v9896_v35, %v22989_v13 }
 0xfd4   :  { %v9788_v20 = vmul.f32 0.03125, %v9766_v40  ;;  %18462 = vrsqrt.f32 %v9802_v12  ;;  %v23001_v59 = vsub.f32 %v9899_v47, %v22991_v10  ;;  %v9870_v56 = vadd.f32 %v22977_v39, %v9848_v60 }
 0xfd5   :  { %v18453_v6 = vpop.eup %18452  ;;  %v9805_v11 = vadd.f32 1e-05, %v9789_v50  ;;  %v9905_v16 = vsel %vm62_vm0, %v9871_v17, 0  ;;  %v9850_v54 = vmul.f32 %v22971_v19, %v9828_v49  ;;  %v24481_v35 = vand.u32 4294901760, %v22998_v55 }
 0xfd6   :  { %v9804_v46 = vadd.f32 1e-05, %v9788_v20  ;;  %v18455_v44 = vpop.eup %18454  ;;  %v9831_v21 = vmul.f32 %v18453_v6, %v22850_v63  ;;  %v9775_v18 = vpop.xlane.xlu1 %9774  ;;  %v24482_v30 = vand.u32 4294901760, %v23001_v59  ;;  %v9902_v47 = vsel %vm62_vm0, %v9870_v56, 0 }
 0xfd7   :  { %v9772_v12 = vpop.xlane.xlu0 %9771  ;;  %v9830_v40 = vmul.f32 %v18455_v44, %v22853_v48  ;;  %18464 = vrsqrt.f32 %v9805_v11  ;;  %v9791_v60 = vmul.f32 0.03125, %v9775_v18  ;;  %v10015_v17 = vsub.f32 %v22998_v55, %v24481_v35 }
 0xfd8   :  { %v9790_v50 = vmul.f32 0.03125, %v9772_v12  ;;  %18466 = vrsqrt.f32 %v9804_v46  ;;  %v10025_v63 = vsub.f32 %v23001_v59, %v24482_v30  ;;  %v23017_v49 = vand.u32 4294901760, %v9902_v47 }
 0xfd9   :  { %v18457_v20 = vpop.eup %18456  ;;  %v9807_v6 = vadd.f32 1e-05, %v9791_v60  ;;  %v23019_v56 = vand.u32 4294901760, %v9905_v16  ;;  %v9872_v48 = vadd.f32 %v22977_v39, %v9850_v54  ;;  %v10016_v44 = vand.u32 4294901760, %v10015_v17 }
 0xfda   :  { %v9806_v4 = vadd.f32 1e-05, %v9790_v50  ;;  %v18459_v11 = vpop.eup %18458  ;;  %v9833_v46 = vmul.f32 %v18457_v20, %v22862_v22  ;;  %v10026_v18 = vand.u32 4294901760, %v10025_v63  ;;  %v23024_v12 = vsub.f32 %v9902_v47, %v23017_v49 }
 0xfdb   :  { %v9832_v35 = vmul.f32 %v18459_v11, %v22865_v61  ;;  %18468 = vrsqrt.f32 %v9807_v6  ;;  %v23028_v30 = vsub.f32 %v9905_v16, %v23019_v56  ;;  %v9908_v60 = vsel %vm62_vm0, %v9872_v48, 0  ;;  %16042 = vmatprep.mubr.f32.mxu0 %v10016_v44 }
 0xfdc   :  { %18470 = vrsqrt.f32 %v9806_v4  ;;  %v24485_v54 = vand.u32 4294901760, %v23024_v12  ;;  %v23032_v50 = vand.u32 4294901760, %v9908_v60  ;;  %v9851_v22 = vmul.f32 %v22971_v19, %v9829_v36  ;;  %16043 = vmatmul.mubr.f32.vlgmr.msra.gmra.mrb[48].mxu0 %v10026_v18 }
 0xfdd   :  { %v18461_v17 = vpop.eup %18460  ;;  %v24483_v47 = vand.u32 4294901760, %v23028_v30  ;;  %v9852_v61 = vmul.f32 %v22971_v19, %v9830_v40  ;;  %v9853_v63 = vmul.f32 %v22971_v19, %v9831_v21  ;;  %v9854_v16 = vmul.f32 %v22971_v19, %v9832_v35  ;;  %17341 = vmatpush3.bf16.msra.mxu0 %v22943_v43 }
 0xfde   :  { %v18463_v20 = vpop.eup %18462  ;;  %v9835_v4 = vmul.f32 %v18461_v17, %v22874_v3  ;;  %v10035_v6 = vsub.f32 %v23024_v12, %v24485_v54  ;;  %v23045_v36 = vsub.f32 %v9908_v60, %v23032_v50  ;;  %v9873_v48 = vadd.f32 %v22977_v39, %v9851_v22  ;;  %17343 = vmatprep.subr.bf16.mxu0 %v22958_v24 }
 0xfdf   :  { %v9834_v40 = vmul.f32 %v18463_v20, %v22877_v8  ;;  %v10045_v21 = vsub.f32 %v23028_v30, %v24483_v47  ;;  %v9874_v35 = vadd.f32 %v22977_v39, %v9852_v61  ;;  %v9875_v3 = vadd.f32 %v22977_v39, %v9853_v63 }
 0xfe0   :  { %v10036_v43 = vand.u32 4294901760, %v10035_v6  ;;  %v24484_v11 = vand.u32 4294901760, %v23045_v36  ;;  %v9911_v44 = vsel %vm62_vm0, %v9873_v48, 0  ;;  %v9876_v18 = vadd.f32 %v22977_v39, %v9854_v16 }
 0xfe1   :  { %v18465_v60 = vpop.eup %18464  ;;  %v10046_v22 = vand.u32 4294901760, %v10045_v21  ;;  %v23058_v8 = vand.u32 4294901760, %v9911_v44  ;;  %v9914_v17 = vsel %vm62_vm0, %v9874_v35, 0  ;;  %v9917_v20 = vsel %vm62_vm0, %v9875_v3, 0  ;;  %17345 = vmatpush3.bf16.msra.mxu0 %v22958_v24 }
 0xfe2   :  { %v18467_v61 = vpop.eup %18466  ;;  %v9837_v63 = vmul.f32 %v18465_v60, %v22886_v37  ;;  %16045 = vmatprep.mubr.f32.mxu0 %v10036_v43  ;;  %v10055_v6 = vsub.f32 %v23045_v36, %v24484_v11  ;;  %v23066_v47 = vand.u32 4294901760, %v9914_v17  ;;  %v23068_v48 = vand.u32 4294901760, %v9917_v20  ;;  %17347 = vmatprep.subr.bf16.mxu0 %v22962_v52 }
 0xfe3   :  { %v9836_v16 = vmul.f32 %v18467_v61, %v22889_v23  ;;  %16046 = vmatmul.mubr.f32.gmra.mrb[50].mxu0 %v10046_v22  ;;  %v23073_v21 = vsub.f32 %v9911_v44, %v23058_v8  ;;  %v9920_v35 = vsel %vm62_vm0, %v9876_v18, 0  ;;  %v9855_v37 = vmul.f32 %v22971_v19, %v9833_v46 }
 0xfe4   :  { %v10056_v3 = vand.u32 4294901760, %v10055_v6  ;;  %v23079_v43 = vsub.f32 %v9914_v17, %v23066_v47  ;;  %v23082_v60 = vsub.f32 %v9917_v20, %v23068_v48  ;;  %v23084_v24 = vand.u32 4294901760, %v9920_v35 }
 0xfe5   :  { %v18469_v23 = vpop.eup %18468  ;;  %v24486_v22 = vand.u32 4294901760, %v23073_v21  ;;  %v9877_v44 = vadd.f32 %v22977_v39, %v9855_v37  ;;  %v9856_v18 = vmul.f32 %v22971_v19, %v9834_v40  ;;  %v9857_v46 = vmul.f32 %v22971_v19, %v9835_v4 }
 0xfe6   :  { %v18471_v61 = vpop.eup %18470  ;;  %v9839_v6 = vmul.f32 %v18469_v23, %v22898_v33  ;;  %16048 = vmatprep.mubr.f32.mxu0 %v10056_v3  ;;  %v24488_v17 = vand.u32 4294901760, %v23079_v43  ;;  %v24489_v20 = vand.u32 4294901760, %v23082_v60  ;;  %v23094_v11 = vsub.f32 %v9920_v35, %v23084_v24 }
 0xfe7   :  { %v9838_v54 = vmul.f32 %v18471_v61, %v22901_v27  ;;  %v10065_v37 = vsub.f32 %v23073_v21, %v24486_v22  ;;  %v9923_v40 = vsel %vm62_vm0, %v9877_v44, 0  ;;  %v9878_v4 = vadd.f32 %v22977_v39, %v9856_v18 }
 0xfe8   :  { %v9861_v33 = vmul.f32 %v22971_v19, %v9839_v6  ;;  %v10075_v3 = vsub.f32 %v23079_v43, %v24488_v17  ;;  %v10085_v35 = vsub.f32 %v23082_v60, %v24489_v20  ;;  %v24491_v27 = vand.u32 4294901760, %v23094_v11 }
 0xfe9   :  { %v9860_v23 = vmul.f32 %v22971_v19, %v9838_v54  ;;  %v10066_v61 = vand.u32 4294901760, %v10065_v37  ;;  %v23111_v22 = vand.u32 4294901760, %v9923_v40  ;;  %v9926_v44 = vsel %vm62_vm0, %v9878_v4, 0 }
 0xfea   :  { %v10076_v18 = vand.u32 4294901760, %v10075_v3  ;;  %v10086_v53 = vand.u32 4294901760, %v10085_v35  ;;  %v10095_v6 = vsub.f32 %v23094_v11, %v24491_v27  ;;  %v23117_v17 = vand.u32 4294901760, %v9926_v44 }
 0xfeb   :  { %16049 = vmatmul.mubr.f32.gmra.mrb[52].mxu0 %v10066_v61  ;;  %v23120_v20 = vsub.f32 %v9923_v40, %v23111_v22  ;;  %v9879_v0 = vadd.f32 %v22977_v39, %v9857_v46  ;;  %v9858_v54 = vmul.f32 %v22971_v19, %v9836_v16  ;;  %v9859_v37 = vmul.f32 %v22971_v19, %v9837_v63 }
 0xfec   :  { %16051 = vmatprep.mubr.f32.mxu0 %v10076_v18  ;;  %v10096_v4 = vand.u32 4294901760, %v10095_v6  ;;  %v23126_v3 = vsub.f32 %v9926_v44, %v23117_v17  ;;  %v9882_v35 = vadd.f32 %v22977_v39, %v9860_v23  ;;  %v9883_v27 = vadd.f32 %v22977_v39, %v9861_v33 }
 0xfed   :  { %v24494_v61 = vand.u32 4294901760, %v23120_v20  ;;  %v9929_v40 = vsel %vm62_vm0, %v9879_v0, 0  ;;  %v9880_v25 = vadd.f32 %v22977_v39, %v9858_v54  ;;  %v9881_v46 = vadd.f32 %v22977_v39, %v9859_v37 }
 0xfee   :  { %v24493_v16 = vand.u32 4294901760, %v23126_v3  ;;  %v23135_v19 = vand.u32 4294901760, %v9929_v40  ;;  %v9938_v63 = vsel %vm62_vm0, %v9882_v35, 0  ;;  %v9941_v44 = vsel %vm62_vm0, %v9883_v27, 0 }
 0xfef   :  { %16052 = vmatmul.mubr.f32.gmra.mrb[54].mxu0 %v10086_v53  ;;  %v10105_v33 = vsub.f32 %v23120_v20, %v24494_v61  ;;  %v9932_v23 = vsel %vm62_vm0, %v9880_v25, 0  ;;  %v9935_v0 = vsel %vm62_vm0, %v9881_v46, 0  ;;  %v23144_v18 = vand.u32 4294901760, %v9938_v63 }
 0xff0   :  { %16054 = vmatprep.mubr.f32.mxu0 %v10096_v4  ;;  %v10115_v39 = vsub.f32 %v23126_v3, %v24493_v16  ;;  %v23150_v6 = vsub.f32 %v9929_v40, %v23135_v19  ;;  %v23152_v27 = vand.u32 4294901760, %v9932_v23  ;;  %v23154_v53 = vand.u32 4294901760, %v9935_v0 }
 0xff1   :  { %v10106_v54 = vand.u32 4294901760, %v10105_v33  ;;  %v23157_v37 = vsub.f32 %v9938_v63, %v23144_v18  ;;  %v23159_v25 = vand.u32 4294901760, %v9941_v44 }
 0xff2   :  { %v10116_v35 = vand.u32 4294901760, %v10115_v39  ;;  %v24495_v4 = vand.u32 4294901760, %v23150_v6  ;;  %v23163_v46 = vsub.f32 %v9932_v23, %v23152_v27  ;;  %v23166_v16 = vsub.f32 %v9935_v0, %v23154_v53 }
 0xff3   :  { %16055 = vmatmul.mubr.f32.gmra.mrb[56].mxu0 %v10106_v54  ;;  %v24499_v40 = vand.u32 4294901760, %v23157_v37  ;;  %v23170_v61 = vsub.f32 %v9941_v44, %v23159_v25 }
 0xff4   :  { %16057 = vmatprep.mubr.f32.mxu0 %v10116_v35  ;;  %v10125_v63 = vsub.f32 %v23150_v6, %v24495_v4  ;;  %v10134_v33 = vand.u32 4294901760, %v23163_v46  ;;  %v10144_v39 = vand.u32 4294901760, %v23166_v16 }
 0xff5   :  { %v10155_v23 = vsub.f32 %v23157_v37, %v24499_v40  ;;  %v10164_v0 = vand.u32 4294901760, %v23170_v61 }
 0xff6   :  { %v10126_v54 = vand.u32 4294901760, %v10125_v63  ;;  %v10135_v44 = vsub.f32 %v23163_v46, %v10134_v33  ;;  %v10145_v35 = vsub.f32 %v23166_v16, %v10144_v39  ;;  %v25128_v63 = vand.u32 4294901760, %v23028_v30 }
 0xff7   :  { %v10165_v26 = vsub.f32 %v23170_v61, %v10164_v0  ;;  %v10156_v42 = vand.u32 4294901760, %v10155_v23  ;;  %v25129_v23 = vand.u32 4294901760, %v23045_v36 }
 0xff8   :  { %16058 = vmatmul.mubr.f32.gmra.mrb[58].mxu0 %v10126_v54  ;;  %v10136_v4 = vand.u32 4294901760, %v10135_v44  ;;  %v10146_v45 = vand.u32 4294901760, %v10145_v35 }
 0xff9   :  { %v10166_v40 = vand.u32 4294901760, %v10165_v26  ;;  %v25122_v26 = vand.u32 4294901760, %v22933_v34  ;;  %v25124_v34 = vand.u32 4294901760, %v22946_v7  ;;  %v25130_v7 = vand.u32 4294901760, %v23073_v21 }
 0xffa   :  { %16060 = vmatprep.mubr.f32.mxu0 %v10136_v4  ;;  %v25126_v4 = vand.u32 4294901760, %v23001_v59 }
 0xffc   :  { %16061 = vmatmul.mubr.f32.gmra.mrb[60].mxu0 %v10146_v45 }
 0xffd   :  { %16063 = vmatprep.mubr.f32.mxu0 %v10156_v42  ;;  %v25121_v42 = vand.u32 4294901760, %v22931_v9  ;;  %v25123_v9 = vand.u32 4294901760, %v22998_v55 }
 0xfff   :  { %v17362_v45 = vpack.c.bf16 %v25122_v26, %v25121_v42 }
0x1000   :  { %16064 = vmatmul.mubr.f32.gmra.mrb[62].mxu0 %v10166_v40  ;;  %v25127_v40 = vand.u32 4294901760, %v23024_v12 }
0x1001   :  { %16074 = vmatprep.mubr.f32.mxu0 %v22989_v13 }
0x1004   :  { %16075 = vmatmul.mubr.f32.vlgmr.msra.gmra.mrb[48].mxu0 %v22991_v10 }
0x1005   :  { %16077 = vmatprep.mubr.f32.mxu0 %v23017_v49  ;;  %17349 = vmatpush3.bf16.msra.mxu0 %v22962_v52  ;;  %v25125_v52 = vand.u32 4294901760, %v22948_v14  ;;  %v25131_v14 = vand.u32 4294901760, %v23079_v43 }
0x1006   :  { %17351 = vmatprep.subr.bf16.mxu0 %v22966_v38 }
0x1008   :  { %16078 = vmatmul.mubr.f32.gmra.mrb[50].mxu0 %v23019_v56 }
0x1009   :  { %16080 = vmatprep.mubr.f32.mxu0 %v23032_v50  ;;  %17353 = vmatpush3.bf16.msra.mxu0 %v22966_v38  ;;  %v17366_v38 = vpack.c.bf16 %v25125_v52, %v25124_v34  ;;  %v24507_v34 = vmov -1.0  }
0x100a   :  { %17355 = vmatprep.subr.bf16.mxu0 %v22917_v5 }
0x100c   :  { %16081 = vmatmul.mubr.f32.gmra.mrb[52].mxu0 %v23058_v8 }
0x100d   :  { %16083 = vmatprep.mubr.f32.mxu0 %v23066_v47 }
0x1010   :  { %16084 = vmatmul.mubr.f32.gmra.mrb[54].mxu0 %v23068_v48 }
0x1011   :  { %16086 = vmatprep.mubr.f32.mxu0 %v23084_v24 }
0x1014   :  { %16087 = vmatmul.mubr.f32.gmra.mrb[56].mxu0 %v23111_v22 }
0x1015   :  { %16089 = vmatprep.mubr.f32.mxu0 %v23117_v17 }
0x1018   :  { %16090 = vmatmul.mubr.f32.gmra.mrb[58].mxu0 %v23135_v19 }
0x1019   :  { %16092 = vmatprep.mubr.f32.mxu0 %v23152_v27 }
0x101c   :  { %16093 = vmatmul.mubr.f32.gmra.mrb[60].mxu0 %v23154_v53 }
0x101d   :  { %16095 = vmatprep.mubr.f32.mxu0 %v23144_v18 }
0x1020   :  { %16096 = vmatmul.mubr.f32.gmra.mrb[62].mxu0 %v23159_v25 }
0x1021   :  { %16106 = vmatprep.mubr.f32.mxu0 %v22998_v55  ;;  %v25132_v55 = vand.u32 4294901760, %v23082_v60 }
0x1024   :  { %16107 = vmatmul.mubr.f32.vlgmr.msra.gmra.mrb[48].mxu0 %v23001_v59  ;;  %v25133_v59 = vand.u32 4294901760, %v23094_v11 }
0x1025   :  { %16109 = vmatprep.mubr.f32.mxu0 %v23024_v12  ;;  %17357 = vmatpush3.bf16.msra.mxu0 %v22917_v5  ;;  %v25135_v12 = vand.u32 4294901760, %v23126_v3 }
0x1026   :  { %17359 = vmatprep.subr.bf16.mxu0 %v22927_v1 }
0x1028   :  { %16110 = vmatmul.mubr.f32.gmra.mrb[50].mxu0 %v23028_v30  ;;  %v25134_v30 = vand.u32 4294901760, %v23120_v20 }
0x1029   :  { %16112 = vmatprep.mubr.f32.mxu0 %v23045_v36  ;;  %17361 = vmatpush3.bf16.msra.mxu0 %v22927_v1  ;;  %v25136_v36 = vand.u32 4294901760, %v23150_v6 }
0x102a   :  { %17363 = vmatprep.subr.bf16.mxu0 %v17362_v45 }
0x102c   :  { %16113 = vmatmul.mubr.f32.gmra.mrb[52].mxu0 %v23073_v21  ;;  %v25137_v21 = vand.u32 4294901760, %v23157_v37 }
0x102d   :  { %16115 = vmatprep.mubr.f32.mxu0 %v23079_v43  ;;  %v23341_v43 = vld [vmem:[%s24160_s11 + $0x28] sm:$0xff] }
0x102e   :  { %25140 = vst [vmem:[#allocation62_spill] sm:$0xff] %v23341_v43 }
0x1030   :  { %16116 = vmatmul.mubr.f32.gmra.mrb[54].mxu0 %v23082_v60 }
0x1031   :  { %16118 = vmatprep.mubr.f32.mxu0 %v23094_v11 }
0x1034   :  { %16119 = vmatmul.mubr.f32.gmra.mrb[56].mxu0 %v23120_v20  ;;  %v23361_v20 = vld [vmem:[%s24160_s11 + $0x38] sm:$0xff] }
0x1035   :  { %16121 = vmatprep.mubr.f32.mxu0 %v23126_v3  ;;  %25143 = vst [vmem:[#allocation63_spill] sm:$0xff] %v23361_v20 }
0x1038   :  { %16122 = vmatmul.mubr.f32.gmra.mrb[58].mxu0 %v23150_v6 }
0x1039   :  { %16124 = vmatprep.mubr.f32.mxu0 %v23163_v46 }
0x103c   :  { %16125 = vmatmul.mubr.f32.gmra.mrb[60].mxu0 %v23166_v16 }
0x103d   :  { %16127 = vmatprep.mubr.f32.mxu0 %v23157_v37 }
0x1040   :  { %16128 = vmatmul.mubr.f32.gmra.mrb[62].mxu0 %v23170_v61  ;;  %v24501_v61 = vand.u32 4294901760, %v23361_v20 }
0x1041   :  { %16138 = vmatprep.mubr.f32.mxu0 %v25123_v9 }
0x1044   :  { %16139 = vmatmul.mubr.f32.vlgmr.msra.gmra.mrb[48].mxu0 %v25126_v4 }
0x1045   :  { %16141 = vmatprep.mubr.f32.mxu0 %v25127_v40  ;;  %17365 = vmatpush3.bf16.msra.mxu0 %v17362_v45 }
0x1046   :  { %17367 = vmatprep.subr.bf16.mxu0 %v17366_v38 }
0x1048   :  { %16142 = vmatmul.mubr.f32.gmra.mrb[50].mxu0 %v25128_v63 }
0x1049   :  { %16144 = vmatprep.mubr.f32.mxu0 %v25129_v23  ;;  %17369 = vmatpush3.bf16.msra.mxu0 %v17366_v38 }
0x104a   :  { %17371 = vmatprep.subr.bf16.mxu0 %v22917_v5 }
0x104c   :  { %16145 = vmatmul.mubr.f32.gmra.mrb[52].mxu0 %v25130_v7 }
0x104d   :  { %16147 = vmatprep.mubr.f32.mxu0 %v25131_v14 }
0x1050   :  { %16148 = vmatmul.mubr.f32.gmra.mrb[54].mxu0 %v25132_v55 }
0x1051   :  { %16150 = vmatprep.mubr.f32.mxu0 %v25133_v59 }
0x1054   :  { %16151 = vmatmul.mubr.f32.gmra.mrb[56].mxu0 %v25134_v30 }
0x1055   :  { %16153 = vmatprep.mubr.f32.mxu0 %v25135_v12 }
0x1058   :  { %16154 = vmatmul.mubr.f32.gmra.mrb[58].mxu0 %v25136_v36 }
0x1059   :  { %16156 = vmatprep.mubr.f32.mxu0 %v10134_v33 }
0x105c   :  { %16157 = vmatmul.mubr.f32.gmra.mrb[60].mxu0 %v10144_v39 }
0x105d   :  { %16159 = vmatprep.mubr.f32.mxu0 %v25137_v21 }
0x1060   :  { %16160 = vmatmul.mubr.f32.gmra.mrb[62].mxu0 %v10164_v0 }
0x1061   :  { %16170 = vmatprep.mubr.f32.mxu0 %v22989_v13 }
0x1064   :  { %16171 = vmatmul.mubr.f32.vlgmr.msra.gmra.mrb[48].mxu0 %v22991_v10 }
0x1065   :  { %16173 = vmatprep.mubr.f32.mxu0 %v23017_v49  ;;  %17373 = vmatpush3.bf16.msra.mxu0 %v22917_v5  ;;  %v11505_v5 = vld [vmem:[%s24160_s11] sm:$0xff] }
0x1066   :  { %17375 = vmatprep.subr.bf16.mxu0 %v22927_v1 }
0x1068   :  { %16174 = vmatmul.mubr.f32.gmra.mrb[50].mxu0 %v23019_v56 }
0x1069   :  { %16176 = vmatprep.mubr.f32.mxu0 %v23032_v50  ;;  %17377 = vmatpush3.bf16.msra.mxu0 %v22927_v1  ;;  %v11506_v1 = vld [vmem:[%s24160_s11 + $0x8] sm:$0xff] }
0x106c   :  { %16177 = vmatmul.mubr.f32.gmra.mrb[52].mxu0 %v23058_v8 }
0x106d   :  { %16179 = vmatprep.mubr.f32.mxu0 %v23066_v47 }
0x1070   :  { %16180 = vmatmul.mubr.f32.gmra.mrb[54].mxu0 %v23068_v48 }
0x1071   :  { %16182 = vmatprep.mubr.f32.mxu0 %v23084_v24 }
0x1074   :  { %16183 = vmatmul.mubr.f32.gmra.mrb[56].mxu0 %v23111_v22 }
0x1075   :  { %16185 = vmatprep.mubr.f32.mxu0 %v23117_v17 }
0x1078   :  { %16186 = vmatmul.mubr.f32.gmra.mrb[58].mxu0 %v23135_v19 }
0x1079   :  { %16188 = vmatprep.mubr.f32.mxu0 %v23152_v27 }
0x107c   :  { %16189 = vmatmul.mubr.f32.gmra.mrb[60].mxu0 %v23154_v53 }
0x107d   :  { %16191 = vmatprep.mubr.f32.mxu0 %v23144_v18 }
0x1080   :  { %16192 = vmatmul.mubr.f32.gmra.mrb[62].mxu0 %v23159_v25 }
0x1081   :  { %16202 = vmatprep.mubr.f32.mxu0 %v22989_v13  ;;  %v11570_v13 = vand.u32 4294901760, %v11505_v5 }
0x1084   :  { %16203 = vmatmul.mubr.f32.vlgmr.msra.gmra.mrb[48].mxu0 %v22991_v10  ;;  %v11573_v10 = vand.u32 4294901760, %v11506_v1 }
0x1085   :  { %16205 = vmatprep.mubr.f32.mxu0 %v23017_v49 }
0x1086   :  { %v23311_v49 = vpack.c.bf16 %v11573_v10, %v11570_v13  ;;  %v23383_v37 = vsub.f32 %v11506_v1, %v11573_v10 }
0x1088   :  { %16206 = vmatmul.mubr.f32.gmra.mrb[50].mxu0 %v23019_v56  ;;  %25138 = vst [vmem:[#allocation46_spill] sm:$0xff] %v23311_v49  ;;  %v23316_v56 = vld [vmem:[%s24160_s11 + $0x10] sm:$0xff]  ;;  %17379 = vmatprep.subr.bf16.mxu0 %v23311_v49 }
0x1089   :  { %16208 = vmatprep.mubr.f32.mxu0 %v23032_v50  ;;  %v23321_v50 = vld [vmem:[%s24160_s11 + $0x18] sm:$0xff]  ;;  %17381 = vmatpush3.bf16.msra.mxu0 %v23311_v49 }
0x108a   :  { %v24505_v11 = vand.u32 4294901760, %v23321_v50 }
0x108c   :  { %16209 = vmatmul.mubr.f32.gmra.mrb[52].mxu0 %v23058_v8 }
0x108d   :  { %16211 = vmatprep.mubr.f32.mxu0 %v23066_v47  ;;  %v24506_v47 = vand.u32 4294901760, %v23316_v56 }
0x108f   :  { %v23331_v8 = vpack.c.bf16 %v24505_v11, %v24506_v47 }
0x1090   :  { %16212 = vmatmul.mubr.f32.gmra.mrb[54].mxu0 %v23068_v48  ;;  %v23336_v48 = vld [vmem:[%s24160_s11 + $0x20] sm:$0xff] }
0x1091   :  { %16214 = vmatprep.mubr.f32.mxu0 %v23084_v24  ;;  %25139 = vst [vmem:[#allocation64_spill] sm:$0xff] %v23331_v8  ;;  %17383 = vmatprep.subr.bf16.mxu0 %v23331_v8  ;;  %v24504_v60 = vand.u32 4294901760, %v23336_v48  ;;  %v24503_v24 = vand.u32 4294901760, %v23341_v43 }
0x1092   :  { %17385 = vmatpush3.bf16.msra.mxu0 %v23331_v8 }
0x1094   :  { %16215 = vmatmul.mubr.f32.gmra.mrb[56].mxu0 %v23111_v22  ;;  %v23351_v22 = vpack.c.bf16 %v24503_v24, %v24504_v60 }
0x1095   :  { %16217 = vmatprep.mubr.f32.mxu0 %v23117_v17  ;;  %v23356_v17 = vld [vmem:[%s24160_s11 + $0x30] sm:$0xff] }
0x1096   :  { %25141 = vst [vmem:[#allocation53_spill] sm:$0xff] %v23351_v22  ;;  %25142 = vst [vmem:[#allocation72_spill] sm:$0xff] %v23356_v17  ;;  %17387 = vmatprep.subr.bf16.mxu0 %v23351_v22  ;;  %v24502_v3 = vand.u32 4294901760, %v23356_v17 }
0x1097   :  { %17389 = vmatpush3.bf16.msra.mxu0 %v23351_v22 }
0x1098   :  { %16218 = vmatmul.mubr.f32.gmra.mrb[58].mxu0 %v23135_v19  ;;  %v23371_v16 = vpack.c.bf16 %v24501_v61, %v24502_v3  ;;  %v23378_v19 = vld [vmem:[%s24161_s10] ss:$0 sm:$0xff] }
0x1099   :  { %16220 = vmatprep.mubr.f32.mxu0 %v23152_v27 }
0x109a   :  { %25144 = vst [vmem:[#allocation77_spill] sm:$0xff] %v23371_v16  ;;  %17391 = vmatprep.subr.bf16.mxu0 %v23371_v16 }
0x109b   :  { %17393 = vmatpush3.bf16.msra.mxu0 %v23371_v16 }
0x109c   :  { %16221 = vmatmul.mubr.f32.gmra.mrb[60].mxu0 %v23154_v53  ;;  %v23381_v53 = vsub.f32 %v11505_v5, %v11570_v13 }
0x109d   :  { %16223 = vmatprep.mubr.f32.mxu0 %v23144_v18 }
0x109e   :  { %25145 = vst [vmem:[#allocation65_spill] sm:$0xff] %v23381_v53  ;;  %v24500_v33 = vand.u32 4294901760, %v23381_v53 }
0x10a0   :  { %16224 = vmatmul.mubr.f32.gmra.mrb[62].mxu0 %v23159_v25  ;;  %v23396_v9 = vsub.f32 %v23381_v53, %v24500_v33 }
0x1157   :  { %v16204_v18 = vpop.f32.mrb[48].mxu0 }
0x1158   :  { %v17538_v6 = vadd.f32 %v16204_v18, %v23378_v19  ;;  %v10979_v27 = vpop.f32.mrb[49].mxu0 }
0x1159   :  { %v17539_v25 = vadd.f32 %v23378_v19, %v10979_v27 }
0x115a   :  { %v11090_v46 = vmul.f32 0.70710677, %v17538_v6  ;;  %v23387_v39 = vmul.f32 0.5, %v17538_v6 }
0x115b   :  { %v23389_v0 = vmul.f32 0.5, %v17539_v25  ;;  %v11089_v54 = vmul.f32 0.70710677, %v17539_v25  ;;  %v16207_v44 = vpop.f32.mrb[50].mxu0 }
0x115c   :  { %vm11106_vm2 = vcmp.ge.f32.partialorder %v11090_v46, 0.0  ;;  %v11138_v42 = vand.u32 2147483647, %v11090_v46  ;;  %v17540_v26 = vadd.f32 %v16207_v44, %v23378_v19  ;;  %v10991_v45 = vpop.f32.mrb[51].mxu0 }
0x115d   :  { %v23399_v52 = vsel %vm11106_vm2, 1.0, %v24507_v34  ;;  %vm11105_vm3 = vcmp.ge.f32.partialorder %v11089_v54, 0.0  ;;  %v11137_v38 = vand.u32 2147483647, %v11089_v54  ;;  %v17541_v4 = vadd.f32 %v23378_v19, %v10991_v45 }
0x115e   :  { %v11154_v40 = vmul.f32 0.3275911, %v11138_v42  ;;  %v11362_v63 = vsub.f32 0.0, %v11138_v42  ;;  %v23403_v23 = vsel %vm11105_vm3, 1.0, %v24507_v34  ;;  %v23405_v7 = vmul.f32 0.5, %v17540_v26 }
0x115f   :  { %v11153_v14 = vmul.f32 0.3275911, %v11137_v38  ;;  %v11361_v55 = vsub.f32 0.0, %v11137_v38  ;;  %v11092_v59 = vmul.f32 0.70710677, %v17540_v26  ;;  %v23407_v30 = vmul.f32 0.5, %v17541_v4 }
0x1160   :  { %v11170_v12 = vadd.f32 1.0, %v11154_v40  ;;  %v11378_v36 = vmul.f32 %v11362_v63, %v11138_v42  ;;  %v11091_v21 = vmul.f32 0.70710677, %v17541_v4  ;;  %v16210_v5 = vpop.f32.mrb[52].mxu0 }
0x1161   :  { %v11169_v13 = vadd.f32 1.0, %v11153_v14  ;;  %v11377_v10 = vmul.f32 %v11361_v55, %v11137_v38  ;;  %vm11108_vm4 = vcmp.ge.f32.partialorder %v11092_v59, 0.0  ;;  %v11140_v18 = vand.u32 2147483647, %v11092_v59  ;;  %v11003_v6 = vpop.f32.mrb[53].mxu0 }
0x1162   :  { %18472 = vrcp.f32 %v11170_v12  ;;  %v11395_v27 = vmul.f32 1.442695, %v11378_v36  ;;  %v23411_v25 = vsel %vm11108_vm4, 1.0, %v24507_v34  ;;  %vm11107_vm5 = vcmp.ge.f32.partialorder %v11091_v21, 0.0 }
0x1163   :  { %18474 = vrcp.f32 %v11169_v13  ;;  %v11393_v46 = vmul.f32 1.442695, %v11377_v10  ;;  %v11156_v54 = vmul.f32 0.3275911, %v11140_v18  ;;  %v11364_v44 = vsub.f32 0.0, %v11140_v18  ;;  %v16213_v42 = vpop.f32.mrb[54].mxu0 }
0x1164   :  { %18476 = vpow2.f32 %v11395_v27  ;;  %v23414_v26 = vsel %vm11107_vm5, 1.0, %v24507_v34  ;;  %v11139_v45 = vand.u32 2147483647, %v11091_v21  ;;  %v17542_v38 = vadd.f32 %v16210_v5, %v23378_v19  ;;  %v11015_v4 = vpop.f32.mrb[55].mxu0 }
0x1165   :  { %18478 = vpow2.f32 %v11393_v46  ;;  %v11172_v40 = vadd.f32 1.0, %v11156_v54  ;;  %v11380_v63 = vmul.f32 %v11364_v44, %v11140_v18  ;;  %v17543_v14 = vadd.f32 %v23378_v19, %v11003_v6 }
0x1166   :  { %v11155_v55 = vmul.f32 0.3275911, %v11139_v45  ;;  %v11363_v59 = vsub.f32 0.0, %v11139_v45  ;;  %v23418_v12 = vmul.f32 0.5, %v17542_v38  ;;  %v11094_v36 = vmul.f32 0.70710677, %v17542_v38 }
0x1167   :  { %18480 = vrcp.f32 %v11172_v40  ;;  %v11399_v13 = vmul.f32 1.442695, %v11380_v63  ;;  %v23420_v10 = vmul.f32 0.5, %v17543_v14  ;;  %v11093_v27 = vmul.f32 0.70710677, %v17543_v14  ;;  %v16216_v33 = vpop.f32.mrb[56].mxu0 }
0x1168   :  { %v11171_v21 = vadd.f32 1.0, %v11155_v55  ;;  %v11379_v61 = vmul.f32 %v11363_v59, %v11139_v45  ;;  %vm11110_vm6 = vcmp.ge.f32.partialorder %v11094_v36, 0.0  ;;  %v11142_v5 = vand.u32 2147483647, %v11094_v36  ;;  %v23422_v46 = vpop.f32.mrb[57].mxu0 }
0x1169   :  { %18482 = vpow2.f32 %v11399_v13  ;;  %v23425_v18 = vsel %vm11110_vm6, 1.0, %v24507_v34  ;;  %vm11109_vm7 = vcmp.ge.f32.partialorder %v11093_v27, 0.0  ;;  %v11141_v6 = vand.u32 2147483647, %v11093_v27 }
0x116a   :  { %18484 = vrcp.f32 %v11171_v21  ;;  %v11397_v54 = vmul.f32 1.442695, %v11379_v61  ;;  %v11158_v44 = vmul.f32 0.3275911, %v11142_v5  ;;  %v11366_v38 = vsub.f32 0.0, %v11142_v5 }
0x116b   :  { %v23428_v40 = vsel %vm11109_vm7, 1.0, %v24507_v34  ;;  %v11157_v63 = vmul.f32 0.3275911, %v11141_v6  ;;  %v11365_v14 = vsub.f32 0.0, %v11141_v6  ;;  %v17544_v45 = vadd.f32 %v16213_v42, %v23378_v19  ;;  %v23431_v55 = vpop.f32.mrb[58].mxu0 }
0x116c   :  { %v23433_v59 = vpop.eup %18472  ;;  %18486 = vpow2.f32 %v11397_v54  ;;  %v11174_v36 = vadd.f32 1.0, %v11158_v44  ;;  %v11382_v13 = vmul.f32 %v11366_v38, %v11142_v5  ;;  %v17545_v27 = vadd.f32 %v23378_v19, %v11015_v4  ;;  %v23436_v21 = vpop.f32.mrb[59].mxu0 }
0x116d   :  { %v23438_v61 = vpop.eup %18474  ;;  %v11218_v3 = vmul.f32 1.0614054, %v23433_v59  ;;  %v11173_v24 = vadd.f32 1.0, %v11157_v63  ;;  %v11381_v60 = vmul.f32 %v11365_v14, %v11141_v6  ;;  %v23441_v11 = vmul.f32 0.5, %v17544_v45 }
0x116e   :  { %v23443_v42 = vpop.eup %18476  ;;  %v11217_v1 = vmul.f32 1.0614054, %v23438_v61  ;;  %18488 = vrcp.f32 %v11174_v36  ;;  %v11403_v54 = vmul.f32 1.442695, %v11382_v13  ;;  %v11096_v44 = vmul.f32 0.70710677, %v17544_v45 }
0x116f   :  { %v23446_v5 = vpop.eup %18478  ;;  %v11234_v4 = vadd.f32 -1.4531521, %v11218_v3  ;;  %18490 = vrcp.f32 %v11173_v24  ;;  %v11401_v38 = vmul.f32 1.442695, %v11381_v60  ;;  %v23448_v47 = vmul.f32 0.5, %v17545_v27  ;;  %v23450_v35 = vpop.f32.mrb[60].mxu0 }
0x1170   :  { %v11233_v63 = vadd.f32 -1.4531521, %v11217_v1  ;;  %18492 = vpow2.f32 %v11403_v54  ;;  %vm11112_vm8 = vcmp.ge.f32.partialorder %v11096_v44, 0.0  ;;  %v11144_v6 = vand.u32 2147483647, %v11096_v44  ;;  %v23452_v14 = vpop.f32.mrb[61].mxu0 }
0x1171   :  { %v23454_v34 = vpop.eup %18480  ;;  %v11250_v36 = vmul.f32 %v23433_v59, %v11234_v4  ;;  %18494 = vpow2.f32 %v11401_v38  ;;  %v25146_v45 = vmov -1.0   ;;  %v11095_v24 = vmul.f32 0.70710677, %v17545_v27 }
0x1172   :  { %v23458_v13 = vsel %vm11112_vm8, 1.0, %v25146_v45  ;;  %v11249_v60 = vmul.f32 %v23438_v61, %v11233_v63  ;;  %v11220_v3 = vmul.f32 1.0614054, %v23454_v34  ;;  %v11160_v28 = vmul.f32 0.3275911, %v11144_v6 }
0x1173   :  { %v11368_v1 = vsub.f32 0.0, %v11144_v6  ;;  %v23462_v54 = vpop.eup %18482  ;;  %v11266_v44 = vadd.f32 1.4214138, %v11250_v36  ;;  %vm11111_vm9 = vcmp.ge.f32.partialorder %v11095_v24, 0.0  ;;  %v11143_v31 = vand.u32 2147483647, %v11095_v24 }
0x1174   :  { %v17546_v58 = vadd.f32 %v16216_v33, %v23378_v19  ;;  %v23465_v29 = vpop.f32.mrb[62].mxu0  ;;  %v23467_v4 = vpop.eup %18484  ;;  %v11265_v38 = vadd.f32 1.4214138, %v11249_v60  ;;  %v11236_v41 = vadd.f32 -1.4531521, %v11220_v3  ;;  %v11176_v27 = vadd.f32 1.0, %v11160_v28 }
0x1175   :  { %v11384_v57 = vmul.f32 %v11368_v1, %v11144_v6  ;;  %v23469_v63 = vpop.f32.mrb[63].mxu0  ;;  %v11282_v15 = vmul.f32 %v23433_v59, %v11266_v44  ;;  %v11219_v62 = vmul.f32 1.0614054, %v23467_v4  ;;  %v23474_v36 = vsel %vm11111_vm9, 1.0, %v25146_v45 }
0x1176   :  { %v11159_v24 = vmul.f32 0.3275911, %v11143_v31  ;;  %v23476_v51 = vpop.eup %18486  ;;  %v11281_v33 = vmul.f32 %v23438_v61, %v11265_v38  ;;  %v11252_v2 = vmul.f32 %v23454_v34, %v11236_v41  ;;  %18496 = vrcp.f32 %v11176_v27 }
0x1177   :  { %v11407_v60 = vmul.f32 1.442695, %v11384_v57  ;;  %v11298_v28 = vadd.f32 -0.28449672, %v11282_v15  ;;  %v11235_v6 = vadd.f32 -1.4531521, %v11219_v62 }
0x1178   :  { %v11175_v3 = vadd.f32 1.0, %v11159_v24  ;;  %v11367_v1 = vsub.f32 0.0, %v11143_v31  ;;  %v23480_v32 = vpop.eup %18488  ;;  %v11297_v44 = vadd.f32 -0.28449672, %v11281_v33  ;;  %v11268_v16 = vadd.f32 1.4214138, %v11252_v2 }
0x1179   :  { %18498 = vpow2.f32 %v11407_v60  ;;  %v23482_v22 = vmul.f32 0.5, %v17546_v58  ;;  %v23484_v8 = vpop.eup %18490  ;;  %v11314_v49 = vmul.f32 %v23433_v59, %v11298_v28  ;;  %v11251_v38 = vmul.f32 %v23467_v4, %v11235_v6 }
0x117a   :  { %v11222_v41 = vmul.f32 1.0614054, %v23480_v32  ;;  %18500 = vrcp.f32 %v11175_v3  ;;  %v23489_v15 = vpop.eup %18492  ;;  %v11313_v62 = vmul.f32 %v23438_v61, %v11297_v44  ;;  %v11284_v57 = vmul.f32 %v23454_v34, %v11268_v16 }
0x117b   :  { %v11221_v2 = vmul.f32 1.0614054, %v23484_v8  ;;  %v11383_v27 = vmul.f32 %v11367_v1, %v11143_v31  ;;  %v23494_v24 = vpop.eup %18494  ;;  %v11330_v33 = vadd.f32 0.2548296, %v11314_v49  ;;  %v11267_v60 = vadd.f32 1.4214138, %v11251_v38 }
0x117c   :  { %v11238_v53 = vadd.f32 -1.4531521, %v11222_v41  ;;  %v23498_v28 = vadd.f32 %v23378_v19, %v23422_v46  ;;  %v11329_v6 = vadd.f32 0.2548296, %v11313_v62  ;;  %v11300_v3 = vadd.f32 -0.28449672, %v11284_v57 }
0x117d   :  { %v11237_v20 = vadd.f32 -1.4531521, %v11221_v2  ;;  %v23502_v44 = vadd.f32 %v23431_v55, %v23378_v19  ;;  %v11346_v16 = vmul.f32 %v23433_v59, %v11330_v33  ;;  %v11283_v31 = vmul.f32 %v23467_v4, %v11267_v60 }
0x117e   :  { %v11254_v1 = vmul.f32 %v23480_v32, %v11238_v53  ;;  %v11405_v49 = vmul.f32 1.442695, %v11383_v27  ;;  %v11345_v38 = vmul.f32 %v23438_v61, %v11329_v6  ;;  %v11316_v46 = vmul.f32 %v23454_v34, %v11300_v3 }
0x117f   :  { %v11253_v41 = vmul.f32 %v23484_v8, %v11237_v20  ;;  %v23510_v62 = vmul.f32 0.70710677, %v17546_v58  ;;  %v11426_v57 = vmul.f32 %v23443_v42, %v11346_v16  ;;  %v11299_v55 = vadd.f32 -0.28449672, %v11283_v31 }
0x1180   :  { %v11270_v2 = vadd.f32 1.4214138, %v11254_v1  ;;  %18502 = vpow2.f32 %v11405_v49  ;;  %v23513_v59 = vpop.eup %18496  ;;  %v11425_v33 = vmul.f32 %v23446_v5, %v11345_v38  ;;  %v11332_v53 = vadd.f32 0.2548296, %v11316_v46 }
0x1181   :  { %v11269_v27 = vadd.f32 1.4214138, %v11253_v41  ;;  %vm11114_vm11 = vcmp.ge.f32.partialorder %v23510_v62, 0.0  ;;  %v11442_v61 = vsub.f32 1.0, %v11426_v57  ;;  %v11315_v60 = vmul.f32 %v23467_v4, %v11299_v55 }
0x1182   :  { %v11286_v20 = vmul.f32 %v23480_v32, %v11270_v2  ;;  %v11224_v58 = vmul.f32 1.0614054, %v23513_v59  ;;  %v11441_v42 = vsub.f32 1.0, %v11425_v33  ;;  %v11348_v3 = vmul.f32 %v23454_v34, %v11332_v53 }
0x1183   :  { %v23520_v6 = vpop.eup %18498  ;;  %v11285_v16 = vmul.f32 %v23484_v8, %v11269_v27  ;;  %v23525_v5 = vsel %vm11114_vm11, 1.0, %v25146_v45  ;;  %v11458_v1 = vmul.f32 %v11442_v61, %v23399_v52  ;;  %v11331_v49 = vadd.f32 0.2548296, %v11315_v60 }
0x1184   :  { %v23527_v31 = vpop.eup %18500  ;;  %v11302_v38 = vadd.f32 -0.28449672, %v11286_v20  ;;  %v11240_v46 = vadd.f32 -1.4531521, %v11224_v58  ;;  %v11457_v41 = vmul.f32 %v11441_v42, %v23403_v23  ;;  %v11428_v57 = vmul.f32 %v23462_v54, %v11348_v3 }
0x1185   :  { %v11301_v55 = vadd.f32 -0.28449672, %v11285_v16  ;;  %v11223_v2 = vmul.f32 1.0614054, %v23527_v31  ;;  %v11474_v34 = vadd.f32 1.0, %v11458_v1  ;;  %v11347_v33 = vmul.f32 %v23467_v4, %v11331_v49 }
0x1186   :  { %v11318_v53 = vmul.f32 %v23480_v32, %v11302_v38  ;;  %v11256_v27 = vmul.f32 %v23513_v59, %v11240_v46  ;;  %v11473_v17 = vadd.f32 1.0, %v11457_v41  ;;  %v11444_v43 = vsub.f32 1.0, %v11428_v57 }
0x1187   :  { %v11317_v52 = vmul.f32 %v23484_v8, %v11301_v55  ;;  %v11239_v61 = vadd.f32 -1.4531521, %v11223_v2  ;;  %v11490_v60 = vmul.f32 %v11474_v34, %v23387_v39  ;;  %v11427_v23 = vmul.f32 %v23476_v51, %v11347_v33 }
0x1188   :  { %v11334_v54 = vadd.f32 0.2548296, %v11318_v53  ;;  %v11272_v20 = vadd.f32 1.4214138, %v11256_v27  ;;  %v11489_v58 = vmul.f32 %v11473_v17, %v23389_v0  ;;  %v11460_v42 = vmul.f32 %v11444_v43, %v23411_v25 }
0x1189   :  { %v11333_v4 = vadd.f32 0.2548296, %v11317_v52  ;;  %v11255_v3 = vmul.f32 %v23527_v31, %v11239_v61  ;;  %v11525_v1 = vsel %vm11520_vm10, %v11490_v60, 0  ;;  %v11443_v49 = vsub.f32 1.0, %v11427_v23 }
0x118a   :  { %v18503_v16 = vpop.eup %18502  ;;  %v11350_v38 = vmul.f32 %v23480_v32, %v11334_v54  ;;  %v11288_v46 = vmul.f32 %v23513_v59, %v11272_v20  ;;  %v23545_v39 = vand.u32 4294901760, %v11525_v1  ;;  %v11522_v51 = vsel %vm11520_vm10, %v11489_v58, 0 }
0x118b   :  { %v11476_v41 = vadd.f32 1.0, %v11460_v42  ;;  %v11349_v17 = vmul.f32 %v23484_v8, %v11333_v4  ;;  %v23549_v0 = vand.u32 4294901760, %v11522_v51  ;;  %v11459_v43 = vmul.f32 %v11443_v49, %v23414_v26 }
0x118c   :  { %v11430_v25 = vmul.f32 %v23489_v15, %v11350_v38  ;;  %v11304_v57 = vadd.f32 -0.28449672, %v11288_v46  ;;  %v23554_v55 = vsub.f32 %v11525_v1, %v23545_v39  ;;  %v11271_v34 = vadd.f32 1.4214138, %v11255_v3 }
0x118d   :  { %v11492_v32 = vmul.f32 %v11476_v41, %v23405_v7  ;;  %v11429_v2 = vmul.f32 %v23494_v24, %v11349_v17  ;;  %v23559_v33 = vsub.f32 %v11522_v51, %v23549_v0  ;;  %v11475_v53 = vadd.f32 1.0, %v11459_v43 }
0x118e   :  { %25147 = vst [vmem:[#allocation68_spill] sm:$0xff] %v23554_v55  ;;  %v11446_v8 = vsub.f32 1.0, %v11430_v25  ;;  %v11320_v27 = vmul.f32 %v23513_v59, %v11304_v57  ;;  %v24533_v26 = vand.u32 4294901760, %v23554_v55  ;;  %v11287_v61 = vmul.f32 %v23527_v31, %v11271_v34 }
0x118f   :  { %v11531_v15 = vsel %vm11520_vm10, %v11492_v32, 0  ;;  %v11445_v52 = vsub.f32 1.0, %v11429_v2  ;;  %v11491_v7 = vmul.f32 %v11475_v53, %v23407_v30  ;;  %v11146_v42 = vand.u32 2147483647, %v23510_v62 }
0x1190   :  { %v23565_v60 = vand.u32 4294901760, %v11531_v15  ;;  %v11462_v24 = vmul.f32 %v11446_v8, %v23425_v18  ;;  %v11336_v23 = vadd.f32 0.2548296, %v11320_v27  ;;  %v23572_v54 = vsub.f32 %v23554_v55, %v24533_v26 }
0x1191   :  { %v11461_v20 = vmul.f32 %v11445_v52, %v23428_v40  ;;  %v11303_v58 = vadd.f32 -0.28449672, %v11287_v61  ;;  %v11528_v3 = vsel %vm11520_vm10, %v11491_v7, 0  ;;  %v11162_v46 = vmul.f32 0.3275911, %v11146_v42 }
0x1192   :  { %v23577_v4 = vsub.f32 %v11531_v15, %v23565_v60  ;;  %v11478_v1 = vadd.f32 1.0, %v11462_v24  ;;  %v11352_v30 = vmul.f32 %v23513_v59, %v11336_v23  ;;  %v23581_v18 = vand.u32 4294901760, %v11528_v3 }
0x1193   :  { %v11477_v49 = vadd.f32 1.0, %v11461_v20  ;;  %v11319_v38 = vmul.f32 %v23527_v31, %v11303_v58  ;;  %v11370_v41 = vsub.f32 0.0, %v11146_v42  ;;  %v23587_v62 = vmul.f32 0.5, %v23498_v28 }
0x1194   :  { %v11494_v51 = vmul.f32 %v11478_v1, %v23418_v12  ;;  %v11432_v40 = vmul.f32 %v23520_v6, %v11352_v30  ;;  %v23590_v17 = vsub.f32 %v11528_v3, %v23581_v18  ;;  %v11178_v25 = vadd.f32 1.0, %v11162_v46 }
0x1195   :  { %v11493_v43 = vmul.f32 %v11477_v49, %v23420_v10  ;;  %v11335_v59 = vadd.f32 0.2548296, %v11319_v38  ;;  %v11386_v2 = vmul.f32 %v11370_v41, %v11146_v42  ;;  %v11097_v34 = vmul.f32 0.70710677, %v23498_v28 }
0x1196   :  { %v11537_v57 = vsel %vm11520_vm10, %v11494_v51, 0  ;;  %v11448_v32 = vsub.f32 1.0, %v11432_v40  ;;  %18504 = vrcp.f32 %v11178_v25  ;;  %v11100_v58 = vmul.f32 0.70710677, %v23502_v44 }
0x1197   :  { %v23595_v12 = vand.u32 4294901760, %v11537_v57  ;;  %v11534_v6 = vsel %vm11520_vm10, %v11493_v43, 0  ;;  %v11351_v53 = vmul.f32 %v23527_v31, %v11335_v59  ;;  %v11411_v10 = vmul.f32 1.442695, %v11386_v2 }
0x1198   :  { %v23599_v8 = vand.u32 4294901760, %v11534_v6  ;;  %v11464_v27 = vmul.f32 %v11448_v32, %v23458_v13  ;;  %vm11113_vm12 = vcmp.ge.f32.partialorder %v11097_v34, 0.0  ;;  %v11145_v28 = vand.u32 2147483647, %v11097_v34 }
0x1199   :  { %25148 = vst [vmem:[#allocation85_spill] sm:$0xff] %v23595_v12  ;;  %v23603_v15 = vsub.f32 %v11537_v57, %v23595_v12  ;;  %v11431_v52 = vmul.f32 %v18503_v16, %v11351_v53  ;;  %v23606_v61 = vsel %vm11113_vm12, 1.0, %v25146_v45  ;;  %18506 = vpow2.f32 %v11411_v10 }
0x119a   :  { %25149 = vst [vmem:[#allocation73_spill] sm:$0xff] %v23599_v8  ;;  %v23609_v7 = vsub.f32 %v11534_v6, %v23599_v8  ;;  %v11480_v24 = vadd.f32 1.0, %v11464_v27  ;;  %v23612_v31 = vmul.f32 0.5, %v23502_v44  ;;  %v11161_v13 = vmul.f32 0.3275911, %v11145_v28 }
0x119b   :  { %v11447_v23 = vsub.f32 1.0, %v11431_v52  ;;  %v11369_v20 = vsub.f32 0.0, %v11145_v28  ;;  %v17549_v16 = vadd.f32 %v23378_v19, %v23436_v21  ;;  %v17550_v3 = vadd.f32 %v23450_v35, %v23378_v19 }
0x119c   :  { %v11496_v42 = vmul.f32 %v11480_v24, %v23441_v11  ;;  %v17551_v1 = vadd.f32 %v23378_v19, %v23452_v14  ;;  %v11177_v49 = vadd.f32 1.0, %v11161_v13  ;;  %vm11116_vm13 = vcmp.ge.f32.partialorder %v11100_v58, 0.0 }
0x119d   :  { %v11463_v30 = vmul.f32 %v11447_v23, %v23474_v36  ;;  %v11385_v38 = vmul.f32 %v11369_v20, %v11145_v28  ;;  %v23625_v44 = vsel %vm11116_vm13, 1.0, %v25146_v45  ;;  %v11148_v11 = vand.u32 2147483647, %v11100_v58 }
0x119e   :  { %v11543_v46 = vsel %vm11520_vm10, %v11496_v42, 0  ;;  %v23627_v51 = vmul.f32 0.5, %v17549_v16  ;;  %18508 = vrcp.f32 %v11177_v49  ;;  %v11099_v43 = vmul.f32 0.70710677, %v17549_v16 }
0x119f   :  { %v23629_v21 = vand.u32 4294901760, %v11543_v46  ;;  %v11479_v40 = vadd.f32 1.0, %v11463_v30  ;;  %v11409_v35 = vmul.f32 1.442695, %v11385_v38  ;;  %v11164_v41 = vmul.f32 0.3275911, %v11148_v11 }
0x11a0   :  { %v11372_v14 = vsub.f32 0.0, %v11148_v11  ;;  %v23631_v36 = vmul.f32 0.5, %v17550_v3  ;;  %v23633_v59 = vpop.eup %18504  ;;  %v11102_v32 = vmul.f32 0.70710677, %v17550_v3  ;;  %vm11115_vm14 = vcmp.ge.f32.partialorder %v11099_v43, 0.0 }
0x11a1   :  { %25150 = vst [vmem:[#allocation96_spill] sm:$0xff] %v23629_v21  ;;  %v23636_v25 = vsub.f32 %v11543_v46, %v23629_v21  ;;  %v11495_v57 = vmul.f32 %v11479_v40, %v23448_v47  ;;  %18510 = vpow2.f32 %v11409_v35  ;;  %v11226_v2 = vmul.f32 1.0614054, %v23633_v59 }
0x11a2   :  { %v11180_v34 = vadd.f32 1.0, %v11164_v41  ;;  %v11388_v6 = vmul.f32 %v11372_v14, %v11148_v11  ;;  %v23642_v27 = vsel %vm11115_vm14, 1.0, %v25146_v45  ;;  %v11147_v10 = vand.u32 2147483647, %v11099_v43 }
0x11a3   :  { %v11540_v53 = vsel %vm11520_vm10, %v11495_v57, 0  ;;  %vm11118_vm15 = vcmp.ge.f32.partialorder %v11102_v32, 0.0  ;;  %v23644_v52 = vpop.eup %18506  ;;  %v11242_v24 = vadd.f32 -1.4531521, %v11226_v2  ;;  %v11150_v58 = vand.u32 2147483647, %v11102_v32 }
0x11a4   :  { %v23646_v28 = vand.u32 4294901760, %v11540_v53  ;;  %18512 = vrcp.f32 %v11180_v34  ;;  %v11415_v47 = vmul.f32 1.442695, %v11388_v6  ;;  %v11163_v23 = vmul.f32 0.3275911, %v11147_v10 }
0x11a5   :  { %v11371_v13 = vsub.f32 0.0, %v11147_v10  ;;  %v23649_v20 = vsel %vm11118_vm15, 1.0, %v25146_v45  ;;  %v11258_v16 = vmul.f32 %v23633_v59, %v11242_v24  ;;  %v23655_v3 = vmul.f32 0.5, %v17551_v1 }
0x11a6   :  { %25151 = vst [vmem:[#allocation81_spill] sm:$0xff] %v23646_v28  ;;  %v23652_v42 = vsub.f32 %v11540_v53, %v23646_v28  ;;  %18514 = vpow2.f32 %v11415_v47  ;;  %v11179_v30 = vadd.f32 1.0, %v11163_v23  ;;  %v11166_v38 = vmul.f32 0.3275911, %v11150_v58 }
0x11a7   :  { %v11387_v49 = vmul.f32 %v11371_v13, %v11147_v10  ;;  %v11374_v46 = vsub.f32 0.0, %v11150_v58  ;;  %v11274_v11 = vadd.f32 1.4214138, %v11258_v16  ;;  %v11101_v40 = vmul.f32 0.70710677, %v17551_v1 }
0x11a8   :  { %v17552_v35 = vadd.f32 %v23465_v29, %v23378_v19  ;;  %v17553_v41 = vadd.f32 %v23378_v19, %v23469_v63  ;;  %v23661_v14 = vpop.eup %18508  ;;  %18516 = vrcp.f32 %v11179_v30  ;;  %v11182_v57 = vadd.f32 1.0, %v11166_v38 }
0x11a9   :  { %v11413_v43 = vmul.f32 1.442695, %v11387_v49  ;;  %v11390_v32 = vmul.f32 %v11374_v46, %v11150_v58  ;;  %v11290_v2 = vmul.f32 %v23633_v59, %v11274_v11  ;;  %v11225_v34 = vmul.f32 1.0614054, %v23661_v14 }
0x11aa   :  { %vm11117_vm1 = vcmp.ge.f32.partialorder %v11101_v40, 0.0  ;;  %v11149_v6 = vand.u32 2147483647, %v11101_v40  ;;  %v23670_v19 = vmul.f32 0.5, %v17552_v35  ;;  %v11104_v23 = vmul.f32 0.70710677, %v17552_v35 }
0x11ab   :  { %v23665_v53 = vpop.eup %18510  ;;  %18518 = vpow2.f32 %v11413_v43  ;;  %v11419_v1 = vmul.f32 1.442695, %v11390_v32  ;;  %v23668_v29 = vsel %vm11117_vm1, 1.0, %v25146_v45  ;;  %v11306_v63 = vadd.f32 -0.28449672, %v11290_v2 }
0x11ac   :  { %v11241_v10 = vadd.f32 -1.4531521, %v11225_v34  ;;  %18520 = vrcp.f32 %v11182_v57  ;;  %v11165_v24 = vmul.f32 0.3275911, %v11149_v6  ;;  %v11373_v47 = vsub.f32 0.0, %v11149_v6 }
0x11ad   :  { %18522 = vpow2.f32 %v11419_v1  ;;  %v23672_v13 = vmul.f32 0.5, %v17553_v41  ;;  %v11322_v16 = vmul.f32 %v23633_v59, %v11306_v63  ;;  %v11103_v38 = vmul.f32 0.70710677, %v17553_v41 }
0x11ae   :  { %v23674_v58 = vpop.eup %18512  ;;  %v11257_v30 = vmul.f32 %v23661_v14, %v11241_v10  ;;  %v11181_v49 = vadd.f32 1.0, %v11165_v24  ;;  %v11389_v11 = vmul.f32 %v11373_v47, %v11149_v6  ;;  %vm11120_vm2 = vcmp.ge.f32.partialorder %v11104_v23, 0.0 }
0x11af   :  { %v11228_v46 = vmul.f32 1.0614054, %v23674_v58  ;;  %v11152_v40 = vand.u32 2147483647, %v11104_v23  ;;  %v11338_v57 = vadd.f32 0.2548296, %v11322_v16 }
0x11b0   :  { %v23679_v43 = vpop.eup %18514  ;;  %v11273_v32 = vadd.f32 1.4214138, %v11257_v30  ;;  %18524 = vrcp.f32 %v11181_v49  ;;  %v23682_v35 = vsel %vm11120_vm2, 1.0, %v25146_v45  ;;  %v11417_v34 = vmul.f32 1.442695, %v11389_v11 }
0x11b1   :  { %v11244_v2 = vadd.f32 -1.4531521, %v11228_v46  ;;  %v11168_v1 = vmul.f32 0.3275911, %v11152_v40  ;;  %v25152_v63 = vand.u32 4294901760, %v23383_v37  ;;  %v11354_v6 = vmul.f32 %v23633_v59, %v11338_v57 }
0x11b2   :  { %v11289_v10 = vmul.f32 %v23661_v14, %v11273_v32  ;;  %v11376_v24 = vsub.f32 0.0, %v11152_v40  ;;  %vm11119_vm3 = vcmp.ge.f32.partialorder %v11103_v38, 0.0  ;;  %v23691_v47 = vpop.eup %18516  ;;  %18526 = vpow2.f32 %v11417_v34 }
0x11b3   :  { %v23687_v41 = vsub.f32 %v23383_v37, %v25152_v63  ;;  %v11260_v23 = vmul.f32 %v23674_v58, %v11244_v2  ;;  %v11184_v16 = vadd.f32 1.0, %v11168_v1  ;;  %v23695_v30 = vsel %vm11119_vm3, 1.0, %v25146_v45 }
0x11b4   :  { %v11434_v49 = vmul.f32 %v23644_v52, %v11354_v6  ;;  %v11305_v46 = vadd.f32 -0.28449672, %v11289_v10  ;;  %v11227_v11 = vmul.f32 1.0614054, %v23691_v47  ;;  %v11392_v63 = vmul.f32 %v11376_v24, %v11152_v40 }
0x11b5   :  { %v23699_v59 = vpop.eup %18518  ;;  %v11276_v57 = vadd.f32 1.4214138, %v11260_v23  ;;  %18528 = vrcp.f32 %v11184_v16  ;;  %v11151_v32 = vand.u32 2147483647, %v11103_v38  ;;  %v25153_v12 = vand.u32 4294901760, %v23559_v33 }
0x11b6   :  { %v23702_v55 = vpop.eup %18520  ;;  %v11450_v2 = vsub.f32 1.0, %v11434_v49  ;;  %v11321_v34 = vmul.f32 %v23661_v14, %v11305_v46  ;;  %v11243_v45 = vadd.f32 -1.4531521, %v11227_v11  ;;  %v11423_v1 = vmul.f32 1.442695, %v11392_v63 }
0x11b7   :  { %v23705_v21 = vpop.eup %18522  ;;  %v11292_v52 = vmul.f32 %v23674_v58, %v11276_v57  ;;  %v11230_v40 = vmul.f32 1.0614054, %v23702_v55  ;;  %v11167_v6 = vmul.f32 0.3275911, %v11151_v32  ;;  %v11375_v10 = vsub.f32 0.0, %v11151_v32 }
0x11b8   :  { %v11466_v24 = vmul.f32 %v11450_v2, %v23525_v5  ;;  %v11337_v38 = vadd.f32 0.2548296, %v11321_v34  ;;  %v11259_v23 = vmul.f32 %v23691_v47, %v11243_v45  ;;  %18530 = vpow2.f32 %v11423_v1 }
0x11b9   :  { %v11308_v16 = vadd.f32 -0.28449672, %v11292_v52  ;;  %v11246_v49 = vadd.f32 -1.4531521, %v11230_v40  ;;  %v11183_v26 = vadd.f32 1.0, %v11167_v6  ;;  %v11391_v46 = vmul.f32 %v11375_v10, %v11151_v32 }
0x11ba   :  { %v23711_v11 = vpop.eup %18524  ;;  %v11482_v63 = vadd.f32 1.0, %v11466_v24  ;;  %v11353_v28 = vmul.f32 %v23661_v14, %v11337_v38  ;;  %v11275_v57 = vadd.f32 1.4214138, %v11259_v23  ;;  %v11645_v8 = vsub.f32 %v23559_v33, %v25153_v12 }
0x11bb   :  { %v11324_v5 = vmul.f32 %v23674_v58, %v11308_v16  ;;  %v11262_v2 = vmul.f32 %v23702_v55, %v11246_v49  ;;  %v11229_v34 = vmul.f32 1.0614054, %v23711_v11  ;;  %18532 = vrcp.f32 %v11183_v26 }
0x11bc   :  { %v11498_v45 = vmul.f32 %v11482_v63, %v23482_v22  ;;  %v11433_v32 = vmul.f32 %v23665_v53, %v11353_v28  ;;  %v11291_v1 = vmul.f32 %v23691_v47, %v11275_v57  ;;  %v11421_v52 = vmul.f32 1.442695, %v11391_v46  ;;  %v23723_v14 = vpop.eup %18526 }
0x11bd   :  { %v11340_v40 = vadd.f32 0.2548296, %v11324_v5  ;;  %v11278_v6 = vadd.f32 1.4214138, %v11262_v2  ;;  %v11245_v10 = vadd.f32 -1.4531521, %v11229_v34 }
0x11be   :  { %v25154_v12 = vand.u32 4294901760, %v23316_v56  ;;  %v11549_v38 = vsel %vm11520_vm10, %v11498_v45, 0  ;;  %v11449_v26 = vsub.f32 1.0, %v11433_v32  ;;  %v11307_v23 = vadd.f32 -0.28449672, %v11291_v1 }
0x11bf   :  { %18534 = vpow2.f32 %v11421_v52  ;;  %v23731_v22 = vpop.eup %18528  ;;  %v23733_v28 = vand.u32 4294901760, %v11549_v38  ;;  %v11356_v53 = vmul.f32 %v23674_v58, %v11340_v40  ;;  %v11294_v16 = vmul.f32 %v23702_v55, %v11278_v6 }
0x11c0   :  { %v23728_v24 = vsub.f32 %v23316_v56, %v25154_v12  ;;  %v11261_v49 = vmul.f32 %v23711_v11, %v11245_v10  ;;  %v11465_v46 = vmul.f32 %v11449_v26, %v23606_v61  ;;  %v11323_v56 = vmul.f32 %v23691_v47, %v11307_v23 }
0x11c1   :  { %v11232_v63 = vmul.f32 1.0614054, %v23731_v22  ;;  %v11646_v57 = vand.u32 4294901760, %v11645_v8  ;;  %v23742_v5 = vsub.f32 %v11549_v38, %v23733_v28  ;;  %v11436_v2 = vmul.f32 %v23679_v43, %v11356_v53 }
0x11c2   :  { %v11310_v34 = vadd.f32 -0.28449672, %v11294_v16  ;;  %v11277_v45 = vadd.f32 1.4214138, %v11261_v49  ;;  %v23745_v32 = vpop.eup %18530  ;;  %v11481_v58 = vadd.f32 1.0, %v11465_v46  ;;  %v11656_v61 = vand.u32 4294901760, %v23572_v54 }
0x11c3   :  { %v11339_v1 = vadd.f32 0.2548296, %v11323_v56  ;;  %v11248_v52 = vadd.f32 -1.4531521, %v11232_v63  ;;  %16242 = vmatprep.mubr.f32.mxu0 %v11646_v57  ;;  %v11452_v40 = vsub.f32 1.0, %v11436_v2  ;;  %v11814_v10 = vand.u32 4294901760, %v23687_v41 }
0x11c4   :  { %v11326_v6 = vmul.f32 %v23702_v55, %v11310_v34  ;;  %v11293_v8 = vmul.f32 %v23711_v11, %v11277_v45  ;;  %v11497_v12 = vmul.f32 %v11481_v58, %v23587_v62  ;;  %16243 = vmatmul.mubr.f32.vlgmr.msra.gmra.mrb[64].mxu0 %v11656_v61  ;;  %v11664_v26 = vand.u32 4294901760, %v23590_v17 }
0x11c5   :  { %v11355_v43 = vmul.f32 %v23691_v47, %v11339_v1  ;;  %v11264_v38 = vmul.f32 %v23731_v22, %v11248_v52  ;;  %v23755_v23 = vpop.eup %18532  ;;  %v11468_v54 = vmul.f32 %v11452_v40, %v23625_v44  ;;  %v25155_v49 = vand.u32 4294901760, %v23396_v9 }
0x11c6   :  { %v11342_v53 = vadd.f32 0.2548296, %v11326_v6  ;;  %v11309_v16 = vadd.f32 -0.28449672, %v11293_v8  ;;  %v11546_v41 = vsel %vm11520_vm10, %v11497_v12, 0 }
0x11c7   :  { %v17394_v46 = vpack.c.bf16 %v11814_v10, %v25155_v49  ;;  %v11435_v62 = vmul.f32 %v23699_v59, %v11355_v43  ;;  %v11280_v56 = vadd.f32 1.4214138, %v11264_v38  ;;  %v11231_v47 = vmul.f32 1.0614054, %v23755_v23 }
0x11c8   :  { %v23763_v63 = vand.u32 4294901760, %v11546_v41  ;;  %v11484_v57 = vadd.f32 1.0, %v11468_v54  ;;  %v11358_v2 = vmul.f32 %v23702_v55, %v11342_v53  ;;  %v11325_v34 = vmul.f32 %v23711_v11, %v11309_v16 }
0x11c9   :  { %17395 = vmatprep.subr.bf16.mxu0 %v17394_v46  ;;  %v23767_v44 = vpop.eup %18534  ;;  %v11451_v45 = vsub.f32 1.0, %v11435_v62  ;;  %v11296_v9 = vmul.f32 %v23731_v22, %v11280_v56  ;;  %v11247_v58 = vadd.f32 -1.4531521, %v11231_v47  ;;  %v11665_v59 = vsub.f32 %v23590_v17, %v11664_v26 }
0x11ca   :  { %17397 = vmatpush3.bf16.msra.mxu0 %v17394_v46  ;;  %v23774_v1 = vsub.f32 %v11546_v41, %v23763_v63  ;;  %v11500_v52 = vmul.f32 %v11484_v57, %v23612_v31  ;;  %v11438_v55 = vmul.f32 %v23705_v21, %v11358_v2  ;;  %v11341_v61 = vadd.f32 0.2548296, %v11325_v34 }
0x11cb   :  { %v11467_v40 = vmul.f32 %v11451_v45, %v23642_v27  ;;  %v11312_v6 = vadd.f32 -0.28449672, %v11296_v9  ;;  %v11263_v8 = vmul.f32 %v23755_v23, %v11247_v58  ;;  %v11666_v10 = vand.u32 4294901760, %v11665_v59 }
0x11cc   :  { %v11555_v12 = vsel %vm11520_vm10, %v11500_v52, 0  ;;  %v11454_v43 = vsub.f32 1.0, %v11438_v55  ;;  %v11357_v38 = vmul.f32 %v23711_v11, %v11341_v61  ;;  %v11674_v54 = vand.u32 4294901760, %v23577_v4 }
0x11cd   :  { %v23783_v53 = vand.u32 4294901760, %v11555_v12  ;;  %v11483_v16 = vadd.f32 1.0, %v11467_v40  ;;  %v11328_v31 = vmul.f32 %v23731_v22, %v11312_v6  ;;  %v11279_v21 = vadd.f32 1.4214138, %v11263_v8  ;;  %16245 = vmatprep.mubr.f32.mxu0 %v11666_v10 }
0x11ce   :  { %v11470_v27 = vmul.f32 %v11454_v43, %v23649_v20  ;;  %v11437_v49 = vmul.f32 %v23723_v14, %v11357_v38  ;;  %v11675_v46 = vsub.f32 %v23577_v4, %v11674_v54  ;;  %v11684_v41 = vand.u32 4294901760, %v23609_v7 }
0x11cf   :  { %v23793_v11 = vsub.f32 %v11555_v12, %v23783_v53  ;;  %v11499_v62 = vmul.f32 %v11483_v16, %v23627_v51  ;;  %v11344_v56 = vadd.f32 0.2548296, %v11328_v31  ;;  %v11295_v47 = vmul.f32 %v23755_v23, %v11279_v21 }
0x11d0   :  { %v11486_v57 = vadd.f32 1.0, %v11470_v27  ;;  %v11453_v2 = vsub.f32 1.0, %v11437_v49  ;;  %v11676_v34 = vand.u32 4294901760, %v11675_v46  ;;  %v11685_v20 = vsub.f32 %v23609_v7, %v11684_v41 }
0x11d1   :  { %v11552_v14 = vsel %vm11520_vm10, %v11499_v62, 0  ;;  %v11360_v45 = vmul.f32 %v23731_v22, %v11344_v56  ;;  %v11311_v9 = vadd.f32 -0.28449672, %v11295_v47  ;;  %v11694_v58 = vand.u32 4294901760, %v23603_v15 }
0x11d2   :  { %v23803_v59 = vand.u32 4294901760, %v11552_v14  ;;  %v11502_v51 = vmul.f32 %v11486_v57, %v23631_v36  ;;  %v11469_v52 = vmul.f32 %v11453_v2, %v23668_v29  ;;  %16246 = vmatmul.mubr.f32.gmra.mrb[66].mxu0 %v11676_v34  ;;  %v11686_v55 = vand.u32 4294901760, %v11685_v20  ;;  %v18568_v29 = vld [vmem:[%s24160_s11 + $0x18] sm:$0xff] }
0x11d3   :  { %v11440_v61 = vmul.f32 %v23745_v32, %v11360_v45  ;;  %v11327_v40 = vmul.f32 %v23755_v23, %v11311_v9  ;;  %v11695_v6 = vsub.f32 %v23603_v15, %v11694_v58  ;;  %v11819_v22 = vand.u32 4294901760, %v23728_v24 }
0x11d4   :  { %v23814_v8 = vsub.f32 %v11552_v14, %v23803_v59  ;;  %v11561_v10 = vsel %vm11520_vm10, %v11502_v51, 0  ;;  %v11485_v36 = vadd.f32 1.0, %v11469_v52  ;;  %16248 = vmatprep.mubr.f32.mxu0 %v11686_v55  ;;  %v25156_v32 = vand.u32 4294901760, %v23321_v50 }
0x11d5   :  { %v23824_v43 = vand.u32 4294901760, %v11561_v10  ;;  %v11456_v38 = vsub.f32 1.0, %v11440_v61  ;;  %v11343_v16 = vadd.f32 0.2548296, %v11327_v40  ;;  %v11696_v31 = vand.u32 4294901760, %v11695_v6 }
0x11d6   :  { %v23822_v12 = vsub.f32 %v18568_v29, %v25156_v32  ;;  %v11501_v21 = vmul.f32 %v11485_v36, %v23655_v3  ;;  %v11820_v27 = vsub.f32 %v23728_v24, %v11819_v22  ;;  %v11704_v46 = vand.u32 4294901760, %v23652_v42  ;;  %v18569_v29 = vld [vmem:[%s24160_s11 + $0x20] sm:$0xff] }
0x11d7   :  { %v23833_v62 = vsub.f32 %v11561_v10, %v23824_v43  ;;  %v11472_v50 = vmul.f32 %v11456_v38, %v23682_v35  ;;  %v11359_v56 = vmul.f32 %v23755_v23, %v11343_v16  ;;  %16249 = vmatmul.mubr.f32.gmra.mrb[68].mxu0 %v11696_v31  ;;  %v11714_v47 = vand.u32 4294901760, %v23636_v25  ;;  %v18570_v31 = vld [vmem:[%s24160_s11 + $0x28] sm:$0xff] }
0x11d8   :  { %v11826_v49 = vand.u32 4294901760, %v23822_v12  ;;  %v11558_v3 = vsel %vm11520_vm10, %v11501_v21, 0  ;;  %v11821_v57 = vand.u32 4294901760, %v11820_v27  ;;  %v11705_v34 = vsub.f32 %v23652_v42, %v11704_v46  ;;  %v25158_v21 = vld [vmem:[#allocation62_spill] sm:$0xff] }
0x11d9   :  { %v23845_v20 = vand.u32 4294901760, %v11558_v3  ;;  %v11488_v14 = vadd.f32 1.0, %v11472_v50  ;;  %v11439_v35 = vmul.f32 %v23767_v44, %v11359_v56  ;;  %v11715_v23 = vsub.f32 %v23636_v25, %v11714_v47 }
0x11da   :  { %v11827_v2 = vsub.f32 %v23822_v12, %v11826_v49  ;;  %v11706_v9 = vand.u32 4294901760, %v11705_v34  ;;  %v11724_v51 = vand.u32 4294901760, %v23774_v1  ;;  %v11734_v52 = vand.u32 4294901760, %v23742_v5 }
0x11db   :  { %v23854_v55 = vsub.f32 %v11558_v3, %v23845_v20  ;;  %v11504_v61 = vmul.f32 %v11488_v14, %v23670_v19  ;;  %v11455_v40 = vsub.f32 1.0, %v11439_v35  ;;  %v11716_v6 = vand.u32 4294901760, %v11715_v23 }
0x11dc   :  { %v11828_v45 = vand.u32 4294901760, %v11827_v2  ;;  %16251 = vmatprep.mubr.f32.mxu0 %v11706_v9  ;;  %v11725_v44 = vsub.f32 %v23774_v1, %v11724_v51  ;;  %v11735_v36 = vsub.f32 %v23742_v5, %v11734_v52  ;;  %v25157_v32 = vand.u32 4294901760, %v23336_v48 }
0x11dd   :  { %v11567_v19 = vsel %vm11520_vm10, %v11504_v61, 0  ;;  %v11471_v16 = vmul.f32 %v11455_v40, %v23695_v30  ;;  %16252 = vmatmul.mubr.f32.gmra.mrb[70].mxu0 %v11716_v6  ;;  %v25159_v27 = vand.u32 4294901760, %v25158_v21  ;;  %v24547_v56 = vand.u32 4294901760, %v23814_v8 }
0x11de   :  { %v17398_v10 = vpack.c.bf16 %v11828_v45, %v11821_v57  ;;  %v23868_v38 = vsub.f32 %v18569_v29, %v25157_v32  ;;  %v23880_v3 = vand.u32 4294901760, %v11567_v19  ;;  %v11726_v48 = vand.u32 4294901760, %v11725_v44 }
0x11df   :  { %v23877_v50 = vsub.f32 %v18570_v31, %v25159_v27  ;;  %v11736_v57 = vand.u32 4294901760, %v11735_v36  ;;  %v11487_v34 = vadd.f32 1.0, %v11471_v16  ;;  %v11745_v14 = vsub.f32 %v23814_v8, %v24547_v56 }
0x11e0   :  { %17399 = vmatprep.subr.bf16.mxu0 %v17398_v10  ;;  %v11833_v2 = vand.u32 4294901760, %v23868_v38  ;;  %v24546_v35 = vand.u32 4294901760, %v23793_v11  ;;  %v23889_v23 = vsub.f32 %v11567_v19, %v23880_v3  ;;  %16254 = vmatprep.mubr.f32.mxu0 %v11726_v48  ;;  %v24545_v9 = vand.u32 4294901760, %v23854_v55  ;;  %v25160_v19 = vld [vmem:[#allocation72_spill] sm:$0xff] }
0x11e1   :  { %17401 = vmatpush3.bf16.msra.mxu0 %v17398_v10  ;;  %v11840_v30 = vand.u32 4294901760, %v23877_v50  ;;  %v24544_v61 = vand.u32 4294901760, %v23833_v62  ;;  %v11503_v40 = vmul.f32 %v11487_v34, %v23672_v13  ;;  %v11746_v10 = vand.u32 4294901760, %v11745_v14  ;;  %v18571_v13 = vld [vmem:[%s24160_s11 + $0x30] sm:$0xff]  ;;  %v25162_v34 = vld [vmem:[#allocation63_spill] sm:$0xff] }
0x11e2   :  { %v11834_v45 = vsub.f32 %v23868_v38, %v11833_v2  ;;  %16255 = vmatmul.mubr.f32.gmra.mrb[72].mxu0 %v11736_v57  ;;  %v11755_v44 = vsub.f32 %v23793_v11, %v24546_v35  ;;  %v11765_v29 = vsub.f32 %v23854_v55, %v24545_v9  ;;  %v25161_v16 = vand.u32 4294901760, %v25160_v19  ;;  %v18572_v57 = vld [vmem:[%s24160_s11 + $0x38] sm:$0xff] }
0x11e3   :  { %v11841_v6 = vsub.f32 %v23877_v50, %v11840_v30  ;;  %v11775_v32 = vsub.f32 %v23833_v62, %v24544_v61  ;;  %v11564_v21 = vsel %vm11520_vm10, %v11503_v40, 0  ;;  %16257 = vmatprep.mubr.f32.mxu0 %v11746_v10  ;;  %v25163_v14 = vand.u32 4294901760, %v25162_v34  ;;  %v25164_v40 = vld [vmem:[#allocation65_spill] sm:$0xff] }
0x11e4   :  { %v11835_v36 = vand.u32 4294901760, %v11834_v45  ;;  %v11846_v31 = vsub.f32 %v18571_v13, %v25161_v16  ;;  %v11756_v48 = vand.u32 4294901760, %v11755_v44  ;;  %v23916_v61 = vand.u32 4294901760, %v11564_v21 }
0x11e5   :  { %v11842_v27 = vand.u32 4294901760, %v11841_v6  ;;  %v11853_v45 = vsub.f32 %v18572_v57, %v25163_v14  ;;  %v11766_v9 = vand.u32 4294901760, %v11765_v29  ;;  %v11794_v13 = vand.u32 4294901760, %v23889_v23 }
0x11e6   :  { %v11847_v35 = vand.u32 4294901760, %v11846_v31  ;;  %16258 = vmatmul.mubr.f32.gmra.mrb[74].mxu0 %v11756_v48  ;;  %v17410_v6 = vpack.c.bf16 %v23383_v37, %v25164_v40  ;;  %v23922_v10 = vsub.f32 %v11564_v21, %v23916_v61  ;;  %v11776_v16 = vand.u32 4294901760, %v11775_v32 }
0x11e7   :  { %v17402_v56 = vpack.c.bf16 %v11842_v27, %v11835_v36  ;;  %v11854_v19 = vand.u32 4294901760, %v11853_v45  ;;  %16260 = vmatprep.mubr.f32.mxu0 %v11766_v9  ;;  %v23929_v36 = vpack.c.bf16 %v11826_v49, %v11819_v22  ;;  %v23931_v27 = vpack.c.bf16 %v11840_v30, %v11833_v2  ;;  %v25165_v2 = vld [vmem:[#allocation73_spill] sm:$0xff] }
0x11e8   :  { %v11848_v44 = vsub.f32 %v11846_v31, %v11847_v35  ;;  %v11784_v29 = vand.u32 4294901760, %v23922_v10  ;;  %v11795_v9 = vsub.f32 %v23889_v23, %v11794_v13  ;;  %v17414_v22 = vpack.c.bf16 %v23822_v12, %v23728_v24  ;;  %v25168_v24 = vld [vmem:[#allocation96_spill] sm:$0xff]  ;;  %v25169_v12 = vld [vmem:[#allocation46_spill] sm:$0xff] }
0x11e9   :  { %17403 = vmatprep.subr.bf16.mxu0 %v17402_v56  ;;  %v11855_v57 = vsub.f32 %v11853_v45, %v11854_v19  ;;  %v23936_v32 = vpack.c.bf16 %v11854_v19, %v11847_v35  ;;  %v17418_v49 = vpack.c.bf16 %v23877_v50, %v23868_v38  ;;  %v17422_v30 = vpack.c.bf16 %v11853_v45, %v11846_v31  ;;  %v25166_v35 = vld [vmem:[#allocation85_spill] sm:$0xff]  ;;  %v25170_v38 = vld [vmem:[#allocation68_spill] sm:$0xff] }
0x11ea   :  { %17405 = vmatpush3.bf16.msra.mxu0 %v17402_v56  ;;  %v11849_v34 = vand.u32 4294901760, %v11848_v44  ;;  %v11785_v56 = vsub.f32 %v23922_v10, %v11784_v29  ;;  %v11796_v44 = vand.u32 4294901760, %v11795_v9  ;;  %v25167_v19 = vld [vmem:[#allocation81_spill] sm:$0xff]  ;;  %v25171_v50 = vld [vmem:[#allocation64_spill] sm:$0xff] }
0x11eb   :  { %16261 = vmatmul.mubr.f32.gmra.mrb[76].mxu0 %v11776_v16  ;;  %v11856_v21 = vand.u32 4294901760, %v11855_v57  ;;  %v25172_v31 = vld [vmem:[#allocation53_spill] sm:$0xff]  ;;  %v25175_v16 = vand.u32 4294901760, %v23383_v37  ;;  %v25176_v37 = vand.u32 4294901760, %v23559_v33  ;;  %v25190_v9 = vld [vmem:[#allocation8_spill] sm:$0xff] }
0x11ec   :  { %v11786_v14 = vand.u32 4294901760, %v11785_v56  ;;  %v25173_v45 = vld [vmem:[#allocation77_spill] sm:$0xff]  ;;  %v25191_v56 = vld [vmem:[#allocation4_spill] sm:$0xff] }
0x11ed   :  { %v17406_v48 = vpack.c.bf16 %v11856_v21, %v11849_v34 }
0x11ee   :  { %16263 = vmatprep.mubr.f32.mxu0 %v11786_v14 }
0x11ef   :  { %17407 = vmatprep.subr.bf16.mxu0 %v17406_v48  ;;  %16264 = vmatmul.mubr.f32.gmra.mrb[78].mxu0 %v11796_v44 }
0x11f0   :  { %17409 = vmatpush3.bf16.msra.mxu0 %v17406_v48  ;;  %16282 = vmatprep.mubr.f32.mxu0 %v23549_v0 }
0x11f1   :  { %17411 = vmatprep.subr.bf16.mxu0 %v17410_v6 }
0x11f3   :  { %16283 = vmatmul.mubr.f32.vlgmr.msra.gmra.mrb[64].mxu0 %v23545_v39 }
0x11f4   :  { %16285 = vmatprep.mubr.f32.mxu0 %v23581_v18  ;;  %17413 = vmatpush3.bf16.msra.mxu0 %v17410_v6  ;;  %v25174_v6 = vand.u32 4294901760, %v25164_v40  ;;  %v25177_v40 = vand.u32 4294901760, %v25170_v38 }
0x11f5   :  { %17415 = vmatprep.subr.bf16.mxu0 %v17414_v22 }
0x11f6   :  { %v17442_v57 = vpack.c.bf16 %v25175_v16, %v25174_v6  ;;  %v25195_v6 = vld [vmem:[#allocation60_spill] sm:$0xff] }
0x11f7   :  { %16286 = vmatmul.mubr.f32.gmra.mrb[66].mxu0 %v23565_v60 }
0x11f8   :  { %16288 = vmatprep.mubr.f32.mxu0 %v25165_v2  ;;  %17417 = vmatpush3.bf16.msra.mxu0 %v17414_v22 }
0x11f9   :  { %17419 = vmatprep.subr.bf16.mxu0 %v17418_v49 }
0x11fb   :  { %16289 = vmatmul.mubr.f32.gmra.mrb[68].mxu0 %v25166_v35 }
0x11fc   :  { %16291 = vmatprep.mubr.f32.mxu0 %v25167_v19  ;;  %17421 = vmatpush3.bf16.msra.mxu0 %v17418_v49 }
0x11fd   :  { %17423 = vmatprep.subr.bf16.mxu0 %v17422_v30 }
0x11ff   :  { %16292 = vmatmul.mubr.f32.gmra.mrb[70].mxu0 %v25168_v24 }
0x1200   :  { %16294 = vmatprep.mubr.f32.mxu0 %v23763_v63  ;;  %17425 = vmatpush3.bf16.msra.mxu0 %v17422_v30 }
0x1201   :  { %17427 = vmatprep.subr.bf16.mxu0 %v25169_v12 }
0x1203   :  { %16295 = vmatmul.mubr.f32.gmra.mrb[72].mxu0 %v23733_v28 }
0x1204   :  { %16297 = vmatprep.mubr.f32.mxu0 %v23803_v59 }
0x1207   :  { %16298 = vmatmul.mubr.f32.gmra.mrb[74].mxu0 %v23783_v53 }
0x1208   :  { %16300 = vmatprep.mubr.f32.mxu0 %v23845_v20 }
0x120b   :  { %16301 = vmatmul.mubr.f32.gmra.mrb[76].mxu0 %v23824_v43 }
0x120c   :  { %16303 = vmatprep.mubr.f32.mxu0 %v23916_v61 }
0x120f   :  { %16304 = vmatmul.mubr.f32.gmra.mrb[78].mxu0 %v23880_v3 }
0x1210   :  { %16322 = vmatprep.mubr.f32.mxu0 %v23559_v33  ;;  %v25178_v33 = vand.u32 4294901760, %v23814_v8 }
0x1213   :  { %16323 = vmatmul.mubr.f32.vlgmr.msra.gmra.mrb[64].mxu0 %v25170_v38 }
0x1214   :  { %16325 = vmatprep.mubr.f32.mxu0 %v23590_v17  ;;  %17429 = vmatpush3.bf16.msra.mxu0 %v25169_v12  ;;  %v25180_v17 = vand.u32 4294901760, %v23854_v55 }
0x1215   :  { %17431 = vmatprep.subr.bf16.mxu0 %v25171_v50 }
0x1217   :  { %16326 = vmatmul.mubr.f32.gmra.mrb[66].mxu0 %v23577_v4  ;;  %v25179_v4 = vand.u32 4294901760, %v23793_v11 }
0x1218   :  { %16328 = vmatprep.mubr.f32.mxu0 %v23609_v7  ;;  %17433 = vmatpush3.bf16.msra.mxu0 %v25171_v50 }
0x1219   :  { %17435 = vmatprep.subr.bf16.mxu0 %v25172_v31 }
0x121b   :  { %16329 = vmatmul.mubr.f32.gmra.mrb[68].mxu0 %v23603_v15  ;;  %v25181_v15 = vand.u32 4294901760, %v23833_v62 }
0x121c   :  { %16331 = vmatprep.mubr.f32.mxu0 %v23652_v42  ;;  %17437 = vmatpush3.bf16.msra.mxu0 %v25172_v31 }
0x121d   :  { %17439 = vmatprep.subr.bf16.mxu0 %v25173_v45 }
0x121f   :  { %16332 = vmatmul.mubr.f32.gmra.mrb[70].mxu0 %v23636_v25  ;;  %v25182_v25 = vld [vmem:[#allocation16_spill] sm:$0xff] }
0x1220   :  { %16334 = vmatprep.mubr.f32.mxu0 %v23774_v1  ;;  %17441 = vmatpush3.bf16.msra.mxu0 %v25173_v45 }
0x1221   :  { %17443 = vmatprep.subr.bf16.mxu0 %v17442_v57 }
0x1223   :  { %16335 = vmatmul.mubr.f32.gmra.mrb[72].mxu0 %v23742_v5 }
0x1224   :  { %16337 = vmatprep.mubr.f32.mxu0 %v23814_v8 }
0x1227   :  { %16338 = vmatmul.mubr.f32.gmra.mrb[74].mxu0 %v23793_v11  ;;  %v25185_v11 = vld [vmem:[#allocation20_spill] sm:$0xff] }
0x1228   :  { %16340 = vmatprep.mubr.f32.mxu0 %v23854_v55 }
0x122b   :  { %16341 = vmatmul.mubr.f32.gmra.mrb[76].mxu0 %v23833_v62  ;;  %v25186_v62 = vld [vmem:[#allocation29_spill] sm:$0xff] }
0x122c   :  { %16343 = vmatprep.mubr.f32.mxu0 %v23922_v10  ;;  %v25189_v10 = vld [vmem:[#allocation42_spill] sm:$0xff] }
0x122f   :  { %16344 = vmatmul.mubr.f32.gmra.mrb[78].mxu0 %v23889_v23 }
0x1230   :  { %16362 = vmatprep.mubr.f32.mxu0 %v25176_v37 }
0x1233   :  { %16363 = vmatmul.mubr.f32.vlgmr.msra.gmra.mrb[64].mxu0 %v25177_v40 }
0x1234   :  { %16365 = vmatprep.mubr.f32.mxu0 %v11664_v26  ;;  %17445 = vmatpush3.bf16.msra.mxu0 %v17442_v57 }
0x1235   :  { %17447 = vmatprep.subr.bf16.mxu0 %v23929_v36 }
0x1237   :  { %16366 = vmatmul.mubr.f32.gmra.mrb[66].mxu0 %v11674_v54 }
0x1238   :  { %16368 = vmatprep.mubr.f32.mxu0 %v11684_v41  ;;  %17449 = vmatpush3.bf16.msra.mxu0 %v23929_v36 }
0x1239   :  { %17451 = vmatprep.subr.bf16.mxu0 %v23931_v27 }
0x123b   :  { %16369 = vmatmul.mubr.f32.gmra.mrb[68].mxu0 %v11694_v58 }
0x123c   :  { %16371 = vmatprep.mubr.f32.mxu0 %v11704_v46  ;;  %17453 = vmatpush3.bf16.msra.mxu0 %v23931_v27 }
0x123d   :  { %17455 = vmatprep.subr.bf16.mxu0 %v23936_v32 }
0x123f   :  { %16372 = vmatmul.mubr.f32.gmra.mrb[70].mxu0 %v11714_v47 }
0x1240   :  { %16374 = vmatprep.mubr.f32.mxu0 %v11724_v51  ;;  %17457 = vmatpush3.bf16.msra.mxu0 %v23936_v32 }
0x1241   :  { %17459 = vmatprep.subr.bf16.mxu0 %v25169_v12 }
0x1243   :  { %16375 = vmatmul.mubr.f32.gmra.mrb[72].mxu0 %v11734_v52 }
0x1244   :  { %16377 = vmatprep.mubr.f32.mxu0 %v25178_v33 }
0x1247   :  { %16378 = vmatmul.mubr.f32.gmra.mrb[74].mxu0 %v25179_v4  ;;  %v25196_v4 = vld [vmem:[#allocation43_spill] sm:$0xff] }
0x1248   :  { %16380 = vmatprep.mubr.f32.mxu0 %v25180_v17 }
0x124b   :  { %16381 = vmatmul.mubr.f32.gmra.mrb[76].mxu0 %v25181_v15  ;;  %v25197_v15 = vld [vmem:[#allocation67_spill] sm:$0xff] }
0x124c   :  { %16383 = vmatprep.mubr.f32.mxu0 %v11784_v29 }
0x124f   :  { %16384 = vmatmul.mubr.f32.gmra.mrb[78].mxu0 %v11794_v13 }
0x1250   :  { %16402 = vmatprep.mubr.f32.mxu0 %v23549_v0 }
0x1253   :  { %16403 = vmatmul.mubr.f32.vlgmr.msra.gmra.mrb[64].mxu0 %v23545_v39 }
0x1254   :  { %16405 = vmatprep.mubr.f32.mxu0 %v23581_v18  ;;  %17461 = vmatpush3.bf16.msra.mxu0 %v25169_v12 }
0x1255   :  { %17463 = vmatprep.subr.bf16.mxu0 %v25171_v50 }
0x1257   :  { %16406 = vmatmul.mubr.f32.gmra.mrb[66].mxu0 %v23565_v60 }
0x1258   :  { %16408 = vmatprep.mubr.f32.mxu0 %v25165_v2  ;;  %17465 = vmatpush3.bf16.msra.mxu0 %v25171_v50 }
0x1259   :  { %17467 = vmatprep.subr.bf16.mxu0 %v25172_v31 }
0x125b   :  { %16409 = vmatmul.mubr.f32.gmra.mrb[68].mxu0 %v25166_v35 }
0x125c   :  { %16411 = vmatprep.mubr.f32.mxu0 %v25167_v19  ;;  %17469 = vmatpush3.bf16.msra.mxu0 %v25172_v31  ;;  %v25194_v31 = vld [vmem:[#allocation9_spill] sm:$0xff] }
0x125d   :  { %17471 = vmatprep.subr.bf16.mxu0 %v25173_v45 }
0x125f   :  { %16412 = vmatmul.mubr.f32.gmra.mrb[70].mxu0 %v25168_v24 }
0x1260   :  { %16414 = vmatprep.mubr.f32.mxu0 %v23763_v63  ;;  %17473 = vmatpush3.bf16.msra.mxu0 %v25173_v45 }
0x1263   :  { %16415 = vmatmul.mubr.f32.gmra.mrb[72].mxu0 %v23733_v28 }
0x1264   :  { %16417 = vmatprep.mubr.f32.mxu0 %v23803_v59 }
0x1267   :  { %16418 = vmatmul.mubr.f32.gmra.mrb[74].mxu0 %v23783_v53 }
0x1268   :  { %16420 = vmatprep.mubr.f32.mxu0 %v23845_v20 }
0x126b   :  { %16421 = vmatmul.mubr.f32.gmra.mrb[76].mxu0 %v23824_v43 }
0x126c   :  { %16423 = vmatprep.mubr.f32.mxu0 %v23916_v61 }
0x126f   :  { %16424 = vmatmul.mubr.f32.gmra.mrb[78].mxu0 %v23880_v3 }
0x1270   :  { %16442 = vmatprep.mubr.f32.mxu0 %v23549_v0 }
0x1273   :  { %16443 = vmatmul.mubr.f32.vlgmr.msra.gmra.mrb[64].mxu0 %v23545_v39  ;;  %v12793_v39 = vld [vmem:[%s24162_s12] ss:$0 sm:$0xff] }
0x1274   :  { %16445 = vmatprep.mubr.f32.mxu0 %v23581_v18 }
0x1277   :  { %16446 = vmatmul.mubr.f32.gmra.mrb[66].mxu0 %v23565_v60 }
0x1278   :  { %16448 = vmatprep.mubr.f32.mxu0 %v25165_v2  ;;  %v25192_v2 = vld [vmem:[#allocation7_spill] sm:$0xff] }
0x127b   :  { %16449 = vmatmul.mubr.f32.gmra.mrb[68].mxu0 %v25166_v35  ;;  %v25193_v35 = vld [vmem:[#allocation5_spill] sm:$0xff] }
0x127c   :  { %16451 = vmatprep.mubr.f32.mxu0 %v25167_v19 }
0x127f   :  { %16452 = vmatmul.mubr.f32.gmra.mrb[70].mxu0 %v25168_v24 }
0x1280   :  { %16454 = vmatprep.mubr.f32.mxu0 %v23763_v63 }
0x1283   :  { %16455 = vmatmul.mubr.f32.gmra.mrb[72].mxu0 %v23733_v28  ;;  %v25183_v28 = vld [vmem:[#allocation40_spill] sm:$0xff] }
0x1284   :  { %16457 = vmatprep.mubr.f32.mxu0 %v23803_v59 }
0x1287   :  { %16458 = vmatmul.mubr.f32.gmra.mrb[74].mxu0 %v23783_v53  ;;  %v25184_v53 = vld [vmem:[#allocation35_spill] sm:$0xff] }
0x1288   :  { %16460 = vmatprep.mubr.f32.mxu0 %v23845_v20  ;;  %v25187_v20 = vld [vmem:[#allocation21_spill] sm:$0xff] }
0x128b   :  { %16461 = vmatmul.mubr.f32.gmra.mrb[76].mxu0 %v23824_v43 }
0x128c   :  { %16463 = vmatprep.mubr.f32.mxu0 %v23916_v61  ;;  %v25188_v61 = vld [vmem:[#allocation28_spill] sm:$0xff] }
0x128f   :  { %16464 = vmatmul.mubr.f32.gmra.mrb[78].mxu0 %v23880_v3 }
0x1346   :  { %v16444_v0 = vpop.f32.mrb[64].mxu0 }
0x1347   :  { %v17554_v60 = vadd.f32 %v16444_v0, %v12793_v39  ;;  %v12657_v18 = vpop.f32.mrb[65].mxu0 }
0x1348   :  { %v17555_v7 = vadd.f32 %v12793_v39, %v12657_v18 }
0x1349   :  { %v12752_v42 = vadd.f32 %v17554_v60, %v25182_v25 }
0x134a   :  { %v12751_v5 = vadd.f32 %v17555_v7, %v25183_v28  ;;  %v16447_v26 = vpop.f32.mrb[66].mxu0 }
0x134b   :  { %12768 = vst.msk [vmem:[%s24163_s13 + $0x8] sm:$0xff] %vm62_vm0, %v12752_v42  ;;  %v17556_v63 = vadd.f32 %v16447_v26, %v12793_v39  ;;  %v12669_v1 = vpop.f32.mrb[67].mxu0 }
0x134c   :  { %12767 = vst.msk [vmem:[%s24163_s13] sm:$0xff] %vm62_vm0, %v12751_v5  ;;  %v17557_v54 = vadd.f32 %v12793_v39, %v12669_v1 }
0x134d   :  { %v12754_v41 = vadd.f32 %v17556_v63, %v25184_v53 }
0x134e   :  { %v12753_v58 = vadd.f32 %v17557_v54, %v25185_v11  ;;  %v16450_v59 = vpop.f32.mrb[68].mxu0 }
0x134f   :  { %12770 = vst.msk [vmem:[%s24163_s13 + $0x18] sm:$0xff] %vm62_vm0, %v12754_v41  ;;  %v17558_v8 = vadd.f32 %v16450_v59, %v12793_v39  ;;  %v12681_v43 = vpop.f32.mrb[69].mxu0 }
0x1350   :  { %12769 = vst.msk [vmem:[%s24163_s13 + $0x10] sm:$0xff] %vm62_vm0, %v12753_v58  ;;  %v17559_v46 = vadd.f32 %v12793_v39, %v12681_v43 }
0x1351   :  { %v12756_v47 = vadd.f32 %v17558_v8, %v25186_v62 }
0x1352   :  { %v12755_v51 = vadd.f32 %v17559_v46, %v25187_v20  ;;  %v16453_v52 = vpop.f32.mrb[70].mxu0 }
0x1353   :  { %12772 = vst.msk [vmem:[%s24163_s13 + $0x28] sm:$0xff] %vm62_vm0, %v12756_v47  ;;  %v17560_v55 = vadd.f32 %v16453_v52, %v12793_v39  ;;  %v12693_v3 = vpop.f32.mrb[71].mxu0 }
0x1354   :  { %12771 = vst.msk [vmem:[%s24163_s13 + $0x20] sm:$0xff] %vm62_vm0, %v12755_v51  ;;  %v17561_v23 = vadd.f32 %v12793_v39, %v12693_v3 }
0x1355   :  { %v12758_v13 = vadd.f32 %v17560_v55, %v25188_v61 }
0x1356   :  { %v12757_v34 = vadd.f32 %v17561_v23, %v25189_v10  ;;  %v16456_v29 = vpop.f32.mrb[72].mxu0 }
0x1357   :  { %12774 = vst.msk [vmem:[%s24163_s13 + $0x38] sm:$0xff] %vm62_vm0, %v12758_v13  ;;  %v17562_v36 = vadd.f32 %v16456_v29, %v12793_v39  ;;  %v12705_v27 = vpop.f32.mrb[73].mxu0 }
0x1358   :  { %12773 = vst.msk [vmem:[%s24163_s13 + $0x30] sm:$0xff] %vm62_vm0, %v12757_v34  ;;  %v17563_v21 = vadd.f32 %v12793_v39, %v12705_v27 }
0x1359   :  { %v12760_v32 = vadd.f32 %v17562_v36, %v25190_v9 }
0x135a   :  { %v12759_v48 = vadd.f32 %v17563_v21, %v25191_v56  ;;  %v16459_v14 = vpop.f32.mrb[74].mxu0 }
0x135b   :  { %12776 = vst.msk [vmem:[%s24163_s13 + $0x48] sm:$0xff] %vm62_vm0, %v12760_v32  ;;  %v17564_v44 = vadd.f32 %v16459_v14, %v12793_v39  ;;  %v12717_v22 = vpop.f32.mrb[75].mxu0 }
0x135c   :  { %12775 = vst.msk [vmem:[%s24163_s13 + $0x40] sm:$0xff] %vm62_vm0, %v12759_v48  ;;  %v17565_v49 = vadd.f32 %v12793_v39, %v12717_v22 }
0x135d   :  { %v12762_v30 = vadd.f32 %v17564_v44, %v25192_v2 }
0x135e   :  { %v12761_v19 = vadd.f32 %v17565_v49, %v25193_v35  ;;  %v16462_v24 = vpop.f32.mrb[76].mxu0 }
0x135f   :  { %12778 = vst.msk [vmem:[%s24163_s13 + $0x58] sm:$0xff] %vm62_vm0, %v12762_v30  ;;  %v17566_v12 = vadd.f32 %v16462_v24, %v12793_v39  ;;  %v12729_v38 = vpop.f32.mrb[77].mxu0 }
0x1360   :  { %12777 = vst.msk [vmem:[%s24163_s13 + $0x50] sm:$0xff] %vm62_vm0, %v12761_v19  ;;  %v17567_v50 = vadd.f32 %v12793_v39, %v12729_v38 }
0x1361   :  { %v12764_v45 = vadd.f32 %v17566_v12, %v25194_v31 }
0x1362   :  { %v12763_v16 = vadd.f32 %v17567_v50, %v25195_v6  ;;  %v16465_v57 = vpop.f32.mrb[78].mxu0 }
0x1363   :  { %12780 = vst.msk [vmem:[%s24163_s13 + $0x68] sm:$0xff] %vm62_vm0, %v12764_v45  ;;  %v17568_v37 = vadd.f32 %v16465_v57, %v12793_v39  ;;  %v12741_v40 = vpop.f32.mrb[79].mxu0 }
0x1364   :  { %12779 = vst.msk [vmem:[%s24163_s13 + $0x60] sm:$0xff] %vm62_vm0, %v12763_v16  ;;  %v17569_v33 = vadd.f32 %v12793_v39, %v12741_v40 }
0x1365   :  { %v12766_v17 = vadd.f32 %v17568_v37, %v25196_v4 }
0x1366   :  { %v12765_v0 = vadd.f32 %v17569_v33, %v25197_v15 }
0x1367   :  { %12782 = vst.msk [vmem:[%s24163_s13 + $0x78] sm:$0xff] %vm62_vm0, %v12766_v17 }
0x1368   :  { %12781 = vst.msk [vmem:[%s24163_s13 + $0x70] sm:$0xff] %vm62_vm0, %v12765_v0 }

</bundles_post_ra>
